<compile_context>
chip_gen: v5e
topology: v5e:2x2
jax: 0.10.0
libtpu: 0.0.40
codegen_flags: <defaults>
</compile_context>

<pallas_src>
import functools

import numpy as np

import jax
import jax.numpy as jnp
from jax.experimental import pallas as pl
from jax.experimental.pallas import tpu as pltpu


# --------------------------------------------------------------------------- #
# wrapper-side static helpers
# --------------------------------------------------------------------------- #

def _interp_matrix_np(n_out, n_in):
    """Interpolation matrix for bilinear resize with align_corners=True
    (matches F.upsample_bilinear).  Returns (matrix[n_out, n_in], i0[n_out])."""
    if n_in == 1:
        return np.ones((n_out, 1), np.float32), np.zeros((n_out,), np.int64)
    if n_out == 1:
        m = np.zeros((1, n_in), np.float32)
        m[0, 0] = 1.0
        return m, np.zeros((1,), np.int64)
    scale = np.float32(n_in - 1) / np.float32(n_out - 1)
    src = np.arange(n_out, dtype=np.float32) * scale
    i0 = np.clip(np.floor(src).astype(np.int64), 0, n_in - 2)
    frac = src - i0.astype(np.float32)
    m = np.zeros((n_out, n_in), np.float32)
    rows = np.arange(n_out)
    m[rows, i0] = 1.0 - frac
    m[rows, i0 + 1] += frac
    return m, i0


def _vmem_capacity_bytes():
    try:
        return int(pltpu.get_tpu_info().vmem_capacity_bytes)
    except Exception:                      # conservative default = v7x per-core VMEM
        return 64 * 1024 * 1024


@functools.lru_cache(maxsize=1)
def _single_buffer_supported():
    """Probe once whether pipeline_mode=pl.Buffered(1) (single-buffered constant
    blocks) lowers and runs on this backend; fall back to default buffering otherwise."""
    try:
        def _k(x_ref, o_ref):
            o_ref[...] = x_ref[...] + 1.0

        f = pl.pallas_call(
            _k,
            out_shape=jax.ShapeDtypeStruct((16, 128), jnp.float32),
            grid=(2,),
            in_specs=[pl.BlockSpec((8, 128), lambda i: (0, 0),
                                   pipeline_mode=pl.Buffered(1))],
            out_specs=pl.BlockSpec((8, 128), lambda i: (i, 0)),
        )
        r = jax.block_until_ready(f(jnp.zeros((8, 128), jnp.float32)))
        return bool(np.allclose(np.asarray(r), 1.0))
    except Exception:
        return False


def _level_vmem_estimate(th, W, C, cout, has_prev, has_next, Wn, hn_bound,
                         in_b=2, out_b=2):
    """Rough per-grid-step VMEM footprint: double-buffered streamed blocks plus
    f32 accumulators / temporaries with 2x headroom."""
    est = 2 * (th + 3) * (W + 2) * C * in_b              # conv1 halo slab
    est += 2 * (3 * 9 * C * cout * in_b + 3 * cout * 4)  # weights + biases (worst case 2x)
    est += 2 * th * W * cout * out_b                     # output block
    acc = th * (W + 2) * cout * 4                        # conv1 f32 accumulator
    if has_prev:
        est += 2 * 4 * (th + 2) * (W + 1) * C * in_b
        acc += th * (W + 1) * cout * 4
    if has_next:
        est += 2 * (hn_bound + 3) * (Wn + 2) * C * in_b
        est += 2 * (th * hn_bound + W * Wn) * in_b
        acc += (hn_bound * (Wn + 2) + hn_bound * W + 2 * th * W) * cout * 4
    return est + 2 * acc


def _pick_tile_h(H, est_fn, budget):
    """Largest H-tile from {64,32,16,8} that fits the VMEM budget and does not
    over-pad H (ceil grid); whole H when H <= 8."""
    if H <= 8:
        return H
    cands = [th for th in (64, 32, 16, 8) if th <= H]
    fitting = [th for th in cands if est_fn(th) <= budget] or [cands[-1]]
    for th in fitting:                                   # largest first
        if -(-H // th) * th - H <= th // 2:
            return th
    return fitting[-1]


# --------------------------------------------------------------------------- #
# fused per-level kernel
# --------------------------------------------------------------------------- #

def _make_level_kernel(*, th, W, Wn, hn_span, cout, has_prev, has_next):
    """One (batch, H-tile) step: conv1(x[l]) [+ stride-2 conv2(x[l-1])]
    [+ align_corners bilinear-up(conv0(x[l+1]))] -> relu."""
    wpad1 = W + 2                    # conv1 slab row width (padded)
    m1 = th * wpad1
    wq = W + 1                       # stride-2 parity-plane width
    m2 = th * wq
    wpadn = Wn + 2                   # conv0 slab row width (padded)
    mn = hn_span * wpadn
    f32 = jnp.float32

    def kernel(*refs):
        k = 0
        x_ref, w1_ref, b1_ref = refs[k:k + 3]
        k += 3
        if has_prev:
            xp_ref, w2_ref, b2_ref = refs[k:k + 3]
            k += 3
        if has_next:
            xn_ref, w0_ref, b0_ref, ah_ref, aw_ref = refs[k:k + 5]
            k += 5
        o_ref = refs[k]

        # ---- Pconv[1]: 3x3 / stride 1.  Slab is the pre-flattened padded window
        # ((th+3)*(W+2), Cin); every tap is a contiguous row-window of it, so the
        # 9 taps form a clean acc += dot chain with no interleaved relayouts. ------
        flat = x_ref[0]
        acc = None
        for i in range(3):
            for j in range(3):
                off = i * wpad1 + j
                d = jnp.dot(flat[off:off + m1], w1_ref[i, j],
                            preferred_element_type=f32)
                acc = d if acc is None else acc + d
        out = acc.reshape(th, wpad1, cout)[:, :W, :] + b1_ref[0]

        # ---- Pconv[2]: true 3x3 / stride 2 on the previous (2x) level, on
        # wrapper-built (row,col)-parity planes: no odd output columns are computed
        # (half the MXU FLOPs) and no in-kernel parity deinterleave. ---------------
        if has_prev:
            planes = xp_ref[0]                       # (4, (th+2)*(W+1), Cin)
            acc2 = None
            for i in range(3):
                for j in range(3):
                    p = (i % 2) * 2 + (j % 2)
                    off = (i // 2) * wq + (j // 2)
                    d = jnp.dot(planes[p, off:off + m2], w2_ref[i, j],
                                preferred_element_type=f32)
                    acc2 = d if acc2 is None else acc2 + d
            out = out + (acc2.reshape(th, wq, cout)[:, :W, :] + b2_ref[0])

        # ---- Pconv[0] on the next (smaller) level + align_corners bilinear up.
        # Only the hn_span conv0 rows this tile needs are computed; the upsample is
        # W-first (hn_span < th => fewer FLOPs) with bf16 operands / f32 accumulation
        # and transpose-free einsum output orders. ---------------------------------
        if has_next:
            flatn = xn_ref[0]
            accn = None
            for i in range(3):
                for j in range(3):
                    off = i * wpadn + j
                    d = jnp.dot(flatn[off:off + mn], w0_ref[i, j],
                                preferred_element_type=f32)
                    accn = d if accn is None else accn + d
            c0 = accn.reshape(hn_span, wpadn, cout)[:, :Wn, :] + b0_ref[0]
            c0 = c0.astype(jnp.bfloat16)
            rowi = jnp.einsum('qw,hwc->qhc', aw_ref[...], c0,
                              preferred_element_type=f32)            # (W, hn_span, Cout)
            up = jnp.einsum('ph,qhc->pqc', ah_ref[0], rowi.astype(jnp.bfloat16),
                            preferred_element_type=f32)              # (th, W, Cout)
            out = out + up

        o_ref[0] = jnp.maximum(out, 0.0).astype(o_ref.dtype)

    return kernel


# --------------------------------------------------------------------------- #
# PConvModule forward (one fused pallas_call per pyramid level)
# --------------------------------------------------------------------------- #

def pconv_module_forward(xs_nhwc, weights, biases, *,
                         compute_dtype=jnp.bfloat16, out_dtype=jnp.bfloat16):
    """SEPC PConvModule forward (iBN=False, part_deform=False).

    xs_nhwc : list of NHWC pyramid features; level l+1 is the ceil(/2) child of level l.
    weights : [w_Pconv0, w_Pconv1, w_Pconv2] in HWIO layout.
    biases  : matching (Cout,) arrays.
    Returns NHWC outputs (same spatial sizes as the inputs) in out_dtype.
    """
    w0c, w1c, w2c = [jnp.asarray(w).astype(compute_dtype) for w in weights]
    b0c, b1c, b2c = [jnp.asarray(b).reshape(1, -1).astype(jnp.float32) for b in biases]
    cout = int(weights[1].shape[-1])
    n_lvls = len(xs_nhwc)
    xs_c = [jnp.asarray(x).astype(compute_dtype) for x in xs_nhwc]   # bf16 once, up front

    vmem_phys = _vmem_capacity_bytes()
    budget = vmem_phys // 2
    const_kw = ({'pipeline_mode': pl.Buffered(1)}
                if _single_buffer_supported() else {})

    outs = []
    for lvl, xc in enumerate(xs_c):
        N, H, W, C = (int(s) for s in xc.shape)
        has_prev = lvl > 0
        has_next = lvl < n_lvls - 1
        Hn = int(xs_c[lvl + 1].shape[1]) if has_next else 0
        Wn = int(xs_c[lvl + 1].shape[2]) if has_next else 0

        def est(th):
            return _level_vmem_estimate(th, W, C, cout, has_prev, has_next, Wn,
                                        min(th + 2, Hn) if has_next else 0)

        th = _pick_tile_h(H, est, budget)
        nt = -(-H // th)
        Hc = nt * th                                   # ceil-padded output height

        in_arrays, in_specs = [], []

        def add(arr, block, idx_map, const=False):
            in_arrays.append(arr)
            in_specs.append(pl.BlockSpec(block, idx_map, **(const_kw if const else {})))

        tile3 = lambda b, t: (b * nt + t, 0, 0)
        tile4 = lambda b, t: (b * nt + t, 0, 0, 0)
        const2 = lambda b, t: (0, 0)
        const4 = lambda b, t: (0, 0, 0, 0)

        # -- Pconv[1] input: rows [t*th, t*th+th+3) of the 1-padded level, pre-flattened.
        r1 = th + 3
        xpad = jnp.pad(xc, ((0, 0), (1, Hc + 2 - H), (1, 1), (0, 0)))
        idx1 = (np.arange(nt)[:, None] * th + np.arange(r1)[None, :]).reshape(-1)
        x_slab = xpad[:, idx1].reshape(N * nt, r1 * (W + 2), C)
        add(x_slab, (1, r1 * (W + 2), C), tile3)
        add(w1c, (3, 3, C, cout), const4, const=True)
        add(b1c, (1, cout), const2, const=True)

        # -- Pconv[2] input: 4 (row,col)-parity planes of the zero-padded previous level,
        #    gathered per tile (rows [t*th, t*th+th+2)) and pre-flattened.
        if has_prev:
            xp = xs_c[lvl - 1]
            Hp, Wp = int(xp.shape[1]), int(xp.shape[2])
            assert (Hp + 1) // 2 == H and (Wp + 1) // 2 == W, (
                "PConv stride-2 term expects level l-1 to be the (ceil) 2x parent of level l")
            xppad = jnp.pad(xp, ((0, 0), (1, 2 * Hc + 3 - Hp), (1, 2 * W + 1 - Wp), (0, 0)))
            planes = jnp.stack([xppad[:, rp::2, cp::2, :]
                                for rp in (0, 1) for cp in (0, 1)], axis=1)
            r2 = th + 2
            idx2 = (np.arange(nt)[:, None] * th + np.arange(r2)[None, :]).reshape(-1)
            p_slab = planes[:, :, idx2].reshape(N, 4, nt, r2, W + 1, C)
            p_slab = p_slab.transpose(0, 2, 1, 3, 4, 5).reshape(N * nt, 4, r2 * (W + 1), C)
            add(p_slab, (1, 4, r2 * (W + 1), C), tile4)
            add(w2c, (3, 3, C, cout), const4, const=True)
            add(b2c, (1, cout), const2, const=True)

        # -- Pconv[0] input: only the conv0 rows each tile's upsample needs, plus the
        #    per-tile H-interp slab (built in lockstep here, so no in-kernel row formula).
        hn_span = 0
        if has_next:
            xn = xs_c[lvl + 1]
            ah_np, i0h = _interp_matrix_np(H, Hn)
            aw_np, _ = _interp_matrix_np(W, Wn)
            ah_full = np.zeros((Hc, Hn), np.float32)
            ah_full[:H] = ah_np                        # zero rows for the ceil-padded tail
            starts, spans = [], []
            for t in range(nt):
                r_lo, r_hi = t * th, min((t + 1) * th, H)
                lo = int(i0h[r_lo:r_hi].min())
                hi = int(i0h[r_lo:r_hi].max()) + 1
                starts.append(lo)
                spans.append(hi - lo + 1)
            hn_span = min(max(spans), Hn)              # uniform static conv0-row span
            ah_tiled = np.zeros((nt, th, hn_span), np.float32)
            for t in range(nt):
                hs = max(min(starts[t], Hn - hn_span), 0)
                ah_tiled[t] = ah_full[t * th:(t + 1) * th, hs:hs + hn_span]
                starts[t] = hs
            rn = hn_span + 3
            xnpad = jnp.pad(xn, ((0, 0), (1, 2), (1, 1), (0, 0)))
            idxn = (np.asarray(starts)[:, None] + np.arange(rn)[None, :]).reshape(-1)
            xn_slab = xnpad[:, idxn].reshape(N * nt, rn * (Wn + 2), C)
            add(xn_slab, (1, rn * (Wn + 2), C), tile3)
            add(w0c, (3, 3, C, cout), const4, const=True)
            add(b0c, (1, cout), const2, const=True)
            add(jnp.asarray(ah_tiled).astype(compute_dtype), (1, th, hn_span),
                lambda b, t: (t, 0, 0))
            add(jnp.asarray(aw_np).astype(compute_dtype), (W, Wn), const2, const=True)

        # Advisory cost estimate for XLA scheduling.
        flops = 2 * 9 * th * (W + 2) * C * cout
        bytes_acc = x_slab.size * 2 + w1c.size * 2 + cout * 4
        if has_prev:
            flops += 2 * 9 * th * (W + 1) * C * cout
            bytes_acc += p_slab.size * 2 + w2c.size * 2 + cout * 4
        if has_next:
            flops += 2 * 9 * hn_span * (Wn + 2) * C * cout
            flops += 2 * hn_span * W * Wn * cout + 2 * th * hn_span * W * cout
            bytes_acc += xn_slab.size * 2 + w0c.size * 2 + cout * 4
            bytes_acc += (ah_tiled.size + aw_np.size) * 2
        flops *= N * nt
        bytes_acc += N * Hc * W * cout * jnp.dtype(out_dtype).itemsize
        cost = pl.CostEstimate(flops=int(flops), transcendentals=0,
                               bytes_accessed=int(bytes_acc))

        vmem_limit = int(min(max(2 * est(th), 48 * 1024 * 1024),
                             (vmem_phys * 9) // 10))

        kernel = _make_level_kernel(th=th, W=W, Wn=Wn, hn_span=hn_span, cout=cout,
                                    has_prev=has_prev, has_next=has_next)
        out = pl.pallas_call(
            kernel,
            out_shape=jax.ShapeDtypeStruct((N, Hc, W, cout), out_dtype),
            grid=(N, nt),
            in_specs=in_specs,
            out_specs=pl.BlockSpec((1, th, W, cout), lambda b, t: (b, t, 0, 0)),
            compiler_params=pltpu.CompilerParams(
                dimension_semantics=("parallel", "parallel"),
                vmem_limit_bytes=vmem_limit),
            cost_estimate=cost,
        )(*in_arrays)
        outs.append(out[:, :H] if Hc != H else out)
    return outs


# --------------------------------------------------------------------------- #
# pure-XLA f32 reference (for a numerical self-check)
# --------------------------------------------------------------------------- #

def _reference_forward(xs_nhwc, weights, biases):
    w0, w1, w2 = weights
    b0, b1, b2 = biases
    dn = jax.lax.conv_dimension_numbers(xs_nhwc[0].shape, w1.shape,
                                        ('NHWC', 'HWIO', 'NHWC'))

    def conv(x, w, b, stride):
        y = jax.lax.conv_general_dilated(x, w, (stride, stride), ((1, 1), (1, 1)),
                                         dimension_numbers=dn)
        return y + b.reshape(1, 1, 1, -1)

    n_lvls = len(xs_nhwc)
    outs = []
    for lvl, x in enumerate(xs_nhwc):
        t = conv(x, w1, b1, 1)
        if lvl > 0:
            t = t + conv(xs_nhwc[lvl - 1], w2, b2, 2)
        if lvl < n_lvls - 1:
            c0 = conv(xs_nhwc[lvl + 1], w0, b0, 1)
            ah, _ = _interp_matrix_np(x.shape[1], c0.shape[1])
            aw, _ = _interp_matrix_np(x.shape[2], c0.shape[2])
            up = jnp.einsum('ph,nhwc->npwc', ah, c0)
            up = jnp.einsum('qw,npwc->npqc', aw, up)
            t = t + up
        outs.append(jnp.maximum(t, 0.0))
    return outs


# ----------------------------------- main ----------------------------------- #

if __name__ == "__main__":
    key = jax.random.PRNGKey(0)
    N, C, K = 2, 4, 3                     # small demo sizes (module default is C=256)

    kw, kb = jax.random.split(key)
    wkeys = jax.random.split(kw, 3)
    bkeys = jax.random.split(kb, 3)
    # Params in the module's convention: OIHW weights ~ N(0, 0.01); small nonzero biases
    # so the in-kernel bias path is exercised (init_weights() would zero them).
    weights, biases = [], []
    for i in range(3):
        w_oihw = 0.01 * jax.random.normal(wkeys[i], (C, C, K, K), jnp.float32)
        weights.append(jnp.transpose(w_oihw, (2, 3, 1, 0)))          # OIHW -> HWIO
        biases.append(0.01 * jax.random.normal(bkeys[i], (C,), jnp.float32))

    def run_case(sizes, case_key):
        xkeys = jax.random.split(case_key, len(sizes))
        xs_nchw = [jax.random.normal(xkeys[i], (N, C, h, w), jnp.float32)
                   for i, (h, w) in enumerate(sizes)]                 # PyTorch NCHW inputs
        xs_nhwc = [jnp.transpose(x, (0, 2, 3, 1)) for x in xs_nchw]   # kernel layout
        outs = pconv_module_forward(xs_nhwc, weights, biases)
        outs = [jax.block_until_ready(o) for o in outs]
        # Numerical self-check against a pure-XLA f32 reference
        # (bf16 MXU operands + bf16 outputs -> loose tolerance).
        refs = _reference_forward(xs_nhwc, weights, biases)
        for o, r in zip(outs, refs):
            np.testing.assert_allclose(np.asarray(o.astype(jnp.float32)),
                                       np.asarray(r), atol=1e-2, rtol=5e-2)
        outs_nchw = [jnp.transpose(o, (0, 3, 1, 2)) for o in outs]    # back to NCHW
        assert [tuple(o.shape) for o in outs_nchw] == [(N, C, h, w) for h, w in sizes], \
            f"unexpected output shapes {[o.shape for o in outs_nchw]}"

    run_case([(16, 16), (8, 8), (4, 4)], jax.random.PRNGKey(1))   # exact /2 pyramid
    run_case([(13, 13), (7, 7), (4, 4)], jax.random.PRNGKey(2))   # ceil /2 pyramid (odd FPN sizes)
    print("KERNEL_OK")
</pallas_src>

<mosaic_0001>
module attributes {stable_mosaic.version = 11 : i64} {
  func.func @_k(%arg0: i32, %arg1: memref<8x128xf32, #tpu.memory_space<vmem>>, %arg2: memref<8x128xf32, #tpu.memory_space<vmem>>) attributes {dimension_semantics = [#tpu.dimension_semantics<arbitrary>], iteration_bounds = array<i64: 2>, scalar_prefetch = 0 : i64, scratch_operands = 0 : i64, tpu.core_type = #tpu.core_type<tc>, window_params = [{pipeline_mode = #tpu.pipeline_mode<synchronous>, transform_indices = @transform_0, window_bounds = array<i64: 8, 128>}, {transform_indices = @transform_1, window_bounds = array<i64: 8, 128>}]} {
    %c0 = arith.constant 0 : index
    %c0_0 = arith.constant 0 : index
    %0 = vector.load %arg1[%c0, %c0_0] : memref<8x128xf32, #tpu.memory_space<vmem>>, vector<8x128xf32>
    %cst = arith.constant 1.000000e+00 : f32
    %1 = vector.broadcast %cst : f32 to vector<8x128xf32>
    %2 = arith.addf %0, %1 : vector<8x128xf32>
    %c0_1 = arith.constant 0 : index
    %c0_2 = arith.constant 0 : index
    %3 = vector.load %arg2[%c0_1, %c0_2] : memref<8x128xf32, #tpu.memory_space<vmem>>, vector<8x128xf32>
    tpu.vector_store %arg2[%c0_1, %c0_2], %2 {strides = array<i32>} : memref<8x128xf32, #tpu.memory_space<vmem>>, vector<8x128xf32>,
    return
  }
  func.func @transform_0(%arg0: i32) -> (i32, i32) {
    %c0_i32 = arith.constant 0 : i32
    %c0_i32_0 = arith.constant 0 : i32
    %c0_i32_1 = arith.constant 0 : i32
    return %c0_i32, %c0_i32_0 : i32, i32
  }
  func.func @transform_1(%arg0: i32) -> (i32, i32) {
    %c0_i32 = arith.constant 0 : i32
    %c0_i32_0 = arith.constant 0 : i32
    return %arg0, %c0_i32 : i32, i32
  }
}

module attributes {stable_mosaic.version = 11 : i64} {
  func.func @kernel(%arg0: i32, %arg1: i32, %arg2: memref<1x342x4xbf16, #tpu.memory_space<vmem>>, %arg3: memref<3x3x4x4xbf16, #tpu.memory_space<vmem>>, %arg4: memref<1x4xf32, #tpu.memory_space<vmem>>, %arg5: memref<1x110x4xbf16, #tpu.memory_space<vmem>>, %arg6: memref<3x3x4x4xbf16, #tpu.memory_space<vmem>>, %arg7: memref<1x4xf32, #tpu.memory_space<vmem>>, %arg8: memref<1x16x8xbf16, #tpu.memory_space<vmem>>, %arg9: memref<16x8xbf16, #tpu.memory_space<vmem>>, %arg10: memref<1x16x16x4xbf16, #tpu.memory_space<vmem>>) attributes {dimension_semantics = [#tpu.dimension_semantics<parallel>, #tpu.dimension_semantics<parallel>], iteration_bounds = array<i64: 2, 1>, scalar_prefetch = 0 : i64, scratch_operands = 0 : i64, tpu.core_type = #tpu.core_type<tc>, window_params = [{transform_indices = @transform_0, window_bounds = array<i64: 1, 342, 4>}, {pipeline_mode = #tpu.pipeline_mode<synchronous>, transform_indices = @transform_1, window_bounds = array<i64: 3, 3, 4, 4>}, {pipeline_mode = #tpu.pipeline_mode<synchronous>, transform_indices = @transform_2, window_bounds = array<i64: 1, 4>}, {transform_indices = @transform_3, window_bounds = array<i64: 1, 110, 4>}, {pipeline_mode = #tpu.pipeline_mode<synchronous>, transform_indices = @transform_4, window_bounds = array<i64: 3, 3, 4, 4>}, {pipeline_mode = #tpu.pipeline_mode<synchronous>, transform_indices = @transform_5, window_bounds = array<i64: 1, 4>}, {transform_indices = @transform_6, window_bounds = array<i64: 1, 16, 8>}, {pipeline_mode = #tpu.pipeline_mode<synchronous>, transform_indices = @transform_7, window_bounds = array<i64: 16, 8>}, {transform_indices = @transform_8, window_bounds = array<i64: 1, 16, 16, 4>}]} {
    %c0 = arith.constant 0 : index
    %c0_0 = arith.constant 0 : index
    %c0_1 = arith.constant 0 : index
    %0 = vector.load %arg2[%c0, %c0_0, %c0_1] : memref<1x342x4xbf16, #tpu.memory_space<vmem>>, vector<1x342x4xbf16>
    %1 = vector.shape_cast %0 : vector<1x342x4xbf16> to vector<342x4xbf16>
    %2 = vector.extract_strided_slice %1 {offsets = [0, 0], sizes = [288, 4], strides = [1, 1]} : vector<342x4xbf16> to vector<288x4xbf16>
    %c0_2 = arith.constant 0 : index
    %c0_3 = arith.constant 0 : index
    %c0_4 = arith.constant 0 : index
    %c0_5 = arith.constant 0 : index
    %3 = vector.load %arg3[%c0_2, %c0_3, %c0_4, %c0_5] : memref<3x3x4x4xbf16, #tpu.memory_space<vmem>>, vector<1x1x4x4xbf16>
    %4 = vector.shape_cast %3 : vector<1x1x4x4xbf16> to vector<4x4xbf16>
    %cst = arith.constant dense<0.000000e+00> : vector<288x4xf32>
    %5 = tpu.matmul %2, %4, %cst {dimension_numbers = #tpu.dot_dimension_numbers<[1], [0], [0], [1], [0, 0, 1, 1], [], []>} : vector<288x4xbf16>, vector<4x4xbf16>, vector<288x4xf32> -> vector<288x4xf32>
    %6 = vector.extract_strided_slice %1 {offsets = [1, 0], sizes = [288, 4], strides = [1, 1]} : vector<342x4xbf16> to vector<288x4xbf16>
    %c0_6 = arith.constant 0 : index
    %c1 = arith.constant 1 : index
    %c0_7 = arith.constant 0 : index
    %c0_8 = arith.constant 0 : index
    %7 = vector.load %arg3[%c0_6, %c1, %c0_7, %c0_8] : memref<3x3x4x4xbf16, #tpu.memory_space<vmem>>, vector<1x1x4x4xbf16>
    %8 = vector.shape_cast %7 : vector<1x1x4x4xbf16> to vector<4x4xbf16>
    %cst_9 = arith.constant dense<0.000000e+00> : vector<288x4xf32>
    %9 = tpu.matmul %6, %8, %cst_9 {dimension_numbers = #tpu.dot_dimension_numbers<[1], [0], [0], [1], [0, 0, 1, 1], [], []>} : vector<288x4xbf16>, vector<4x4xbf16>, vector<288x4xf32> -> vector<288x4xf32>
    %10 = arith.addf %5, %9 : vector<288x4xf32>
    %11 = vector.extract_strided_slice %1 {offsets = [2, 0], sizes = [288, 4], strides = [1, 1]} : vector<342x4xbf16> to vector<288x4xbf16>
    %c0_10 = arith.constant 0 : index
    %c2 = arith.constant 2 : index
    %c0_11 = arith.constant 0 : index
    %c0_12 = arith.constant 0 : index
    %12 = vector.load %arg3[%c0_10, %c2, %c0_11, %c0_12] : memref<3x3x4x4xbf16, #tpu.memory_space<vmem>>, vector<1x1x4x4xbf16>
    %13 = vector.shape_cast %12 : vector<1x1x4x4xbf16> to vector<4x4xbf16>
    %cst_13 = arith.constant dense<0.000000e+00> : vector<288x4xf32>
    %14 = tpu.matmul %11, %13, %cst_13 {dimension_numbers = #tpu.dot_dimension_numbers<[1], [0], [0], [1], [0, 0, 1, 1], [], []>} : vector<288x4xbf16>, vector<4x4xbf16>, vector<288x4xf32> -> vector<288x4xf32>
    %15 = arith.addf %10, %14 : vector<288x4xf32>
    %16 = vector.extract_strided_slice %1 {offsets = [18, 0], sizes = [288, 4], strides = [1, 1]} : vector<342x4xbf16> to vector<288x4xbf16>
    %c1_14 = arith.constant 1 : index
    %c0_15 = arith.constant 0 : index
    %c0_16 = arith.constant 0 : index
    %c0_17 = arith.constant 0 : index
    %17 = vector.load %arg3[%c1_14, %c0_15, %c0_16, %c0_17] : memref<3x3x4x4xbf16, #tpu.memory_space<vmem>>, vector<1x1x4x4xbf16>
    %18 = vector.shape_cast %17 : vector<1x1x4x4xbf16> to vector<4x4xbf16>
    %cst_18 = arith.constant dense<0.000000e+00> : vector<288x4xf32>
    %19 = tpu.matmul %16, %18, %cst_18 {dimension_numbers = #tpu.dot_dimension_numbers<[1], [0], [0], [1], [0, 0, 1, 1], [], []>} : vector<288x4xbf16>, vector<4x4xbf16>, vector<288x4xf32> -> vector<288x4xf32>
    %20 = arith.addf %15, %19 : vector<288x4xf32>
    %21 = vector.extract_strided_slice %1 {offsets = [19, 0], sizes = [288, 4], strides = [1, 1]} : vector<342x4xbf16> to vector<288x4xbf16>
    %c1_19 = arith.constant 1 : index
    %c1_20 = arith.constant 1 : index
    %c0_21 = arith.constant 0 : index
    %c0_22 = arith.constant 0 : index
    %22 = vector.load %arg3[%c1_19, %c1_20, %c0_21, %c0_22] : memref<3x3x4x4xbf16, #tpu.memory_space<vmem>>, vector<1x1x4x4xbf16>
    %23 = vector.shape_cast %22 : vector<1x1x4x4xbf16> to vector<4x4xbf16>
    %cst_23 = arith.constant dense<0.000000e+00> : vector<288x4xf32>
    %24 = tpu.matmul %21, %23, %cst_23 {dimension_numbers = #tpu.dot_dimension_numbers<[1], [0], [0], [1], [0, 0, 1, 1], [], []>} : vector<288x4xbf16>, vector<4x4xbf16>, vector<288x4xf32> -> vector<288x4xf32>
    %25 = arith.addf %20, %24 : vector<288x4xf32>
    %26 = vector.extract_strided_slice %1 {offsets = [20, 0], sizes = [288, 4], strides = [1, 1]} : vector<342x4xbf16> to vector<288x4xbf16>
    %c1_24 = arith.constant 1 : index
    %c2_25 = arith.constant 2 : index
    %c0_26 = arith.constant 0 : index
    %c0_27 = arith.constant 0 : index
    %27 = vector.load %arg3[%c1_24, %c2_25, %c0_26, %c0_27] : memref<3x3x4x4xbf16, #tpu.memory_space<vmem>>, vector<1x1x4x4xbf16>
    %28 = vector.shape_cast %27 : vector<1x1x4x4xbf16> to vector<4x4xbf16>
    %cst_28 = arith.constant dense<0.000000e+00> : vector<288x4xf32>
    %29 = tpu.matmul %26, %28, %cst_28 {dimension_numbers = #tpu.dot_dimension_numbers<[1], [0], [0], [1], [0, 0, 1, 1], [], []>} : vector<288x4xbf16>, vector<4x4xbf16>, vector<288x4xf32> -> vector<288x4xf32>
    %30 = arith.addf %25, %29 : vector<288x4xf32>
    %31 = vector.extract_strided_slice %1 {offsets = [36, 0], sizes = [288, 4], strides = [1, 1]} : vector<342x4xbf16> to vector<288x4xbf16>
    %c2_29 = arith.constant 2 : index
    %c0_30 = arith.constant 0 : index
    %c0_31 = arith.constant 0 : index
    %c0_32 = arith.constant 0 : index
    %32 = vector.load %arg3[%c2_29, %c0_30, %c0_31, %c0_32] : memref<3x3x4x4xbf16, #tpu.memory_space<vmem>>, vector<1x1x4x4xbf16>
    %33 = vector.shape_cast %32 : vector<1x1x4x4xbf16> to vector<4x4xbf16>
    %cst_33 = arith.constant dense<0.000000e+00> : vector<288x4xf32>
    %34 = tpu.matmul %31, %33, %cst_33 {dimension_numbers = #tpu.dot_dimension_numbers<[1], [0], [0], [1], [0, 0, 1, 1], [], []>} : vector<288x4xbf16>, vector<4x4xbf16>, vector<288x4xf32> -> vector<288x4xf32>
    %35 = arith.addf %30, %34 : vector<288x4xf32>
    %36 = vector.extract_strided_slice %1 {offsets = [37, 0], sizes = [288, 4], strides = [1, 1]} : vector<342x4xbf16> to vector<288x4xbf16>
    %c2_34 = arith.constant 2 : index
    %c1_35 = arith.constant 1 : index
    %c0_36 = arith.constant 0 : index
    %c0_37 = arith.constant 0 : index
    %37 = vector.load %arg3[%c2_34, %c1_35, %c0_36, %c0_37] : memref<3x3x4x4xbf16, #tpu.memory_space<vmem>>, vector<1x1x4x4xbf16>
    %38 = vector.shape_cast %37 : vector<1x1x4x4xbf16> to vector<4x4xbf16>
    %cst_38 = arith.constant dense<0.000000e+00> : vector<288x4xf32>
    %39 = tpu.matmul %36, %38, %cst_38 {dimension_numbers = #tpu.dot_dimension_numbers<[1], [0], [0], [1], [0, 0, 1, 1], [], []>} : vector<288x4xbf16>, vector<4x4xbf16>, vector<288x4xf32> -> vector<288x4xf32>
    %40 = arith.addf %35, %39 : vector<288x4xf32>
    %41 = vector.extract_strided_slice %1 {offsets = [38, 0], sizes = [288, 4], strides = [1, 1]} : vector<342x4xbf16> to vector<288x4xbf16>
    %c2_39 = arith.constant 2 : index
    %c2_40 = arith.constant 2 : index
    %c0_41 = arith.constant 0 : index
    %c0_42 = arith.constant 0 : index
    %42 = vector.load %arg3[%c2_39, %c2_40, %c0_41, %c0_42] : memref<3x3x4x4xbf16, #tpu.memory_space<vmem>>, vector<1x1x4x4xbf16>
    %43 = vector.shape_cast %42 : vector<1x1x4x4xbf16> to vector<4x4xbf16>
    %cst_43 = arith.constant dense<0.000000e+00> : vector<288x4xf32>
    %44 = tpu.matmul %41, %43, %cst_43 {dimension_numbers = #tpu.dot_dimension_numbers<[1], [0], [0], [1], [0, 0, 1, 1], [], []>} : vector<288x4xbf16>, vector<4x4xbf16>, vector<288x4xf32> -> vector<288x4xf32>
    %45 = arith.addf %40, %44 : vector<288x4xf32>
    %46 = vector.shape_cast %45 : vector<288x4xf32> to vector<16x18x4xf32>
    %47 = vector.extract_strided_slice %46 {offsets = [0, 0, 0], sizes = [16, 16, 4], strides = [1, 1, 1]} : vector<16x18x4xf32> to vector<16x16x4xf32>
    %c0_44 = arith.constant 0 : index
    %c0_45 = arith.constant 0 : index
    %48 = vector.load %arg4[%c0_44, %c0_45] : memref<1x4xf32, #tpu.memory_space<vmem>>, vector<1x4xf32>
    %49 = vector.shape_cast %48 : vector<1x4xf32> to vector<4xf32>
    %50 = vector.shape_cast %49 : vector<4xf32> to vector<1x1x4xf32>
    %51 = vector.broadcast %50 : vector<1x1x4xf32> to vector<16x16x4xf32>
    %52 = arith.addf %47, %51 : vector<16x16x4xf32>
    %c0_46 = arith.constant 0 : index
    %c0_47 = arith.constant 0 : index
    %c0_48 = arith.constant 0 : index
    %53 = vector.load %arg5[%c0_46, %c0_47, %c0_48] : memref<1x110x4xbf16, #tpu.memory_space<vmem>>, vector<1x110x4xbf16>
    %54 = vector.shape_cast %53 : vector<1x110x4xbf16> to vector<110x4xbf16>
    %55 = vector.extract_strided_slice %54 {offsets = [0, 0], sizes = [80, 4], strides = [1, 1]} : vector<110x4xbf16> to vector<80x4xbf16>
    %c0_49 = arith.constant 0 : index
    %c0_50 = arith.constant 0 : index
    %c0_51 = arith.constant 0 : index
    %c0_52 = arith.constant 0 : index
    %56 = vector.load %arg6[%c0_49, %c0_50, %c0_51, %c0_52] : memref<3x3x4x4xbf16, #tpu.memory_space<vmem>>, vector<1x1x4x4xbf16>
    %57 = vector.shape_cast %56 : vector<1x1x4x4xbf16> to vector<4x4xbf16>
    %cst_53 = arith.constant dense<0.000000e+00> : vector<80x4xf32>
    %58 = tpu.matmul %55, %57, %cst_53 {dimension_numbers = #tpu.dot_dimension_numbers<[1], [0], [0], [1], [0, 0, 1, 1], [], []>} : vector<80x4xbf16>, vector<4x4xbf16>, vector<80x4xf32> -> vector<80x4xf32>
    %59 = vector.extract_strided_slice %54 {offsets = [1, 0], sizes = [80, 4], strides = [1, 1]} : vector<110x4xbf16> to vector<80x4xbf16>
    %c0_54 = arith.constant 0 : index
    %c1_55 = arith.constant 1 : index
    %c0_56 = arith.constant 0 : index
    %c0_57 = arith.constant 0 : index
    %60 = vector.load %arg6[%c0_54, %c1_55, %c0_56, %c0_57] : memref<3x3x4x4xbf16, #tpu.memory_space<vmem>>, vector<1x1x4x4xbf16>
    %61 = vector.shape_cast %60 : vector<1x1x4x4xbf16> to vector<4x4xbf16>
    %cst_58 = arith.constant dense<0.000000e+00> : vector<80x4xf32>
    %62 = tpu.matmul %59, %61, %cst_58 {dimension_numbers = #tpu.dot_dimension_numbers<[1], [0], [0], [1], [0, 0, 1, 1], [], []>} : vector<80x4xbf16>, vector<4x4xbf16>, vector<80x4xf32> -> vector<80x4xf32>
    %63 = arith.addf %58, %62 : vector<80x4xf32>
    %64 = vector.extract_strided_slice %54 {offsets = [2, 0], sizes = [80, 4], strides = [1, 1]} : vector<110x4xbf16> to vector<80x4xbf16>
    %c0_59 = arith.constant 0 : index
    %c2_60 = arith.constant 2 : index
    %c0_61 = arith.constant 0 : index
    %c0_62 = arith.constant 0 : index
    %65 = vector.load %arg6[%c0_59, %c2_60, %c0_61, %c0_62] : memref<3x3x4x4xbf16, #tpu.memory_space<vmem>>, vector<1x1x4x4xbf16>
    %66 = vector.shape_cast %65 : vector<1x1x4x4xbf16> to vector<4x4xbf16>
    %cst_63 = arith.constant dense<0.000000e+00> : vector<80x4xf32>
    %67 = tpu.matmul %64, %66, %cst_63 {dimension_numbers = #tpu.dot_dimension_numbers<[1], [0], [0], [1], [0, 0, 1, 1], [], []>} : vector<80x4xbf16>, vector<4x4xbf16>, vector<80x4xf32> -> vector<80x4xf32>
    %68 = arith.addf %63, %67 : vector<80x4xf32>
    %69 = vector.extract_strided_slice %54 {offsets = [10, 0], sizes = [80, 4], strides = [1, 1]} : vector<110x4xbf16> to vector<80x4xbf16>
    %c1_64 = arith.constant 1 : index
    %c0_65 = arith.constant 0 : index
    %c0_66 = arith.constant 0 : index
    %c0_67 = arith.constant 0 : index
    %70 = vector.load %arg6[%c1_64, %c0_65, %c0_66, %c0_67] : memref<3x3x4x4xbf16, #tpu.memory_space<vmem>>, vector<1x1x4x4xbf16>
    %71 = vector.shape_cast %70 : vector<1x1x4x4xbf16> to vector<4x4xbf16>
    %cst_68 = arith.constant dense<0.000000e+00> : vector<80x4xf32>
    %72 = tpu.matmul %69, %71, %cst_68 {dimension_numbers = #tpu.dot_dimension_numbers<[1], [0], [0], [1], [0, 0, 1, 1], [], []>} : vector<80x4xbf16>, vector<4x4xbf16>, vector<80x4xf32> -> vector<80x4xf32>
    %73 = arith.addf %68, %72 : vector<80x4xf32>
    %74 = vector.extract_strided_slice %54 {offsets = [11, 0], sizes = [80, 4], strides = [1, 1]} : vector<110x4xbf16> to vector<80x4xbf16>
    %c1_69 = arith.constant 1 : index
    %c1_70 = arith.constant 1 : index
    %c0_71 = arith.constant 0 : index
    %c0_72 = arith.constant 0 : index
    %75 = vector.load %arg6[%c1_69, %c1_70, %c0_71, %c0_72] : memref<3x3x4x4xbf16, #tpu.memory_space<vmem>>, vector<1x1x4x4xbf16>
    %76 = vector.shape_cast %75 : vector<1x1x4x4xbf16> to vector<4x4xbf16>
    %cst_73 = arith.constant dense<0.000000e+00> : vector<80x4xf32>
    %77 = tpu.matmul %74, %76, %cst_73 {dimension_numbers = #tpu.dot_dimension_numbers<[1], [0], [0], [1], [0, 0, 1, 1], [], []>} : vector<80x4xbf16>, vector<4x4xbf16>, vector<80x4xf32> -> vector<80x4xf32>
    %78 = arith.addf %73, %77 : vector<80x4xf32>
    %79 = vector.extract_strided_slice %54 {offsets = [12, 0], sizes = [80, 4], strides = [1, 1]} : vector<110x4xbf16> to vector<80x4xbf16>
    %c1_74 = arith.constant 1 : index
    %c2_75 = arith.constant 2 : index
    %c0_76 = arith.constant 0 : index
    %c0_77 = arith.constant 0 : index
    %80 = vector.load %arg6[%c1_74, %c2_75, %c0_76, %c0_77] : memref<3x3x4x4xbf16, #tpu.memory_space<vmem>>, vector<1x1x4x4xbf16>
    %81 = vector.shape_cast %80 : vector<1x1x4x4xbf16> to vector<4x4xbf16>
    %cst_78 = arith.constant dense<0.000000e+00> : vector<80x4xf32>
    %82 = tpu.matmul %79, %81, %cst_78 {dimension_numbers = #tpu.dot_dimension_numbers<[1], [0], [0], [1], [0, 0, 1, 1], [], []>} : vector<80x4xbf16>, vector<4x4xbf16>, vector<80x4xf32> -> vector<80x4xf32>
    %83 = arith.addf %78, %82 : vector<80x4xf32>
    %84 = vector.extract_strided_slice %54 {offsets = [20, 0], sizes = [80, 4], strides = [1, 1]} : vector<110x4xbf16> to vector<80x4xbf16>
    %c2_79 = arith.constant 2 : index
    %c0_80 = arith.constant 0 : index
    %c0_81 = arith.constant 0 : index
    %c0_82 = arith.constant 0 : index
    %85 = vector.load %arg6[%c2_79, %c0_80, %c0_81, %c0_82] : memref<3x3x4x4xbf16, #tpu.memory_space<vmem>>, vector<1x1x4x4xbf16>
    %86 = vector.shape_cast %85 : vector<1x1x4x4xbf16> to vector<4x4xbf16>
    %cst_83 = arith.constant dense<0.000000e+00> : vector<80x4xf32>
    %87 = tpu.matmul %84, %86, %cst_83 {dimension_numbers = #tpu.dot_dimension_numbers<[1], [0], [0], [1], [0, 0, 1, 1], [], []>} : vector<80x4xbf16>, vector<4x4xbf16>, vector<80x4xf32> -> vector<80x4xf32>
    %88 = arith.addf %83, %87 : vector<80x4xf32>
    %89 = vector.extract_strided_slice %54 {offsets = [21, 0], sizes = [80, 4], strides = [1, 1]} : vector<110x4xbf16> to vector<80x4xbf16>
    %c2_84 = arith.constant 2 : index
    %c1_85 = arith.constant 1 : index
    %c0_86 = arith.constant 0 : index
    %c0_87 = arith.constant 0 : index
    %90 = vector.load %arg6[%c2_84, %c1_85, %c0_86, %c0_87] : memref<3x3x4x4xbf16, #tpu.memory_space<vmem>>, vector<1x1x4x4xbf16>
    %91 = vector.shape_cast %90 : vector<1x1x4x4xbf16> to vector<4x4xbf16>
    %cst_88 = arith.constant dense<0.000000e+00> : vector<80x4xf32>
    %92 = tpu.matmul %89, %91, %cst_88 {dimension_numbers = #tpu.dot_dimension_numbers<[1], [0], [0], [1], [0, 0, 1, 1], [], []>} : vector<80x4xbf16>, vector<4x4xbf16>, vector<80x4xf32> -> vector<80x4xf32>
    %93 = arith.addf %88, %92 : vector<80x4xf32>
    %94 = vector.extract_strided_slice %54 {offsets = [22, 0], sizes = [80, 4], strides = [1, 1]} : vector<110x4xbf16> to vector<80x4xbf16>
    %c2_89 = arith.constant 2 : index
    %c2_90 = arith.constant 2 : index
    %c0_91 = arith.constant 0 : index
    %c0_92 = arith.constant 0 : index
    %95 = vector.load %arg6[%c2_89, %c2_90, %c0_91, %c0_92] : memref<3x3x4x4xbf16, #tpu.memory_space<vmem>>, vector<1x1x4x4xbf16>
    %96 = vector.shape_cast %95 : vector<1x1x4x4xbf16> to vector<4x4xbf16>
    %cst_93 = arith.constant dense<0.000000e+00> : vector<80x4xf32>
    %97 = tpu.matmul %94, %96, %cst_93 {dimension_numbers = #tpu.dot_dimension_numbers<[1], [0], [0], [1], [0, 0, 1, 1], [], []>} : vector<80x4xbf16>, vector<4x4xbf16>, vector<80x4xf32> -> vector<80x4xf32>
    %98 = arith.addf %93, %97 : vector<80x4xf32>
    %99 = vector.shape_cast %98 : vector<80x4xf32> to vector<8x10x4xf32>
    %100 = vector.extract_strided_slice %99 {offsets = [0, 0, 0], sizes = [8, 8, 4], strides = [1, 1, 1]} : vector<8x10x4xf32> to vector<8x8x4xf32>
    %c0_94 = arith.constant 0 : index
    %c0_95 = arith.constant 0 : index
    %101 = vector.load %arg7[%c0_94, %c0_95] : memref<1x4xf32, #tpu.memory_space<vmem>>, vector<1x4xf32>
    %102 = vector.shape_cast %101 : vector<1x4xf32> to vector<4xf32>
    %103 = vector.shape_cast %102 : vector<4xf32> to vector<1x1x4xf32>
    %104 = vector.broadcast %103 : vector<1x1x4xf32> to vector<8x8x4xf32>
    %105 = arith.addf %100, %104 : vector<8x8x4xf32>
    %106 = arith.truncf %105 : vector<8x8x4xf32> to vector<8x8x4xbf16>
    %c0_96 = arith.constant 0 : index
    %c0_97 = arith.constant 0 : index
    %107 = vector.load %arg9[%c0_96, %c0_97] : memref<16x8xbf16, #tpu.memory_space<vmem>>, vector<16x8xbf16>
    "tpu.trace_start"() <{level = 10 : i32, message = "qw,hwc->qhc"}> : () -> ()
    %cst_98 = arith.constant dense<0.000000e+00> : vector<16x8x4xf32>
    %108 = tpu.matmul %107, %106, %cst_98 {dimension_numbers = #tpu.dot_dimension_numbers<[1], [1], [0], [0, 2], [0, 0, 1, 0, 1, 2], [], []>} : vector<16x8xbf16>, vector<8x8x4xbf16>, vector<16x8x4xf32> -> vector<16x8x4xf32>
    "tpu.trace_stop"() : () -> ()
    %c0_99 = arith.constant 0 : index
    %c0_100 = arith.constant 0 : index
    %c0_101 = arith.constant 0 : index
    %109 = vector.load %arg8[%c0_99, %c0_100, %c0_101] : memref<1x16x8xbf16, #tpu.memory_space<vmem>>, vector<1x16x8xbf16>
    %110 = vector.shape_cast %109 : vector<1x16x8xbf16> to vector<16x8xbf16>
    %111 = arith.truncf %108 : vector<16x8x4xf32> to vector<16x8x4xbf16>
    "tpu.trace_start"() <{level = 10 : i32, message = "ph,qhc->pqc"}> : () -> ()
    %cst_102 = arith.constant dense<0.000000e+00> : vector<16x16x4xf32>
    %112 = tpu.matmul %110, %111, %cst_102 {dimension_numbers = #tpu.dot_dimension_numbers<[1], [1], [0], [0, 2], [0, 0, 1, 0, 1, 2], [], []>} : vector<16x8xbf16>, vector<16x8x4xbf16>, vector<16x16x4xf32> -> vector<16x16x4xf32>
    "tpu.trace_stop"() : () -> ()
    %113 = arith.addf %52, %112 : vector<16x16x4xf32>
    %cst_103 = arith.constant 0.000000e+00 : f32
    %114 = vector.broadcast %cst_103 : f32 to vector<16x16x4xf32>
    %115 = arith.maximumf %113, %114 : vector<16x16x4xf32>
    %116 = arith.truncf %115 : vector<16x16x4xf32> to vector<16x16x4xbf16>
    %c0_104 = arith.constant 0 : index
    %c0_105 = arith.constant 0 : index
    %c0_106 = arith.constant 0 : index
    %c0_107 = arith.constant 0 : index
    %117 = vector.load %arg10[%c0_104, %c0_105, %c0_106, %c0_107] : memref<1x16x16x4xbf16, #tpu.memory_space<vmem>>, vector<1x16x16x4xbf16>
    %118 = vector.shape_cast %117 : vector<1x16x16x4xbf16> to vector<16x16x4xbf16>
    %119 = vector.shape_cast %116 : vector<16x16x4xbf16> to vector<1x16x16x4xbf16>
    tpu.vector_store %arg10[%c0_104, %c0_105, %c0_106, %c0_107], %119 {strides = array<i32>} : memref<1x16x16x4xbf16, #tpu.memory_space<vmem>>, vector<1x16x16x4xbf16>,
    return
  }
  func.func @transform_0(%arg0: i32, %arg1: i32) -> (i32, i32, i32) {
    %c1_i32 = arith.constant 1 : i32
    %0 = arith.muli %arg0, %c1_i32 : i32
    %1 = arith.addi %0, %arg1 : i32
    %c0_i32 = arith.constant 0 : i32
    %c0_i32_0 = arith.constant 0 : i32
    %c0_i32_1 = arith.constant 0 : i32
    return %1, %c0_i32, %c0_i32_0 : i32, i32, i32
  }
  func.func @transform_1(%arg0: i32, %arg1: i32) -> (i32, i32, i32, i32) {
    %c0_i32 = arith.constant 0 : i32
    %c0_i32_0 = arith.constant 0 : i32
    %c0_i32_1 = arith.constant 0 : i32
    %c0_i32_2 = arith.constant 0 : i32
    %c0_i32_3 = arith.constant 0 : i32
    return %c0_i32, %c0_i32_0, %c0_i32_1, %c0_i32_2 : i32, i32, i32, i32
  }
  func.func @transform_2(%arg0: i32, %arg1: i32) -> (i32, i32) {
    %c0_i32 = arith.constant 0 : i32
    %c0_i32_0 = arith.constant 0 : i32
    %c0_i32_1 = arith.constant 0 : i32
    return %c0_i32, %c0_i32_0 : i32, i32
  }
  func.func @transform_3(%arg0: i32, %arg1: i32) -> (i32, i32, i32) {
    %c1_i32 = arith.constant 1 : i32
    %0 = arith.muli %arg0, %c1_i32 : i32
    %1 = arith.addi %0, %arg1 : i32
    %c0_i32 = arith.constant 0 : i32
    %c0_i32_0 = arith.constant 0 : i32
    %c0_i32_1 = arith.constant 0 : i32
    return %1, %c0_i32, %c0_i32_0 : i32, i32, i32
  }
  func.func @transform_4(%arg0: i32, %arg1: i32) -> (i32, i32, i32, i32) {
    %c0_i32 = arith.constant 0 : i32
    %c0_i32_0 = arith.constant 0 : i32
    %c0_i32_1 = arith.constant 0 : i32
    %c0_i32_2 = arith.constant 0 : i32
    %c0_i32_3 = arith.constant 0 : i32
    return %c0_i32, %c0_i32_0, %c0_i32_1, %c0_i32_2 : i32, i32, i32, i32
  }
  func.func @transform_5(%arg0: i32, %arg1: i32) -> (i32, i32) {
    %c0_i32 = arith.constant 0 : i32
    %c0_i32_0 = arith.constant 0 : i32
    %c0_i32_1 = arith.constant 0 : i32
    return %c0_i32, %c0_i32_0 : i32, i32
  }
  func.func @transform_6(%arg0: i32, %arg1: i32) -> (i32, i32, i32) {
    %c0_i32 = arith.constant 0 : i32
    %c0_i32_0 = arith.constant 0 : i32
    %c0_i32_1 = arith.constant 0 : i32
    return %arg1, %c0_i32, %c0_i32_0 : i32, i32, i32
  }
  func.func @transform_7(%arg0: i32, %arg1: i32) -> (i32, i32) {
    %c0_i32 = arith.constant 0 : i32
    %c0_i32_0 = arith.constant 0 : i32
    %c0_i32_1 = arith.constant 0 : i32
    return %c0_i32, %c0_i32_0 : i32, i32
  }
  func.func @transform_8(%arg0: i32, %arg1: i32) -> (i32, i32, i32, i32) {
    %c0_i32 = arith.constant 0 : i32
    %c0_i32_0 = arith.constant 0 : i32
    %c0_i32_1 = arith.constant 0 : i32
    return %arg0, %arg1, %c0_i32, %c0_i32_0 : i32, i32, i32, i32
  }
}

</mosaic_0001>

<bundles_post_ra>
// kernel: tpu_custom_call.1
= control target key start
LH: loop header
LB: loop body
LE: loop exit
PB: predicated region body
PF: predicated region fallthrough
CT: control target
= control target key end

     0   :  { %6 = vsyncpa [#allocation3], 0  ;;  %s441_s0 = inlined_call_operand.hbm [shape: f32[8,128], index: 0, kind: input, shape index: {}]   ;;  %s442_s1 = inlined_call_operand.hbm [shape: f32[16,128], index: 1, kind: output, shape index: {}]  }
   0x1   :  { %7 = vsyncpa [#allocation4], 0 }
   0x2   :  { %9 = vsyncpa [#allocation4 + $0x1], 0  ;;  %s357_s6 = smov 0   ;;  %s359_s7 = smov 0  }
   0x3   :  { %s361_s8 = smov 0   ;;  %s363_s9 = smov 0  }
   0x4 LB: > { %s378_s10 = sadd.s32 4294967295, %s344_s9   ;;  %s188_s11 = sadd.s32 4294967294, %s344_s9   ;;  %s344_s9 = sphi %s363_s9, %s448_s9   ;;  %s340_s8 = sphi %s361_s8, %s447_s8   ;;  %s336_s7 = sphi %s359_s7, %s446_s7   ;;  %s332_s6 = sphi %s357_s6, %s445_s6  }
   0x5   : > { %s382_s12 = sadd.s32 1, %s344_s9   ;;  %s43_s13 = sadd.s32 1, %s340_s8 }
   0x6   : > { %s40_s14 = ssub.s32 %s344_s9, %s382_s12  ;;  %p53_p0 = scmp.ne.s32.totalorder %s340_s8, %s336_s7 }
   0x7   : > { %p41_p1 = scmp.eq.s32.totalorder %s40_s14, 0  ;;  %p54_p2 = scmp.eq.s32.totalorder %s378_s10, 1 }
   0x8   : > { %p59_p3 = scmp.ne.s32.totalorder %s336_s7, %s332_s6  ;;  %p60_p4 = scmp.eq.s32.totalorder %s188_s11, 1 }
   0x9   : > { %s393_s15 = scalar_select %p41_p1, %s340_s8, %s43_s13  }
   0xa   : > { %p395_p5 = por %p54_p2, %p53_p0  ;;  %p399_p6 = por %p60_p4, %p59_p3 }
   0xb   : > { %p189_p7 = scmp.ge.s32.totalorder %s344_s9, 1  ;;  %p67_p8 = scmp.lt.s32.totalorder %s344_s9, 3 }
   0xc   : > { %p212_p9 = scmp.eq.s32.totalorder %s378_s10, 0  ;;  %s79_s20 = sshll.u32 %s441_s0, 4  ;;  %s80_s20 = int_to_ptr.hbm [resolvable:$true] %s79_s20 }
   0xd   : > { %p68_p10 = pnand %p189_p7, %p67_p8  ;;  %s346_s21 = smov [#allocation2]  }
   0xe   : > { %s81_s22 = sshll.u32 %s346_s21, 4  ;;  %s82_s22 = int_to_ptr.vmem [resolvable:$true] %s81_s22 }
   0xf   : > { %p204_p11 = pneg %p68_p10  ;;  %94 = sbr.rel (%p68_p10) target bundleno = 37 (0x25), region = 24 }
  0x11   : > { %p205_p12 = pnand %p212_p9, %p204_p11 }
  0x13   : > { %207 = dma.hbm_to_vmem [thread:$0]  (!%p205_p12), %s80_s20, 128, %s82_s22, [#allocation3]  }
  0x14   : > { %323 = dma.done.wait (%p212_p9), [#allocation3], 128  }
  0x15   : > { %325 = vsyncadd (%p212_p9), [#allocation3], 4294967168  ;;  %s107_s23 = sand.u32 1, %s336_s7   ;;  %s195_s24 = sshll.u32 %s378_s10, 3  ;;  %v110_v0 = vld [vmem:[#allocation2] sm:$0xff] }
  0x16   : > { %s193_s25 = sshll.u32 %s107_s23, 3  ;;  %s124_s28 = scalar_lea.hbm %s442_s1, %s195_s24  ;;  %v111_v1 = vadd.f32 1.0, %v110_v0 }
  0x17   : > { %s109_s29 = scalar_lea.vmem [#allocation5], %s193_s25  ;;  %s128_s2 = sshll.u32 %s124_s28, 4  ;;  %s129_s2 = int_to_ptr.hbm [resolvable:$true] %s128_s2 }
  0x18   : > { %s126_s30 = sshll.u32 %s109_s29, 4  ;;  %112 = vst [vmem:[%s109_s29] sm:$0xff] %v111_v1  ;;  %s114_s3 = scalar_lea.sflag [#allocation4], %s107_s23  ;;  %s127_s30 = int_to_ptr.vmem [resolvable:$true] %s126_s30 }
  0x19   : > { %s292_s4 = sshra.s32 %s129_s2, 4  ;;  %s298_s13 = scalar_lea.hbm %s442_s1, 16  ;;  %s293_s4 = int_to_ptr.hbm [resolvable:$true] %s292_s4 }
  0x1a   : > { %s294_s5 = scalar_lea.hbm %s293_s4, 8  ;;  %p299_p2 = scmp.lt.s32.totalorder %s293_s4, %s442_s1 }
  0x1b   : > { %p295_p13 = scmp.ne.s32.totalorder %s293_s4, %s294_s5  ;;  %p300_p3 = scmp.lt.s32.totalorder %s298_s13, %s294_s5 }
  0x1d   : > { %p296_p0 = pnand %p295_p13, %p395_p5  ;;  %p301_p4 = por %p300_p3, %p299_p2 }
  0x1f   : > { %p297_p1 = pneg %p296_p0 }
  0x21   : > { %p302_p7 = pnand %p301_p4, %p297_p1 }
  0x23   : > { %305 = shalt.err (!%p302_p7)
}
  0x24   : > { %202 = dma.vmem_to_hbm [thread:$0]  (%p395_p5), %s127_s30, 128, %s129_s2, %s114_s3  }
  0x25 PF: > { %p214_p8 = scmp.ge.s32.totalorder %s344_s9, 2  ;;  %s140_s19 = sand.u32 1, %s332_s6  }
  0x26   : > { %s141_s20 = scalar_lea.sflag [#allocation4], %s140_s19 }
  0x27   : > { %p209_p9 = pnand %p214_p8, %p399_p6 }
  0x29   : > { %p210_p10 = pneg %p209_p9 }
  0x2b   : > { %327 = dma.done.wait (%p210_p10), %s141_s20, 128  }
  0x2c   : > { %329 = vsyncadd (%p210_p10), %s141_s20, 4294967168  ;;  %p12_p11 = scmp.ge.s32.totalorder %s382_s12, 4   ;;  %s445_s6 = smov %s336_s7 }
  0x2d   : > { %s446_s7 = smov %s340_s8  ;;  %s447_s8 = smov %s393_s15 }
  0x2e   : > { %s448_s9 = smov %s382_s12  ;;  %14 = sbr.rel (!%p12_p11) target bundleno = 4 (0x4), region = 61 }
  0x33   :  { %147 = vsyncpa [#allocation3], 1 }
  0x34   :  { %149 = vsyncpa [#allocation3 + $0x1], 1 }
  0x35   :  { %150 = vsyncpa [#allocation4], 1 }
  0x36   :  { %152 = vsyncpa [#allocation4 + $0x1], 1 }

// kernel: tpu_custom_call.1
= control target key start
LH: loop header
LB: loop body
LE: loop exit
PB: predicated region body
PF: predicated region fallthrough
CT: control target
= control target key end

     0   :  { %s7125_s27 = smov 0   ;;  %s7127_s28 = smov 0   ;;  %s10344_s0 = inlined_call_operand.vmem [shape: bf16[2,342,4], index: 0, kind: input, shape index: {}]   ;;  %s10345_s1 = inlined_call_operand.vmem [shape: bf16[3,3,4,4], index: 1, kind: input, shape index: {}]   ;;  %s10346_s2 = inlined_call_operand.vmem [shape: f32[1,4], index: 2, kind: input, shape index: {}]   ;;  %s10347_s3 = inlined_call_operand.vmem [shape: bf16[2,110,4], index: 3, kind: input, shape index: {}]   ;;  %s10348_s4 = inlined_call_operand.vmem [shape: bf16[3,3,4,4], index: 4, kind: input, shape index: {}]   ;;  %s10349_s5 = inlined_call_operand.vmem [shape: f32[1,4], index: 5, kind: input, shape index: {}]   ;;  %s10350_s6 = inlined_call_operand.vmem [shape: bf16[1,16,8], index: 6, kind: input, shape index: {}]   ;;  %s10351_s7 = inlined_call_operand.vmem [shape: bf16[16,8], index: 7, kind: input, shape index: {}]   ;;  %s10352_s8 = inlined_call_operand.vmem [shape: bf16[2,16,16,4], index: 8, kind: output, shape index: {}]  }
   0x1   :  { %s7129_s29 = smov 0  }
   0x2 LB: > { %s30_s30 = sadd.s32 1, %s7041_s28  ;;  %p6519_p0 = scmp.ge.s32.totalorder %s7045_s29, 1  ;;  %s7045_s29 = sphi %s7129_s29, %s18_s29   ;;  %s7041_s28 = sphi %s7127_s28, %s10805_s28   ;;  %s7037_s27 = sphi %s7125_s27, %s10804_s27  }
   0x3   : > { %p32_p1 = scmp.ge.s32.totalorder %s30_s30, 2  ;;  %p304_p2 = scmp.lt.s32.totalorder %s7045_s29, 3 }
   0x5   : > { %s10807_s30 = smov (%p32_p1, %s30_s30), 0  ;;  %p305_p3 = pnand %p6519_p0, %p304_p2 }
   0x7   : > { %308 = sbr.rel (%p305_p3) target bundleno = 2193 (0x891), region = 52 }
   0xc   : > { %v427_v0 = vld [vmem:[%s10345_s1] sm:$0x3]  ;;  %vm727_vm0 = vcmask 1041408   ;;  %p356_p4 = scmp.lt.s32.totalorder %s7037_s27, 1  ;;  %v6633_v2 = vld [vmem:[%s10345_s1 + $0x4] sm:$0x3] }
   0xd   : > { %v867_v1 = vsel %vm727_vm0, %v427_v0, 0  ;;  %v6524_v3 = vld [vmem:[%s10345_s1 + $0x2] sm:$0x3]  ;;  %v1063_v4 = vsel %vm727_vm0, %v6633_v2, 0  ;;  %v6652_v6 = vld [vmem:[%s10345_s1 + $0x6] sm:$0x3] }
   0xe   : > { %876 = vmatpush.bf16.msra.mxu1 %v867_v1  ;;  %s10809_s27 = smov (!%p356_p4, %s7037_s27), 1  ;;  %v729_v5 = vsel %vm727_vm0, %v6524_v3, 0  ;;  %1072 = vmatpush.bf16.msra.mxu2 %v1063_v4  ;;  %v1219_v7 = vsel %vm727_vm0, %v6652_v6, 0  ;;  %vm672_vm1 = vcmask 31744   ;;  %vm970_vm2 = vcmask 1046528   ;;  %s7050_s21 = smov 4  }
   0xf   : > { %738 = vmatpush.bf16.msra.mxu0 %v729_v5  ;;  %s6920_s17 = smul.u32 172, %s10809_s27  ;;  %6919 = vmatpush.bf16.msra.mxu3 %v729_v5  ;;  %vm523_vm3 = vsmask.f32 7424  ;;  %v6709_v62 = vld [vmem:[%s10345_s1 + $0xc] sm:$0x3]  ;;  %vm1638_vm5 = vcmask 1045504  }
  0x10   : > { %v1887_v63 = vsel %vm727_vm0, %v6709_v62, 0  ;;  %v6728_v0 = vld [vmem:[%s10345_s1 + $0xe] sm:$0x3]  ;;  %v6690_v1 = vld [vmem:[%s10345_s1 + $0xa] sm:$0x3]  ;;  %s6921_s19 = smul.u32 56, %s10809_s27 }
  0x11   : > { %s7165_s20 = scalar_lea.vmem %s10344_s0, %s6920_s17  ;;  %v2167_v3 = vsel %vm727_vm0, %v6728_v0, 0  ;;  %v1731_v4 = vsel %vm727_vm0, %v6690_v1, 0  ;;  %vm1358_vm4 = vsmask.f32 6400  ;;  %vm2026_vm6 = vsmask.f32 5376 }
  0x12   : > { %v6832_v8 = vld [vmem:[%s7165_s20] sm:$0xff]  ;;  %v7169_v9 = vld [vmem:[%s7165_s20 + $0x8] sm:$0xff]  ;;  %v7175_v11 = vld [vmem:[%s7165_s20 + $0x90] sm:$0xff]   ;;  %1896 = vmatpush.bf16.msrb.mxu2 %v1887_v63  ;;  %1740 = vmatpush.bf16.msrb.mxu1 %v1731_v4  ;;  %s7896_s23 = scalar_lea.vmem %s10347_s3, %s6921_s19  ;;  %vm2306_vm7 = vcmask 1044480   ;;  %vm3888_vm8 = vcmask 1047556   ;;  %s7049_s19 = smov 20  }
  0x13   : > { %1228 = vmatpush.bf16.msrb.mxu3 %v1219_v7  ;;  %v7172_v10 = vld [vmem:[%s7165_s20 + $0x88] sm:$0xff]  ;;  %6615 = vmatmul.msk.bf16.vlgmr.msra.gmra.mxu1 %vm672_vm1, %v6832_v8  ;;  %v971_v12 = vrot.slane %v6832_v8, 1  ;;  %v972_v13 = vrot.slane %v7169_v9, 1  ;;  %v525_v14 = vshrl.u32 %v6832_v8, 16  ;;  %v527_v15 = vshll.u32 %v6832_v8, 16  ;;  %v7201_v30 = vld [vmem:[%s7165_s20 + $0x10] sm:$0xff] }
  0x14   : > { %v10355_v16 = vshll.u32 %v7169_v9, 16  ;;  %v6854_v17 = vunpack.c.l.b16 %v7175_v11  ;;  %v7182_v18 = vshll.u32 %v7172_v10, 16  ;;  %v7185_v19 = vshrl.u32 %v7172_v10, 16  ;;  %v7220_v39 = vld [vmem:[%s7165_s20 + $0x18] sm:$0xff]  ;;  %v7239_v47 = vld [vmem:[%s7165_s20 + $0x20] sm:$0xff]  ;;  %v7258_v55 = vld [vmem:[%s7165_s20 + $0x28] sm:$0xff] }
  0x15   : > { %v973_v20 = vsel %vm970_vm2, %v971_v12, %v972_v13  ;;  %v529_v21 = vrot.slane %v527_v15, 1  ;;  %v974_v32 = vrot.slane %v7201_v30, 1  ;;  %v10354_v33 = vshrl.u32 %v7169_v9, 16  ;;  %v7289_v5 = vld [vmem:[%s7165_s20 + $0x30] sm:$0xff]  ;;  %s7051_s22 = smov 12   ;;  %s7053_s24 = smov 8  }
  0x16   : > { %10431 = vst [vmem:[#allocation2_spill] sm:$0xff] %v7182_v18  ;;  %6634 = vmatmul.msk.bf16.vlgmr.msra.gmra.mxu2 %vm672_vm1, %v973_v20  ;;  %v534_v22 = vrot.slane %v10355_v16, 1  ;;  %v7191_v23 = vpack.c.b16 %v6854_v17, %v6854_v17  ;;  %v10353_v24 = vrot.slane %v7182_v18, 1  ;;  %v7208_v34 = vshll.u32 %v7201_v30, 16  ;;  %v7308_v17 = vld [vmem:[%s7165_s20 + $0x38] sm:$0xff]  ;;  %v7365_v63 = vld [vmem:[%s7165_s20 + $0x50] sm:$0xff] }
  0x17   : > { %10432 = vst [vmem:[#allocation3_spill] sm:$0xff] %v7185_v19  ;;  %v530_v25 = vor.u32 %v529_v21, %v525_v14  ;;  %v975_v35 = vsel %vm970_vm2, %v972_v13, %v974_v32  ;;  %v976_v40 = vrot.slane %v7220_v39, 1  ;;  %v7225_v41 = vshrl.u32 %v7201_v30, 16  ;;  %s7054_s25 = smov 16   ;;  %s7055_s26 = smov 28  }
  0x18   : > { %v666_v26 = vor.u32 %v7185_v19, %v10353_v24  ;;  %v668_v27 = vshll.u32 %v7191_v23, 16  ;;  %v538_v36 = vor.u32 %v10354_v33, %v534_v22  ;;  %v542_v37 = vrot.slane %v7208_v34, 1  ;;  %v7434_v24 = vld [vmem:[%s7165_s20 + $0x68] sm:$0xff]  ;;  %s7057_s11 = smov 116   ;;  %s7058_s12 = smov 108  }
  0x19   : > { %v535_v28 = vsel %vm523_vm3, %v530_v25, %v534_v22  ;;  %v7228_v42 = vshll.u32 %v7220_v39, 16  ;;  %v977_v43 = vsel %vm970_vm2, %v974_v32, %v976_v40  ;;  %v978_v48 = vrot.slane %v7239_v47, 1  ;;  %10437 = vst [vmem:[#allocation8_spill] sm:$0xff] %v7434_v24  ;;  %s7059_s13 = smov 124   ;;  %s7060_s14 = smov 120  }
  0x1a   : > { %6597 = vmatmul.msk.bf16.vlgmr.msra.gmra.mxu0 %vm672_vm1, %v535_v28  ;;  %v670_v29 = vrot.slane %v668_v27, 1  ;;  %v543_v38 = vsel %vm523_vm3, %v538_v36, %v542_v37  ;;  %v546_v44 = vor.u32 %v7225_v41, %v542_v37  ;;  %v7244_v49 = vshrl.u32 %v7220_v39, 16  ;;  %s7061_s15 = smov 100   ;;  %s7062_s16 = smov 112  }
  0x1b   : > { %v550_v45 = vrot.slane %v7228_v42, 1  ;;  %v7247_v50 = vshll.u32 %v7239_v47, 16  ;;  %v979_v51 = vsel %vm970_vm2, %v976_v40, %v978_v48  ;;  %v980_v56 = vrot.slane %v7258_v55, 1  ;;  %s7063_s17 = smov 104   ;;  %s7065_s18 = smov 32  }
  0x1c   : > { %v671_v31 = vsel %vm523_vm3, %v666_v26, %v670_v29  ;;  %v7263_v57 = vshrl.u32 %v7239_v47, 16  ;;  %v7266_v58 = vshll.u32 %v7258_v55, 16  ;;  %v982_v6 = vrot.slane %v7289_v5, 1  ;;  %v7327_v29 = vld [vmem:[%s7165_s20 + $0x40] sm:$0xff]  ;;  %s7072_s10 = smov 68  }
  0x1d   : > { %6614 = vmatmul.msk.bf16.vlgmr.msra.gmra.mxu3 %vm672_vm1, %v671_v31  ;;  %v551_v46 = vsel %vm523_vm3, %v546_v44, %v550_v45  ;;  %v554_v52 = vor.u32 %v7244_v49, %v550_v45  ;;  %v558_v53 = vrot.slane %v7247_v50, 1  ;;  %v981_v59 = vsel %vm970_vm2, %v978_v48, %v980_v56 }
  0x1e   : > { %v566_v61 = vrot.slane %v7266_v58, 1  ;;  %2176 = vmatpush.bf16.msra.mxu3 %v2167_v3  ;;  %v7294_v7 = vshrl.u32 %v7258_v55, 16  ;;  %v7297_v8 = vshll.u32 %v7289_v5, 16  ;;  %v983_v12 = vsel %vm970_vm2, %v980_v56, %v982_v6 }
  0x1f   : > { %v559_v54 = vsel %vm523_vm3, %v554_v52, %v558_v53  ;;  %v562_v60 = vor.u32 %v7263_v57, %v558_v53  ;;  %v984_v20 = vrot.slane %v7308_v17, 1  ;;  %v7313_v21 = vshrl.u32 %v7289_v5, 16 }
  0x20   : > { %v570_v13 = vor.u32 %v7294_v7, %v566_v61  ;;  %v574_v14 = vrot.slane %v7297_v8, 1  ;;  %v7316_v22 = vshll.u32 %v7308_v17, 16  ;;  %v986_v31 = vrot.slane %v7327_v29, 1 }
  0x21   : > { %v567_v2 = vsel %vm523_vm3, %v562_v60, %v566_v61  ;;  %v985_v25 = vsel %vm970_vm2, %v982_v6, %v984_v20  ;;  %v7332_v32 = vshrl.u32 %v7308_v17, 16  ;;  %v7351_v45 = vshrl.u32 %v7327_v29, 16 }
  0x22   : > { %v575_v15 = vsel %vm523_vm3, %v570_v13, %v574_v14  ;;  %v578_v26 = vor.u32 %v7313_v21, %v574_v14  ;;  %v582_v27 = vrot.slane %v7316_v22, 1  ;;  %v987_v36 = vsel %vm970_vm2, %v984_v20, %v986_v31 }
  0x23   : > { %6616 = vmatmul.msk.bf16.gmra.mxu1 %vm672_vm1, %v7169_v9  ;;  %v990_v1 = vrot.slane %v7365_v63, 1  ;;  %v7373_v3 = vshll.u32 %v7365_v63, 16  ;;  %vm4087_vm9 = vcmask 64512   ;;  %vm4090_vm10 = vcmask 97280  }
  0x24   : > { %v583_v28 = vsel %vm523_vm3, %v578_v26, %v582_v27  ;;  %v586_v37 = vor.u32 %v7332_v32, %v582_v27  ;;  %vm4093_vm11 = vcmask 130048   ;;  %vm4096_vm12 = vcmask 162816  }
  0x25   : > { %vm4099_vm13 = vcmask 195584   ;;  %vm4102_vm14 = vcmask 228352   ;;  %vm4193_vm15 = vcmask 1043456  }
  0x26   : > { %6635 = vmatmul.msk.bf16.gmra.mxu2 %vm672_vm1, %v975_v35 }
  0x2a   : > { %6598 = vmatmul.msk.bf16.gmra.mxu0 %vm672_vm1, %v543_v38 }
  0x2d   : > { %6653 = vmatmul.msk.bf16.vlgmr.msrb.gmra.mxu3 %vm672_vm1, %v975_v35  ;;  %v7335_v35 = vshll.u32 %v7327_v29, 16 }
  0x2f   : > { %v590_v38 = vrot.slane %v7335_v35, 1 }
  0x31   : > { %v591_v40 = vsel %vm523_vm3, %v586_v37, %v590_v38  ;;  %v594_v52 = vor.u32 %v7351_v45, %v590_v38 }
  0x33   : > { %6617 = vmatmul.msk.bf16.gmra.mxu1 %vm672_vm1, %v7201_v30 }
  0x36   : > { %6636 = vmatmul.msk.bf16.gmra.mxu2 %vm672_vm1, %v977_v43 }
  0x3a   : > { %6599 = vmatmul.msk.bf16.gmra.mxu0 %vm672_vm1, %v551_v46 }
  0x3d   : > { %6654 = vmatmul.msk.bf16.gmra.mxu3 %vm672_vm1, %v977_v43  ;;  %v7346_v43 = vld [vmem:[%s7165_s20 + $0x48] sm:$0xff] }
  0x3e   : > { %v988_v44 = vrot.slane %v7346_v43, 1  ;;  %v7354_v46 = vshll.u32 %v7346_v43, 16 }
  0x40   : > { %v598_v53 = vrot.slane %v7354_v46, 1 }
  0x42   : > { %v599_v56 = vsel %vm523_vm3, %v594_v52, %v598_v53 }
  0x43   : > { %6618 = vmatmul.msk.bf16.gmra.mxu1 %vm672_vm1, %v7220_v39 }
  0x46   : > { %6637 = vmatmul.msk.bf16.gmra.mxu2 %vm672_vm1, %v979_v51 }
  0x4a   : > { %6600 = vmatmul.msk.bf16.gmra.mxu0 %vm672_vm1, %v559_v54 }
  0x4d   : > { %6655 = vmatmul.msk.bf16.gmra.mxu3 %vm672_vm1, %v979_v51  ;;  %v989_v51 = vsel %vm970_vm2, %v986_v31, %v988_v44 }
  0x53   : > { %6619 = vmatmul.msk.bf16.gmra.mxu1 %vm672_vm1, %v7239_v47 }
  0x56   : > { %6638 = vmatmul.msk.bf16.gmra.mxu2 %vm672_vm1, %v981_v59 }
  0x5a   : > { %6601 = vmatmul.msk.bf16.gmra.mxu0 %vm672_vm1, %v567_v2  ;;  %v7370_v2 = vshrl.u32 %v7346_v43, 16 }
  0x5c   : > { %v602_v20 = vor.u32 %v7370_v2, %v598_v53 }
  0x5d   : > { %6656 = vmatmul.msk.bf16.gmra.mxu3 %vm672_vm1, %v981_v59 }
  0x63   : > { %6620 = vmatmul.msk.bf16.gmra.mxu1 %vm672_vm1, %v7258_v55 }
  0x66   : > { %6639 = vmatmul.msk.bf16.gmra.mxu2 %vm672_vm1, %v983_v12 }
  0x6a   : > { %6602 = vmatmul.msk.bf16.gmra.mxu0 %vm672_vm1, %v575_v15  ;;  %v991_v15 = vsel %vm970_vm2, %v988_v44, %v990_v1 }
  0x6d   : > { %6657 = vmatmul.msk.bf16.gmra.mxu3 %vm672_vm1, %v983_v12 }
  0x73   : > { %6621 = vmatmul.msk.bf16.gmra.mxu1 %vm672_vm1, %v7289_v5 }
  0x76   : > { %6640 = vmatmul.msk.bf16.gmra.mxu2 %vm672_vm1, %v985_v25 }
  0x7a   : > { %6603 = vmatmul.msk.bf16.gmra.mxu0 %vm672_vm1, %v583_v28 }
  0x7d   : > { %6658 = vmatmul.msk.bf16.gmra.mxu3 %vm672_vm1, %v985_v25  ;;  %v606_v25 = vrot.slane %v7373_v3, 1 }
  0x7f   : > { %v607_v27 = vsel %vm523_vm3, %v602_v20, %v606_v25 }
  0x83   : > { %6622 = vmatmul.msk.bf16.gmra.mxu1 %vm672_vm1, %v7308_v17 }
  0x86   : > { %6641 = vmatmul.msk.bf16.gmra.mxu2 %vm672_vm1, %v987_v36 }
  0x8a   : > { %6604 = vmatmul.msk.bf16.gmra.mxu0 %vm672_vm1, %v591_v40  ;;  %v7388_v40 = vld [vmem:[%s7165_s20 + $0x58] sm:$0xff] }
  0x8b   : > { %v7396_v52 = vshll.u32 %v7388_v40, 16 }
  0x8d   : > { %6659 = vmatmul.msk.bf16.gmra.mxu3 %vm672_vm1, %v987_v36 }
  0x90   : > { %v878_v48 = vpop.f32.mrf.mxu1 }
  0x93   : > { %6623 = vmatmul.msk.bf16.gmra.mxu1 %vm672_vm1, %v7327_v29 }
  0x96   : > { %6642 = vmatmul.msk.bf16.gmra.mxu2 %vm672_vm1, %v989_v51 }
  0x97   : > { %v740_v54 = vpop.f32.mrf.mxu0 }
  0x98   : > { %v879_v59 = vadd.f32 %v878_v48, %v740_v54  ;;  %v880_v60 = vpop.f32.mrf.mxu1  ;;  %v992_v48 = vrot.slane %v7388_v40, 1 }
  0x99   : > { %v1074_v61 = vpop.f32.mrf.mxu2 }
  0x9a   : > { %v1164_v62 = vadd.f32 %v1074_v61, %v879_v59  ;;  %6605 = vmatmul.msk.bf16.gmra.mxu0 %vm672_vm1, %v599_v56 }
  0x9d   : > { %6660 = vmatmul.msk.bf16.gmra.mxu3 %vm672_vm1, %v989_v51  ;;  %v7393_v51 = vshrl.u32 %v7365_v63, 16 }
  0x9f   : > { %v742_v0 = vpop.f32.mrf.mxu0 }
  0xa0   : > { %v7375_v4 = vpop.f32.mrf.mxu3  ;;  %v881_v6 = vadd.f32 %v880_v60, %v742_v0  ;;  %v883_v12 = vpop.f32.mrf.mxu1  ;;  %v993_v0 = vsel %vm970_vm2, %v990_v1, %v992_v48 }
  0xa1   : > { %v1076_v13 = vpop.f32.mrf.mxu2 }
  0xa2   : > { %v1165_v14 = vadd.f32 %v1076_v13, %v881_v6  ;;  %v610_v6 = vor.u32 %v7393_v51, %v606_v25 }
  0xa3   : > { %6624 = vmatmul.msk.bf16.gmra.mxu1 %vm672_vm1, %v7346_v43 }
  0xa6   : > { %6643 = vmatmul.msk.bf16.gmra.mxu2 %vm672_vm1, %v991_v15 }
  0xa7   : > { %v745_v26 = vpop.f32.mrf.mxu0 }
  0xa8   : > { %v7384_v28 = vpop.f32.mrf.mxu3  ;;  %v884_v31 = vadd.f32 %v883_v12, %v745_v26  ;;  %v885_v36 = vpop.f32.mrf.mxu1  ;;  %v614_v12 = vrot.slane %v7396_v52, 1 }
  0xa9   : > { %v1079_v37 = vpop.f32.mrf.mxu2 }
  0xaa   : > { %v1166_v38 = vadd.f32 %v1079_v37, %v884_v31  ;;  %6606 = vmatmul.msk.bf16.gmra.mxu0 %vm672_vm1, %v607_v27  ;;  %v7411_v37 = vld [vmem:[%s7165_s20 + $0x60] sm:$0xff] }
  0xab   : > { %10433 = vst [vmem:[#allocation4_spill] sm:$0xff] %v7411_v37  ;;  %v994_v25 = vrot.slane %v7411_v37, 1  ;;  %v7439_v33 = vshrl.u32 %v7411_v37, 16 }
  0xad   : > { %6661 = vmatmul.msk.bf16.gmra.mxu3 %vm672_vm1, %v991_v15  ;;  %v615_v15 = vsel %vm523_vm3, %v610_v6, %v614_v12  ;;  %10438 = vst [vmem:[#allocation9_spill] sm:$0xff] %v7439_v33 }
  0xaf   : > { %v747_v44 = vpop.f32.mrf.mxu0 }
  0xb0   : > { %v1230_v53 = vpop.f32.mrf.mxu3  ;;  %v886_v54 = vadd.f32 %v885_v36, %v747_v44  ;;  %v888_v56 = vpop.f32.mrf.mxu1  ;;  %v7416_v44 = vshrl.u32 %v7388_v40, 16 }
  0xb1   : > { %v7398_v59 = vadd.f32 %v1230_v53, %v1164_v62  ;;  %v1081_v60 = vpop.f32.mrf.mxu2  ;;  %v7419_v53 = vshll.u32 %v7411_v37, 16 }
  0xb2   : > { %v1167_v61 = vadd.f32 %v1081_v60, %v886_v54 }
  0xb3   : > { %6625 = vmatmul.msk.bf16.gmra.mxu1 %vm672_vm1, %v7365_v63  ;;  %10434 = vst [vmem:[#allocation5_spill] sm:$0xff] %v7419_v53 }
  0xb6   : > { %6644 = vmatmul.msk.bf16.gmra.mxu2 %vm672_vm1, %v993_v0 }
  0xb7   : > { %v750_v13 = vpop.f32.mrf.mxu0 }
  0xb8   : > { %v1232_v20 = vpop.f32.mrf.mxu3  ;;  %v889_v62 = vadd.f32 %v888_v56, %v750_v13  ;;  %v890_v26 = vpop.f32.mrf.mxu1 }
  0xb9   : > { %v7407_v27 = vadd.f32 %v1232_v20, %v1165_v14  ;;  %v1084_v31 = vpop.f32.mrf.mxu2  ;;  %v622_v20 = vrot.slane %v7419_v53, 1 }
  0xba   : > { %v1168_v36 = vadd.f32 %v1084_v31, %v889_v62  ;;  %6607 = vmatmul.msk.bf16.gmra.mxu0 %vm672_vm1, %v615_v15  ;;  %v618_v15 = vor.u32 %v7416_v44, %v614_v12  ;;  %v996_v12 = vrot.slane %v7434_v24, 1 }
  0xbd   : > { %6662 = vmatmul.msk.bf16.gmra.mxu3 %vm672_vm1, %v993_v0  ;;  %v995_v0 = vsel %vm970_vm2, %v992_v48, %v994_v25 }
  0xbf   : > { %v752_v1 = vpop.f32.mrf.mxu0 }
  0xc0   : > { %v1235_v54 = vpop.f32.mrf.mxu3  ;;  %v891_v14 = vadd.f32 %v890_v26, %v752_v1  ;;  %v893_v56 = vpop.f32.mrf.mxu1  ;;  %v623_v26 = vsel %vm523_vm3, %v618_v15, %v622_v20  ;;  %v7442_v15 = vshll.u32 %v7434_v24, 16 }
  0xc1   : > { %v7421_v60 = vadd.f32 %v1235_v54, %v1166_v38  ;;  %v1086_v6 = vpop.f32.mrf.mxu2 }
  0xc2   : > { %v1169_v13 = vadd.f32 %v1086_v6, %v891_v14  ;;  %10439 = vst [vmem:[#allocation10_spill] sm:$0xff] %v7442_v15  ;;  %v630_v16 = vrot.slane %v7442_v15, 1  ;;  %v7462_v15 = vshrl.u32 %v7434_v24, 16 }
  0xc3   : > { %10435 = vst [vmem:[#allocation6_spill] sm:$0xff] %v7421_v60  ;;  %6626 = vmatmul.msk.bf16.gmra.mxu1 %vm672_vm1, %v7388_v40 }
  0xc4   : > { %10443 = vst [vmem:[#allocation14_spill] sm:$0xff] %v7462_v15 }
  0xc6   : > { %6645 = vmatmul.msk.bf16.gmra.mxu2 %vm672_vm1, %v995_v0 }
  0xc7   : > { %v755_v62 = vpop.f32.mrf.mxu0 }
  0xc8   : > { %v1237_v31 = vpop.f32.mrf.mxu3  ;;  %v894_v38 = vadd.f32 %v893_v56, %v755_v62  ;;  %v895_v1 = vpop.f32.mrf.mxu1 }
  0xc9   : > { %v7430_v54 = vadd.f32 %v1237_v31, %v1167_v61  ;;  %v1089_v14 = vpop.f32.mrf.mxu2 }
  0xca   : > { %v1170_v6 = vadd.f32 %v1089_v14, %v894_v38  ;;  %6608 = vmatmul.msk.bf16.gmra.mxu0 %vm672_vm1, %v623_v26  ;;  %v626_v14 = vor.u32 %v7439_v33, %v622_v20 }
  0xcb   : > { %10436 = vst [vmem:[#allocation7_spill] sm:$0xff] %v7430_v54  ;;  %v7457_v54 = vld [vmem:[%s7165_s20 + $0x70] sm:$0xff] }
  0xcc   : > { %10442 = vst [vmem:[#allocation13_spill] sm:$0xff] %v7457_v54  ;;  %v998_v20 = vrot.slane %v7457_v54, 1 }
  0xcd   : > { %6663 = vmatmul.msk.bf16.gmra.mxu3 %vm672_vm1, %v995_v0  ;;  %v997_v0 = vsel %vm970_vm2, %v994_v25, %v996_v12 }
  0xcf   : > { %v757_v48 = vpop.f32.mrf.mxu0 }
  0xd0   : > { %v1240_v56 = vpop.f32.mrf.mxu3  ;;  %v896_v61 = vadd.f32 %v895_v1, %v757_v48  ;;  %v898_v62 = vpop.f32.mrf.mxu1  ;;  %v631_v1 = vsel %vm523_vm3, %v626_v14, %v630_v16  ;;  %v7465_v14 = vshll.u32 %v7457_v54, 16 }
  0xd1   : > { %v7444_v31 = vadd.f32 %v1240_v56, %v1168_v36  ;;  %v1091_v38 = vpop.f32.mrf.mxu2 }
  0xd2   : > { %v1171_v26 = vadd.f32 %v1091_v38, %v896_v61  ;;  %10444 = vst [vmem:[#allocation15_spill] sm:$0xff] %v7465_v14 }
  0xd3   : > { %10440 = vst [vmem:[#allocation11_spill] sm:$0xff] %v7444_v31  ;;  %6627 = vmatmul.msk.bf16.gmra.mxu1 %vm672_vm1, %v7411_v37  ;;  %v10456_v37 = vshrl.u32 %v7169_v9, 16 }
  0xd6   : > { %6646 = vmatmul.msk.bf16.gmra.mxu2 %vm672_vm1, %v997_v0 }
  0xd7   : > { %v760_v19 = vpop.f32.mrf.mxu0 }
  0xd8   : > { %v1242_v48 = vpop.f32.mrf.mxu3  ;;  %v899_v36 = vadd.f32 %v898_v62, %v760_v19  ;;  %v900_v56 = vpop.f32.mrf.mxu1 }
  0xd9   : > { %v7453_v31 = vadd.f32 %v1242_v48, %v1169_v13  ;;  %v1094_v61 = vpop.f32.mrf.mxu2 }
  0xda   : > { %v1172_v38 = vadd.f32 %v1094_v61, %v899_v36  ;;  %6609 = vmatmul.msk.bf16.gmra.mxu0 %vm672_vm1, %v631_v1  ;;  %v634_v61 = vor.u32 %v7462_v15, %v630_v16 }
  0xdb   : > { %10441 = vst [vmem:[#allocation12_spill] sm:$0xff] %v7453_v31  ;;  %v638_v31 = vrot.slane %v7465_v14, 1  ;;  %v7485_v14 = vshrl.u32 %v7457_v54, 16 }
  0xdd   : > { %6664 = vmatmul.msk.bf16.gmra.mxu3 %vm672_vm1, %v997_v0  ;;  %v999_v0 = vsel %vm970_vm2, %v996_v12, %v998_v20  ;;  %10448 = vst [vmem:[#allocation19_spill] sm:$0xff] %v7485_v14 }
  0xdf   : > { %v762_v25 = vpop.f32.mrf.mxu0 }
  0xe0   : > { %v1245_v19 = vpop.f32.mrf.mxu3  ;;  %v901_v13 = vadd.f32 %v900_v56, %v762_v25  ;;  %v903_v62 = vpop.f32.mrf.mxu1  ;;  %v639_v56 = vsel %vm523_vm3, %v634_v61, %v638_v31 }
  0xe1   : > { %v7467_v48 = vadd.f32 %v1245_v19, %v1170_v6  ;;  %v1096_v36 = vpop.f32.mrf.mxu2 }
  0xe2   : > { %v1173_v1 = vadd.f32 %v1096_v36, %v901_v13 }
  0xe3   : > { %10445 = vst [vmem:[#allocation16_spill] sm:$0xff] %v7467_v48  ;;  %6628 = vmatmul.msk.bf16.gmra.mxu1 %vm672_vm1, %v7434_v24  ;;  %v7480_v24 = vld [vmem:[%s7165_s20 + $0x78] sm:$0xff] }
  0xe4   : > { %10447 = vst [vmem:[#allocation18_spill] sm:$0xff] %v7480_v24  ;;  %v1000_v12 = vrot.slane %v7480_v24, 1  ;;  %v7488_v61 = vshll.u32 %v7480_v24, 16 }
  0xe6   : > { %6647 = vmatmul.msk.bf16.gmra.mxu2 %vm672_vm1, %v999_v0  ;;  %10449 = vst [vmem:[#allocation20_spill] sm:$0xff] %v7488_v61 }
  0xe7   : > { %v765_v53 = vpop.f32.mrf.mxu0 }
  0xe8   : > { %v1247_v25 = vpop.f32.mrf.mxu3  ;;  %v904_v6 = vadd.f32 %v903_v62, %v765_v53  ;;  %v905_v19 = vpop.f32.mrf.mxu1 }
  0xe9   : > { %v7476_v48 = vadd.f32 %v1247_v25, %v1171_v26  ;;  %v1099_v13 = vpop.f32.mrf.mxu2 }
  0xea   : > { %v1174_v36 = vadd.f32 %v1099_v13, %v904_v6  ;;  %6610 = vmatmul.msk.bf16.gmra.mxu0 %vm672_vm1, %v639_v56  ;;  %v642_v13 = vor.u32 %v7485_v14, %v638_v31  ;;  %v10455_v14 = vshll.u32 %v7169_v9, 16 }
  0xeb   : > { %10446 = vst [vmem:[#allocation17_spill] sm:$0xff] %v7476_v48  ;;  %v646_v48 = vrot.slane %v7488_v61, 1  ;;  %v7508_v61 = vshrl.u32 %v7480_v24, 16 }
  0xec   : > { %v1360_v33 = vrot.slane %v10455_v14, 2 }
  0xed   : > { %6665 = vmatmul.msk.bf16.gmra.mxu3 %vm672_vm1, %v999_v0  ;;  %v1001_v0 = vsel %vm970_vm2, %v998_v20, %v1000_v12  ;;  %10452 = vst [vmem:[#allocation23_spill] sm:$0xff] %v7508_v61 }
  0xef   : > { %v767_v16 = vpop.f32.mrf.mxu0 }
  0xf0   : > { %v1250_v53 = vpop.f32.mrf.mxu3  ;;  %v906_v26 = vadd.f32 %v905_v19, %v767_v16  ;;  %v908_v62 = vpop.f32.mrf.mxu1  ;;  %v647_v19 = vsel %vm523_vm3, %v642_v13, %v646_v48 }
  0xf1   : > { %v7490_v25 = vadd.f32 %v1250_v53, %v1172_v38  ;;  %v1101_v6 = vpop.f32.mrf.mxu2 }
  0xf2   : > { %v1175_v56 = vadd.f32 %v1101_v6, %v906_v26 }
  0xf3   : > { %10450 = vst [vmem:[#allocation21_spill] sm:$0xff] %v7490_v25  ;;  %6629 = vmatmul.msk.bf16.gmra.mxu1 %vm672_vm1, %v7457_v54  ;;  %v7503_v54 = vld [vmem:[%s7165_s20 + $0x80] sm:$0xff] }
  0xf4   : > { %v1002_v20 = vrot.slane %v7503_v54, 1  ;;  %v7511_v13 = vshll.u32 %v7503_v54, 16 }
  0xf6   : > { %6648 = vmatmul.msk.bf16.gmra.mxu2 %vm672_vm1, %v1001_v0  ;;  %10453 = vst [vmem:[#allocation24_spill] sm:$0xff] %v7511_v13 }
  0xf7   : > { %v770_v15 = vpop.f32.mrf.mxu0 }
  0xf8   : > { %v1252_v16 = vpop.f32.mrf.mxu3  ;;  %v909_v38 = vadd.f32 %v908_v62, %v770_v15  ;;  %v910_v53 = vpop.f32.mrf.mxu1 }
  0xf9   : > { %v7499_v25 = vadd.f32 %v1252_v16, %v1173_v1  ;;  %v1104_v26 = vpop.f32.mrf.mxu2 }
  0xfa   : > { %v1176_v6 = vadd.f32 %v1104_v26, %v909_v38  ;;  %6611 = vmatmul.msk.bf16.gmra.mxu0 %vm672_vm1, %v647_v19  ;;  %v650_v26 = vor.u32 %v7508_v61, %v646_v48  ;;  %v1004_v61 = vrot.slane %v7172_v10, 1 }
  0xfb   : > { %10451 = vst [vmem:[#allocation22_spill] sm:$0xff] %v7499_v25  ;;  %v654_v25 = vrot.slane %v7511_v13, 1 }
  0xfd   : > { %6666 = vmatmul.msk.bf16.gmra.mxu3 %vm672_vm1, %v1001_v0  ;;  %v1003_v0 = vsel %vm970_vm2, %v1000_v12, %v1002_v20 }
  0xff   : > { %v772_v31 = vpop.f32.mrf.mxu0 }
 0x100   : > { %v1255_v15 = vpop.f32.mrf.mxu3  ;;  %v911_v1 = vadd.f32 %v910_v53, %v772_v31  ;;  %v913_v62 = vpop.f32.mrf.mxu1  ;;  %v1359_v53 = vrot.slane %v10456_v37, 1  ;;  %v655_v31 = vsel %vm523_vm3, %v650_v26, %v654_v25 }
 0x101   : > { %v7513_v16 = vadd.f32 %v1255_v15, %v1174_v36  ;;  %v1106_v38 = vpop.f32.mrf.mxu2  ;;  %v6671_v15 = vld [vmem:[%s10345_s1 + $0x8] sm:$0x3] }
 0x102   : > { %v1177_v19 = vadd.f32 %v1106_v38, %v911_v1  ;;  %v1499_v38 = vsel %vm727_vm0, %v6671_v15, 0 }
 0x103   : > { %10454 = vst [vmem:[#allocation25_spill] sm:$0xff] %v7513_v16  ;;  %6630 = vmatmul.msk.bf16.gmra.mxu1 %vm672_vm1, %v7480_v24  ;;  %1508 = vmatpush.bf16.msrb.mxu0 %v1499_v38  ;;  %v1361_v16 = vor.u32 %v1360_v33, %v1359_v53  ;;  %v7536_v24 = vshrl.u32 %v7503_v54, 16  ;;  %v1005_v33 = vsel %vm970_vm2, %v1002_v20, %v1004_v61 }
 0x106   : > { %6649 = vmatmul.msk.bf16.gmra.mxu2 %vm672_vm1, %v1003_v0 }
 0x107   : > { %v775_v36 = vpop.f32.mrf.mxu0 }
 0x108   : > { %v1257_v12 = vpop.f32.mrf.mxu3  ;;  %v914_v1 = vadd.f32 %v913_v62, %v775_v36  ;;  %v915_v48 = vpop.f32.mrf.mxu1 }
 0x109   : > { %v7530_v13 = vadd.f32 %v1257_v12, %v1175_v56  ;;  %v1109_v14 = vpop.f32.mrf.mxu2 }
 0x10a   : > { %v1178_v37 = vadd.f32 %v1109_v14, %v914_v1  ;;  %6612 = vmatmul.msk.bf16.gmra.mxu0 %vm672_vm1, %v655_v31  ;;  %v10457_v31 = vrot.slane %v7182_v18, 1 }
 0x10d   : > { %6667 = vmatmul.msk.bf16.gmra.mxu3 %vm672_vm1, %v1003_v0  ;;  %v658_v0 = vor.u32 %v7536_v24, %v654_v25  ;;  %v1006_v25 = vrot.slane %v7191_v23, 1  ;;  %v1208_v23 = vrot.slane %v7175_v11, 1  ;;  %v1640_v11 = vrot.slane %v7201_v30, 2 }
 0x10f   : > { %v777_v26 = vpop.f32.mrf.mxu0  ;;  %v663_v1 = vsel %vm523_vm3, %v658_v0, %v10457_v31 }
 0x110   : > { %v1260_v62 = vpop.f32.mrf.mxu3  ;;  %v916_v36 = vadd.f32 %v915_v48, %v777_v26  ;;  %v918_v60 = vpop.f32.mrf.mxu1 }
 0x111   : > { %v7538_v15 = vadd.f32 %v1260_v62, %v1176_v6  ;;  %v1111_v56 = vpop.f32.mrf.mxu2 }
 0x112   : > { %v1179_v12 = vadd.f32 %v1111_v56, %v916_v36  ;;  %v1362_v36 = vrot.slane %v7225_v41, 1  ;;  %v1363_v56 = vrot.slane %v7208_v34, 2 }
 0x113   : > { %6631 = vmatmul.msk.bf16.gmra.mxu1 %vm672_vm1, %v7503_v54 }
 0x116   : > { %6650 = vmatmul.msk.bf16.gmra.mxu2 %vm672_vm1, %v1005_v33 }
 0x117   : > { %v780_v53 = vpop.f32.mrf.mxu0 }
 0x118   : > { %v1262_v48 = vpop.f32.mrf.mxu3  ;;  %v919_v38 = vadd.f32 %v918_v60, %v780_v53  ;;  %v920_v6 = vpop.f32.mrf.mxu1 }
 0x119   : > { %v7548_v14 = vadd.f32 %v1262_v48, %v1177_v19  ;;  %v1114_v26 = vpop.f32.mrf.mxu2 }
 0x11a   : > { %v1180_v62 = vadd.f32 %v1114_v26, %v919_v38  ;;  %6613 = vmatmul.msk.bf16.gmra.mxu0 %vm672_vm1, %v663_v1  ;;  %v1364_v1 = vor.u32 %v1363_v56, %v1362_v36  ;;  %v1639_v36 = vrot.slane %v7169_v9, 2 }
 0x11c   : > { %v1365_v38 = vsel %vm1358_vm4, %v1361_v16, %v1364_v1 }
 0x11d   : > { %6668 = vmatmul.msk.bf16.gmra.mxu3 %vm672_vm1, %v1005_v33  ;;  %v1007_v33 = vsel %vm970_vm2, %v1004_v61, %v1006_v25  ;;  %v7568_v25 = vld [vmem:[%s7165_s20 + $0x98] sm:$0xff]  }
 0x11e   : > { %10458 = vst [vmem:[#allocation26_spill] sm:$0xff] %v7568_v25  ;;  %v6858_v16 = vunpack.c.l.b16 %v7568_v25 }
 0x11f   : > { %v782_v20 = vpop.f32.mrf.mxu0 }
 0x120   : > { %v1265_v18 = vpop.f32.mrf.mxu3  ;;  %v921_v0 = vadd.f32 %v920_v6, %v782_v20  ;;  %v923_v31 = vpop.f32.mrf.mxu1 }
 0x121   : > { %v7555_v60 = vadd.f32 %v1265_v18, %v1178_v37  ;;  %v1116_v19 = vpop.f32.mrf.mxu2 }
 0x122   : > { %v1181_v53 = vadd.f32 %v1116_v19, %v921_v0 }
 0x123   : > { %6632 = vmatmul.msk.bf16.gmra.mxu1 %vm672_vm1, %v7172_v10  ;;  %v1209_v10 = vsel %vm970_vm2, %v1004_v61, %v1208_v23  ;;  %v1367_v61 = vrot.slane %v7228_v42, 2 }
 0x126   : > { %6651 = vmatmul.msk.bf16.gmra.mxu2 %vm672_vm1, %v1007_v33 }
 0x127   : > { %v785_v48 = vpop.f32.mrf.mxu0 }
 0x128   : > { %v1267_v6 = vpop.f32.mrf.mxu3  ;;  %v924_v18 = vadd.f32 %v923_v31, %v785_v48  ;;  %v925_v37 = vpop.f32.mrf.mxu1  ;;  %v1366_v31 = vrot.slane %v7244_v49, 1 }
 0x129   : > { %v7563_v26 = vadd.f32 %v1267_v6, %v1179_v12  ;;  %v1119_v20 = vpop.f32.mrf.mxu2  ;;  %v1642_v12 = vrot.slane %v7220_v39, 2 }
 0x12a   : > { %v1182_v0 = vadd.f32 %v1119_v20, %v924_v18  ;;  %6672 = vmatmul.msk.bf16.vlgmr.msrb.gmra.mxu0 %vm672_vm1, %v1365_v38  ;;  %v1641_v38 = vsel %vm1638_vm5, %v1639_v36, %v1640_v11  ;;  %v7580_v18 = vpack.c.b16 %v6858_v16, %v6858_v16  ;;  %v1368_v39 = vor.u32 %v1367_v61, %v1366_v31 }
 0x12b   : > { %v1643_v20 = vsel %vm1638_vm5, %v1640_v11, %v1642_v12  ;;  %v1644_v31 = vrot.slane %v7239_v47, 2  ;;  %v1370_v61 = vrot.slane %v7263_v57, 1 }
 0x12d   : > { %6669 = vmatmul.msk.bf16.gmra.mxu3 %vm672_vm1, %v1209_v10  ;;  %v1210_v10 = vrot.slane %v7580_v18, 1  ;;  %v1645_v47 = vsel %vm1638_vm5, %v1642_v12, %v1644_v31 }
 0x12f   : > { %v787_v56 = vpop.f32.mrf.mxu0 }
 0x130   : > { %v1270_v19 = vpop.f32.mrf.mxu3  ;;  %v926_v33 = vadd.f32 %v925_v37, %v787_v56  ;;  %v928_v48 = vpop.f32.mrf.mxu1  ;;  %v1369_v37 = vsel %vm1358_vm4, %v1364_v1, %v1368_v39  ;;  %v1371_v1 = vrot.slane %v7247_v50, 2 }
 0x131   : > { %v7578_v9 = vadd.f32 %v1270_v19, %v1180_v62  ;;  %v1121_v30 = vpop.f32.mrf.mxu2 }
 0x132   : > { %v1183_v6 = vadd.f32 %v1121_v30, %v926_v33  ;;  %v1211_v30 = vsel %vm970_vm2, %v1208_v23, %v1210_v10  ;;  %v2028_v10 = vrot.slane %v7208_v34, 3 }
 0x133   : > { %6691 = vmatmul.msk.bf16.vlgmr.msrb.gmra.mxu1 %vm672_vm1, %v1641_v38 }
 0x136   : > { %6710 = vmatmul.msk.bf16.vlgmr.msrb.gmra.mxu2 %vm672_vm1, %v1643_v20 }
 0x137   : > { %v790_v25 = vpop.f32.mrf.mxu0 }
 0x138   : > { %v1272_v56 = vpop.f32.mrf.mxu3  ;;  %v929_v36 = vadd.f32 %v928_v48, %v790_v25  ;;  %v930_v62 = vpop.f32.mrf.mxu1 }
 0x139   : > { %v7587_v19 = vadd.f32 %v1272_v56, %v1181_v53  ;;  %v1124_v33 = vpop.f32.mrf.mxu2 }
 0x13a   : > { %v1184_v16 = vadd.f32 %v1124_v33, %v929_v36  ;;  %6673 = vmatmul.msk.bf16.gmra.mxu0 %vm672_vm1, %v1369_v37  ;;  %v2027_v36 = vrot.slane %v7225_v41, 2  ;;  %v2030_v37 = vrot.slane %v7244_v49, 2  ;;  %v2031_v33 = vrot.slane %v7228_v42, 3 }
 0x13d   : > { %6670 = vmatmul.msk.bf16.gmra.mxu3 %vm672_vm1, %v1211_v30  ;;  %v1372_v30 = vor.u32 %v1371_v1, %v1370_v61  ;;  %v1646_v61 = vrot.slane %v7258_v55, 2  ;;  %v1374_v1 = vrot.slane %v7294_v7, 1 }
 0x13f   : > { %v792_v11 = vpop.f32.mrf.mxu0 }
 0x140   : > { %v1275_v38 = vpop.f32.mrf.mxu3  ;;  %v931_v25 = vadd.f32 %v930_v62, %v792_v11  ;;  %v933_v48 = vpop.f32.mrf.mxu1  ;;  %v2029_v62 = vor.u32 %v2028_v10, %v2027_v36 }
 0x141   : > { %v7595_v53 = vadd.f32 %v1275_v38, %v1182_v0  ;;  %v1126_v56 = vpop.f32.mrf.mxu2  ;;  %v2032_v0 = vor.u32 %v2031_v33, %v2030_v37  ;;  %v1373_v38 = vsel %vm1358_vm4, %v1368_v39, %v1372_v30  ;;  %v1375_v39 = vrot.slane %v7266_v58, 2 }
 0x142   : > { %v1185_v23 = vadd.f32 %v1126_v56, %v931_v25 }
 0x143   : > { %6692 = vmatmul.msk.bf16.gmra.mxu1 %vm672_vm1, %v1643_v20  ;;  %v2033_v12 = vsel %vm2026_vm6, %v2029_v62, %v2032_v0  ;;  %v2035_v62 = vrot.slane %v7247_v50, 3  ;;  %v1376_v55 = vor.u32 %v1375_v39, %v1374_v1  ;;  %v1378_v1 = vrot.slane %v7313_v21, 1 }
 0x146   : > { %6711 = vmatmul.msk.bf16.gmra.mxu2 %vm672_vm1, %v1645_v47 }
 0x147   : > { %v795_v11 = vpop.f32.mrf.mxu0 }
 0x148   : > { %v1277_v41 = vpop.f32.mrf.mxu3  ;;  %v934_v25 = vadd.f32 %v933_v48, %v795_v11  ;;  %v935_v34 = vpop.f32.mrf.mxu1  ;;  %v2034_v11 = vrot.slane %v7263_v57, 2 }
 0x149   : > { %v7605_v56 = vadd.f32 %v1277_v41, %v1183_v6  ;;  %v1129_v49 = vpop.f32.mrf.mxu2 }
 0x14a   : > { %v1186_v42 = vadd.f32 %v1129_v49, %v934_v25  ;;  %6674 = vmatmul.msk.bf16.gmra.mxu0 %vm672_vm1, %v1373_v38  ;;  %v1647_v38 = vsel %vm1638_vm5, %v1644_v31, %v1646_v61  ;;  %v2036_v41 = vor.u32 %v2035_v62, %v2034_v11  ;;  %v2038_v62 = vrot.slane %v7294_v7, 2 }
 0x14c   : > { %v2037_v50 = vsel %vm2026_vm6, %v2032_v0, %v2036_v41  ;;  %v2039_v0 = vrot.slane %v7266_v58, 3 }
 0x14d   : > { %6729 = vmatmul.msk.bf16.vlgmr.msra.gmra.mxu3 %vm672_vm1, %v2033_v12 }
 0x14f   : > { %v797_v20 = vpop.f32.mrf.mxu0 }
 0x150   : > { %v1280_v36 = vpop.f32.mrf.mxu3  ;;  %v936_v48 = vadd.f32 %v935_v34, %v797_v20  ;;  %v938_v10 = vpop.f32.mrf.mxu1  ;;  %v1377_v34 = vsel %vm1358_vm4, %v1372_v30, %v1376_v55  ;;  %v1379_v30 = vrot.slane %v7297_v8, 2 }
 0x151   : > { %v7613_v6 = vadd.f32 %v1280_v36, %v1184_v16  ;;  %v1131_v37 = vpop.f32.mrf.mxu2 }
 0x152   : > { %v1187_v33 = vadd.f32 %v1131_v37, %v936_v48 }
 0x153   : > { %6693 = vmatmul.msk.bf16.gmra.mxu1 %vm672_vm1, %v1645_v47  ;;  %v1648_v47 = vrot.slane %v7289_v5, 2  ;;  %v1380_v5 = vor.u32 %v1379_v30, %v1378_v1  ;;  %v1382_v1 = vrot.slane %v7332_v32, 1 }
 0x156   : > { %6712 = vmatmul.msk.bf16.gmra.mxu2 %vm672_vm1, %v1647_v38 }
 0x157   : > { %v800_v25 = vpop.f32.mrf.mxu0 }
 0x158   : > { %v1282_v49 = vpop.f32.mrf.mxu3  ;;  %v939_v16 = vadd.f32 %v938_v10, %v800_v25  ;;  %v940_v12 = vpop.f32.mrf.mxu1  ;;  %v1649_v25 = vsel %vm1638_vm5, %v1646_v61, %v1648_v47 }
 0x159   : > { %v7621_v20 = vadd.f32 %v1282_v49, %v1185_v23  ;;  %v1134_v36 = vpop.f32.mrf.mxu2 }
 0x15a   : > { %v1188_v57 = vadd.f32 %v1134_v36, %v939_v16  ;;  %6675 = vmatmul.msk.bf16.gmra.mxu0 %vm672_vm1, %v1377_v34  ;;  %v2040_v34 = vor.u32 %v2039_v0, %v2038_v62  ;;  %v1381_v16 = vsel %vm1358_vm4, %v1376_v55, %v1380_v5  ;;  %v1383_v55 = vrot.slane %v7316_v22, 2 }
 0x15b   : > { %v2042_v62 = vrot.slane %v7313_v21, 2  ;;  %v6777_v21 = vld [vmem:[%s10348_s4 + $0x4] sm:$0x3] }
 0x15c   : > { %v2041_v58 = vsel %vm2026_vm6, %v2036_v41, %v2040_v34  ;;  %v2043_v41 = vrot.slane %v7297_v8, 3  ;;  %v2915_v8 = vld [vmem:[%s10348_s4] sm:$0x3] }
 0x15d   : > { %6730 = vmatmul.msk.bf16.gmra.mxu3 %vm672_vm1, %v2037_v50 }
 0x15f   : > { %v802_v31 = vpop.f32.mrf.mxu0 }
 0x160   : > { %v1285_v39 = vpop.f32.mrf.mxu3  ;;  %v941_v48 = vadd.f32 %v940_v12, %v802_v31  ;;  %v943_v10 = vpop.f32.mrf.mxu1 }
 0x161   : > { %v7629_v23 = vadd.f32 %v1285_v39, %v1186_v42  ;;  %v1136_v37 = vpop.f32.mrf.mxu2 }
 0x162   : > { %v1189_v11 = vadd.f32 %v1136_v37, %v941_v48 }
 0x163   : > { %6694 = vmatmul.msk.bf16.gmra.mxu1 %vm672_vm1, %v1647_v38  ;;  %v1650_v38 = vrot.slane %v7308_v17, 2  ;;  %v1384_v17 = vor.u32 %v1383_v55, %v1382_v1 }
 0x165   : > { %v1651_v0 = vsel %vm1638_vm5, %v1648_v47, %v1650_v38 }
 0x166   : > { %6713 = vmatmul.msk.bf16.gmra.mxu2 %vm672_vm1, %v1649_v25 }
 0x167   : > { %v805_v49 = vpop.f32.mrf.mxu0 }
 0x168   : > { %v1287_v12 = vpop.f32.mrf.mxu3  ;;  %v944_v42 = vadd.f32 %v943_v10, %v805_v49  ;;  %v945_v36 = vpop.f32.mrf.mxu1  ;;  %v2044_v49 = vor.u32 %v2043_v41, %v2042_v62 }
 0x169   : > { %v7637_v50 = vadd.f32 %v1287_v12, %v1187_v33  ;;  %v1139_v31 = vpop.f32.mrf.mxu2  ;;  %v1385_v12 = vsel %vm1358_vm4, %v1380_v5, %v1384_v17  ;;  %v3053_v5 = vsel %vm727_vm0, %v2915_v8, 0 }
 0x16a   : > { %v1190_v7 = vadd.f32 %v1139_v31, %v944_v42  ;;  %6676 = vmatmul.msk.bf16.gmra.mxu0 %vm672_vm1, %v1381_v16  ;;  %3062 = vmatpush.bf16.msra.mxu2 %v3053_v5 }
 0x16d   : > { %6731 = vmatmul.msk.bf16.gmra.mxu3 %vm672_vm1, %v2041_v58 }
 0x16f   : > { %v807_v61 = vpop.f32.mrf.mxu0 }
 0x170   : > { %v1290_v30 = vpop.f32.mrf.mxu3  ;;  %v946_v39 = vadd.f32 %v945_v36, %v807_v61  ;;  %v948_v48 = vpop.f32.mrf.mxu1  ;;  %v3118_v61 = vsel %vm727_vm0, %v6777_v21, 0 }
 0x171   : > { %v7645_v33 = vadd.f32 %v1290_v30, %v1188_v57  ;;  %v1141_v10 = vpop.f32.mrf.mxu2  ;;  %3127 = vmatpush.bf16.msrb.mxu3 %v3118_v61  ;;  %v1652_v30 = vrot.slane %v7327_v29, 2 }
 0x172   : > { %v1191_v37 = vadd.f32 %v1141_v10, %v946_v39  ;;  %v1387_v39 = vrot.slane %v7335_v35, 2 }
 0x173   : > { %6695 = vmatmul.msk.bf16.gmra.mxu1 %vm672_vm1, %v1649_v25  ;;  %v2045_v25 = vsel %vm2026_vm6, %v2040_v34, %v2044_v49  ;;  %v1386_v34 = vrot.slane %v7351_v45, 1 }
 0x175   : > { %v1388_v29 = vor.u32 %v1387_v39, %v1386_v34 }
 0x176   : > { %6714 = vmatmul.msk.bf16.gmra.mxu2 %vm672_vm1, %v1651_v0 }
 0x177   : > { %v810_v16 = vpop.f32.mrf.mxu0 }
 0x178   : > { %v1292_v42 = vpop.f32.mrf.mxu3  ;;  %v949_v57 = vadd.f32 %v948_v48, %v810_v16  ;;  %v950_v36 = vpop.f32.mrf.mxu1 }
 0x179   : > { %v7653_v31 = vadd.f32 %v1292_v42, %v1189_v11  ;;  %v1144_v58 = vpop.f32.mrf.mxu2  ;;  %v6766_v11 = vld [vmem:[%s10348_s4 + $0x2] sm:$0x3]  ;;  %v2046_v42 = vrot.slane %v7332_v32, 2 }
 0x17a   : > { %v1192_v47 = vadd.f32 %v1144_v58, %v949_v57  ;;  %6677 = vmatmul.msk.bf16.gmra.mxu0 %vm672_vm1, %v1385_v12  ;;  %v3006_v1 = vsel %vm727_vm0, %v6766_v11, 0  ;;  %v2047_v57 = vrot.slane %v7316_v22, 3  ;;  %v1653_v58 = vsel %vm1638_vm5, %v1650_v38, %v1652_v30 }
 0x17b   : > { %3015 = vmatpush.bf16.msra.mxu1 %v3006_v1  ;;  %v1390_v1 = vrot.slane %v7370_v2, 1 }
 0x17c   : > { %v2048_v8 = vor.u32 %v2047_v57, %v2046_v42 }
 0x17d   : > { %6732 = vmatmul.msk.bf16.gmra.mxu3 %vm672_vm1, %v2045_v25 }
 0x17e   : > { %v2049_v22 = vsel %vm2026_vm6, %v2044_v49, %v2048_v8  ;;  %v2051_v49 = vrot.slane %v7335_v35, 3 }
 0x17f   : > { %v812_v55 = vpop.f32.mrf.mxu0 }
 0x180   : > { %v1295_v48 = vpop.f32.mrf.mxu3  ;;  %v951_v10 = vadd.f32 %v950_v36, %v812_v55  ;;  %v953_v62 = vpop.f32.mrf.mxu1  ;;  %v1389_v36 = vsel %vm1358_vm4, %v1384_v17, %v1388_v29  ;;  %v1391_v17 = vrot.slane %v7354_v46, 2 }
 0x181   : > { %v7673_v41 = vadd.f32 %v1295_v48, %v1190_v7  ;;  %v1146_v16 = vpop.f32.mrf.mxu2 }
 0x182   : > { %v1193_v12 = vadd.f32 %v1146_v16, %v951_v10 }
 0x183   : > { %6696 = vmatmul.msk.bf16.gmra.mxu1 %vm672_vm1, %v1651_v0  ;;  %v1654_v0 = vrot.slane %v7346_v43, 2  ;;  %v1392_v43 = vor.u32 %v1391_v17, %v1390_v1 }
 0x185   : > { %v1655_v16 = vsel %vm1638_vm5, %v1652_v30, %v1654_v0 }
 0x186   : > { %6715 = vmatmul.msk.bf16.gmra.mxu2 %vm672_vm1, %v1653_v58 }
 0x187   : > { %v815_v21 = vpop.f32.mrf.mxu0 }
 0x188   : > { %v1297_v25 = vpop.f32.mrf.mxu3  ;;  %v954_v7 = vadd.f32 %v953_v62, %v815_v21  ;;  %v955_v5 = vpop.f32.mrf.mxu1  ;;  %v2050_v62 = vrot.slane %v7351_v45, 2  ;;  %v1393_v21 = vsel %vm1358_vm4, %v1388_v29, %v1392_v43  ;;  %v1395_v29 = vrot.slane %v7373_v3, 2 }
 0x189   : > { %v7681_v61 = vadd.f32 %v1297_v25, %v1191_v37  ;;  %v1149_v11 = vpop.f32.mrf.mxu2 }
 0x18a   : > { %v1194_v32 = vadd.f32 %v1149_v11, %v954_v7  ;;  %6678 = vmatmul.msk.bf16.gmra.mxu0 %vm672_vm1, %v1389_v36  ;;  %v2052_v42 = vor.u32 %v2051_v49, %v2050_v62  ;;  %v1394_v11 = vrot.slane %v7393_v51, 1 }
 0x18c   : > { %v2053_v35 = vsel %vm2026_vm6, %v2048_v8, %v2052_v42  ;;  %v2055_v8 = vrot.slane %v7354_v46, 3 }
 0x18d   : > { %6733 = vmatmul.msk.bf16.gmra.mxu3 %vm672_vm1, %v2049_v22 }
 0x18f   : > { %v817_v38 = vpop.f32.mrf.mxu0 }
 0x190   : > { %v1300_v55 = vpop.f32.mrf.mxu3  ;;  %v956_v34 = vadd.f32 %v955_v5, %v817_v38  ;;  %v958_v39 = vpop.f32.mrf.mxu1 }
 0x191   : > { %v7689_v37 = vadd.f32 %v1300_v55, %v1192_v47  ;;  %v1151_v48 = vpop.f32.mrf.mxu2 }
 0x192   : > { %v1195_v10 = vadd.f32 %v1151_v48, %v956_v34  ;;  %v2054_v34 = vrot.slane %v7370_v2, 2 }
 0x193   : > { %6697 = vmatmul.msk.bf16.gmra.mxu1 %vm672_vm1, %v1653_v58  ;;  %v1656_v58 = vrot.slane %v7365_v63, 2  ;;  %v1396_v63 = vor.u32 %v1395_v29, %v1394_v11 }
 0x194   : > { %v2056_v48 = vor.u32 %v2055_v8, %v2054_v34  ;;  %v10459_v34 = vld [vmem:[#allocation6_spill] sm:$0xff] }
 0x195   : > { %v1397_v49 = vsel %vm1358_vm4, %v1392_v43, %v1396_v63  ;;  %v1398_v43 = vrot.slane %v7416_v44, 1 }
 0x196   : > { %6716 = vmatmul.msk.bf16.gmra.mxu2 %vm672_vm1, %v1655_v16 }
 0x197   : > { %v820_v57 = vpop.f32.mrf.mxu0 }
 0x198   : > { %v1302_v36 = vpop.f32.mrf.mxu3  ;;  %v959_v47 = vadd.f32 %v958_v39, %v820_v57  ;;  %v960_v25 = vpop.f32.mrf.mxu1  ;;  %v1657_v39 = vsel %vm1638_vm5, %v1654_v0, %v1656_v58  ;;  %v2057_v0 = vsel %vm2026_vm6, %v2052_v42, %v2056_v48 }
 0x199   : > { %v7697_v7 = vadd.f32 %v1302_v36, %v1193_v12  ;;  %v1154_v5 = vpop.f32.mrf.mxu2 }
 0x19a   : > { %v1196_v45 = vadd.f32 %v1154_v5, %v959_v47  ;;  %6679 = vmatmul.msk.bf16.gmra.mxu0 %vm672_vm1, %v1393_v21 }
 0x19d   : > { %6734 = vmatmul.msk.bf16.gmra.mxu3 %vm672_vm1, %v2053_v35 }
 0x19f   : > { %v822_v30 = vpop.f32.mrf.mxu0 }
 0x1a0   : > { %v1305_v22 = vpop.f32.mrf.mxu3  ;;  %v961_v38 = vadd.f32 %v960_v25, %v822_v30  ;;  %v963_v1 = vpop.f32.mrf.mxu1  ;;  %v1658_v25 = vrot.slane %v7388_v40, 2 }
 0x1a1   : > { %v7705_v12 = vadd.f32 %v1305_v22, %v1194_v32  ;;  %v1156_v17 = vpop.f32.mrf.mxu2  ;;  %v964_v32 = vadd.f32 %v963_v1, %v7375_v4  ;;  %v1399_v4 = vrot.slane %v7396_v52, 2  ;;  %v2058_v22 = vrot.slane %v7393_v51, 2 }
 0x1a2   : > { %v1197_v55 = vadd.f32 %v1156_v17, %v961_v38  ;;  %v2059_v38 = vrot.slane %v7373_v3, 3  ;;  %v1659_v40 = vsel %vm1638_vm5, %v1656_v58, %v1658_v25 }
 0x1a3   : > { %6698 = vmatmul.msk.bf16.gmra.mxu1 %vm672_vm1, %v1655_v16  ;;  %v1400_v1 = vor.u32 %v1399_v4, %v1398_v43  ;;  %v10463_v43 = vld [vmem:[#allocation7_spill] sm:$0xff] }
 0x1a6   : > { %6717 = vmatmul.msk.bf16.gmra.mxu2 %vm672_vm1, %v1657_v39 }
 0x1a7   : > { %v1510_v62 = vpop.f32.mrf.mxu0 }
 0x1a8   : > { %v1307_v57 = vpop.f32.mrf.mxu3  ;;  %v1600_v21 = vadd.f32 %v1510_v62, %v7398_v59  ;;  %v965_v36 = vpop.f32.mrf.mxu1 }
 0x1a9   : > { %v7715_v2 = vadd.f32 %v1307_v57, %v1195_v10  ;;  %v1159_v46 = vpop.f32.mrf.mxu2  ;;  %v966_v59 = vadd.f32 %v965_v36, %v7384_v28  ;;  %v2060_v28 = vor.u32 %v2059_v38, %v2058_v22  ;;  %v10460_v57 = vld [vmem:[#allocation4_spill] sm:$0xff]  ;;  %v10461_v36 = vld [vmem:[#allocation9_spill] sm:$0xff] }
 0x1aa   : > { %v1198_v47 = vadd.f32 %v1159_v46, %v964_v32  ;;  %6680 = vmatmul.msk.bf16.gmra.mxu0 %vm672_vm1, %v1397_v49  ;;  %v10462_v46 = vld [vmem:[#allocation5_spill] sm:$0xff] }
 0x1ab   : > { %v2061_v58 = vsel %vm2026_vm6, %v2056_v48, %v2060_v28  ;;  %v2062_v48 = vrot.slane %v7416_v44, 2 }
 0x1ad   : > { %6735 = vmatmul.msk.bf16.gmra.mxu3 %vm672_vm1, %v2057_v0  ;;  %v1403_v0 = vrot.slane %v10462_v46, 2 }
 0x1af   : > { %v1512_v16 = vpop.f32.mrf.mxu0 }
 0x1b0   : > { %v1310_v5 = vpop.f32.mrf.mxu3  ;;  %v1601_v10 = vadd.f32 %v1512_v16, %v7407_v27  ;;  %v1742_v35 = vpop.f32.mrf.mxu1  ;;  %v1401_v27 = vsel %vm1358_vm4, %v1396_v63, %v1400_v1  ;;  %v1402_v63 = vrot.slane %v10461_v36, 1 }
 0x1b1   : > { %v7725_v30 = vadd.f32 %v1310_v5, %v1196_v45  ;;  %v1832_v11 = vadd.f32 %v1742_v35, %v1600_v21  ;;  %v1161_v29 = vpop.f32.mrf.mxu2  ;;  %v1660_v21 = vrot.slane %v10460_v57, 2  ;;  %v10467_v57 = vld [vmem:[#allocation10_spill] sm:$0xff] }
 0x1b2   : > { %v1199_v42 = vadd.f32 %v1161_v29, %v966_v59  ;;  %v1404_v22 = vor.u32 %v1403_v0, %v1402_v63  ;;  %v1407_v63 = vrot.slane %v10467_v57, 2 }
 0x1b3   : > { %6699 = vmatmul.msk.bf16.gmra.mxu1 %vm672_vm1, %v1657_v39  ;;  %v1661_v29 = vsel %vm1638_vm5, %v1658_v25, %v1660_v21 }
 0x1b6   : > { %6718 = vmatmul.msk.bf16.gmra.mxu2 %vm672_vm1, %v1659_v40 }
 0x1b7   : > { %v1515_v17 = vpop.f32.mrf.mxu0 }
 0x1b8   : > { %v1312_v45 = vpop.f32.mrf.mxu3  ;;  %v1602_v8 = vadd.f32 %v1515_v17, %v10459_v34  ;;  %v1744_v62 = vpop.f32.mrf.mxu1 }
 0x1b9   : > { %v7734_v49 = vadd.f32 %v1312_v45, %v1197_v55  ;;  %v1833_v51 = vadd.f32 %v1744_v62, %v1601_v10  ;;  %v1898_v32 = vpop.f32.mrf.mxu2  ;;  %v10464_v45 = vld [vmem:[#allocation11_spill] sm:$0xff] }
 0x1ba   : > { %v1988_v3 = vadd.f32 %v1898_v32, %v1832_v11  ;;  %6681 = vmatmul.msk.bf16.gmra.mxu0 %vm672_vm1, %v1401_v27  ;;  %v2063_v11 = vrot.slane %v7396_v52, 3  ;;  %v1405_v27 = vsel %vm1358_vm4, %v1400_v1, %v1404_v22  ;;  %v10465_v32 = vld [vmem:[#allocation8_spill] sm:$0xff] }
 0x1bc   : > { %v2064_v38 = vor.u32 %v2063_v11, %v2062_v48  ;;  %v2067_v48 = vrot.slane %v10462_v46, 3 }
 0x1bd   : > { %6736 = vmatmul.msk.bf16.gmra.mxu3 %vm672_vm1, %v2061_v58  ;;  %v1662_v58 = vrot.slane %v10465_v32, 2 }
 0x1be   : > { %v2065_v25 = vsel %vm2026_vm6, %v2060_v28, %v2064_v38  ;;  %v2066_v28 = vrot.slane %v10461_v36, 2 }
 0x1bf   : > { %v1517_v39 = vpop.f32.mrf.mxu0  ;;  %v1663_v11 = vsel %vm1638_vm5, %v1660_v21, %v1662_v58 }
 0x1c0   : > { %v1315_v16 = vpop.f32.mrf.mxu3  ;;  %v1603_v55 = vadd.f32 %v1517_v39, %v10463_v43  ;;  %v1747_v4 = vpop.f32.mrf.mxu1  ;;  %v10466_v39 = vld [vmem:[#allocation14_spill] sm:$0xff] }
 0x1c1   : > { %v7743_v59 = vadd.f32 %v1315_v16, %v1198_v47  ;;  %v1834_v5 = vadd.f32 %v1747_v4, %v1602_v8  ;;  %v1900_v10 = vpop.f32.mrf.mxu2  ;;  %v1406_v1 = vrot.slane %v10466_v39, 1  ;;  %v10468_v16 = vld [vmem:[#allocation12_spill] sm:$0xff] }
 0x1c2   : > { %v1989_v35 = vadd.f32 %v1900_v10, %v1833_v51 }
 0x1c3   : > { %6700 = vmatmul.msk.bf16.gmra.mxu1 %vm672_vm1, %v1659_v40 }
 0x1c6   : > { %6719 = vmatmul.msk.bf16.gmra.mxu2 %vm672_vm1, %v1661_v29 }
 0x1c7   : > { %v1520_v17 = vpop.f32.mrf.mxu0 }
 0x1c8   : > { %v1317_v47 = vpop.f32.mrf.mxu3  ;;  %v1604_v34 = vadd.f32 %v1520_v17, %v10464_v45  ;;  %v1749_v8 = vpop.f32.mrf.mxu1  ;;  %v1408_v17 = vor.u32 %v1407_v63, %v1406_v1  ;;  %v10471_v1 = vld [vmem:[#allocation19_spill] sm:$0xff] }
 0x1c9   : > { %v7752_v62 = vadd.f32 %v1317_v47, %v1199_v42  ;;  %v1835_v44 = vadd.f32 %v1749_v8, %v1603_v55  ;;  %v1903_v51 = vpop.f32.mrf.mxu2  ;;  %v10469_v8 = vld [vmem:[#allocation16_spill] sm:$0xff]  ;;  %v10472_v63 = vld [vmem:[#allocation15_spill] sm:$0xff] }
 0x1ca   : > { %v1990_v52 = vadd.f32 %v1903_v51, %v1834_v5  ;;  %6682 = vmatmul.msk.bf16.gmra.mxu0 %vm672_vm1, %v1405_v27  ;;  %v2068_v27 = vor.u32 %v2067_v48, %v2066_v28  ;;  %v1409_v45 = vsel %vm1358_vm4, %v1404_v22, %v1408_v17  ;;  %v1410_v22 = vrot.slane %v10471_v1, 1 }
 0x1cc   : > { %v2069_v21 = vsel %vm2026_vm6, %v2064_v38, %v2068_v27  ;;  %v2070_v38 = vrot.slane %v10466_v39, 2 }
 0x1cd   : > { %6737 = vmatmul.msk.bf16.gmra.mxu3 %vm672_vm1, %v2065_v25 }
 0x1cf   : > { %v1522_v40 = vpop.f32.mrf.mxu0 }
 0x1d0   : > { %v2178_v0 = vpop.f32.mrf.mxu3  ;;  %v1605_v42 = vadd.f32 %v1522_v40, %v10468_v16  ;;  %v1752_v43 = vpop.f32.mrf.mxu1  ;;  %v10470_v40 = vld [vmem:[#allocation13_spill] sm:$0xff] }
 0x1d1   : > { %v7761_v55 = vadd.f32 %v2178_v0, %v1988_v3  ;;  %v1836_v4 = vadd.f32 %v1752_v43, %v1604_v34  ;;  %v1905_v5 = vpop.f32.mrf.mxu2  ;;  %v1664_v32 = vrot.slane %v10470_v40, 2  ;;  %v1411_v0 = vrot.slane %v10472_v63, 2  ;;  %v10473_v43 = vld [vmem:[#allocation17_spill] sm:$0xff] }
 0x1d2   : > { %v1991_v10 = vadd.f32 %v1905_v5, %v1835_v44 }
 0x1d3   : > { %6701 = vmatmul.msk.bf16.gmra.mxu1 %vm672_vm1, %v1661_v29 }
 0x1d6   : > { %6720 = vmatmul.msk.bf16.gmra.mxu2 %vm672_vm1, %v1663_v11 }
 0x1d7   : > { %v1525_v47 = vpop.f32.mrf.mxu0 }
 0x1d8   : > { %v2180_v3 = vpop.f32.mrf.mxu3  ;;  %v1606_v34 = vadd.f32 %v1525_v47, %v10469_v8  ;;  %v1754_v51 = vpop.f32.mrf.mxu1  ;;  %v2071_v47 = vrot.slane %v10467_v57, 3 }
 0x1d9   : > { %v7770_v44 = vadd.f32 %v2180_v3, %v1989_v35  ;;  %v1837_v36 = vadd.f32 %v1754_v51, %v1605_v42  ;;  %v1908_v25 = vpop.f32.mrf.mxu2  ;;  %v1412_v3 = vor.u32 %v1411_v0, %v1410_v22  ;;  %v10475_v22 = vld [vmem:[#allocation18_spill] sm:$0xff] }
 0x1da   : > { %v1992_v46 = vadd.f32 %v1908_v25, %v1836_v4  ;;  %6683 = vmatmul.msk.bf16.gmra.mxu0 %vm672_vm1, %v1409_v45  ;;  %v1665_v45 = vsel %vm1638_vm5, %v1662_v58, %v1664_v32  ;;  %v2072_v8 = vor.u32 %v2071_v47, %v2070_v38  ;;  %v1666_v0 = vrot.slane %v10475_v22, 2  ;;  %v10478_v38 = vld [vmem:[#allocation22_spill] sm:$0xff]  ;;  %v10479_v22 = vld [vmem:[#allocation25_spill] sm:$0xff] }
 0x1db   : > { %v1413_v25 = vsel %vm1358_vm4, %v1408_v17, %v1412_v3 }
 0x1dc   : > { %v2073_v58 = vsel %vm2026_vm6, %v2068_v27, %v2072_v8  ;;  %v2074_v27 = vrot.slane %v10471_v1, 2 }
 0x1dd   : > { %6738 = vmatmul.msk.bf16.gmra.mxu3 %vm672_vm1, %v2069_v21  ;;  %v10474_v21 = vld [vmem:[#allocation21_spill] sm:$0xff] }
 0x1df   : > { %v1527_v29 = vpop.f32.mrf.mxu0 }
 0x1e0   : > { %v2183_v16 = vpop.f32.mrf.mxu3  ;;  %v1607_v35 = vadd.f32 %v1527_v29, %v10473_v43  ;;  %v1757_v5 = vpop.f32.mrf.mxu1  ;;  %v10477_v43 = vld [vmem:[#allocation20_spill] sm:$0xff] }
 0x1e1   : > { %v7779_v42 = vadd.f32 %v2183_v16, %v1990_v52  ;;  %v1838_v4 = vadd.f32 %v1757_v5, %v1606_v34  ;;  %v1910_v28 = vpop.f32.mrf.mxu2  ;;  %v10476_v16 = vld [vmem:[#allocation23_spill] sm:$0xff]  ;;  %v1415_v5 = vrot.slane %v10477_v43, 2 }
 0x1e2   : > { %v1993_v48 = vadd.f32 %v1910_v28, %v1837_v36  ;;  %v1414_v17 = vrot.slane %v10476_v16, 1 }
 0x1e3   : > { %6702 = vmatmul.msk.bf16.gmra.mxu1 %vm672_vm1, %v1663_v11 }
 0x1e6   : > { %6721 = vmatmul.msk.bf16.gmra.mxu2 %vm672_vm1, %v1665_v45 }
 0x1e7   : > { %v1530_v51 = vpop.f32.mrf.mxu0 }
 0x1e8   : > { %v2185_v52 = vpop.f32.mrf.mxu3  ;;  %v1608_v34 = vadd.f32 %v1530_v51, %v10474_v21  ;;  %v1759_v29 = vpop.f32.mrf.mxu1  ;;  %v1667_v21 = vsel %vm1638_vm5, %v1664_v32, %v1666_v0 }
 0x1e9   : > { %v7788_v36 = vadd.f32 %v2185_v52, %v1991_v10  ;;  %v1839_v39 = vadd.f32 %v1759_v29, %v1607_v35  ;;  %v1913_v40 = vpop.f32.mrf.mxu2  ;;  %v2075_v52 = vrot.slane %v10472_v63, 3  ;;  %v1416_v29 = vor.u32 %v1415_v5, %v1414_v17  ;;  %v10480_v5 = vld [vmem:[#allocation24_spill] sm:$0xff] }
 0x1ea   : > { %v1994_v57 = vadd.f32 %v1913_v40, %v1838_v4  ;;  %6684 = vmatmul.msk.bf16.gmra.mxu0 %vm672_vm1, %v1413_v25  ;;  %v1668_v17 = vrot.slane %v7503_v54, 2 }
 0x1eb   : > { %v2076_v40 = vor.u32 %v2075_v52, %v2074_v27 }
 0x1ec   : > { %v1669_v54 = vsel %vm1638_vm5, %v1666_v0, %v1668_v17 }
 0x1ed   : > { %6739 = vmatmul.msk.bf16.gmra.mxu3 %vm672_vm1, %v2073_v58  ;;  %v2077_v32 = vsel %vm2026_vm6, %v2072_v8, %v2076_v40  ;;  %v2078_v8 = vrot.slane %v10476_v16, 2 }
 0x1ef   : > { %v1532_v11 = vpop.f32.mrf.mxu0 }
 0x1f0   : > { %v2188_v28 = vpop.f32.mrf.mxu3  ;;  %v1609_v10 = vadd.f32 %v1532_v11, %v10478_v38  ;;  %v1762_v47 = vpop.f32.mrf.mxu1  ;;  %v1417_v11 = vsel %vm1358_vm4, %v1412_v3, %v1416_v29  ;;  %v1418_v3 = vrot.slane %v7536_v24, 1 }
 0x1f1   : > { %v7797_v35 = vadd.f32 %v2188_v28, %v1992_v46  ;;  %v1840_v4 = vadd.f32 %v1762_v47, %v1608_v34  ;;  %v1915_v51 = vpop.f32.mrf.mxu2  ;;  %v1419_v47 = vrot.slane %v10480_v5, 2 }
 0x1f2   : > { %v1995_v25 = vadd.f32 %v1915_v51, %v1839_v39 }
 0x1f3   : > { %6703 = vmatmul.msk.bf16.gmra.mxu1 %vm672_vm1, %v1665_v45 }
 0x1f6   : > { %6722 = vmatmul.msk.bf16.gmra.mxu2 %vm672_vm1, %v1667_v21 }
 0x1f7   : > { %v1535_v58 = vpop.f32.mrf.mxu0 }
 0x1f8   : > { %v2190_v46 = vpop.f32.mrf.mxu3  ;;  %v1610_v34 = vadd.f32 %v1535_v58, %v10479_v22  ;;  %v1764_v28 = vpop.f32.mrf.mxu1 }
 0x1f9   : > { %v7806_v39 = vadd.f32 %v2190_v46, %v1993_v48  ;;  %v1841_v1 = vadd.f32 %v1764_v28, %v1609_v10  ;;  %v1918_v38 = vpop.f32.mrf.mxu2  ;;  %v1420_v46 = vor.u32 %v1419_v47, %v1418_v3  ;;  %v10481_v47 = vld [vmem:[#allocation3_spill] sm:$0xff] }
 0x1fa   : > { %v1996_v63 = vadd.f32 %v1918_v38, %v1840_v4  ;;  %6685 = vmatmul.msk.bf16.gmra.mxu0 %vm672_vm1, %v1417_v11  ;;  %v2079_v11 = vrot.slane %v10477_v43, 3 }
 0x1fc   : > { %v2080_v22 = vor.u32 %v2079_v11, %v2078_v8 }
 0x1fd   : > { %6740 = vmatmul.msk.bf16.gmra.mxu3 %vm672_vm1, %v2077_v32 }
 0x1fe   : > { %v2081_v0 = vsel %vm2026_vm6, %v2076_v40, %v2080_v22  ;;  %v2082_v40 = vrot.slane %v7536_v24, 2 }
 0x1ff   : > { %v1537_v45 = vpop.f32.mrf.mxu0 }
 0x200   : > { %v2193_v51 = vpop.f32.mrf.mxu3  ;;  %v1611_v48 = vadd.f32 %v1537_v45, %v7530_v13  ;;  %v1767_v27 = vpop.f32.mrf.mxu1  ;;  %v7001_v45 = vld [vmem:[%s7165_s20 + $0x88] sm:$0xff] }
 0x201   : > { %v7815_v10 = vadd.f32 %v2193_v51, %v1994_v57  ;;  %v1842_v4 = vadd.f32 %v1767_v27, %v1610_v34  ;;  %v1920_v52 = vpop.f32.mrf.mxu2  ;;  %v1421_v57 = vsel %vm1358_vm4, %v1416_v29, %v1420_v46  ;;  %v1670_v3 = vrot.slane %v7001_v45, 2  ;;  %v10482_v51 = vld [vmem:[#allocation2_spill] sm:$0xff] }
 0x202   : > { %v1997_v58 = vadd.f32 %v1920_v52, %v1841_v1  ;;  %v1422_v29 = vrot.slane %v10481_v47, 1  ;;  %v1423_v27 = vrot.slane %v10482_v51, 2 }
 0x203   : > { %6704 = vmatmul.msk.bf16.gmra.mxu1 %vm672_vm1, %v1667_v21 }
 0x206   : > { %6723 = vmatmul.msk.bf16.gmra.mxu2 %vm672_vm1, %v1669_v54 }
 0x207   : > { %v1540_v13 = vpop.f32.mrf.mxu0 }
 0x208   : > { %v2195_v28 = vpop.f32.mrf.mxu3  ;;  %v1612_v34 = vadd.f32 %v1540_v13, %v7538_v15  ;;  %v1769_v1 = vpop.f32.mrf.mxu1  ;;  %v2083_v13 = vrot.slane %v10480_v5, 3 }
 0x209   : > { %v7824_v38 = vadd.f32 %v2195_v28, %v1995_v25  ;;  %v1843_v16 = vadd.f32 %v1769_v1, %v1611_v48  ;;  %v1923_v43 = vpop.f32.mrf.mxu2  ;;  %v1424_v28 = vor.u32 %v1423_v27, %v1422_v29 }
 0x20a   : > { %v1998_v32 = vadd.f32 %v1923_v43, %v1842_v4  ;;  %6686 = vmatmul.msk.bf16.gmra.mxu0 %vm672_vm1, %v1421_v57  ;;  %v1671_v57 = vsel %vm1638_vm5, %v1668_v17, %v1670_v3  ;;  %v2084_v1 = vor.u32 %v2083_v13, %v2082_v40 }
 0x20c   : > { %v2085_v17 = vsel %vm2026_vm6, %v2080_v22, %v2084_v1  ;;  %v2086_v22 = vrot.slane %v10481_v47, 2 }
 0x20d   : > { %6741 = vmatmul.msk.bf16.gmra.mxu3 %vm672_vm1, %v2081_v0 }
 0x20f   : > { %v1542_v21 = vpop.f32.mrf.mxu0 }
 0x210   : > { %v2198_v15 = vpop.f32.mrf.mxu3  ;;  %v1613_v25 = vadd.f32 %v1542_v21, %v7548_v14  ;;  %v1772_v52 = vpop.f32.mrf.mxu1 }
 0x211   : > { %v7833_v48 = vadd.f32 %v2198_v15, %v1996_v63  ;;  %v1844_v4 = vadd.f32 %v1772_v52, %v1612_v34  ;;  %v1925_v8 = vpop.f32.mrf.mxu2  ;;  %v1425_v63 = vsel %vm1358_vm4, %v1420_v46, %v1424_v28 }
 0x212   : > { %v1999_v11 = vadd.f32 %v1925_v8, %v1843_v16 }
 0x213   : > { %6705 = vmatmul.msk.bf16.gmra.mxu1 %vm672_vm1, %v1669_v54  ;;  %v7002_v54 = vld [vmem:[%s7165_s20 + $0x90] sm:$0xff]  }
 0x214   : > { %v1427_v45 = vshrl.u32 %v7002_v54, 16  ;;  %v1430_v29 = vshll.u32 %v7002_v54, 16  ;;  %v7848_v46 = vrot.slane %v7002_v54, 2 }
 0x216   : > { %6724 = vmatmul.msk.bf16.gmra.mxu2 %vm672_vm1, %v1671_v57  ;;  %v1429_v15 = vrot.slane %v1427_v45, 1 }
 0x217   : > { %v1545_v14 = vpop.f32.mrf.mxu0 }
 0x218   : > { %v2200_v43 = vpop.f32.mrf.mxu3  ;;  %v1614_v34 = vadd.f32 %v1545_v14, %v7555_v60  ;;  %v1774_v16 = vpop.f32.mrf.mxu1  ;;  %v1432_v60 = vrot.slane %v1430_v29, 2  ;;  %v2087_v14 = vrot.slane %v10482_v51, 3 }
 0x219   : > { %v7842_v0 = vadd.f32 %v2200_v43, %v1997_v58  ;;  %v1845_v24 = vadd.f32 %v1774_v16, %v1613_v25  ;;  %v1928_v5 = vpop.f32.mrf.mxu2 }
 0x21a   : > { %v2000_v21 = vadd.f32 %v1928_v5, %v1844_v4  ;;  %6687 = vmatmul.msk.bf16.gmra.mxu0 %vm672_vm1, %v1425_v63  ;;  %v1673_v63 = vsel %vm1638_vm5, %v1670_v3, %v7848_v46  ;;  %v1433_v43 = vor.u32 %v1432_v60, %v1429_v15  ;;  %v2088_v16 = vor.u32 %v2087_v14, %v2086_v22  ;;  %v10483_v60 = vld [vmem:[#allocation26_spill] sm:$0xff] }
 0x21b   : > { %v1439_v15 = vshll.u32 %v7580_v18, 16 }
 0x21d   : > { %6742 = vmatmul.msk.bf16.gmra.mxu3 %vm672_vm1, %v2085_v17 }
 0x21f   : > { %v1547_v27 = vpop.f32.mrf.mxu0 }
 0x220   : > { %v2203_v52 = vpop.f32.mrf.mxu3  ;;  %v1615_v58 = vadd.f32 %v1547_v27, %v7563_v26  ;;  %v1777_v25 = vpop.f32.mrf.mxu1  ;;  %v1436_v27 = vshrl.u32 %v7580_v18, 16 }
 0x221   : > { %v7851_v8 = vadd.f32 %v2203_v52, %v1998_v32  ;;  %v1846_v4 = vadd.f32 %v1777_v25, %v1614_v34  ;;  %v1930_v40 = vpop.f32.mrf.mxu2  ;;  %v1434_v32 = vsel %vm1358_vm4, %v1424_v28, %v1433_v43  ;;  %v6747_v34 = vld [vmem:[%s10345_s1 + $0x10] sm:$0x3]  ;;  %v2089_v28 = vsel %vm2026_vm6, %v2084_v1, %v2088_v16 }
 0x222   : > { %v2001_v13 = vadd.f32 %v1930_v40, %v1845_v24  ;;  %v1876_v52 = vrot.slane %v10483_v60, 2  ;;  %v1441_v25 = vrot.slane %v1439_v15, 2 }
 0x223   : > { %6706 = vmatmul.msk.bf16.gmra.mxu1 %vm672_vm1, %v1671_v57  ;;  %v2399_v57 = vsel %vm727_vm0, %v6747_v34, 0  ;;  %v2091_v34 = vrot.slane %v1430_v29, 3 }
 0x224   : > { %2408 = vmatpush.bf16.msra.mxu0 %v2399_v57  ;;  %v426_v57 = vld [vmem:[%s7165_s20 + $0xa0] sm:$0xf] }
 0x226   : > { %6725 = vmatmul.msk.bf16.gmra.mxu2 %vm672_vm1, %v1673_v63 }
 0x227   : > { %v1550_v26 = vpop.f32.mrf.mxu0 }
 0x228   : > { %v2205_v24 = vpop.f32.mrf.mxu3  ;;  %v1616_v47 = vadd.f32 %v1550_v26, %v7578_v9  ;;  %v1779_v51 = vpop.f32.mrf.mxu1 }
 0x229   : > { %v7865_v5 = vadd.f32 %v2205_v24, %v1999_v11  ;;  %v1847_v3 = vadd.f32 %v1779_v51, %v1615_v58  ;;  %v1933_v17 = vpop.f32.mrf.mxu2  ;;  %v1438_v11 = vrot.slane %v1436_v27, 1  ;;  %v1877_v24 = vsel %vm1638_vm5, %v7848_v46, %v1876_v52 }
 0x22a   : > { %v2002_v54 = vadd.f32 %v1933_v17, %v1846_v4  ;;  %6688 = vmatmul.msk.bf16.gmra.mxu0 %vm672_vm1, %v1434_v32  ;;  %v2090_v32 = vrot.slane %v1427_v45, 2 }
 0x22b   : > { %v1442_v51 = vor.u32 %v1441_v25, %v1438_v11  ;;  %v1674_v11 = vrot.slane %v7580_v18, 2 }
 0x22c   : > { %v2092_v17 = vor.u32 %v2091_v34, %v2090_v32  ;;  %v7905_v34 = vld [vmem:[%s7896_s23] sm:$0xff]  }
 0x22d   : > { %6743 = vmatmul.msk.bf16.gmra.mxu3 %vm672_vm1, %v2089_v28 }
 0x22f   : > { %v1552_v9 = vpop.f32.mrf.mxu0 }
 0x230   : > { %v2208_v58 = vpop.f32.mrf.mxu3  ;;  %v1617_v40 = vadd.f32 %v1552_v9, %v7587_v19  ;;  %v1782_v4 = vpop.f32.mrf.mxu1  ;;  %v2093_v9 = vsel %vm2026_vm6, %v2088_v16, %v2092_v17 }
 0x231   : > { %v7874_v22 = vadd.f32 %v2208_v58, %v2000_v21  ;;  %v1848_v14 = vadd.f32 %v1782_v4, %v1616_v47  ;;  %v1935_v1 = vpop.f32.mrf.mxu2  ;;  %v1443_v21 = vsel %vm1358_vm4, %v1433_v43, %v1442_v51  ;;  %v1873_v47 = vunpack.c.l.b16 %v426_v57  ;;  %v7003_v43 = vld [vmem:[%s7165_s20 + $0x98] sm:$0xff]  }
 0x232   : > { %v2003_v26 = vadd.f32 %v1935_v1, %v1847_v3  ;;  %v2095_v25 = vshrl.u32 %v7003_v43, 16  ;;  %v1675_v4 = vsel %vm1638_vm5, %v7848_v46, %v1674_v11  ;;  %v2949_v46 = vshll.u32 %v7905_v34, 16 }
 0x233   : > { %6707 = vmatmul.msk.bf16.gmra.mxu1 %vm672_vm1, %v1673_v63  ;;  %v7888_v60 = vpack.c.b16 %v1873_v47, %v1873_v47  ;;  %v7005_v47 = vld [vmem:[%s7165_s20 + $0x18] sm:$0xff] }
 0x234   : > { %v2097_v51 = vrot.slane %v2095_v25, 2 }
 0x235   : > { %v1878_v16 = vrot.slane %v7888_v60, 2 }
 0x236   : > { %6726 = vmatmul.msk.bf16.gmra.mxu2 %vm672_vm1, %v1877_v24 }
 0x237   : > { %v1555_v19 = vpop.f32.mrf.mxu0 }
 0x238   : > { %v2210_v28 = vpop.f32.mrf.mxu3  ;;  %v1618_v45 = vadd.f32 %v1555_v19, %v7595_v53  ;;  %v1784_v29 = vpop.f32.mrf.mxu1  ;;  %v2098_v53 = vshll.u32 %v7003_v43, 16  ;;  %v1879_v19 = vsel %vm1638_vm5, %v1876_v52, %v1878_v16  ;;  %v2947_v52 = vshrl.u32 %v7905_v34, 16 }
 0x239   : > { %v7883_v3 = vadd.f32 %v2210_v28, %v2001_v13  ;;  %v1849_v63 = vadd.f32 %v1784_v29, %v1617_v40  ;;  %v1938_v27 = vpop.f32.mrf.mxu2  ;;  %v2308_v28 = vrot.slane %v7005_v47, 3  ;;  %v2951_v43 = vrot.slane %v2949_v46, 1 }
 0x23a   : > { %v2004_v15 = vadd.f32 %v1938_v27, %v1848_v14  ;;  %6689 = vmatmul.msk.bf16.gmra.mxu0 %vm672_vm1, %v1443_v21  ;;  %v2100_v57 = vrot.slane %v2098_v53, 3  ;;  %v7004_v21 = vld [vmem:[%s7165_s20 + $0x10] sm:$0xff] }
 0x23d   : > { %6744 = vmatmul.msk.bf16.gmra.mxu3 %vm672_vm1, %v2093_v9 }
 0x23f   : > { %v1557_v13 = vpop.f32.mrf.mxu0 }
 0x240   : > { %v2213_v58 = vpop.f32.mrf.mxu3  ;;  %v1619_v40 = vadd.f32 %v1557_v13, %v7605_v56  ;;  %v1787_v18 = vpop.f32.mrf.mxu1  ;;  %v2307_v56 = vrot.slane %v7004_v21, 3 }
 0x241   : > { %v7902_v14 = vadd.f32 %v2213_v58, %v2002_v54  ;;  %v1850_v1 = vadd.f32 %v1787_v18, %v1618_v45  ;;  %v1940_v32 = vpop.f32.mrf.mxu2  ;;  %v7913_v54 = vld [vmem:[%s7896_s23 + $0x8] sm:$0xff]   ;;  %v2101_v45 = vor.u32 %v2100_v57, %v2097_v51 }
 0x242   : > { %v2005_v24 = vadd.f32 %v1940_v32, %v1849_v63  ;;  %v2309_v63 = vsel %vm2306_vm7, %v2307_v56, %v2308_v28  ;;  %v10386_v25 = vshll.u32 %v7913_v54, 16 }
 0x243   : > { %6708 = vmatmul.msk.bf16.gmra.mxu1 %vm672_vm1, %v1675_v4  ;;  %v2102_v18 = vsel %vm2026_vm6, %v2092_v17, %v2101_v45  ;;  %v2952_v4 = vor.u32 %v2951_v43, %v2947_v52 }
 0x244   : > { %v2956_v32 = vrot.slane %v10386_v25, 1 }
 0x246   : > { %6727 = vmatmul.msk.bf16.gmra.mxu2 %vm672_vm1, %v1879_v19  ;;  %v2957_v17 = vsel %vm523_vm3, %v2952_v4, %v2956_v32 }
 0x247   : > { %v1560_v29 = vpop.f32.mrf.mxu0 }
 0x248   : > { %v2215_v27 = vpop.f32.mrf.mxu3  ;;  %v1620_v9 = vadd.f32 %v1560_v29, %v7613_v6  ;;  %v1789_v11 = vpop.f32.mrf.mxu1  ;;  %v2104_v6 = vshrl.u32 %v7888_v60, 16 }
 0x249   : > { %v7920_v53 = vadd.f32 %v2215_v27, %v2003_v26  ;;  %v1851_v13 = vadd.f32 %v1789_v11, %v1619_v40  ;;  %v1943_v16 = vpop.f32.mrf.mxu2  ;;  %v2107_v26 = vshll.u32 %v7888_v60, 16  ;;  %v7936_v11 = vld [vmem:[%s7896_s23 + $0x10] sm:$0xff]  }
 0x24a   : > { %v2006_v58 = vadd.f32 %v1943_v16, %v1850_v1  ;;  %6748 = vmatmul.msk.bf16.vlgmr.msra.gmra.mxu0 %vm672_vm1, %v2309_v63  ;;  %v2106_v46 = vrot.slane %v2104_v6, 2  ;;  %v7006_v63 = vld [vmem:[%s7165_s20 + $0x20] sm:$0xff] }
 0x24b   : > { %v2109_v29 = vrot.slane %v2107_v26, 3  ;;  %v2310_v27 = vrot.slane %v7006_v63, 3 }
 0x24d   : > { %6745 = vmatmul.msk.bf16.gmra.mxu3 %vm672_vm1, %v2102_v18  ;;  %v2311_v43 = vsel %vm2306_vm7, %v2308_v28, %v2310_v27  ;;  %v10388_v18 = vshll.u32 %v7936_v11, 16 }
 0x24f   : > { %v1562_v51 = vpop.f32.mrf.mxu0 }
 0x250   : > { %v2218_v40 = vpop.f32.mrf.mxu3  ;;  %v1621_v1 = vadd.f32 %v1562_v51, %v7621_v20  ;;  %v1792_v57 = vpop.f32.mrf.mxu1  ;;  %v2110_v20 = vor.u32 %v2109_v29, %v2106_v46 }
 0x251   : > { %v7931_v19 = vadd.f32 %v2218_v40, %v2004_v15  ;;  %v1852_v21 = vadd.f32 %v1792_v57, %v1620_v9  ;;  %v1945_v56 = vpop.f32.mrf.mxu2 }
 0x252   : > { %v2007_v47 = vadd.f32 %v1945_v56, %v1851_v13  ;;  %v10390_v13 = vshrl.u32 %v7913_v54, 16  ;;  %v2111_v40 = vsel %vm2026_vm6, %v2101_v45, %v2110_v20  ;;  %v7960_v20 = vld [vmem:[%s7896_s23 + $0x18] sm:$0xff]  }
 0x253   : > { %6767 = vmatmul.msk.bf16.vlgmr.msra.gmra.mxu1 %vm672_vm1, %v2957_v17 }
 0x254   : > { %v2960_v28 = vor.u32 %v10390_v13, %v2956_v32  ;;  %v7007_v32 = vld [vmem:[%s7165_s20 + $0x28] sm:$0xff] }
 0x255   : > { %v2312_v63 = vrot.slane %v7007_v32, 3 }
 0x256   : > { %6772 = vmatmul.msk.bf16.vlgmr.msra.gmra.mxu2 %vm672_vm1, %v7905_v34 }
 0x257   : > { %v1565_v52 = vpop.f32.mrf.mxu0 }
 0x258   : > { %v2220_v15 = vpop.f32.mrf.mxu3  ;;  %v1622_v9 = vadd.f32 %v1565_v52, %v7629_v23  ;;  %v1794_v16 = vpop.f32.mrf.mxu1  ;;  %v2964_v23 = vrot.slane %v10388_v18, 1  ;;  %v3091_v52 = vrot.slane %v7905_v34, 1 }
 0x259   : > { %v7944_v4 = vadd.f32 %v2220_v15, %v2005_v24  ;;  %v1853_v6 = vadd.f32 %v1794_v16, %v1621_v1  ;;  %v1948_v26 = vpop.f32.mrf.mxu2 }
 0x25a   : > { %v2008_v51 = vadd.f32 %v1948_v26, %v1852_v21  ;;  %6749 = vmatmul.msk.bf16.gmra.mxu0 %vm672_vm1, %v2311_v43  ;;  %v2965_v21 = vsel %vm523_vm3, %v2960_v28, %v2964_v23  ;;  %v10384_v26 = vshll.u32 %v7960_v20, 16 }
 0x25d   : > { %6746 = vmatmul.msk.bf16.gmra.mxu3 %vm672_vm1, %v2111_v40 }
 0x25f   : > { %v1567_v57 = vpop.f32.mrf.mxu0 }
 0x260   : > { %v2223_v24 = vpop.f32.mrf.mxu3  ;;  %v1623_v1 = vadd.f32 %v1567_v57, %v7637_v50  ;;  %v1797_v17 = vpop.f32.mrf.mxu1  ;;  %v3092_v50 = vrot.slane %v7913_v54, 1 }
 0x261   : > { %v7955_v56 = vadd.f32 %v2223_v24, %v2006_v58  ;;  %v1854_v45 = vadd.f32 %v1797_v17, %v1622_v9  ;;  %v1950_v46 = vpop.f32.mrf.mxu2  ;;  %v2313_v58 = vsel %vm2306_vm7, %v2310_v27, %v2312_v63 }
 0x262   : > { %v2009_v29 = vadd.f32 %v1950_v46, %v1853_v6  ;;  %v10387_v6 = vshrl.u32 %v7936_v11, 16  ;;  %v3093_v34 = vsel %vm970_vm2, %v3091_v52, %v3092_v50 }
 0x263   : > { %10484 = vst [vmem:[#allocation6_spill] sm:$0xff] %v7955_v56  ;;  %6768 = vmatmul.msk.bf16.gmra.mxu1 %vm672_vm1, %v2965_v21 }
 0x264   : > { %v2968_v27 = vor.u32 %v10387_v6, %v2964_v23  ;;  %v7008_v23 = vld [vmem:[%s7165_s20 + $0x30] sm:$0xff] }
 0x266   : > { %6773 = vmatmul.msk.bf16.gmra.mxu2 %vm672_vm1, %v7913_v54 }
 0x267   : > { %v1570_v43 = vpop.f32.mrf.mxu0 }
 0x268   : > { %v2225_v15 = vpop.f32.mrf.mxu3  ;;  %v1624_v9 = vadd.f32 %v1570_v43, %v7645_v33  ;;  %v1799_v16 = vpop.f32.mrf.mxu1  ;;  %v2972_v33 = vrot.slane %v10384_v26, 1 }
 0x269   : > { %v7970_v40 = vadd.f32 %v2225_v15, %v2007_v47  ;;  %v1855_v28 = vadd.f32 %v1799_v16, %v1623_v1  ;;  %v1953_v57 = vpop.f32.mrf.mxu2  ;;  %v7986_v15 = vld [vmem:[%s7896_s23 + $0x20] sm:$0xff]   ;;  %v3094_v16 = vrot.slane %v7936_v11, 1 }
 0x26a   : > { %v2010_v24 = vadd.f32 %v1953_v57, %v1854_v45  ;;  %6750 = vmatmul.msk.bf16.gmra.mxu0 %vm672_vm1, %v2313_v58  ;;  %v2973_v45 = vsel %vm523_vm3, %v2968_v27, %v2972_v33  ;;  %v2314_v58 = vrot.slane %v7008_v23, 3  ;;  %v10383_v27 = vshll.u32 %v7986_v15, 16  ;;  %v8005_v23 = vld [vmem:[%s7896_s23 + $0x28] sm:$0xff]  }
 0x26c   : > { %v2315_v57 = vsel %vm2306_vm7, %v2312_v63, %v2314_v58 }
 0x26d   : > { %6778 = vmatmul.msk.bf16.vlgmr.msrb.gmra.mxu3 %vm672_vm1, %v3093_v34 }
 0x26f   : > { %v1572_v17 = vpop.f32.mrf.mxu0 }
 0x270   : > { %v2228_v47 = vpop.f32.mrf.mxu3  ;;  %v1625_v1 = vadd.f32 %v1572_v17, %v7653_v31  ;;  %v1802_v21 = vpop.f32.mrf.mxu1 }
 0x271   : > { %v7981_v46 = vadd.f32 %v2228_v47, %v2008_v51  ;;  %v1856_v32 = vadd.f32 %v1802_v21, %v1624_v9  ;;  %v1955_v52 = vpop.f32.mrf.mxu2 }
 0x272   : > { %v2011_v43 = vadd.f32 %v1955_v52, %v1855_v28  ;;  %v10385_v28 = vshrl.u32 %v7960_v20, 16  ;;  %v3095_v52 = vsel %vm970_vm2, %v3092_v50, %v3094_v16  ;;  %v8010_v50 = vunpack.c.l.b16 %v8005_v23 }
 0x273   : > { %10485 = vst [vmem:[#allocation4_spill] sm:$0xff] %v7981_v46  ;;  %6769 = vmatmul.msk.bf16.gmra.mxu1 %vm672_vm1, %v2973_v45 }
 0x274   : > { %v2976_v63 = vor.u32 %v10385_v28, %v2972_v33  ;;  %v6783_v33 = vld [vmem:[%s10348_s4 + $0x6] sm:$0x3]  ;;  %v8025_v26 = vpack.c.b16 %v8010_v50, %v8010_v50 }
 0x276   : > { %6774 = vmatmul.msk.bf16.gmra.mxu2 %vm672_vm1, %v7936_v11 }
 0x277   : > { %v1575_v31 = vpop.f32.mrf.mxu0 }
 0x278   : > { %v2230_v51 = vpop.f32.mrf.mxu3  ;;  %v1626_v9 = vadd.f32 %v1575_v31, %v7673_v41  ;;  %v1804_v34 = vpop.f32.mrf.mxu1  ;;  %v2980_v41 = vrot.slane %v10383_v27, 1 }
 0x279   : > { %v7995_v17 = vadd.f32 %v2230_v51, %v2009_v29  ;;  %v1857_v47 = vadd.f32 %v1804_v34, %v1625_v1  ;;  %v1958_v21 = vpop.f32.mrf.mxu2 }
 0x27a   : > { %v2012_v45 = vadd.f32 %v1958_v21, %v1856_v32  ;;  %6751 = vmatmul.msk.bf16.gmra.mxu0 %vm672_vm1, %v2315_v57  ;;  %v2981_v57 = vsel %vm523_vm3, %v2976_v63, %v2980_v41  ;;  %v6789_v63 = vld [vmem:[%s10348_s4 + $0x8] sm:$0x3] }
 0x27b   : > { %10486 = vst [vmem:[#allocation9_spill] sm:$0xff] %v7995_v17 }
 0x27d   : > { %6779 = vmatmul.msk.bf16.gmra.mxu3 %vm672_vm1, %v3095_v52  ;;  %v3201_v52 = vsel %vm727_vm0, %v6783_v33, 0 }
 0x27e   : > { %3210 = vmatpush.bf16.msrb.mxu1 %v3201_v52  ;;  %v2986_v52 = vshll.u32 %v8025_v26, 16 }
 0x27f   : > { %v1577_v29 = vpop.f32.mrf.mxu0 }
 0x280   : > { %v2233_v31 = vpop.f32.mrf.mxu3  ;;  %v1627_v1 = vadd.f32 %v1577_v29, %v7681_v61  ;;  %v1807_v32 = vpop.f32.mrf.mxu1  ;;  %v7009_v61 = vld [vmem:[%s7165_s20 + $0x38] sm:$0xff] }
 0x281   : > { %v8015_v51 = vadd.f32 %v2233_v31, %v2010_v24  ;;  %v1858_v34 = vadd.f32 %v1807_v32, %v1626_v9  ;;  %v1960_v21 = vpop.f32.mrf.mxu2  ;;  %v2316_v29 = vrot.slane %v7009_v61, 3  ;;  %v3318_v24 = vsel %vm727_vm0, %v6789_v63, 0 }
 0x282   : > { %v2013_v27 = vadd.f32 %v1960_v21, %v1857_v47  ;;  %3327 = vmatpush.bf16.msrb.mxu2 %v3318_v24  ;;  %v3096_v9 = vrot.slane %v7960_v20, 1  ;;  %v10389_v21 = vshrl.u32 %v7986_v15, 16 }
 0x283   : > { %10487 = vst [vmem:[#allocation5_spill] sm:$0xff] %v8015_v51  ;;  %6770 = vmatmul.msk.bf16.gmra.mxu1 %vm672_vm1, %v2981_v57  ;;  %v2317_v31 = vsel %vm2306_vm7, %v2314_v58, %v2316_v29 }
 0x284   : > { %v3097_v25 = vsel %vm970_vm2, %v3094_v16, %v3096_v9  ;;  %v2984_v58 = vor.u32 %v10389_v21, %v2980_v41  ;;  %v8049_v41 = vld [vmem:[%s7896_s23 + $0x4] sm:$0xff]  }
 0x285   : > { %v3174_v51 = vrot.slane %v8049_v41, 1 }
 0x286   : > { %6775 = vmatmul.msk.bf16.gmra.mxu2 %vm672_vm1, %v7960_v20 }
 0x287   : > { %v1580_v47 = vpop.f32.mrf.mxu0 }
 0x288   : > { %v2235_v32 = vpop.f32.mrf.mxu3  ;;  %v1628_v57 = vadd.f32 %v1580_v47, %v7689_v37  ;;  %v1809_v33 = vpop.f32.mrf.mxu1  ;;  %v2988_v37 = vrot.slane %v2986_v52, 1  ;;  %v8052_v52 = vld [vmem:[%s7896_s23 + $0xc] sm:$0xff]  }
 0x289   : > { %v8035_v61 = vadd.f32 %v2235_v32, %v2011_v43  ;;  %v1859_v63 = vadd.f32 %v1809_v33, %v1627_v1  ;;  %v1963_v24 = vpop.f32.mrf.mxu2 }
 0x28a   : > { %v2014_v28 = vadd.f32 %v1963_v24, %v1858_v34  ;;  %6752 = vmatmul.msk.bf16.gmra.mxu0 %vm672_vm1, %v2317_v31  ;;  %v2989_v32 = vsel %vm523_vm3, %v2984_v58, %v2988_v37  ;;  %v7010_v24 = vld [vmem:[%s7165_s20 + $0x40] sm:$0xff]  ;;  %v3261_v58 = vshll.u32 %v8052_v52, 16  ;;  %vm4916_vm3 = vcmask 359424  }
 0x28b   : > { %10488 = vst [vmem:[#allocation7_spill] sm:$0xff] %v8035_v61  ;;  %v2318_v18 = vrot.slane %v7010_v24, 3 }
 0x28d   : > { %6780 = vmatmul.msk.bf16.gmra.mxu3 %vm672_vm1, %v3097_v25  ;;  %v3098_v25 = vrot.slane %v7986_v15, 1 }
 0x28f   : > { %v1582_v47 = vpop.f32.mrf.mxu0 }
 0x290   : > { %v2238_v6 = vpop.f32.mrf.mxu3  ;;  %v1629_v43 = vadd.f32 %v1582_v47, %v7697_v7  ;;  %v1812_v1 = vpop.f32.mrf.mxu1  ;;  %v2319_v7 = vsel %vm2306_vm7, %v2316_v29, %v2318_v18 }
 0x291   : > { %v8044_v34 = vadd.f32 %v2238_v6, %v2012_v45  ;;  %v1860_v31 = vadd.f32 %v1812_v1, %v1628_v57  ;;  %v1965_v33 = vpop.f32.mrf.mxu2  ;;  %v3250_v45 = vshrl.u32 %v8049_v41, 16  ;;  %v3253_v57 = vshll.u32 %v8049_v41, 16 }
 0x292   : > { %v2015_v16 = vadd.f32 %v1965_v33, %v1859_v63  ;;  %v3258_v63 = vshrl.u32 %v8052_v52, 16 }
 0x293   : > { %10489 = vst [vmem:[#allocation11_spill] sm:$0xff] %v8044_v34  ;;  %6771 = vmatmul.msk.bf16.gmra.mxu1 %vm672_vm1, %v2989_v32  ;;  %v6795_v32 = vld [vmem:[%s10348_s4 + $0xa] sm:$0x3]  ;;  %v3099_v34 = vsel %vm970_vm2, %v3096_v9, %v3098_v25  ;;  %v3252_v61 = vrot.slane %v3250_v45, 1  ;;  %v3255_v17 = vrot.slane %v3253_v57, 2 }
 0x294   : > { %v3393_v21 = vsel %vm727_vm0, %v6795_v32, 0 }
 0x295   : > { %3402 = vmatpush.bf16.msra.mxu3 %v3393_v21 }
 0x296   : > { %6776 = vmatmul.msk.bf16.gmra.mxu2 %vm672_vm1, %v7986_v15 }
 0x297   : > { %v1585_v6 = vpop.f32.mrf.mxu0 }
 0x298   : > { %v2240_v37 = vpop.f32.mrf.mxu3  ;;  %v1630_v47 = vadd.f32 %v1585_v6, %v7705_v12  ;;  %v1814_v1 = vpop.f32.mrf.mxu1  ;;  %v3260_v12 = vrot.slane %v3258_v63, 1  ;;  %v3263_v6 = vrot.slane %v3261_v58, 2 }
 0x299   : > { %v8066_v29 = vadd.f32 %v2240_v37, %v2013_v27  ;;  %v1861_v33 = vadd.f32 %v1814_v1, %v1629_v43  ;;  %v1968_v24 = vpop.f32.mrf.mxu2  ;;  %v3175_v27 = vrot.slane %v8052_v52, 1  ;;  %v3256_v37 = vor.u32 %v3255_v17, %v3252_v61 }
 0x29a   : > { %v2016_v13 = vadd.f32 %v1968_v24, %v1860_v31  ;;  %6753 = vmatmul.msk.bf16.gmra.mxu0 %vm672_vm1, %v2319_v7  ;;  %v3264_v31 = vor.u32 %v3263_v6, %v3260_v12 }
 0x29b   : > { %10490 = vst [vmem:[#allocation8_spill] sm:$0xff] %v8066_v29  ;;  %v3176_v21 = vsel %vm970_vm2, %v3174_v51, %v3175_v27  ;;  %v8082_v29 = vld [vmem:[%s7896_s23 + $0x14] sm:$0xff]  }
 0x29c   : > { %v3265_v32 = vsel %vm1358_vm4, %v3256_v37, %v3264_v31  ;;  %v3270_v61 = vshll.u32 %v8082_v29, 16 }
 0x29d   : > { %6781 = vmatmul.msk.bf16.gmra.mxu3 %vm672_vm1, %v3099_v34  ;;  %v7011_v34 = vld [vmem:[%s7165_s20 + $0x48] sm:$0xff] }
 0x29e   : > { %v2320_v24 = vrot.slane %v7011_v34, 3 }
 0x29f   : > { %v1587_v43 = vpop.f32.mrf.mxu0 }
 0x2a0   : > { %v2243_v1 = vpop.f32.mrf.mxu3  ;;  %v1631_v7 = vadd.f32 %v1587_v43, %v7715_v2  ;;  %v1817_v9 = vpop.f32.mrf.mxu1  ;;  %v3100_v2 = vrot.slane %v8025_v26, 1  ;;  %v2321_v51 = vsel %vm2306_vm7, %v2318_v18, %v2320_v24  ;;  %v3272_v18 = vrot.slane %v3270_v61, 2 }
 0x2a1   : > { %v8076_v45 = vadd.f32 %v2243_v1, %v2014_v28  ;;  %v1862_v57 = vadd.f32 %v1817_v9, %v1630_v47  ;;  %v1970_v63 = vpop.f32.mrf.mxu2  ;;  %v3267_v28 = vshrl.u32 %v8082_v29, 16 }
 0x2a2   : > { %v2017_v58 = vadd.f32 %v1970_v63, %v1861_v33  ;;  %v3101_v26 = vsel %vm970_vm2, %v3098_v25, %v3100_v2 }
 0x2a3   : > { %10491 = vst [vmem:[#allocation14_spill] sm:$0xff] %v8076_v45  ;;  %6784 = vmatmul.msk.bf16.vlgmr.msrb.gmra.mxu1 %vm672_vm1, %v3176_v21  ;;  %v3269_v9 = vrot.slane %v3267_v28, 1  ;;  %v3177_v21 = vrot.slane %v8082_v29, 1  ;;  %v7012_v28 = vld [vmem:[%s7165_s20 + $0x50] sm:$0xff] }
 0x2a4   : > { %v2322_v61 = vrot.slane %v7012_v28, 3 }
 0x2a6   : > { %6790 = vmatmul.msk.bf16.vlgmr.msrb.gmra.mxu2 %vm672_vm1, %v3265_v32 }
 0x2a7   : > { %v1590_v17 = vpop.f32.mrf.mxu0 }
 0x2a8   : > { %v2245_v47 = vpop.f32.mrf.mxu3  ;;  %v1632_v33 = vadd.f32 %v1590_v17, %v7725_v30  ;;  %v1819_v12 = vpop.f32.mrf.mxu1  ;;  %v3273_v30 = vor.u32 %v3272_v18, %v3269_v9 }
 0x2a9   : > { %v8090_v6 = vadd.f32 %v2245_v47, %v2015_v16  ;;  %v1863_v43 = vadd.f32 %v1819_v12, %v1631_v7  ;;  %v1973_v37 = vpop.f32.mrf.mxu2  ;;  %v8104_v47 = vld [vmem:[%s7896_s23 + $0x1c] sm:$0xff]   ;;  %v3367_v12 = vrot.slane %v8052_v52, 2 }
 0x2aa   : > { %v2018_v1 = vadd.f32 %v1973_v37, %v1862_v57  ;;  %6754 = vmatmul.msk.bf16.gmra.mxu0 %vm672_vm1, %v2321_v51  ;;  %v3178_v57 = vsel %vm970_vm2, %v3175_v27, %v3177_v21  ;;  %v3274_v51 = vsel %vm1358_vm4, %v3264_v31, %v3273_v30 }
 0x2ab   : > { %10492 = vst [vmem:[#allocation10_spill] sm:$0xff] %v8090_v6 }
 0x2ad   : > { %6782 = vmatmul.msk.bf16.gmra.mxu3 %vm672_vm1, %v3101_v26 }
 0x2af   : > { %v1592_v63 = vpop.f32.mrf.mxu0 }
 0x2b0   : > { %v2248_v32 = vpop.f32.mrf.mxu3  ;;  %v1633_v16 = vadd.f32 %v1592_v63, %v7734_v49  ;;  %v1822_v7 = vpop.f32.mrf.mxu1  ;;  %v3366_v49 = vrot.slane %v8049_v41, 2 }
 0x2b1   : > { %v8098_v34 = vadd.f32 %v2248_v32, %v2016_v13  ;;  %v1864_v17 = vadd.f32 %v1822_v7, %v1632_v33  ;;  %v1975_v25 = vpop.f32.mrf.mxu2  ;;  %v2323_v13 = vsel %vm2306_vm7, %v2320_v24, %v2322_v61  ;;  %v3276_v33 = vshrl.u32 %v8104_v47, 16 }
 0x2b2   : > { %v2019_v2 = vadd.f32 %v1975_v25, %v1863_v43  ;;  %v3279_v43 = vshll.u32 %v8104_v47, 16  ;;  %v3368_v41 = vsel %vm1638_vm5, %v3366_v49, %v3367_v12  ;;  %v3179_v24 = vrot.slane %v8104_v47, 1 }
 0x2b3   : > { %10493 = vst [vmem:[#allocation12_spill] sm:$0xff] %v8098_v34  ;;  %6785 = vmatmul.msk.bf16.gmra.mxu1 %vm672_vm1, %v3178_v57  ;;  %v3278_v52 = vrot.slane %v3276_v33, 1  ;;  %v6879_v57 = vunpack.c.h.b16 %v7986_v15 }
 0x2b4   : > { %v3281_v7 = vrot.slane %v3279_v43, 2 }
 0x2b6   : > { %6791 = vmatmul.msk.bf16.gmra.mxu2 %vm672_vm1, %v3274_v51  ;;  %v3282_v25 = vor.u32 %v3281_v7, %v3278_v52 }
 0x2b7   : > { %v1595_v27 = vpop.f32.mrf.mxu0 }
 0x2b8   : > { %v2250_v37 = vpop.f32.mrf.mxu3  ;;  %v1634_v31 = vadd.f32 %v1595_v27, %v7743_v59  ;;  %v1824_v26 = vpop.f32.mrf.mxu1  ;;  %v3283_v43 = vsel %vm1358_vm4, %v3273_v30, %v3282_v25 }
 0x2b9   : > { %v8113_v9 = vadd.f32 %v2250_v37, %v2017_v58  ;;  %v1865_v18 = vadd.f32 %v1824_v26, %v1633_v16  ;;  %v1978_v63 = vpop.f32.mrf.mxu2  ;;  %v7013_v37 = vld [vmem:[%s7165_s20 + $0x58] sm:$0xff] }
 0x2ba   : > { %v2020_v32 = vadd.f32 %v1978_v63, %v1864_v17  ;;  %6755 = vmatmul.msk.bf16.gmra.mxu0 %vm672_vm1, %v2323_v13  ;;  %v3180_v17 = vsel %vm970_vm2, %v3177_v21, %v3179_v24  ;;  %v8125_v13 = vpack.c.b16 %v8010_v50, %v6879_v57  ;;  %v2324_v26 = vrot.slane %v7013_v37, 3 }
 0x2bb   : > { %10494 = vst [vmem:[#allocation16_spill] sm:$0xff] %v8113_v9 }
 0x2bc   : > { %v3285_v21 = vshrl.u32 %v8125_v13, 16  ;;  %v2325_v63 = vsel %vm2306_vm7, %v2322_v61, %v2324_v26 }
 0x2bd   : > { %6796 = vmatmul.msk.bf16.vlgmr.msra.gmra.mxu3 %vm672_vm1, %v3368_v41 }
 0x2be   : > { %v3287_v57 = vrot.slane %v3285_v21, 1  ;;  %v10498_v21 = vshll.u32 %v7936_v11, 16 }
 0x2bf   : > { %v1597_v59 = vpop.f32.mrf.mxu0 }
 0x2c0   : > { %v2253_v58 = vpop.f32.mrf.mxu3  ;;  %v1635_v16 = vadd.f32 %v1597_v59, %v7752_v62  ;;  %v1827_v51 = vpop.f32.mrf.mxu1  ;;  %v3369_v62 = vrot.slane %v8082_v29, 2 }
 0x2c1   : > { %v8122_v28 = vadd.f32 %v2253_v58, %v2018_v1  ;;  %v1866_v49 = vadd.f32 %v1827_v51, %v1634_v31  ;;  %v1980_v27 = vpop.f32.mrf.mxu2  ;;  %v3288_v1 = vshll.u32 %v8125_v13, 16  ;;  %v3181_v51 = vrot.slane %v8125_v13, 1 }
 0x2c2   : > { %v2021_v33 = vadd.f32 %v1980_v27, %v1865_v18  ;;  %v3370_v29 = vsel %vm1638_vm5, %v3367_v12, %v3369_v62 }
 0x2c3   : > { %10495 = vst [vmem:[#allocation13_spill] sm:$0xff] %v8122_v28  ;;  %6786 = vmatmul.msk.bf16.gmra.mxu1 %vm672_vm1, %v3180_v17  ;;  %v3290_v59 = vrot.slane %v3288_v1, 2  ;;  %v3182_v37 = vsel %vm970_vm2, %v3179_v24, %v3181_v51  ;;  %v3524_v1 = vrot.slane %v10498_v21, 3  ;;  %v7014_v24 = vld [vmem:[%s7165_s20 + $0x60] sm:$0xff] }
 0x2c5   : > { %v3291_v61 = vor.u32 %v3290_v59, %v3287_v57  ;;  %v2326_v57 = vrot.slane %v7014_v24, 3 }
 0x2c6   : > { %6792 = vmatmul.msk.bf16.gmra.mxu2 %vm672_vm1, %v3283_v43 }
 0x2c7   : > { %v2410_v31 = vpop.f32.mrf.mxu0 }
 0x2c8   : > { %v2255_v50 = vpop.f32.mrf.mxu3  ;;  %v8136_v18 = vadd.f32 %v2410_v31, %v7761_v55  ;;  %v1829_v41 = vpop.f32.mrf.mxu1  ;;  %v6883_v55 = vunpack.c.h.b16 %v8005_v23  ;;  %v10499_v31 = vshrl.u32 %v7936_v11, 16 }
 0x2c9   : > { %v8138_v52 = vadd.f32 %v2255_v50, %v2019_v2  ;;  %v1867_v30 = vadd.f32 %v1829_v41, %v1635_v16  ;;  %v1983_v7 = vpop.f32.mrf.mxu2  ;;  %v10497_v2 = vshrl.u32 %v7913_v54, 16 }
 0x2ca   : > { %6756 = vmatmul.msk.bf16.gmra.mxu0 %vm672_vm1, %v2325_v63  ;;  %v2022_v58 = vadd.f32 %v1983_v7, %v1866_v49  ;;  %v6801_v49 = vld [vmem:[%s10348_s4 + $0xc] sm:$0x3]  ;;  %v3523_v63 = vrot.slane %v10499_v31, 2  ;;  %v8164_v59 = vpack.c.b16 %v6883_v55, %v6883_v55  ;;  %v2327_v55 = vsel %vm2306_vm7, %v2324_v26, %v2326_v57 }
 0x2cb   : > { %10496 = vst [vmem:[#allocation19_spill] sm:$0xff] %v8138_v52  ;;  %v3520_v16 = vrot.slane %v10497_v2, 2  ;;  %v3472_v7 = vsel %vm727_vm0, %v6801_v49, 0 }
 0x2cc   : > { %3481 = vmatpush.bf16.msra.mxu1 %v3472_v7  ;;  %v3294_v21 = vshrl.u32 %v8164_v59, 16  ;;  %v3297_v31 = vshll.u32 %v8164_v59, 16 }
 0x2cd   : > { %6797 = vmatmul.msk.bf16.gmra.mxu3 %vm672_vm1, %v3370_v29 }
 0x2ce   : > { %v3296_v26 = vrot.slane %v3294_v21, 1 }
 0x2cf   : > { %v2412_v17 = vpop.f32.mrf.mxu0 }
 0x2d0   : > { %v2258_v27 = vpop.f32.mrf.mxu3  ;;  %v8148_v43 = vadd.f32 %v2412_v17, %v7770_v44  ;;  %v3017_v12 = vpop.f32.mrf.mxu1  ;;  %v3292_v44 = vsel %vm1358_vm4, %v3282_v25, %v3291_v61  ;;  %v6807_v17 = vld [vmem:[%s10348_s4 + $0xe] sm:$0x3]  ;;  %v8172_v25 = vor.u32 %v3524_v1, %v3523_v63 }
 0x2d1   : > { %v8158_v50 = vadd.f32 %v2258_v27, %v2020_v32  ;;  %v1985_v41 = vpop.f32.mrf.mxu2  ;;  %v10501_v32 = vshll.u32 %v7913_v54, 16  ;;  %v3569_v27 = vsel %vm727_vm0, %v6807_v17, 0  ;;  %v3299_v17 = vrot.slane %v3297_v31, 2  ;;  %v7015_v31 = vld [vmem:[%s7165_s20 + $0x68] sm:$0xff] }
 0x2d2   : > { %v2023_v29 = vadd.f32 %v1985_v41, %v1867_v30  ;;  %3578 = vmatpush.bf16.msra.mxu2 %v3569_v27  ;;  %v3371_v30 = vrot.slane %v8104_v47, 2 }
 0x2d3   : > { %10500 = vst [vmem:[#allocation15_spill] sm:$0xff] %v8158_v50  ;;  %6787 = vmatmul.msk.bf16.gmra.mxu1 %vm672_vm1, %v3182_v37  ;;  %v3521_v2 = vrot.slane %v10501_v32, 3  ;;  %v3183_v32 = vrot.slane %v8164_v59, 1  ;;  %v3300_v27 = vor.u32 %v3299_v17, %v3296_v26 }
 0x2d4   : > { %v3372_v47 = vsel %vm1638_vm5, %v3369_v62, %v3371_v30 }
 0x2d5   : > { %v3522_v49 = vor.u32 %v3521_v2, %v3520_v16  ;;  %v3301_v21 = vsel %vm1358_vm4, %v3291_v61, %v3300_v27  ;;  %vm4919_vm4 = vcmask 392192  }
 0x2d6   : > { %6793 = vmatmul.msk.bf16.gmra.mxu2 %vm672_vm1, %v3292_v44 }
 0x2d7   : > { %v2415_v37 = vpop.f32.mrf.mxu0  ;;  %v3526_v41 = vsel %vm2026_vm6, %v3522_v49, %v8172_v25 }
 0x2d8   : > { %v2260_v7 = vpop.f32.mrf.mxu3  ;;  %v8182_v24 = vadd.f32 %v2415_v37, %v7779_v42  ;;  %v3019_v16 = vpop.f32.mrf.mxu1 }
 0x2d9   : > { %v8184_v1 = vadd.f32 %v2260_v7, %v2021_v33  ;;  %v3064_v63 = vpop.f32.mrf.mxu2  ;;  %v2328_v7 = vrot.slane %v7015_v31, 3 }
 0x2da   : > { %v3065_v44 = vadd.f32 %v3064_v63, %v3017_v12  ;;  %6757 = vmatmul.msk.bf16.gmra.mxu0 %vm672_vm1, %v2327_v55  ;;  %v3184_v12 = vsel %vm970_vm2, %v3181_v51, %v3183_v32  ;;  %v3373_v63 = vrot.slane %v8125_v13, 2  ;;  %vm4913_vm2 = vcmask 326656  }
 0x2db   : > { %10502 = vst [vmem:[#allocation17_spill] sm:$0xff] %v8184_v1 }
 0x2dc   : > { %v3374_v13 = vsel %vm1638_vm5, %v3371_v30, %v3373_v63  ;;  %v7016_v30 = vld [vmem:[%s7165_s20 + $0x70] sm:$0xff] }
 0x2dd   : > { %6798 = vmatmul.msk.bf16.gmra.mxu3 %vm672_vm1, %v3372_v47 }
 0x2df   : > { %v2417_v2 = vpop.f32.mrf.mxu0 }
 0x2e0   : > { %v2263_v42 = vpop.f32.mrf.mxu3  ;;  %v8191_v49 = vadd.f32 %v2417_v2, %v7788_v36  ;;  %v3022_v33 = vpop.f32.mrf.mxu1  ;;  %v2329_v36 = vsel %vm2306_vm7, %v2326_v57, %v2328_v7  ;;  %v3446_v57 = vrot.slane %v7936_v11, 2 }
 0x2e1   : > { %v8194_v37 = vadd.f32 %v2263_v42, %v2022_v58  ;;  %v3066_v55 = vpop.f32.mrf.mxu2 }
 0x2e2   : > { %v3067_v62 = vadd.f32 %v3066_v55, %v3019_v16  ;;  %v6813_v16 = vld [vmem:[%s10348_s4 + $0x10] sm:$0x3] }
 0x2e3   : > { %10503 = vst [vmem:[#allocation21_spill] sm:$0xff] %v8194_v37  ;;  %6788 = vmatmul.msk.bf16.gmra.mxu1 %vm672_vm1, %v3184_v12  ;;  %v3644_v32 = vsel %vm727_vm0, %v6813_v16, 0  ;;  %vm4907_vm0 = vcmask 261120  }
 0x2e4   : > { %3653 = vmatpush.bf16.msrb.mxu3 %v3644_v32 }
 0x2e6   : > { %6794 = vmatmul.msk.bf16.gmra.mxu2 %vm672_vm1, %v3301_v21 }
 0x2e7   : > { %v2420_v47 = vpop.f32.mrf.mxu0 }
 0x2e8   : > { %v2265_v26 = vpop.f32.mrf.mxu3  ;;  %v8203_v51 = vadd.f32 %v2420_v47, %v7797_v35  ;;  %v3024_v58 = vpop.f32.mrf.mxu1  ;;  %v3445_v35 = vrot.slane %v7913_v54, 2  ;;  %v2330_v47 = vrot.slane %v7016_v30, 3 }
 0x2e9   : > { %v8208_v17 = vadd.f32 %v2265_v26, %v2023_v29  ;;  %v3069_v61 = vpop.f32.mrf.mxu2 }
 0x2ea   : > { %v3070_v2 = vadd.f32 %v3069_v61, %v3022_v33  ;;  %6758 = vmatmul.msk.bf16.gmra.mxu0 %vm672_vm1, %v2329_v36  ;;  %v3447_v33 = vsel %vm1638_vm5, %v3445_v35, %v3446_v57  ;;  %v3375_v36 = vrot.slane %v8164_v59, 2  ;;  %v2331_v16 = vsel %vm2306_vm7, %v2328_v7, %v2330_v47 }
 0x2eb   : > { %10504 = vst [vmem:[#allocation18_spill] sm:$0xff] %v8208_v17 }
 0x2ec   : > { %v3376_v35 = vsel %vm1638_vm5, %v3373_v63, %v3375_v36 }
 0x2ed   : > { %6799 = vmatmul.msk.bf16.gmra.mxu3 %vm672_vm1, %v3374_v13 }
 0x2ef   : > { %v2422_v27 = vpop.f32.mrf.mxu0 }
 0x2f0   : > { %v3129_v42 = vpop.f32.mrf.mxu3  ;;  %v8217_v29 = vadd.f32 %v2422_v27, %v7806_v39  ;;  %v3027_v12 = vpop.f32.mrf.mxu1  ;;  %v10506_v27 = vshll.u32 %v7960_v20, 16 }
 0x2f1   : > { %v8220_v55 = vadd.f32 %v3129_v42, %v3065_v44  ;;  %v3071_v21 = vpop.f32.mrf.mxu2  ;;  %v3448_v42 = vrot.slane %v7960_v20, 2 }
 0x2f2   : > { %v3072_v31 = vadd.f32 %v3071_v21, %v3024_v58  ;;  %v3528_v7 = vrot.slane %v10506_v27, 3 }
 0x2f3   : > { %6802 = vmatmul.msk.bf16.vlgmr.msra.gmra.mxu1 %vm672_vm1, %v3447_v33  ;;  %v3449_v63 = vsel %vm1638_vm5, %v3446_v57, %v3448_v42 }
 0x2f6   : > { %6808 = vmatmul.msk.bf16.vlgmr.msra.gmra.mxu2 %vm672_vm1, %v3526_v41  ;;  %v10505_v41 = vshrl.u32 %v7960_v20, 16 }
 0x2f7   : > { %v2425_v26 = vpop.f32.mrf.mxu0 }
 0x2f8   : > { %v3131_v39 = vpop.f32.mrf.mxu3  ;;  %v8228_v61 = vadd.f32 %v2425_v26, %v7815_v10  ;;  %v3029_v32 = vpop.f32.mrf.mxu1  ;;  %v3527_v59 = vrot.slane %v10505_v41, 2 }
 0x2f9   : > { %v8230_v44 = vadd.f32 %v3131_v39, %v3067_v62  ;;  %v3074_v13 = vpop.f32.mrf.mxu2  ;;  %v7017_v39 = vld [vmem:[%s7165_s20 + $0x78] sm:$0xff] }
 0x2fa   : > { %v3075_v58 = vadd.f32 %v3074_v13, %v3027_v12  ;;  %6759 = vmatmul.msk.bf16.gmra.mxu0 %vm672_vm1, %v2331_v16  ;;  %v3529_v62 = vor.u32 %v3528_v7, %v3527_v59  ;;  %v2332_v13 = vrot.slane %v7017_v39, 3 }
 0x2fc   : > { %v3530_v16 = vsel %vm2026_vm6, %v8172_v25, %v3529_v62  ;;  %v2333_v57 = vsel %vm2306_vm7, %v2330_v47, %v2332_v13  ;;  %v10508_v47 = vshll.u32 %v7986_v15, 16 }
 0x2fd   : > { %6800 = vmatmul.msk.bf16.gmra.mxu3 %vm672_vm1, %v3376_v35  ;;  %v3617_v35 = vrot.slane %v7913_v54, 3 }
 0x2ff   : > { %v2427_v10 = vpop.f32.mrf.mxu0 }
 0x300   : > { %v3134_v33 = vpop.f32.mrf.mxu3  ;;  %v8241_v12 = vadd.f32 %v2427_v10, %v7824_v38  ;;  %v3032_v21 = vpop.f32.mrf.mxu1  ;;  %v3618_v38 = vrot.slane %v7936_v11, 3  ;;  %v10507_v11 = vshrl.u32 %v7986_v15, 16 }
 0x301   : > { %v8244_v30 = vadd.f32 %v3134_v33, %v3070_v2  ;;  %v3076_v36 = vpop.f32.mrf.mxu2  ;;  %v3532_v33 = vrot.slane %v10508_v47, 3 }
 0x302   : > { %v3077_v26 = vadd.f32 %v3076_v36, %v3029_v32  ;;  %v3619_v54 = vsel %vm2306_vm7, %v3617_v35, %v3618_v38  ;;  %v3531_v10 = vrot.slane %v10507_v11, 2 }
 0x303   : > { %6803 = vmatmul.msk.bf16.gmra.mxu1 %vm672_vm1, %v3449_v63 }
 0x306   : > { %6809 = vmatmul.msk.bf16.gmra.mxu2 %vm672_vm1, %v3530_v16 }
 0x307   : > { %v2430_v41 = vpop.f32.mrf.mxu0 }
 0x308   : > { %v3136_v2 = vpop.f32.mrf.mxu3  ;;  %v8255_v59 = vadd.f32 %v2430_v41, %v7833_v48  ;;  %v8257_v32 = vpop.f32.mrf.mxu1  ;;  %v3450_v48 = vrot.slane %v7986_v15, 2 }
 0x309   : > { %v8259_v27 = vadd.f32 %v3136_v2, %v3072_v31  ;;  %v3079_v25 = vpop.f32.mrf.mxu2  ;;  %v3533_v31 = vor.u32 %v3532_v33, %v3531_v10  ;;  %v7018_v2 = vld [vmem:[%s7165_s20 + $0x80] sm:$0xff] }
 0x30a   : > { %v3080_v7 = vadd.f32 %v3079_v25, %v3032_v21  ;;  %6760 = vmatmul.msk.bf16.gmra.mxu0 %vm672_vm1, %v2333_v57  ;;  %v3451_v39 = vsel %vm1638_vm5, %v3448_v42, %v3450_v48  ;;  %v2334_v25 = vrot.slane %v7018_v2, 3  ;;  %v3536_v42 = vshrl.u32 %v8005_v23, 16  ;;  %v2914_v2 = vld [vmem:[%s7896_s23 + $0x30] sm:$0xf]  ;;  %s7052_s23 = smov 24  }
 0x30b   : > { %v3534_v57 = vsel %vm2026_vm6, %v3529_v62, %v3533_v31 }
 0x30c   : > { %v2335_v11 = vsel %vm2306_vm7, %v2332_v13, %v2334_v25  ;;  %v3452_v13 = vrot.slane %v8005_v23, 2 }
 0x30d   : > { %6814 = vmatmul.msk.bf16.vlgmr.msrb.gmra.mxu3 %vm672_vm1, %v3619_v54  ;;  %v3620_v54 = vrot.slane %v7960_v20, 3 }
 0x30f   : > { %v2432_v63 = vpop.f32.mrf.mxu0  ;;  %v3621_v20 = vsel %vm2306_vm7, %v3618_v38, %v3620_v54 }
 0x310   : > { %v3139_v36 = vpop.f32.mrf.mxu3  ;;  %v8270_v21 = vadd.f32 %v2432_v63, %v7842_v0  ;;  %v3037_v16 = vpop.f32.mrf.mxu1 }
 0x311   : > { %v8273_v35 = vadd.f32 %v3139_v36, %v3075_v58  ;;  %v8275_v41 = vpop.f32.mrf.mxu2  ;;  %v3539_v58 = vshll.u32 %v8005_v23, 16 }
 0x313   : > { %6804 = vmatmul.msk.bf16.gmra.mxu1 %vm672_vm1, %v3451_v39  ;;  %v3538_v39 = vrot.slane %v3536_v42, 2 }
 0x316   : > { %6810 = vmatmul.msk.bf16.gmra.mxu2 %vm672_vm1, %v3534_v57  ;;  %v3541_v57 = vrot.slane %v3539_v58, 3 }
 0x317   : > { %v2435_v0 = vpop.f32.mrf.mxu0 }
 0x318   : > { %v3141_v10 = vpop.f32.mrf.mxu3  ;;  %v8286_v47 = vadd.f32 %v2435_v0, %v7851_v8  ;;  %v3039_v33 = vpop.f32.mrf.mxu1  ;;  %v3542_v8 = vor.u32 %v3541_v57, %v3538_v39  ;;  %v3442_v0 = vunpack.c.l.b16 %v2914_v2 }
 0x319   : > { %v8288_v62 = vadd.f32 %v3141_v10, %v3077_v26  ;;  %v3084_v63 = vpop.f32.mrf.mxu2 }
 0x31a   : > { %6761 = vmatmul.msk.bf16.gmra.mxu0 %vm672_vm1, %v2335_v11  ;;  %v3085_v36 = vadd.f32 %v3084_v63, %v3037_v16  ;;  %v3453_v11 = vsel %vm1638_vm5, %v3450_v48, %v3452_v13  ;;  %v3543_v63 = vsel %vm2026_vm6, %v3533_v31, %v3542_v8  ;;  %v8305_v57 = vpack.c.b16 %v3442_v0, %v3442_v0 }
 0x31d   : > { %6815 = vmatmul.msk.bf16.gmra.mxu3 %vm672_vm1, %v3621_v20  ;;  %v7019_v20 = vld [vmem:[%s7165_s20 + $0x88] sm:$0xff] }
 0x31e   : > { %v2336_v39 = vrot.slane %v7019_v20, 3 }
 0x31f   : > { %v2437_v45 = vpop.f32.mrf.mxu0 }
 0x320   : > { %v3144_v17 = vpop.f32.mrf.mxu3  ;;  %v8296_v26 = vadd.f32 %v2437_v45, %v7865_v5  ;;  %v3212_v10 = vpop.f32.mrf.mxu1  ;;  %v3622_v5 = vrot.slane %v7986_v15, 3 }
 0x321   : > { %v8299_v38 = vadd.f32 %v3144_v17, %v3080_v7  ;;  %v3237_v16 = vadd.f32 %v3212_v10, %v8220_v55  ;;  %v3086_v42 = vpop.f32.mrf.mxu2  ;;  %v2337_v17 = vsel %vm2306_vm7, %v2334_v25, %v2336_v39  ;;  %v3545_v7 = vshrl.u32 %v8305_v57, 16 }
 0x322   : > { %v3087_v58 = vadd.f32 %v3086_v42, %v3039_v33  ;;  %v3548_v55 = vshll.u32 %v8305_v57, 16  ;;  %v3623_v15 = vsel %vm2306_vm7, %v3620_v54, %v3622_v5  ;;  %v3454_v42 = vrot.slane %v8305_v57, 2 }
 0x323   : > { %6805 = vmatmul.msk.bf16.gmra.mxu1 %vm672_vm1, %v3453_v11  ;;  %v3547_v11 = vrot.slane %v3545_v7, 2 }
 0x324   : > { %v3550_v25 = vrot.slane %v3548_v55, 3 }
 0x326   : > { %6811 = vmatmul.msk.bf16.gmra.mxu2 %vm672_vm1, %v3543_v63  ;;  %v3551_v20 = vor.u32 %v3550_v25, %v3547_v11 }
 0x327   : > { %v2440_v45 = vpop.f32.mrf.mxu0 }
 0x328   : > { %v8312_v48 = vpop.f32.mrf.mxu3  ;;  %v8315_v33 = vadd.f32 %v2440_v45, %v7874_v22  ;;  %v3214_v31 = vpop.f32.mrf.mxu1  ;;  %v3552_v55 = vsel %vm2026_vm6, %v3542_v8, %v3551_v20  ;;  %vm4925_vm6 = vcmask 457728  }
 0x329   : > { %v3238_v2 = vadd.f32 %v3214_v31, %v8230_v44  ;;  %v3329_v0 = vpop.f32.mrf.mxu2  ;;  %v3455_v31 = vsel %vm1638_vm5, %v3452_v13, %v3454_v42  ;;  %vm4922_vm5 = vcmask 424960  }
 0x32a   : > { %6762 = vmatmul.msk.bf16.gmra.mxu0 %vm672_vm1, %v2337_v17  ;;  %v3354_v10 = vadd.f32 %v3329_v0, %v3237_v16  ;;  %v7020_v0 = vld [vmem:[%s7165_s20 + $0x90] sm:$0xff]  }
 0x32d   : > { %6816 = vmatmul.msk.bf16.gmra.mxu3 %vm672_vm1, %v3623_v15  ;;  %v2338_v15 = vrot.slane %v7020_v0, 3 }
 0x32f   : > { %v2442_v63 = vpop.f32.mrf.mxu0  ;;  %v2339_v13 = vsel %vm2306_vm7, %v2336_v39, %v2338_v15 }
 0x330   : > { %v3149_v22 = vpop.f32.mrf.mxu3  ;;  %v8323_v45 = vadd.f32 %v2442_v63, %v7883_v3  ;;  %v3217_v44 = vpop.f32.mrf.mxu1  ;;  %v3624_v3 = vrot.slane %v8005_v23, 3 }
 0x331   : > { %v8326_v17 = vadd.f32 %v3149_v22, %v3085_v36  ;;  %v3239_v54 = vadd.f32 %v3217_v44, %v8244_v30  ;;  %v3331_v16 = vpop.f32.mrf.mxu2 }
 0x332   : > { %v3355_v7 = vadd.f32 %v3331_v16, %v3238_v2  ;;  %v3625_v8 = vsel %vm2306_vm7, %v3622_v5, %v3624_v3  ;;  %v7021_v16 = vld [vmem:[%s7165_s20 + $0x98] sm:$0xff]   ;;  %s7064_s20 = smov 48  }
 0x333   : > { %6806 = vmatmul.msk.bf16.gmra.mxu1 %vm672_vm1, %v3455_v31 }
 0x336   : > { %6812 = vmatmul.msk.bf16.gmra.mxu2 %vm672_vm1, %v3552_v55  ;;  %v3626_v55 = vrot.slane %v8305_v57, 3 }
 0x337   : > { %v8334_v11 = vpop.f32.mrf.mxu0 }
 0x338   : > { %v3151_v36 = vpop.f32.mrf.mxu3  ;;  %v3219_v25 = vpop.f32.mrf.mxu1 }
 0x339   : > { %v3163_v30 = vadd.f32 %v3151_v36, %v3087_v58  ;;  %v3240_v2 = vadd.f32 %v3219_v25, %v8259_v27  ;;  %v3334_v42 = vpop.f32.mrf.mxu2  ;;  %v2340_v27 = vrot.slane %v7021_v16, 3 }
 0x33a   : > { %6763 = vmatmul.msk.bf16.gmra.mxu0 %vm672_vm1, %v2339_v13  ;;  %v3356_v63 = vadd.f32 %v3334_v42, %v3239_v54 }
 0x33b   : > { %v2341_v5 = vsel %vm2306_vm7, %v2338_v15, %v2340_v27 }
 0x33d   : > { %6817 = vmatmul.msk.bf16.gmra.mxu3 %vm672_vm1, %v3625_v8 }
 0x33f   : > { %v8341_v20 = vpop.f32.mrf.mxu0 }
 0x340   : > { %v3404_v23 = vpop.f32.mrf.mxu3  ;;  %v3222_v22 = vpop.f32.mrf.mxu1 }
 0x341   : > { %v8343_v44 = vadd.f32 %v3404_v23, %v3354_v10  ;;  %v3241_v39 = vadd.f32 %v3222_v22, %v8273_v35  ;;  %v3336_v31 = vpop.f32.mrf.mxu2  ;;  %v3627_v35 = vsel %vm2306_vm7, %v3624_v3, %v3626_v55  ;;  %v3082_v3 = vadd.f32 %v8275_v41, %v8257_v32 }
 0x342   : > { %v3357_v58 = vadd.f32 %v3336_v31, %v3240_v2  ;;  %v2342_v31 = vrot.slane %v7888_v60, 3 }
 0x344   : > { %v2343_v55 = vsel %vm2306_vm7, %v2340_v27, %v2342_v31  ;;  %vm4928_vm7 = vcmask 490496  }
 0x347   : > { %v8348_v0 = vpop.f32.mrf.mxu0 }
 0x348   : > { %10509 = vst [vmem:[#allocation23_spill] sm:$0xff] %v8348_v0  ;;  %v3406_v54 = vpop.f32.mrf.mxu3  ;;  %v3224_v13 = vpop.f32.mrf.mxu1 }
 0x349   : > { %v8351_v36 = vadd.f32 %v3406_v54, %v3355_v7  ;;  %v3242_v25 = vadd.f32 %v3224_v13, %v8288_v62  ;;  %v3339_v10 = vpop.f32.mrf.mxu2 }
 0x34a   : > { %6764 = vmatmul.msk.bf16.gmra.mxu0 %vm672_vm1, %v2341_v5  ;;  %v3358_v2 = vadd.f32 %v3339_v10, %v3241_v39  ;;  %v3161_v39 = vadd.f32 %v8312_v48, %v3082_v3 }
 0x34d   : > { %6818 = vmatmul.msk.bf16.gmra.mxu3 %vm672_vm1, %v3627_v35 }
 0x34f   : > { %v2452_v42 = vpop.f32.mrf.mxu0 }
 0x350   : > { %v3409_v57 = vpop.f32.mrf.mxu3  ;;  %v8358_v8 = vadd.f32 %v2452_v42, %v7944_v4  ;;  %v3227_v15 = vpop.f32.mrf.mxu1 }
 0x351   : > { %v8360_v23 = vadd.f32 %v3409_v57, %v3356_v63  ;;  %v3243_v7 = vadd.f32 %v3227_v15, %v8299_v38  ;;  %v3341_v22 = vpop.f32.mrf.mxu2 }
 0x352   : > { %10510 = vst [vmem:[#allocation20_spill] sm:$0xff] %v8358_v8  ;;  %v3359_v62 = vadd.f32 %v3341_v22, %v3242_v25 }
 0x357   : > { %v8367_v16 = vpop.f32.mrf.mxu0 }
 0x358   : > { %10511 = vst [vmem:[#allocation22_spill] sm:$0xff] %v8367_v16  ;;  %v3411_v4 = vpop.f32.mrf.mxu3  ;;  %v3229_v5 = vpop.f32.mrf.mxu1 }
 0x359   : > { %v8370_v54 = vadd.f32 %v3411_v4, %v3357_v58  ;;  %v3244_v63 = vadd.f32 %v3229_v5, %v3161_v39  ;;  %v3344_v13 = vpop.f32.mrf.mxu2 }
 0x35a   : > { %6765 = vmatmul.msk.bf16.gmra.mxu0 %vm672_vm1, %v2343_v55  ;;  %v3360_v38 = vadd.f32 %v3344_v13, %v3243_v7 }
 0x35f   : > { %v2457_v25 = vpop.f32.mrf.mxu0 }
 0x360   : > { %v3414_v60 = vpop.f32.mrf.mxu3  ;;  %v8374_v10 = vadd.f32 %v2457_v25, %v7970_v40  ;;  %v3232_v32 = vpop.f32.mrf.mxu1 }
 0x361   : > { %v8376_v41 = vadd.f32 %v3414_v60, %v3358_v2  ;;  %v3245_v48 = vadd.f32 %v3232_v32, %v8326_v17  ;;  %v3346_v27 = vpop.f32.mrf.mxu2 }
 0x362   : > { %10512 = vst [vmem:[#allocation25_spill] sm:$0xff] %v8374_v10  ;;  %v3361_v35 = vadd.f32 %v3346_v27, %v3244_v63 }
 0x368   : > { %v3416_v42 = vpop.f32.mrf.mxu3  ;;  %v3234_v58 = vpop.f32.mrf.mxu1 }
 0x369   : > { %v8379_v57 = vadd.f32 %v3416_v42, %v3359_v62  ;;  %v3246_v15 = vadd.f32 %v3234_v58, %v3163_v30  ;;  %v3349_v22 = vpop.f32.mrf.mxu2 }
 0x36a   : > { %v3362_v31 = vadd.f32 %v3349_v22, %v3245_v48 }
 0x370   : > { %v3419_v7 = vpop.f32.mrf.mxu3  ;;  %v3483_v55 = vpop.f32.mrf.mxu1 }
 0x371   : > { %v8381_v3 = vadd.f32 %v3419_v7, %v3360_v38  ;;  %v3351_v39 = vpop.f32.mrf.mxu2  ;;  %v3508_v32 = vadd.f32 %v3483_v55, %v8343_v44  ;;  %v8393_v38 = vld [vmem:[%s10349_s5] ss:$0 sm:$0xff] }
 0x372   : > { %v3363_v40 = vadd.f32 %v3351_v39, %v3246_v15  ;;  %v8396_v58 = vrot.slane %v8393_v38, 2  ;;  %v8399_v15 = vrot.slane %v8393_v38, 4  ;;  %v8402_v22 = vrot.slane %v8393_v38, 6 }
 0x378   : > { %v3421_v4 = vpop.f32.mrf.mxu3  ;;  %v3485_v63 = vpop.f32.mrf.mxu1 }
 0x379   : > { %v8383_v2 = vadd.f32 %v3421_v4, %v3361_v35  ;;  %v3580_v5 = vpop.f32.mrf.mxu2 }
 0x37a   : > { %v3605_v27 = vadd.f32 %v3580_v5, %v3508_v32 }
 0x380   : > { %v3424_v17 = vpop.f32.mrf.mxu3  ;;  %v3488_v30 = vpop.f32.mrf.mxu1 }
 0x381   : > { %v8385_v13 = vadd.f32 %v3424_v17, %v3362_v31  ;;  %v3582_v25 = vpop.f32.mrf.mxu2 }
 0x388   : > { %v3426_v62 = vpop.f32.mrf.mxu3  ;;  %v3490_v17 = vpop.f32.mrf.mxu1 }
 0x389   : > { %v8387_v60 = vadd.f32 %v3426_v62, %v3363_v40  ;;  %v3585_v48 = vpop.f32.mrf.mxu2  ;;  %v3509_v40 = vadd.f32 %v3485_v63, %v8351_v36  ;;  %v3510_v36 = vadd.f32 %v3488_v30, %v8360_v23  ;;  %v3511_v23 = vadd.f32 %v3490_v17, %v8370_v54 }
 0x38b   : > { %v3606_v62 = vadd.f32 %v3582_v25, %v3509_v40 }
 0x390   : > { %v3655_v35 = vpop.f32.mrf.mxu3  ;;  %v3493_v25 = vpop.f32.mrf.mxu1 }
 0x391   : > { %v3680_v42 = vadd.f32 %v3655_v35, %v3605_v27  ;;  %v3587_v32 = vpop.f32.mrf.mxu2  ;;  %v3512_v54 = vadd.f32 %v3493_v25, %v8376_v41 }
 0x393   : > { %v3700_v31 = vrot.slane %v3680_v42, 2  ;;  %v3701_v44 = vrot.slane %v3680_v42, 4  ;;  %v3702_v7 = vrot.slane %v3680_v42, 6  ;;  %v3758_v39 = vadd.f32 %v8393_v38, %v3680_v42 }
 0x395   : > { %v3759_v55 = vadd.f32 %v8396_v58, %v3700_v31  ;;  %v3760_v4 = vadd.f32 %v8399_v15, %v3701_v44  ;;  %v3761_v5 = vadd.f32 %v8402_v22, %v3702_v7  ;;  %3822 = vst [vmem:[#allocation1] ss:$4 sm:$0xff] %v3758_v39  ;;  %v3607_v7 = vadd.f32 %v3585_v48, %v3510_v36 }
 0x396   : > { %v3608_v48 = vadd.f32 %v3587_v32, %v3511_v23 }
 0x397   : > { %3824 = vst [vmem:[#allocation1 + $0x1] ss:$4 sm:$0xff] %v3759_v55 }
 0x398   : > { %3826 = vst [vmem:[#allocation1 + $0x2] ss:$4 sm:$0xff] %v3760_v4  ;;  %v3657_v27 = vpop.f32.mrf.mxu3 }
 0x399   : > { %3828 = vst [vmem:[#allocation1 + $0x3] ss:$4 sm:$0xff] %v3761_v5  ;;  %v3681_v35 = vadd.f32 %v3657_v27, %v3606_v62  ;;  %v3590_v55 = vpop.f32.mrf.mxu2 }
 0x39b   : > { %v3703_v10 = vrot.slane %v3681_v35, 2  ;;  %v3704_v37 = vrot.slane %v3681_v35, 4  ;;  %v3705_v42 = vrot.slane %v3681_v35, 6 }
 0x39d   : > { %v3762_v63 = vadd.f32 %v8393_v38, %v3703_v10  ;;  %v3763_v31 = vadd.f32 %v8396_v58, %v3704_v37  ;;  %v3764_v44 = vadd.f32 %v8399_v15, %v3705_v42  ;;  %v3495_v42 = vpop.f32.mrf.mxu1 }
 0x39f   : > { %3831 = vst [vmem:[#allocation1 + $0x20] ss:$4 sm:$0xff] %v3762_v63 }
 0x3a0   : > { %3833 = vst [vmem:[#allocation1 + $0x21] ss:$4 sm:$0xff] %v3763_v31  ;;  %v3660_v39 = vpop.f32.mrf.mxu3  ;;  %v8417_v30 = vld.sshfl [vmem:[#allocation1] sm:$0xff pattern:$0x73625140] }
 0x3a1   : > { %3835 = vst [vmem:[#allocation1 + $0x22] ss:$4 sm:$0xff] %v3764_v44  ;;  %v3682_v40 = vadd.f32 %v3660_v39, %v3607_v7  ;;  %v3592_v44 = vpop.f32.mrf.mxu2  ;;  %v3609_v39 = vadd.f32 %v3590_v55, %v3512_v54 }
 0x3a3   : > { %v3706_v4 = vrot.slane %v3682_v40, 4  ;;  %v3707_v5 = vrot.slane %v3682_v40, 6  ;;  %v3765_v62 = vadd.f32 %v8402_v22, %v3682_v40 }
 0x3a5   : > { %v3766_v10 = vadd.f32 %v8393_v38, %v3706_v4  ;;  %v3767_v37 = vadd.f32 %v8396_v58, %v3707_v5  ;;  %3837 = vst [vmem:[#allocation1 + $0x23] ss:$4 sm:$0xff] %v3765_v62 }
 0x3a7   : > { %3839 = vst [vmem:[#allocation1] ss:$4 sm:$0xff] %v3766_v10  ;;  %v3498_v10 = vpop.f32.mrf.mxu1 }
 0x3a8   : > { %3840 = vst [vmem:[#allocation1 + $0x1] ss:$4 sm:$0xff] %v3767_v37  ;;  %v3662_v27 = vpop.f32.mrf.mxu3  ;;  %v3513_v37 = vadd.f32 %v3495_v42, %v8379_v57  ;;  %v3514_v57 = vadd.f32 %v3498_v10, %v8381_v3 }
 0x3a9   : > { %v3683_v35 = vadd.f32 %v3662_v27, %v3608_v48  ;;  %v3595_v48 = vpop.f32.mrf.mxu2 }
 0x3aa   : > { %v3610_v55 = vadd.f32 %v3592_v44, %v3513_v37 }
 0x3ab   : > { %v3708_v36 = vrot.slane %v3683_v35, 2  ;;  %v3709_v63 = vrot.slane %v3683_v35, 6  ;;  %v3768_v31 = vadd.f32 %v8399_v15, %v3683_v35 }
 0x3ac   : > { %v8423_v40 = vld.sshfl [vmem:[#allocation1 + $0x20] sm:$0xff pattern:$0x73625140] }
 0x3ad   : > { %v3769_v17 = vadd.f32 %v8402_v22, %v3708_v36  ;;  %v3770_v7 = vadd.f32 %v8393_v38, %v3709_v63  ;;  %3841 = vst [vmem:[#allocation1 + $0x2] ss:$4 sm:$0xff] %v3768_v31 }
 0x3af   : > { %3842 = vst [vmem:[#allocation1 + $0x3] ss:$4 sm:$0xff] %v3769_v17  ;;  %v3500_v44 = vpop.f32.mrf.mxu1 }
 0x3b0   : > { %3844 = vst [vmem:[#allocation1 + $0x20] ss:$4 sm:$0xff] %v3770_v7  ;;  %v3665_v32 = vpop.f32.mrf.mxu3  ;;  %v3515_v3 = vadd.f32 %v3500_v44, %v8383_v2 }
 0x3b1   : > { %v3684_v4 = vadd.f32 %v3665_v32, %v3609_v39  ;;  %v3611_v32 = vadd.f32 %v3595_v48, %v3514_v57 }
 0x3b3   : > { %v3710_v5 = vrot.slane %v3684_v4, 2  ;;  %v3711_v62 = vrot.slane %v3684_v4, 4  ;;  %v3771_v23 = vadd.f32 %v8396_v58, %v3684_v4  ;;  %v3597_v4 = vpop.f32.mrf.mxu2 }
 0x3b4   : > { %v3612_v48 = vadd.f32 %v3597_v4, %v3515_v3 }
 0x3b5   : > { %v3772_v41 = vadd.f32 %v8399_v15, %v3710_v5  ;;  %v3773_v25 = vadd.f32 %v8402_v22, %v3711_v62  ;;  %3845 = vst [vmem:[#allocation1 + $0x21] ss:$4 sm:$0xff] %v3771_v23 }
 0x3b6   : > { %v8430_v17 = vld.sshfl [vmem:[#allocation1] sm:$0xff pattern:$0x73625140] }
 0x3b7   : > { %3846 = vst [vmem:[#allocation1 + $0x22] ss:$4 sm:$0xff] %v3772_v41 }
 0x3b8   : > { %3847 = vst [vmem:[#allocation1 + $0x23] ss:$4 sm:$0xff] %v3773_v25  ;;  %v3667_v27 = vpop.f32.mrf.mxu3 }
 0x3b9   : > { %v3685_v35 = vadd.f32 %v3667_v27, %v3610_v55 }
 0x3bb   : > { %v3712_v36 = vrot.slane %v3685_v35, 2  ;;  %v3713_v63 = vrot.slane %v3685_v35, 4  ;;  %v3714_v31 = vrot.slane %v3685_v35, 6  ;;  %v3774_v54 = vadd.f32 %v8393_v38, %v3685_v35  ;;  %v3503_v35 = vpop.f32.mrf.mxu1 }
 0x3bd   : > { %v3775_v42 = vadd.f32 %v8396_v58, %v3712_v36  ;;  %v3776_v7 = vadd.f32 %v8399_v15, %v3713_v63  ;;  %v3777_v39 = vadd.f32 %v8402_v22, %v3714_v31  ;;  %3849 = vst [vmem:[#allocation1] ss:$4 sm:$0xff] %v3774_v54  ;;  %v3600_v31 = vpop.f32.mrf.mxu2 }
 0x3bf   : > { %3850 = vst [vmem:[#allocation1 + $0x1] ss:$4 sm:$0xff] %v3775_v42  ;;  %v8440_v27 = vld.sshfl [vmem:[#allocation1 + $0x20] sm:$0xff pattern:$0x73625140]  ;;  %v3516_v42 = vadd.f32 %v3503_v35, %v8385_v13 }
 0x3c0   : > { %3851 = vst [vmem:[#allocation1 + $0x2] ss:$4 sm:$0xff] %v3776_v7  ;;  %v3670_v5 = vpop.f32.mrf.mxu3 }
 0x3c1   : > { %3852 = vst [vmem:[#allocation1 + $0x3] ss:$4 sm:$0xff] %v3777_v39  ;;  %v3686_v62 = vadd.f32 %v3670_v5, %v3611_v32  ;;  %v3613_v32 = vadd.f32 %v3600_v31, %v3516_v42 }
 0x3c3   : > { %v3715_v23 = vrot.slane %v3686_v62, 2  ;;  %v3716_v37 = vrot.slane %v3686_v62, 4  ;;  %v3717_v41 = vrot.slane %v3686_v62, 6  ;;  %v3505_v62 = vpop.f32.mrf.mxu1 }
 0x3c5   : > { %v3778_v10 = vadd.f32 %v8393_v38, %v3715_v23  ;;  %v3779_v25 = vadd.f32 %v8396_v58, %v3716_v37  ;;  %v3780_v55 = vadd.f32 %v8399_v15, %v3717_v41  ;;  %v3602_v3 = vpop.f32.mrf.mxu2 }
 0x3c7   : > { %3854 = vst [vmem:[#allocation1 + $0x20] ss:$4 sm:$0xff] %v3778_v10  ;;  %v3517_v10 = vadd.f32 %v3505_v62, %v8387_v60 }
 0x3c8   : > { %3855 = vst [vmem:[#allocation1 + $0x21] ss:$4 sm:$0xff] %v3779_v25  ;;  %v3672_v36 = vpop.f32.mrf.mxu3  ;;  %v3853_v44 = vld.sshfl [vmem:[#allocation1] sm:$0xff pattern:$0x73625140] }
 0x3c9   : > { %3856 = vst [vmem:[#allocation1 + $0x22] ss:$4 sm:$0xff] %v3780_v55  ;;  %v3687_v63 = vadd.f32 %v3672_v36, %v3612_v48  ;;  %v3881_v55 = vpack.c.bf16 %v3853_v44, %v3853_v44  ;;  %v3614_v48 = vadd.f32 %v3602_v3, %v3517_v10 }
 0x3cb   : > { %v3718_v54 = vrot.slane %v3687_v63, 4  ;;  %v3719_v57 = vrot.slane %v3687_v63, 6  ;;  %v3781_v2 = vadd.f32 %v8402_v22, %v3687_v63  ;;  %v7047_v63 = vmov 1983009808  }
 0x3cc   : > { %v3891_v31 = vunpack.c.l.s4 %v7047_v63 }
 0x3cd   : > { %v3782_v7 = vadd.f32 %v8393_v38, %v3718_v54  ;;  %v3783_v39 = vadd.f32 %v8396_v58, %v3719_v57  ;;  %3857 = vst [vmem:[#allocation1 + $0x23] ss:$4 sm:$0xff] %v3781_v2  ;;  %v3887_v57 = vrot.slane %v3881_v55, 4 }
 0x3cf   : > { %3859 = vst [vmem:[#allocation1] ss:$4 sm:$0xff] %v3782_v7  ;;  %v3877_v7 = vpack.c.bf16 %v8417_v30, %v8417_v30  ;;  %v3879_v30 = vpack.c.bf16 %v8430_v17, %v8430_v17 }
 0x3d0   : > { %3860 = vst [vmem:[#allocation1 + $0x1] ss:$4 sm:$0xff] %v3783_v39  ;;  %v3675_v4 = vpop.f32.mrf.mxu3 }
 0x3d1   : > { %v3688_v5 = vadd.f32 %v3675_v4, %v3613_v32  ;;  %v3889_v32 = vsel %vm3888_vm8, %v3887_v57, %v3877_v7 }
 0x3d3   : > { %v3720_v23 = vrot.slane %v3688_v5, 2  ;;  %v3721_v37 = vrot.slane %v3688_v5, 6  ;;  %v3784_v41 = vadd.f32 %v8399_v15, %v3688_v5 }
 0x3d4   : > { %v3858_v35 = vld.sshfl [vmem:[#allocation1 + $0x20] sm:$0xff pattern:$0x73625140] }
 0x3d5   : > { %v3785_v13 = vadd.f32 %v8402_v22, %v3720_v23  ;;  %v3786_v25 = vadd.f32 %v8393_v38, %v3721_v37  ;;  %3861 = vst [vmem:[#allocation1 + $0x2] ss:$4 sm:$0xff] %v3784_v41  ;;  %v8453_v38 = vunpack.c.0.s8 %v3891_v31  ;;  %v3882_v5 = vpack.c.bf16 %v3858_v35, %v3858_v35 }
 0x3d7   : > { %3862 = vst [vmem:[#allocation1 + $0x3] ss:$4 sm:$0xff] %v3785_v13  ;;  %v3893_v23 = vperm.slane %v3889_v32, %v8453_v38  ;;  %v3916_v3 = vrot.slane %v3882_v5, 4 }
 0x3d8   : > { %3864 = vst [vmem:[#allocation1 + $0x20] ss:$4 sm:$0xff] %v3786_v25  ;;  %v3677_v36 = vpop.f32.mrf.mxu3 }
 0x3d9   : > { %v3689_v54 = vadd.f32 %v3677_v36, %v3614_v48  ;;  %10513 = vst [vmem:[#allocation24_spill] sm:$0xff] %v8453_v38  ;;  %v3902_v13 = vrot.slane %v3893_v23, 4 }
 0x3db   : > { %v3722_v2 = vrot.slane %v3689_v54, 2  ;;  %v3723_v42 = vrot.slane %v3689_v54, 4  ;;  %v3787_v60 = vadd.f32 %v8396_v58, %v3689_v54  ;;  %v7048_v58 = vmov 1934713408  }
 0x3dc   : > { %v3905_v37 = vunpack.c.l.s4 %v7048_v58 }
 0x3dd   : > { %v3788_v39 = vadd.f32 %v8399_v15, %v3722_v2  ;;  %v3789_v44 = vadd.f32 %v8402_v22, %v3723_v42  ;;  %3865 = vst [vmem:[#allocation1 + $0x21] ss:$4 sm:$0xff] %v3787_v60  ;;  %v3878_v22 = vpack.c.bf16 %v8423_v40, %v8423_v40  ;;  %v3880_v40 = vpack.c.bf16 %v8440_v27, %v8440_v27 }
 0x3de   : > { %v3863_v4 = vld.sshfl [vmem:[#allocation1] sm:$0xff pattern:$0x73625140]  ;;  %v8465_v25 = vunpack.c.0.s8 %v3905_v37 }
 0x3df   : > { %3866 = vst [vmem:[#allocation1 + $0x22] ss:$4 sm:$0xff] %v3788_v39  ;;  %v3883_v62 = vpack.c.bf16 %v3863_v4, %v3863_v4  ;;  %v3917_v35 = vsel %vm3888_vm8, %v3916_v3, %v3878_v22 }
 0x3e0   : > { %3867 = vst [vmem:[#allocation1 + $0x23] ss:$4 sm:$0xff] %v3789_v44  ;;  %v3921_v54 = vperm.slane %v3917_v35, %v8453_v38 }
 0x3e1   : > { %v3894_v41 = vrot.slane %v3883_v62, 4  ;;  %10514 = vst [vmem:[#allocation3_spill] sm:$0xff] %v8465_v25 }
 0x3e2   : > { %v3930_v39 = vrot.slane %v3921_v54, 4 }
 0x3e3   : > { %v3895_v15 = vsel %vm3888_vm8, %v3894_v41, %v3879_v30 }
 0x3e4   : > { %v3899_v10 = vperm.slane %v3895_v15, %v8453_v38 }
 0x3e6   : > { %v3900_v55 = vrot.slane %v3899_v10, 4  ;;  %v3903_v48 = vsel %vm3888_vm8, %v3899_v10, %v3902_v13 }
 0x3e7   : > { %v3868_v36 = vld.sshfl [vmem:[#allocation1 + $0x20] sm:$0xff pattern:$0x73625140]  ;;  %v3911_v31 = vperm.slane %v3903_v48, %v8465_v25 }
 0x3e8   : > { %v3884_v63 = vpack.c.bf16 %v3868_v36, %v3868_v36  ;;  %v3901_v17 = vsel %vm3888_vm8, %v3900_v55, %v3893_v23 }
 0x3e9   : > { %v3907_v2 = vperm.slane %v3901_v17, %v8465_v25  ;;  %v3914_v42 = vrot.slane %v3911_v31, 4  ;;  %v3964_v15 = vshrl.u32 %v3911_v31, 16 }
 0x3ea   : > { %v3922_v57 = vrot.slane %v3884_v63, 4 }
 0x3eb   : > { %v3912_v44 = vrot.slane %v3907_v2, 4  ;;  %v3915_v5 = vsel %vm3888_vm8, 0, %v3914_v42  ;;  %v3948_v3 = vshrl.u32 %v3907_v2, 16 }
 0x3ec   : > { %v3923_v60 = vsel %vm3888_vm8, %v3922_v57, %v3880_v40  ;;  %v3972_v22 = vshrl.u32 %v3915_v5, 16 }
 0x3ed   : > { %v3927_v7 = vperm.slane %v3923_v60, %v8453_v38  ;;  %v3913_v41 = vsel %vm3888_vm8, 0, %v3912_v44 }
 0x3ee   : > { %v3956_v57 = vshrl.u32 %v3913_v41, 16 }
 0x3ef   : > { %v3928_v32 = vrot.slane %v3927_v7, 4  ;;  %v3931_v4 = vsel %vm3888_vm8, %v3927_v7, %v3930_v39 }
 0x3f0   : > { %v3939_v62 = vperm.slane %v3931_v4, %v8465_v25 }
 0x3f1   : > { %v3929_v23 = vsel %vm3888_vm8, %v3928_v32, %v3921_v54 }
 0x3f2   : > { %v3935_v27 = vperm.slane %v3929_v23, %v8465_v25  ;;  %v3942_v58 = vrot.slane %v3939_v62, 4  ;;  %v3962_v37 = vpack.i.b16 %v3939_v62, %v3911_v31  ;;  %v3965_v30 = vshrl.u32 %v3939_v62, 16 }
 0x3f4   : > { %v3940_v10 = vrot.slane %v3935_v27, 4  ;;  %v3943_v13 = vsel %vm3888_vm8, 0, %v3942_v58  ;;  %v3946_v55 = vpack.i.b16 %v3935_v27, %v3907_v2  ;;  %v3949_v48 = vshrl.u32 %v3935_v27, 16 }
 0x3f5   : > { %v3966_v35 = vpack.i.b16 %v3965_v30, %v3964_v15  ;;  %v3970_v36 = vpack.i.b16 %v3943_v13, %v3915_v5  ;;  %v3973_v63 = vshrl.u32 %v3943_v13, 16  ;;  %v3976_v17 = vrot.slane %v3962_v37, 4 }
 0x3f6   : > { %v3941_v54 = vsel %vm3888_vm8, 0, %v3940_v10  ;;  %v3950_v40 = vpack.i.b16 %v3949_v48, %v3948_v3 }
 0x3f7   : > { %v3954_v42 = vpack.i.b16 %v3941_v54, %v3913_v41  ;;  %v3957_v60 = vshrl.u32 %v3941_v54, 16  ;;  %v3974_v7 = vpack.i.b16 %v3973_v63, %v3972_v22  ;;  %v3977_v39 = vsel %vm3888_vm8, %v3976_v17, %v3946_v55 }
 0x3f8   : > { %v3981_v31 = vperm.slane %v3977_v39, %v8453_v38  ;;  %v3982_v44 = vrot.slane %v3970_v36, 4  ;;  %v4004_v32 = vrot.slane %v3966_v35, 4 }
 0x3f9   : > { %v3958_v4 = vpack.i.b16 %v3957_v60, %v3956_v57  ;;  %v4010_v2 = vrot.slane %v3974_v7, 4 }
 0x3fa   : > { %v3983_v62 = vsel %vm3888_vm8, %v3982_v44, %v3954_v42  ;;  %v3990_v5 = vrot.slane %v3981_v31, 4  ;;  %v4005_v23 = vsel %vm3888_vm8, %v4004_v32, %v3950_v40 }
 0x3fb   : > { %v3987_v27 = vperm.slane %v3983_v62, %v8453_v38  ;;  %v4009_v58 = vperm.slane %v4005_v23, %v8453_v38  ;;  %v4011_v37 = vsel %vm3888_vm8, %v4010_v2, %v3958_v4 }
 0x3fc   : > { %v4015_v30 = vperm.slane %v4011_v37, %v8453_v38 }
 0x3fd   : > { %v3991_v41 = vsel %vm3888_vm8, %v3987_v27, %v3990_v5  ;;  %v4018_v3 = vrot.slane %v4009_v58, 4  ;;  %v3988_v15 = vrot.slane %v3987_v27, 4 }
 0x3fe   : > { %v3999_v22 = vperm.slane %v3991_v41, %v8465_v25  ;;  %v4016_v10 = vrot.slane %v4015_v30, 4 }
 0x3ff   : > { %v4019_v13 = vsel %vm3888_vm8, %v4015_v30, %v4018_v3  ;;  %v3989_v55 = vsel %vm3888_vm8, %v3988_v15, %v3981_v31 }
 0x400   : > { %v4027_v48 = vperm.slane %v4019_v13, %v8465_v25  ;;  %v8499_v35 = vperm.slane %v3989_v55, %v8465_v25  ;;  %v4017_v36 = vsel %vm3888_vm8, %v4016_v10, %v4009_v58  ;;  %v4047_v17 = vshrl.u32 %v3999_v22, 16 }
 0x401   : > { %v8503_v63 = vperm.slane %v4017_v36, %v8465_v25  ;;  %v4002_v39 = vrot.slane %v3999_v22, 4 }
 0x402   : > { %v4048_v54 = vshrl.u32 %v4027_v48, 16  ;;  %v4000_v40 = vrot.slane %v8499_v35, 4  ;;  %v4030_v57 = vrot.slane %v4027_v48, 4  ;;  %v4035_v42 = vshrl.u32 %v8499_v35, 16 }
 0x403   : > { %v4036_v60 = vshrl.u32 %v8503_v63, 16  ;;  %v4028_v7 = vrot.slane %v8503_v63, 4  ;;  %v4003_v58 = vsel %vm3888_vm8, 0, %v4002_v39  ;;  %v4034_v37 = vpack.i.b16 %v8503_v63, %v8499_v35 }
 0x404   : > { %v4049_v31 = vpack.i.b16 %v4048_v54, %v4047_v17  ;;  %v4001_v44 = vsel %vm3888_vm8, 0, %v4000_v40  ;;  %v4031_v2 = vsel %vm3888_vm8, 0, %v4030_v57  ;;  %v4046_v17 = vpack.i.b16 %v4027_v48, %v3999_v22 }
 0x405   : > { %v4037_v32 = vpack.i.b16 %v4036_v60, %v4035_v42  ;;  %v4029_v4 = vsel %vm3888_vm8, 0, %v4028_v7  ;;  %v4041_v5 = vshrl.u32 %v4001_v44, 16  ;;  %v4052_v3 = vpack.i.b16 %v4031_v2, %v4003_v58 }
 0x406   : > { %v4072_v62 = vunpack.c.l.b16 %v4049_v31  ;;  %v4042_v23 = vshrl.u32 %v4029_v4, 16  ;;  %v4040_v10 = vpack.i.b16 %v4029_v4, %v4001_v44  ;;  %v4054_v40 = vshrl.u32 %v4031_v2, 16 }
 0x407   : > { %v4056_v27 = vunpack.c.l.b16 %v4037_v32  ;;  %v4076_v36 = vunpack.c.l.b16 %v4052_v3  ;;  %v4053_v35 = vshrl.u32 %v4003_v58, 16  ;;  %v4068_v57 = vunpack.c.l.b16 %v4046_v17 }
 0x408   : > { %v4073_v30 = vpack.c.b16 %v4072_v62, %v4072_v62  ;;  %v4043_v41 = vpack.i.b16 %v4042_v23, %v4041_v5  ;;  %v4060_v54 = vunpack.c.l.b16 %v4040_v10  ;;  %v7056_v48 = vmov 0.0  }
 0x409   : > { %v4057_v15 = vpack.c.b16 %v4056_v27, %v4056_v27  ;;  %v4077_v63 = vpack.c.b16 %v4076_v36, %v4076_v36  ;;  %v4055_v60 = vpack.i.b16 %v4054_v40, %v4053_v35  ;;  %v4069_v7 = vpack.c.b16 %v4068_v57, %v4068_v57 }
 0x40a   : > { %4074 = vrot.lane.b32.xlu2 %v4073_v30, %s7049_s19  ;;  %v4064_v13 = vunpack.c.l.b16 %v4043_v41  ;;  %v4061_v42 = vpack.c.b16 %v4060_v54, %v4060_v54  ;;  %v4111_v31 = vperm.slane %v7056_v48, %v8453_v38 }
 0x40b   : > { %4058 = vrot.lane.b32.xlu0 %v4057_v15, %s7050_s21  ;;  %v4080_v39 = vunpack.c.l.b16 %v4055_v60 }
 0x40c   : > { %v4065_v55 = vpack.c.b16 %v4064_v13, %v4064_v13  ;;  %v4116_v44 = vrot.slane %v4111_v31, 4 }
 0x40d   : > { %v4081_v22 = vpack.c.b16 %v4080_v39, %v4080_v39 }
 0x40e   : > { %4066 = vrot.lane.b32.xlu1 %v4065_v55, %s7051_s22  ;;  %v4117_v32 = vsel %vm3888_vm8, %v4116_v44, %v4111_v31  ;;  %v4118_v5 = vsel %vm3888_vm8, %v4111_v31, %v4116_v44 }
 0x40f   : > { %v4122_v4 = vperm.slane %v4117_v32, %v8465_v25  ;;  %v4126_v23 = vperm.slane %v4118_v5, %v8465_v25 }
 0x411   : > { %v4138_v2 = vrot.slane %v4122_v4, 4  ;;  %v4141_v27 = vrot.slane %v4126_v23, 4 }
 0x412   : > { %4078 = vrot.lane.b32.xlu2 %v4077_v63, %s7052_s23 }
 0x413   : > { %4062 = vrot.lane.b32.xlu0 %v4061_v42, %s7053_s24  ;;  %v8526_v62 = vsel %vm3888_vm8, %v4122_v4, %v4138_v2  ;;  %v8533_v58 = vsel %vm3888_vm8, %v4138_v2, %v4122_v4  ;;  %v8536_v30 = vsel %vm3888_vm8, %v4126_v23, %v4141_v27  ;;  %v8539_v41 = vsel %vm3888_vm8, %v4141_v27, %v4126_v23 }
 0x416   : > { %4070 = vrot.lane.b32.xlu1 %v4069_v7, %s7054_s25  ;;  %v6850_v7 = vld [vmem:[%s10351_s7] sm:$0xff] }
 0x41a   : > { %4155 = vrot.lane.b32.xlu2 %v8539_v41, %s7053_s24 }
 0x41b   : > { %4082 = vrot.lane.b32.xlu0 %v4081_v22, %s7055_s26 }
 0x41e   : > { %4151 = vrot.lane.b32.xlu1 %v8526_v62, %s7050_s21 }
 0x422   : > { %4167 = vrot.lane.b32.xlu2 %v8526_v62, %s7049_s19 }
 0x423   : > { %4159 = vrot.lane.b32.xlu0 %v8536_v30, %s7051_s22 }
 0x426   : > { %4163 = vrot.lane.b32.xlu1 %v8533_v58, %s7054_s25 }
 0x42b   : > { %4171 = vrot.lane.b32.xlu0 %v8539_v41, %s7052_s23 }
 0x42e   : > { %4175 = vrot.lane.b32.xlu1 %v8536_v30, %s7055_s26 }
 0x464   : > { %v4075_v10 = vpop.permute.xlu2 %4074 }
 0x46c   : > { %v4079_v63 = vpop.permute.xlu2 %4078 }
 0x474   : > { %v4156_v22 = vpop.permute.xlu2 %4155 }
 0x47c   : > { %v4168_v5 = vpop.permute.xlu2 %4167 }
 0x47d   : > { %v4059_v3 = vpop.permute.xlu0 %4058 }
 0x47e   : > { %v4086_v13 = vsel %vm672_vm1, %v4034_v37, %v4059_v3 }
 0x480   : > { %v4067_v15 = vpop.permute.xlu1 %4066 }
 0x485   : > { %v4063_v55 = vpop.permute.xlu0 %4062 }
 0x486   : > { %v4089_v36 = vsel %vm4087_vm9, %v4086_v13, %v4063_v55 }
 0x487   : > { %v4092_v17 = vsel %vm4090_vm10, %v4089_v36, %v4067_v15 }
 0x488   : > { %v4071_v54 = vpop.permute.xlu1 %4070 }
 0x489   : > { %v4095_v40 = vsel %vm4093_vm11, %v4092_v17, %v4071_v54 }
 0x48a   : > { %v4098_v35 = vsel %vm4096_vm12, %v4095_v40, %v4075_v10 }
 0x48b   : > { %v4101_v57 = vsel %vm4099_vm13, %v4098_v35, %v4079_v63 }
 0x48d   : > { %v4083_v42 = vpop.permute.xlu0 %4082 }
 0x48e   : > { %v4104_v37 = vsel %vm4102_vm14, %v4101_v57, %v4083_v42 }
 0x48f   : > { %v4194_v60 = vsel %vm4193_vm15, %v4104_v37, 0 }
 0x490   : > { %4203 = vmatpush.bf16.msrb.mxu1 %v4194_v60  ;;  %v4152_v39 = vpop.permute.xlu1 %4151 }
 0x491   : > { %v4178_v48 = vsel %vm672_vm1, %v8533_v58, %v4152_v39 }
 0x492   : > { %v4179_v44 = vsel %vm4087_vm9, %v4178_v48, %v4156_v22 }
 0x493   : > { %6823 = vmatmul.msk.bf16.vlgmr.msrb.gmra.mxu1 %vm4087_vm9, %v6850_v7 }
 0x495   : > { %v4160_v31 = vpop.permute.xlu0 %4159 }
 0x496   : > { %v4180_v4 = vsel %vm4090_vm10, %v4179_v44, %v4160_v31 }
 0x498   : > { %v4164_v32 = vpop.permute.xlu1 %4163 }
 0x499   : > { %v4181_v2 = vsel %vm4093_vm11, %v4180_v4, %v4164_v32 }
 0x49a   : > { %v4182_v27 = vsel %vm4096_vm12, %v4181_v2, %v4168_v5 }
 0x49d   : > { %v4172_v3 = vpop.permute.xlu0 %4171 }
 0x49e   : > { %v4183_v15 = vsel %vm4099_vm13, %v4182_v27, %v4172_v3 }
 0x4a0   : > { %v4176_v10 = vpop.permute.xlu1 %4175 }
 0x4a1   : > { %v8573_v13 = vsel %vm4102_vm14, %v4183_v15, %v4176_v10 }
 0x510   : > { %v4205_v23 = vpop.f32.mrf.mxu1 }
 0x511   : > { %v8576_v36 = vadd.f32 %v4205_v23, %v8573_v13 }
 0x518   : > { %v4207_v55 = vpop.f32.mrf.mxu1 }
 0x519   : > { %v8579_v17 = vadd.f32 %v4207_v55, %v8573_v13 }
 0x51b   : > { %v6989_v54 = vpack.i.bf16 %v8579_v17, %v8576_v36 }
 0x51d   : > { %6990 = vrot.lane.b32.xlu1 %v6989_v54, %s7057_s11  ;;  %6985 = vrot.lane.b32.xlu0 %v6989_v54, %s7058_s12 }
 0x51e   : > { %6980 = vrot.lane.b32.xlu2 %v6989_v54, %s7059_s13 }
 0x525   : > { %4218 = vrot.lane.b32.xlu1 %v8576_v36, %s7060_s14  ;;  %4248 = vrot.lane.b32.xlu0 %v8576_v36, %s7061_s15 }
 0x526   : > { %6995 = vrot.lane.b32.xlu2 %v6989_v54, %s7062_s16 }
 0x52d   : > { %4220 = vrot.lane.b32.xlu1 %v8579_v17, %s7060_s14  ;;  %4250 = vrot.lane.b32.xlu0 %v8579_v17, %s7061_s15 }
 0x52e   : > { %4242 = vrot.lane.b32.xlu2 %v8576_v36, %s7063_s17 }
 0x536   : > { %4244 = vrot.lane.b32.xlu2 %v8579_v17, %s7063_s17 }
 0x578   : > { %v6981_v40 = vpop.permute.xlu2 %6980 }
 0x579   : > { %v6982_v37 = vunpack.i.l.bf16 %v6981_v40  ;;  %v6983_v7 = vunpack.i.h.bf16 %v6981_v40 }
 0x57b   : > { %v4268_v32 = vrot.slane %v6982_v37, 4  ;;  %v4380_v23 = vrot.slane %v6983_v7, 4 }
 0x580   : > { %v6996_v35 = vpop.permute.xlu2 %6995 }
 0x581   : > { %v6997_v63 = vunpack.i.l.bf16 %v6996_v35  ;;  %v6998_v22 = vunpack.i.h.bf16 %v6996_v35 }
 0x583   : > { %v4280_v60 = vrot.slane %v6997_v63, 4  ;;  %v4392_v54 = vrot.slane %v6998_v22, 4 }
 0x588   : > { %v4243_v57 = vpop.permute.xlu2 %4242 }
 0x589   : > { %v4278_v42 = vrot.slane %v4243_v57, 4  ;;  %v4281_v39 = vsel %vm3888_vm8, %v4243_v57, %v4280_v60 }
 0x58a   : > { %v4289_v27 = vperm.slane %v4281_v39, %v8453_v38 }
 0x58b   : > { %v4279_v48 = vsel %vm3888_vm8, %v4278_v42, %v6997_v63 }
 0x58c   : > { %v4285_v3 = vperm.slane %v4279_v48, %v8453_v38  ;;  %v4256_v48 = vrot.slane %v8576_v36, 4 }
 0x58e   : > { %v4328_v1 = vrot.slane %v4285_v3, 4 }
 0x58f   : > { %v6991_v31 = vpop.permute.xlu1 %6990  ;;  %v8601_v44 = vpop.permute.xlu0 %6985 }
 0x590   : > { %v6993_v4 = vunpack.i.h.bf16 %v6991_v31  ;;  %v6992_v2 = vunpack.i.l.bf16 %v6991_v31  ;;  %v4245_v5 = vpop.permute.xlu2 %4244  ;;  %v6987_v35 = vunpack.i.l.bf16 %v8601_v44 }
 0x591   : > { %v4390_v63 = vrot.slane %v4245_v5, 4  ;;  %v4393_v39 = vsel %vm3888_vm8, %v4245_v5, %v4392_v54 }
 0x592   : > { %v4378_v15 = vrot.slane %v6993_v4, 4  ;;  %v4266_v10 = vrot.slane %v6992_v2, 4  ;;  %v4269_v55 = vsel %vm3888_vm8, %v6992_v2, %v4268_v32  ;;  %v4381_v42 = vsel %vm3888_vm8, %v6993_v4, %v4380_v23 }
 0x593   : > { %v4277_v60 = vperm.slane %v4269_v55, %v8453_v38  ;;  %v4340_v32 = vrot.slane %v4289_v27, 4  ;;  %v8617_v50 = vperm.slane %v4381_v42, %v8453_v38  ;;  %v4292_v23 = vrot.slane %v6987_v35, 4 }
 0x594   : > { %v4267_v57 = vsel %vm3888_vm8, %v4266_v10, %v6982_v37  ;;  %v4379_v40 = vsel %vm3888_vm8, %v4378_v15, %v6983_v7  ;;  %v10515_v37 = vunpack.i.h.bf16 %v8601_v44  ;;  %v8624_v5 = vsel %vm3888_vm8, %v4390_v63, %v6998_v22 }
 0x595   : > { %v4273_v2 = vperm.slane %v4267_v57, %v8453_v38  ;;  %v8627_v54 = vperm.slane %v4393_v39, %v8453_v38  ;;  %v4314_v15 = vrot.slane %v4277_v60, 4  ;;  %v8631_v42 = vperm.slane %v4379_v40, %v8453_v38 }
 0x596   : > { %v8621_v4 = vrot.slane %v10515_v37, 4  ;;  %v4426_v34 = vrot.slane %v8617_v50, 4 }
 0x597   : > { %v4219_v10 = vpop.permute.xlu1 %4218  ;;  %v4249_v55 = vpop.permute.xlu0 %4248  ;;  %v4302_v28 = vrot.slane %v4273_v2, 4 }
 0x598   : > { %v4254_v31 = vrot.slane %v4219_v10, 4  ;;  %v4257_v57 = vsel %vm3888_vm8, %v4219_v10, %v4256_v48  ;;  %v4290_v7 = vrot.slane %v4249_v55, 4  ;;  %v4293_v52 = vsel %vm3888_vm8, %v4249_v55, %v4292_v23 }
 0x599   : > { %v4265_v37 = vperm.slane %v4257_v57, %v8453_v38  ;;  %v4301_v39 = vperm.slane %v4293_v52, %v8453_v38 }
 0x59a   : > { %v4255_v22 = vsel %vm3888_vm8, %v4254_v31, %v8576_v36  ;;  %v4291_v63 = vsel %vm3888_vm8, %v4290_v7, %v6987_v35 }
 0x59b   : > { %v4261_v9 = vperm.slane %v4255_v22, %v8453_v38  ;;  %v4315_v48 = vsel %vm3888_vm8, %v4314_v15, %v4265_v37  ;;  %v4316_v10 = vrot.slane %v4265_v37, 4  ;;  %v4297_v40 = vperm.slane %v4291_v63, %v8453_v38 }
 0x59c   : > { %v4321_v57 = vperm.slane %v4315_v48, %v8465_v25  ;;  %v4338_v23 = vrot.slane %v4301_v39, 4  ;;  %v4341_v55 = vsel %vm3888_vm8, %v4301_v39, %v4340_v32 }
 0x59d   : > { %v4303_v36 = vsel %vm3888_vm8, %v4302_v28, %v4261_v9  ;;  %v4304_v31 = vrot.slane %v4261_v9, 4  ;;  %v4317_v35 = vsel %vm3888_vm8, %v4277_v60, %v4316_v10  ;;  %v4326_v52 = vrot.slane %v4297_v40, 4 }
 0x59e   : > { %v4309_v7 = vperm.slane %v4303_v36, %v8465_v25  ;;  %v4325_v15 = vperm.slane %v4317_v35, %v8465_v25  ;;  %v4360_v37 = vrot.slane %v4321_v57, 4  ;;  %v4329_v22 = vsel %vm3888_vm8, %v4297_v40, %v4328_v1 }
 0x59f   : > { %v4305_v63 = vsel %vm3888_vm8, %v4273_v2, %v4304_v31  ;;  %v4327_v48 = vsel %vm3888_vm8, %v4326_v52, %v4285_v3  ;;  %v4337_v6 = vperm.slane %v4329_v22, %v8465_v25  ;;  %v4339_v32 = vsel %vm3888_vm8, %v4338_v23, %v4289_v27  ;;  %v4221_v28 = vpop.permute.xlu1 %4220  ;;  %v4251_v0 = vpop.permute.xlu0 %4250 }
 0x5a0   : > { %v4313_v9 = vperm.slane %v4305_v63, %v8465_v25  ;;  %v4352_v60 = vrot.slane %v4309_v7, 4  ;;  %v4364_v39 = vrot.slane %v4325_v15, 4  ;;  %v4333_v10 = vperm.slane %v4327_v48, %v8465_v25 }
 0x5a1   : > { %v4414_v36 = vrot.slane %v8631_v42, 4  ;;  %v4345_v35 = vperm.slane %v4339_v32, %v8465_v25  ;;  %v4349_v1 = vperm.slane %v4341_v55, %v8465_v25  ;;  %v4354_v2 = vrot.slane %v4337_v6, 4 }
 0x5a2   : > { %v4356_v40 = vrot.slane %v4313_v9, 4  ;;  %v4350_v3 = vrot.slane %v4333_v10, 4  ;;  %v4353_v31 = vsel %vm3888_vm8, %v4333_v10, %v4352_v60  ;;  %v4366_v52 = vrot.slane %v4221_v28, 4 }
 0x5a3   : > { %v4355_v27 = vsel %vm3888_vm8, %v4354_v2, %v4313_v9  ;;  %v4358_v23 = vrot.slane %v4345_v35, 4  ;;  %v4361_v22 = vsel %vm3888_vm8, %v4345_v35, %v4360_v37  ;;  %v4362_v63 = vrot.slane %v4349_v1, 4 }
 0x5a4   : > { %v4351_v48 = vsel %vm3888_vm8, %v4350_v3, %v4309_v7  ;;  %v4357_v8 = vsel %vm3888_vm8, %v4337_v6, %v4356_v40  ;;  %v4365_v32 = vsel %vm3888_vm8, %v4349_v1, %v4364_v39  ;;  %v10516_v55 = vrot.slane %v8579_v17, 4 }
 0x5a5   : > { %v4359_v16 = vsel %vm3888_vm8, %v4358_v23, %v4321_v57  ;;  %v4363_v60 = vsel %vm3888_vm8, %v4362_v63, %v4325_v15  ;;  %v4480_v10 = vpack.c.bf16 %v4351_v48, %v4351_v48  ;;  %v4481_v9 = vpack.c.bf16 %v4353_v31, %v4353_v31 }
 0x5a6   : > { %v4369_v46 = vsel %vm3888_vm8, %v4221_v28, %v10516_v55  ;;  %v4482_v2 = vpack.c.bf16 %v4355_v27, %v4355_v27  ;;  %v4484_v56 = vpack.c.bf16 %v4359_v16, %v4359_v16  ;;  %v4485_v37 = vpack.c.bf16 %v4361_v22, %v4361_v22 }
 0x5a7   : > { %v4486_v35 = vpack.c.bf16 %v4363_v60, %v4363_v60  ;;  %v4483_v7 = vpack.c.bf16 %v4357_v8, %v4357_v8  ;;  %v4487_v3 = vpack.c.bf16 %v4365_v32, %v4365_v32  ;;  %v4367_v6 = vsel %vm3888_vm8, %v4366_v52, %v8579_v17 }
 0x5a8   : > { %v4377_v39 = vperm.slane %v4369_v46, %v8453_v38  ;;  %v4496_v1 = vrot.slane %v4484_v56, 4  ;;  %v4524_v40 = vrot.slane %v4485_v37, 4  ;;  %v4373_v57 = vperm.slane %v4367_v6, %v8453_v38 }
 0x5a9   : > { %v4502_v28 = vrot.slane %v4486_v35, 4  ;;  %v4530_v15 = vrot.slane %v4487_v3, 4  ;;  %v4402_v16 = vrot.slane %v4251_v0, 4 }
 0x5aa   : > { %v4427_v31 = vsel %vm3888_vm8, %v4426_v34, %v4377_v39  ;;  %v4428_v27 = vrot.slane %v4377_v39, 4  ;;  %v4497_v23 = vsel %vm3888_vm8, %v4496_v1, %v4480_v10  ;;  %v4525_v22 = vsel %vm3888_vm8, %v4524_v40, %v4481_v9 }
 0x5ab   : > { %v4503_v8 = vsel %vm3888_vm8, %v4502_v28, %v4482_v2  ;;  %v4415_v17 = vsel %vm3888_vm8, %v4414_v36, %v4373_v57  ;;  %v4501_v46 = vperm.slane %v4497_v23, %v8453_v38  ;;  %v4529_v52 = vperm.slane %v4525_v22, %v8453_v38 }
 0x5ac   : > { %v4507_v56 = vperm.slane %v4503_v8, %v8453_v38  ;;  %v4531_v63 = vsel %vm3888_vm8, %v4530_v15, %v4483_v7  ;;  %v4397_v34 = vperm.slane %v8624_v5, %v8453_v38  ;;  %v4416_v32 = vrot.slane %v4373_v57, 4 }
 0x5ad   : > { %v4535_v48 = vperm.slane %v4531_v63, %v8453_v38  ;;  %v4429_v55 = vsel %vm3888_vm8, %v8617_v50, %v4428_v27  ;;  %v4510_v10 = vrot.slane %v4501_v46, 4  ;;  %v4538_v36 = vrot.slane %v4529_v52, 4 }
 0x5ae   : > { %v4508_v60 = vrot.slane %v4507_v56, 4  ;;  %v10517_v9 = vunpack.i.h.bf16 %v8601_v44  ;;  %v4417_v35 = vsel %vm3888_vm8, %v8631_v42, %v4416_v32  ;;  %v4421_v7 = vperm.slane %v4415_v17, %v8465_v25 }
 0x5af   : > { %v4536_v37 = vrot.slane %v4535_v48, 4  ;;  %v4433_v5 = vperm.slane %v4427_v31, %v8465_v25  ;;  %v4511_v3 = vsel %vm3888_vm8, %v4507_v56, %v4510_v10  ;;  %v4539_v6 = vsel %vm3888_vm8, %v4535_v48, %v4538_v36 }
 0x5b0   : > { %v4403_v2 = vsel %vm3888_vm8, %v4402_v16, %v10517_v9  ;;  %v4425_v50 = vperm.slane %v4417_v35, %v8465_v25  ;;  %v4437_v39 = vperm.slane %v4429_v55, %v8465_v25  ;;  %v4452_v44 = vrot.slane %v8627_v54, 4 }
 0x5b1   : > { %v4509_v1 = vsel %vm3888_vm8, %v4508_v60, %v4501_v46  ;;  %v8702_v28 = vperm.slane %v4511_v3, %v8465_v25  ;;  %v4537_v42 = vsel %vm3888_vm8, %v4536_v37, %v4529_v52  ;;  %v4440_v40 = vrot.slane %v4397_v34, 4 }
 0x5b2   : > { %v8706_v57 = vperm.slane %v4537_v42, %v8465_v25  ;;  %v8709_v15 = vperm.slane %v4539_v6, %v8465_v25  ;;  %v4405_v31 = vsel %vm3888_vm8, %v4251_v0, %v8621_v4  ;;  %v4464_v27 = vrot.slane %v4421_v7, 4 }
 0x5b3   : > { %v4472_v16 = vrot.slane %v4433_v5, 4  ;;  %v4409_v23 = vperm.slane %v4403_v2, %v8453_v38  ;;  %v4413_v8 = vperm.slane %v4405_v31, %v8453_v38  ;;  %v4468_v22 = vrot.slane %v4425_v50, 4 }
 0x5b4   : > { %v4476_v17 = vrot.slane %v4437_v39, 4  ;;  %v8716_v46 = vperm.slane %v4509_v1, %v8465_v25  ;;  %v4522_v56 = vrot.slane %v8702_v28, 4  ;;  %v4548_v55 = vrot.slane %v8706_v57, 4 }
 0x5b5   : > { %v4438_v52 = vrot.slane %v4409_v23, 4  ;;  %v4441_v63 = vsel %vm3888_vm8, %v4409_v23, %v4440_v40  ;;  %v4450_v48 = vrot.slane %v4413_v8, 4  ;;  %v4453_v32 = vsel %vm3888_vm8, %v4413_v8, %v4452_v44 }
 0x5b6   : > { %v4449_v0 = vperm.slane %v4441_v63, %v8465_v25  ;;  %v4461_v4 = vperm.slane %v4453_v32, %v8465_v25  ;;  %v4550_v60 = vrot.slane %v8709_v15, 4  ;;  %v4613_v9 = vshrl.u32 %v8706_v57, 16 }
 0x5b7   : > { %v4439_v10 = vsel %vm3888_vm8, %v4438_v52, %v4397_v34  ;;  %v4451_v36 = vsel %vm3888_vm8, %v4450_v48, %v8627_v54  ;;  %v4626_v2 = vpack.i.b16 %v8709_v15, %v8702_v28  ;;  %v4520_v6 = vrot.slane %v8716_v46, 4 }
 0x5b8   : > { %v4445_v37 = vperm.slane %v4439_v10, %v8465_v25  ;;  %v4457_v35 = vperm.slane %v4451_v36, %v8465_v25  ;;  %v4466_v3 = vrot.slane %v4449_v0, 4  ;;  %v4469_v44 = vsel %vm3888_vm8, %v4449_v0, %v4468_v22 }
 0x5b9   : > { %v4474_v1 = vrot.slane %v4461_v4, 4  ;;  %v4477_v34 = vsel %vm3888_vm8, %v4461_v4, %v4476_v17  ;;  %v4523_v42 = vsel %vm3888_vm8, 0, %v4522_v56  ;;  %v4491_v56 = vpack.c.bf16 %v4469_v44, %v4469_v44 }
 0x5ba   : > { %v4462_v54 = vrot.slane %v4445_v37, 4  ;;  %v4465_v40 = vsel %vm3888_vm8, %v4445_v37, %v4464_v27  ;;  %v4467_v31 = vsel %vm3888_vm8, %v4466_v3, %v4425_v50  ;;  %v4470_v23 = vrot.slane %v4457_v35, 4 }
 0x5bb   : > { %v4473_v8 = vsel %vm3888_vm8, %v4457_v35, %v4472_v16  ;;  %v4475_v52 = vsel %vm3888_vm8, %v4474_v1, %v4437_v39  ;;  %v4489_v63 = vpack.c.bf16 %v4465_v40, %v4465_v40  ;;  %v4490_v48 = vpack.c.bf16 %v4467_v31, %v4467_v31 }
 0x5bc   : > { %v4463_v32 = vsel %vm3888_vm8, %v4462_v54, %v4421_v7  ;;  %v4471_v22 = vsel %vm3888_vm8, %v4470_v23, %v4433_v5  ;;  %v4493_v0 = vpack.c.bf16 %v4473_v8, %v4473_v8  ;;  %v4494_v17 = vpack.c.bf16 %v4475_v52, %v4475_v52 }
 0x5bd   : > { %v4488_v4 = vpack.c.bf16 %v4463_v32, %v4463_v32  ;;  %v4492_v10 = vpack.c.bf16 %v4471_v22, %v4471_v22  ;;  %v4495_v36 = vpack.c.bf16 %v4477_v34, %v4477_v34  ;;  %v4549_v50 = vsel %vm3888_vm8, 0, %v4548_v55 }
 0x5be   : > { %v4558_v27 = vrot.slane %v4494_v17, 4  ;;  %v4580_v37 = vrot.slane %v4493_v0, 4  ;;  %v4551_v16 = vsel %vm3888_vm8, 0, %v4550_v60  ;;  %v4521_v3 = vsel %vm3888_vm8, 0, %v4520_v6 }
 0x5bf   : > { %v4552_v35 = vrot.slane %v4492_v10, 4  ;;  %v4586_v39 = vrot.slane %v4495_v36, 4  ;;  %v4610_v7 = vpack.i.b16 %v8706_v57, %v8716_v46  ;;  %v4612_v44 = vshrl.u32 %v8716_v46, 16 }
 0x5c0   : > { %v4559_v5 = vsel %vm3888_vm8, %v4558_v27, %v4490_v48  ;;  %v4581_v1 = vsel %vm3888_vm8, %v4580_v37, %v4489_v63  ;;  %v4628_v34 = vshrl.u32 %v8702_v28, 16  ;;  %v4621_v31 = vshrl.u32 %v4549_v50, 16 }
 0x5c1   : > { %v4553_v54 = vsel %vm3888_vm8, %v4552_v35, %v4488_v4  ;;  %v4563_v55 = vperm.slane %v4559_v5, %v8453_v38  ;;  %v4585_v60 = vperm.slane %v4581_v1, %v8453_v38  ;;  %v4587_v40 = vsel %vm3888_vm8, %v4586_v39, %v4491_v56 }
 0x5c2   : > { %v4557_v6 = vperm.slane %v4553_v54, %v8453_v38  ;;  %v4591_v57 = vperm.slane %v4587_v40, %v8453_v38  ;;  %v4629_v23 = vshrl.u32 %v8709_v15, 16  ;;  %v4634_v46 = vpack.i.b16 %v4551_v16, %v4523_v42 }
 0x5c3   : > { %v4564_v8 = vrot.slane %v4563_v55, 4  ;;  %v4594_v52 = vrot.slane %v4585_v60, 4  ;;  %v4636_v63 = vshrl.u32 %v4523_v42, 16  ;;  %v4618_v48 = vpack.i.b16 %v4549_v50, %v4521_v3 }
 0x5c4   : > { %v4566_v28 = vrot.slane %v4557_v6, 4  ;;  %v4630_v32 = vpack.i.b16 %v4629_v23, %v4628_v34  ;;  %v4637_v22 = vshrl.u32 %v4551_v16, 16  ;;  %v4592_v0 = vrot.slane %v4591_v57, 4 }
 0x5c5   : > { %v4620_v17 = vshrl.u32 %v4521_v3, 16  ;;  %v4672_v4 = vrot.slane %v4626_v2, 4  ;;  %v4678_v10 = vrot.slane %v4634_v46, 4  ;;  %v4595_v56 = vsel %vm3888_vm8, %v4591_v57, %v4594_v52 }
 0x5c6   : > { %v4614_v36 = vpack.i.b16 %v4613_v9, %v4612_v44  ;;  %v4638_v27 = vpack.i.b16 %v4637_v22, %v4636_v63  ;;  %v4565_v37 = vsel %vm3888_vm8, %v4564_v8, %v4557_v6  ;;  %v4700_v42 = vrot.slane %v4630_v32, 4 }
 0x5c7   : > { %v4622_v35 = vpack.i.b16 %v4621_v31, %v4620_v17  ;;  %v4673_v15 = vsel %vm3888_vm8, %v4672_v4, %v4610_v7  ;;  %v4679_v39 = vsel %vm3888_vm8, %v4678_v10, %v4618_v48  ;;  %v4567_v50 = vsel %vm3888_vm8, %v4563_v55, %v4566_v28 }
 0x5c8   : > { %v4677_v16 = vperm.slane %v4673_v15, %v8453_v38  ;;  %v4683_v3 = vperm.slane %v4679_v39, %v8453_v38  ;;  %v4706_v2 = vrot.slane %v4638_v27, 4  ;;  %v4593_v5 = vsel %vm3888_vm8, %v4592_v0, %v4585_v60 }
 0x5c9   : > { %v8768_v9 = vperm.slane %v4595_v56, %v8465_v25  ;;  %v4701_v1 = vsel %vm3888_vm8, %v4700_v42, %v4614_v36  ;;  %v8772_v44 = vperm.slane %v4565_v37, %v8465_v25  ;;  %v8778_v6 = vperm.slane %v4567_v50, %v8465_v25 }
 0x5ca   : > { %v4686_v7 = vrot.slane %v4677_v16, 4  ;;  %v4705_v34 = vperm.slane %v4701_v1, %v8453_v38  ;;  %v4707_v54 = vsel %vm3888_vm8, %v4706_v2, %v4622_v35  ;;  %v4684_v55 = vrot.slane %v4683_v3, 4 }
 0x5cb   : > { %v4711_v40 = vperm.slane %v4707_v54, %v8453_v38  ;;  %v8783_v23 = vperm.slane %v4593_v5, %v8465_v25  ;;  %v4576_v28 = vrot.slane %v8772_v44, 4  ;;  %v4606_v48 = vrot.slane %v8768_v9, 4 }
 0x5cc   : > { %v4687_v60 = vsel %vm3888_vm8, %v4683_v3, %v4686_v7  ;;  %v4714_v57 = vrot.slane %v4705_v34, 4  ;;  %v4685_v31 = vsel %vm3888_vm8, %v4684_v55, %v4677_v16  ;;  %v4578_v17 = vrot.slane %v8778_v6, 4 }
 0x5cd   : > { %v4695_v8 = vperm.slane %v4687_v60, %v8465_v25  ;;  %v8787_v52 = vperm.slane %v4685_v31, %v8465_v25  ;;  %v4712_v46 = vrot.slane %v4711_v40, 4  ;;  %v4604_v36 = vrot.slane %v8783_v23, 4 }
 0x5ce   : > { %v4715_v63 = vsel %vm3888_vm8, %v4711_v40, %v4714_v57 }
 0x5cf   : > { %v4723_v32 = vperm.slane %v4715_v63, %v8465_v25  ;;  %v4698_v22 = vrot.slane %v4695_v8, 4  ;;  %v4713_v0 = vsel %vm3888_vm8, %v4712_v46, %v4705_v34  ;;  %v4799_v4 = vshrl.u32 %v4695_v8, 16 }
 0x5d0   : > { %v8796_v10 = vperm.slane %v4713_v0, %v8465_v25  ;;  %v4696_v56 = vrot.slane %v8787_v52, 4  ;;  %v4787_v15 = vshrl.u32 %v8787_v52, 16  ;;  %v4577_v46 = vsel %vm3888_vm8, 0, %v4576_v28 }
 0x5d1   : > { %v4798_v27 = vpack.i.b16 %v4723_v32, %v4695_v8  ;;  %v4800_v37 = vshrl.u32 %v4723_v32, 16  ;;  %v4726_v35 = vrot.slane %v4723_v32, 4  ;;  %v4699_v39 = vsel %vm3888_vm8, 0, %v4698_v22 }
 0x5d2   : > { %v4788_v42 = vshrl.u32 %v8796_v10, 16  ;;  %v4697_v50 = vsel %vm3888_vm8, 0, %v4696_v56  ;;  %v4724_v16 = vrot.slane %v8796_v10, 4  ;;  %v4579_v63 = vsel %vm3888_vm8, 0, %v4578_v17 }
 0x5d3   : > { %v4844_v3 = vunpack.c.l.b16 %v4798_v27  ;;  %v4801_v2 = vpack.i.b16 %v4800_v37, %v4799_v4  ;;  %v4727_v5 = vsel %vm3888_vm8, 0, %v4726_v35  ;;  %v4793_v1 = vshrl.u32 %v4697_v50, 16 }
 0x5d4   : > { %v4804_v7 = vpack.i.b16 %v4727_v5, %v4699_v39  ;;  %v4789_v34 = vpack.i.b16 %v4788_v42, %v4787_v15  ;;  %v4725_v54 = vsel %vm3888_vm8, 0, %v4724_v16  ;;  %v4806_v55 = vshrl.u32 %v4727_v5, 16 }
 0x5d5   : > { %v4845_v40 = vpack.c.b16 %v4844_v3, %v4844_v3  ;;  %v4848_v60 = vunpack.c.l.b16 %v4801_v2  ;;  %v4792_v57 = vpack.i.b16 %v4725_v54, %v4697_v50  ;;  %v4794_v31 = vshrl.u32 %v4725_v54, 16 }
 0x5d6   : > { %v4852_v8 = vunpack.c.l.b16 %v4804_v7  ;;  %v4607_v32 = vsel %vm3888_vm8, 0, %v4606_v48  ;;  %v4805_v4 = vshrl.u32 %v4699_v39, 16  ;;  %v4605_v56 = vsel %vm3888_vm8, 0, %v4604_v36 }
 0x5d7   : > { %4846 = vrot.lane.b32.xlu0 %v4845_v40, %s7054_s25  ;;  %v4849_v22 = vpack.c.b16 %v4848_v60, %v4848_v60  ;;  %v4795_v0 = vpack.i.b16 %v4794_v31, %v4793_v1  ;;  %v4642_v37 = vpack.i.b16 %v8783_v23, %v8772_v44  ;;  %v4644_v35 = vshrl.u32 %v8772_v44, 16  ;;  %s7071_s25 = smov 56  }
 0x5d8   : > { %v4853_v27 = vpack.c.b16 %v4852_v8, %v4852_v8  ;;  %v4645_v15 = vshrl.u32 %v8783_v23, 16  ;;  %v4832_v28 = vunpack.c.l.b16 %v4789_v34  ;;  %v4836_v17 = vunpack.c.l.b16 %v4792_v57 }
 0x5d9   : > { %4850 = vrot.lane.b32.xlu1 %v4849_v22, %s7049_s19  ;;  %v4807_v48 = vpack.i.b16 %v4806_v55, %v4805_v4  ;;  %v4658_v42 = vpack.i.b16 %v8768_v9, %v8778_v6  ;;  %v4650_v39 = vpack.i.b16 %v4605_v56, %v4577_v46  ;;  %v4660_v36 = vshrl.u32 %v8778_v6, 16  ;;  %s7066_s19 = smov 40  }
 0x5da   : > { %4854 = vrot.lane.b32.xlu2 %v4853_v27, %s7052_s23  ;;  %v4661_v50 = vshrl.u32 %v8768_v9, 16  ;;  %v4666_v16 = vpack.i.b16 %v4607_v32, %v4579_v63  ;;  %v4840_v3 = vunpack.c.l.b16 %v4795_v0  ;;  %v4653_v44 = vshrl.u32 %v4605_v56, 16  ;;  %s7069_s23 = smov 52  }
 0x5db   : > { %v4668_v2 = vshrl.u32 %v4579_v63, 16  ;;  %v4669_v23 = vshrl.u32 %v4607_v32, 16  ;;  %v4728_v1 = vrot.slane %v4658_v42, 4  ;;  %v4786_v34 = vpack.i.b16 %v8796_v10, %v8787_v52 }
 0x5dc   : > { %v4662_v5 = vpack.i.b16 %v4661_v50, %v4660_v36  ;;  %v4734_v7 = vrot.slane %v4666_v16, 4  ;;  %v4833_v54 = vpack.c.b16 %v4832_v28, %v4832_v28  ;;  %v4646_v55 = vpack.i.b16 %v4645_v15, %v4644_v35 }
 0x5dd   : > { %v4652_v40 = vshrl.u32 %v4577_v46, 16  ;;  %v4670_v60 = vpack.i.b16 %v4669_v23, %v4668_v2  ;;  %v4837_v57 = vpack.c.b16 %v4836_v17, %v4836_v17  ;;  %v4729_v6 = vsel %vm3888_vm8, %v4728_v1, %v4642_v37 }
 0x5de   : > { %v4735_v9 = vsel %vm3888_vm8, %v4734_v7, %v4650_v39  ;;  %v4756_v31 = vrot.slane %v4662_v5, 4  ;;  %v4733_v63 = vperm.slane %v4729_v6, %v8453_v38  ;;  %v4841_v0 = vpack.c.b16 %v4840_v3, %v4840_v3 }
 0x5df   : > { %4834 = vrot.lane.b32.xlu0 %v4833_v54, %s7050_s21  ;;  %v4654_v8 = vpack.i.b16 %v4653_v44, %v4652_v40  ;;  %v4739_v32 = vperm.slane %v4735_v9, %v8453_v38  ;;  %v4762_v22 = vrot.slane %v4670_v60, 4  ;;  %v4856_v4 = vunpack.c.l.b16 %v4807_v48  ;;  %s7067_s21 = smov 36  }
 0x5e0   : > { %v4757_v56 = vsel %vm3888_vm8, %v4756_v31, %v4646_v55  ;;  %v4742_v35 = vrot.slane %v4733_v63, 4 }
 0x5e1   : > { %4838 = vrot.lane.b32.xlu1 %v4837_v57, %s7053_s24  ;;  %v4740_v46 = vrot.slane %v4739_v32, 4  ;;  %v4761_v27 = vperm.slane %v4757_v56, %v8453_v38  ;;  %v4763_v37 = vsel %vm3888_vm8, %v4762_v22, %v4654_v8  ;;  %v4857_v36 = vpack.c.b16 %v4856_v4, %v4856_v4  ;;  %s7070_s24 = smov 60  }
 0x5e2   : > { %4842 = vrot.lane.b32.xlu2 %v4841_v0, %s7051_s22  ;;  %v4767_v15 = vperm.slane %v4763_v37, %v8453_v38  ;;  %v4743_v17 = vsel %vm3888_vm8, %v4739_v32, %v4742_v35  ;;  %s7068_s22 = smov 44  }
 0x5e3   : > { %v4741_v28 = vsel %vm3888_vm8, %v4740_v46, %v4733_v63  ;;  %v4770_v42 = vrot.slane %v4761_v27, 4  ;;  %v4751_v3 = vperm.slane %v4743_v17, %v8465_v25 }
 0x5e4   : > { %v4747_v48 = vperm.slane %v4741_v28, %v8465_v25  ;;  %v4768_v39 = vrot.slane %v4767_v15, 4 }
 0x5e5   : > { %v4771_v50 = vsel %vm3888_vm8, %v4767_v15, %v4770_v42  ;;  %v4754_v6 = vrot.slane %v4751_v3, 4  ;;  %v4823_v35 = vshrl.u32 %v4751_v3, 16 }
 0x5e6   : > { %v4769_v16 = vsel %vm3888_vm8, %v4768_v39, %v4761_v27  ;;  %v4779_v44 = vperm.slane %v4771_v50, %v8465_v25  ;;  %v4752_v2 = vrot.slane %v4747_v48, 4  ;;  %v4811_v57 = vshrl.u32 %v4747_v48, 16 }
 0x5e7   : > { %4858 = vrot.lane.b32.xlu0 %v4857_v36, %s7055_s26  ;;  %v4775_v23 = vperm.slane %v4769_v16, %v8465_v25  ;;  %v4755_v15 = vsel %vm3888_vm8, 0, %v4754_v6 }
 0x5e8   : > { %v4822_v5 = vpack.i.b16 %v4779_v44, %v4751_v3  ;;  %v4753_v1 = vsel %vm3888_vm8, 0, %v4752_v2  ;;  %v4782_v40 = vrot.slane %v4779_v44, 4  ;;  %v4824_v63 = vshrl.u32 %v4779_v44, 16 }
 0x5e9   : > { %v4810_v7 = vpack.i.b16 %v4775_v23, %v4747_v48  ;;  %v4780_v54 = vrot.slane %v4775_v23, 4  ;;  %v4812_v55 = vshrl.u32 %v4775_v23, 16  ;;  %v4817_v8 = vshrl.u32 %v4753_v1, 16 }
 0x5ea   : > { %v4876_v60 = vunpack.c.l.b16 %v4822_v5  ;;  %v4783_v46 = vsel %vm3888_vm8, 0, %v4782_v40  ;;  %v4825_v42 = vpack.i.b16 %v4824_v63, %v4823_v35  ;;  %v4829_v36 = vshrl.u32 %v4755_v15, 16 }
 0x5eb   : > { %v4860_v9 = vunpack.c.l.b16 %v4810_v7  ;;  %v4781_v31 = vsel %vm3888_vm8, 0, %v4780_v54  ;;  %v4813_v4 = vpack.i.b16 %v4812_v55, %v4811_v57  ;;  %v4830_v48 = vshrl.u32 %v4783_v46, 16 }
 0x5ec   : > { %v4877_v32 = vpack.c.b16 %v4876_v60, %v4876_v60  ;;  %v4816_v22 = vpack.i.b16 %v4781_v31, %v4753_v1  ;;  %v4818_v0 = vshrl.u32 %v4781_v31, 16  ;;  %v4880_v16 = vunpack.c.l.b16 %v4825_v42 }
 0x5ed   : > { %v4861_v56 = vpack.c.b16 %v4860_v9, %v4860_v9  ;;  %v4864_v17 = vunpack.c.l.b16 %v4813_v4  ;;  %v4831_v44 = vpack.i.b16 %v4830_v48, %v4829_v36  ;;  %v4828_v23 = vpack.i.b16 %v4783_v46, %v4755_v15 }
 0x5ee   : > { %4878 = vrot.lane.b32.xlu2 %v4877_v32, %s7064_s20  ;;  %v4868_v27 = vunpack.c.l.b16 %v4816_v22  ;;  %v4819_v37 = vpack.i.b16 %v4818_v0, %v4817_v8  ;;  %v4881_v3 = vpack.c.b16 %v4880_v16, %v4880_v16 }
 0x5ef   : > { %4862 = vrot.lane.b32.xlu1 %v4861_v56, %s7065_s18  ;;  %v4865_v50 = vpack.c.b16 %v4864_v17, %v4864_v17  ;;  %v4888_v5 = vunpack.c.l.b16 %v4831_v44  ;;  %v4884_v1 = vunpack.c.l.b16 %v4828_v23 }
 0x5f0   : > { %v4869_v28 = vpack.c.b16 %v4868_v27, %v4868_v27  ;;  %v4872_v39 = vunpack.c.l.b16 %v4819_v37 }
 0x5f1   : > { %v4889_v7 = vpack.c.b16 %v4888_v5, %v4888_v5  ;;  %v4885_v54 = vpack.c.b16 %v4884_v1, %v4884_v1 }
 0x5f2   : > { %4870 = vrot.lane.b32.xlu0 %v4869_v28, %s7066_s19  ;;  %v4873_v2 = vpack.c.b16 %v4872_v39, %v4872_v39 }
 0x5f6   : > { %4866 = vrot.lane.b32.xlu2 %v4865_v50, %s7067_s21  ;;  %v6851_v50 = vld [vmem:[%s10350_s6] sm:$0xff] }
 0x5f7   : > { %4874 = vrot.lane.b32.xlu1 %v4873_v2, %s7068_s22 }
 0x5fa   : > { %4882 = vrot.lane.b32.xlu0 %v4881_v3, %s7069_s23 }
 0x5fe   : > { %4890 = vrot.lane.b32.xlu2 %v4889_v7, %s7070_s24 }
 0x5ff   : > { %4886 = vrot.lane.b32.xlu1 %v4885_v54, %s7071_s25 }
 0x602   : > { %4932 = vrot.lane.b32.xlu0 %v8533_v58, %s7065_s18  ;;  %s7074_s18 = smov 72  }
 0x606   : > { %4938 = vrot.lane.b32.xlu2 %v8539_v41, %s7066_s19  ;;  %s7075_s19 = smov 76  }
 0x607   : > { %4935 = vrot.lane.b32.xlu1 %v8526_v62, %s7067_s21  ;;  %s7076_s21 = smov 92  }
 0x60a   : > { %4941 = vrot.lane.b32.xlu0 %v8536_v30, %s7068_s22  ;;  %s7077_s22 = smov 96  }
 0x60e   : > { %4947 = vrot.lane.b32.xlu2 %v8526_v62, %s7069_s23  ;;  %s7078_s23 = smov 80  }
 0x60f   : > { %4944 = vrot.lane.b32.xlu1 %v8533_v58, %s7064_s20  ;;  %s7073_s20 = smov 84  }
 0x612   : > { %4950 = vrot.lane.b32.xlu0 %v8539_v41, %s7071_s25 }
 0x617   : > { %4953 = vrot.lane.b32.xlu1 %v8536_v30, %s7070_s24  ;;  %s7079_s24 = smov 88  }
 0x634   : > { %v4855_v55 = vpop.permute.xlu2 %4854 }
 0x63c   : > { %v4843_v57 = vpop.permute.xlu2 %4842 }
 0x648   : > { %v4879_v41 = vpop.permute.xlu2 %4878 }
 0x649   : > { %v4847_v40 = vpop.permute.xlu0 %4846 }
 0x64b   : > { %v4851_v60 = vpop.permute.xlu1 %4850 }
 0x650   : > { %v4867_v52 = vpop.permute.xlu2 %4866 }
 0x651   : > { %v4835_v6 = vpop.permute.xlu0 %4834 }
 0x652   : > { %v4894_v9 = vsel %vm672_vm1, %v4786_v34, %v4835_v6  ;;  %vm4910_vm1 = vcmask 293888  }
 0x653   : > { %v4839_v31 = vpop.permute.xlu1 %4838 }
 0x654   : > { %v4896_v62 = vsel %vm4087_vm9, %v4894_v9, %v4839_v31 }
 0x655   : > { %v4898_v8 = vsel %vm4090_vm10, %v4896_v62, %v4843_v57 }
 0x656   : > { %v4900_v58 = vsel %vm4093_vm11, %v4898_v8, %v4847_v40  ;;  %v8916_v8 = vpop.f32.mrf.mxu0 }
 0x657   : > { %v4902_v30 = vsel %vm4096_vm12, %v4900_v58, %v4851_v60 }
 0x658   : > { %v4904_v32 = vsel %vm4099_vm13, %v4902_v30, %v4855_v55  ;;  %v4891_v35 = vpop.permute.xlu2 %4890 }
 0x659   : > { %v4859_v63 = vpop.permute.xlu0 %4858 }
 0x65a   : > { %v4906_v22 = vsel %vm4102_vm14, %v4904_v32, %v4859_v63 }
 0x660   : > { %v4939_v16 = vpop.permute.xlu2 %4938 }
 0x661   : > { %v4863_v0 = vpop.permute.xlu1 %4862 }
 0x662   : > { %v4909_v10 = vsel %vm4907_vm0, %v4906_v22, %v4863_v0  ;;  %v8955_v0 = vld [vmem:[%s10346_s2] ss:$0 sm:$0xff] }
 0x663   : > { %v4912_v4 = vsel %vm4910_vm1, %v4909_v10, %v4867_v52  ;;  %10519 = vst [vmem:[#allocation26_spill] sm:$0xff] %v8955_v0  ;;  %v2572_v10 = vrot.slane %v8136_v18, 2 }
 0x664   : > { %v4871_v34 = vpop.permute.xlu0 %4870 }
 0x665   : > { %v4915_v56 = vsel %vm4913_vm2, %v4912_v4, %v4871_v34  ;;  %v8961_v34 = vrot.slane %v8955_v0, 2  ;;  %v2573_v4 = vrot.slane %v8136_v18, 4 }
 0x668   : > { %v4948_v7 = vpop.permute.xlu2 %4947 }
 0x669   : > { %v4875_v46 = vpop.permute.xlu1 %4874 }
 0x66a   : > { %v4918_v27 = vsel %vm4916_vm3, %v4915_v56, %v4875_v46  ;;  %v2574_v56 = vrot.slane %v8136_v18, 6  ;;  %v8966_v46 = vrot.slane %v8955_v0, 4 }
 0x66b   : > { %v4921_v15 = vsel %vm4919_vm4, %v4918_v27, %v4879_v41  ;;  %v8925_v41 = vpop.f32.mrf.mxu0  ;;  %v8969_v27 = vrot.slane %v8955_v0, 6 }
 0x66c   : > { %v4883_v37 = vpop.permute.xlu0 %4882  ;;  %10520 = vst [vmem:[#allocation27_spill] sm:$0xff] %v8966_v46 }
 0x66d   : > { %v4924_v28 = vsel %vm4922_vm5, %v4921_v15, %v4883_v37  ;;  %10521 = vst [vmem:[#allocation28_spill] sm:$0xff] %v8969_v27  ;;  %v2575_v37 = vrot.slane %v8148_v43, 2  ;;  %v2576_v15 = vrot.slane %v8148_v43, 4 }
 0x671   : > { %v4887_v17 = vpop.permute.xlu1 %4886 }
 0x672   : > { %v4927_v42 = vsel %vm4925_vm6, %v4924_v28, %v4887_v17  ;;  %v2577_v28 = vrot.slane %v8148_v43, 6  ;;  %v2578_v17 = vrot.slane %v8182_v24, 2 }
 0x673   : > { %v4930_v48 = vsel %vm4928_vm7, %v4927_v42, %v4891_v35  ;;  %v8932_v63 = vpop.f32.mrf.mxu0  ;;  %v8979_v42 = vadd.f32 %v8955_v0, %v8136_v18  ;;  %v8996_v18 = vadd.f32 %v8955_v0, %v8148_v43  ;;  %v2585_v43 = vrot.slane %v8203_v51, 6 }
 0x674   : > { %v4972_v39 = vsel %vm4193_vm15, %v4930_v48, 0  ;;  %v4933_v36 = vpop.permute.xlu0 %4932  ;;  %v8982_v48 = vadd.f32 %v8961_v34, %v2572_v10 }
 0x675   : > { %4981 = vmatpush.bf16.msrb.mxu2 %v4972_v39  ;;  %v4956_v44 = vsel %vm4907_vm0, %v8573_v13, %v4933_v36  ;;  %v2579_v39 = vrot.slane %v8182_v24, 4  ;;  %v2580_v36 = vrot.slane %v8182_v24, 6  ;;  %10523 = vst [vmem:[#allocation30_spill] sm:$0xff] %v8996_v18  ;;  %v2584_v24 = vrot.slane %v8203_v51, 4 }
 0x678   : > { %6828 = vmatmul.msk.bf16.vlgmr.msrb.gmra.mxu2 %vm4087_vm9, %v6851_v50  ;;  %v8987_v50 = vadd.f32 %v8966_v46, %v2573_v4  ;;  %v9039_v4 = vadd.f32 %v8969_v27, %v8203_v51  ;;  %vm6367_vm9 = vcmask 27648  }
 0x679   : > { %v4936_v2 = vpop.permute.xlu1 %4935 }
 0x67a   : > { %v4957_v23 = vsel %vm4910_vm1, %v4956_v44, %v4936_v2  ;;  %v2581_v44 = vrot.slane %v8191_v49, 2  ;;  %v2582_v2 = vrot.slane %v8191_v49, 4  ;;  %10534 = vst [vmem:[#allocation41_spill] sm:$0xff] %v9039_v4 }
 0x67b   : > { %v4958_v3 = vsel %vm4913_vm2, %v4957_v23, %v4939_v16  ;;  %v8943_v30 = vpop.f32.mrf.mxu0  ;;  %v8990_v16 = vadd.f32 %v8969_v27, %v2574_v56  ;;  %v8999_v23 = vadd.f32 %v8961_v34, %v2575_v37  ;;  %v9042_v56 = vadd.f32 %v8955_v0, %v2584_v24 }
 0x67c   : > { %v4942_v5 = vpop.permute.xlu0 %4941  ;;  %v9046_v37 = vadd.f32 %v8961_v34, %v2585_v43  ;;  %v2594_v24 = vrot.slane %v8255_v59, 2  ;;  %v2595_v43 = vrot.slane %v8255_v59, 4 }
 0x67d   : > { %v4959_v1 = vsel %vm4916_vm3, %v4958_v3, %v4942_v5  ;;  %10524 = vst [vmem:[#allocation31_spill] sm:$0xff] %v8999_v23  ;;  %v2583_v3 = vrot.slane %v8191_v49, 6 }
 0x67e   : > { %10535 = vst [vmem:[#allocation42_spill] sm:$0xff] %v9042_v56 }
 0x67f   : > { %v9035_v10 = vadd.f32 %v8966_v46, %v2583_v3  ;;  %10536 = vst [vmem:[#allocation43_spill] sm:$0xff] %v9046_v37 }
 0x681   : > { %v4945_v54 = vpop.permute.xlu1 %4944  ;;  %10533 = vst [vmem:[#allocation40_spill] sm:$0xff] %v9035_v10 }
 0x682   : > { %v4960_v55 = vsel %vm4919_vm4, %v4959_v1, %v4945_v54  ;;  %v9006_v1 = vadd.f32 %v8966_v46, %v2576_v15  ;;  %v9012_v54 = vadd.f32 %v8955_v0, %v2578_v17  ;;  %v2590_v15 = vrot.slane %v8228_v61, 6 }
 0x683   : > { %v4961_v40 = vsel %vm4922_vm5, %v4960_v55, %v4948_v7  ;;  %v8948_v32 = vpop.f32.mrf.mxu0  ;;  %v9009_v7 = vadd.f32 %v8969_v27, %v2577_v28  ;;  %v9016_v55 = vadd.f32 %v8961_v34, %v2579_v39  ;;  %v2591_v28 = vrot.slane %v8241_v12, 2 }
 0x684   : > { %v4951_v60 = vpop.permute.xlu0 %4950  ;;  %10525 = vst [vmem:[#allocation32_spill] sm:$0xff] %v9006_v1  ;;  %v2592_v17 = vrot.slane %v8241_v12, 4  ;;  %v9053_v39 = vadd.f32 %v8966_v46, %v8217_v29 }
 0x685   : > { %v4962_v57 = vsel %vm4925_vm6, %v4961_v40, %v4951_v60  ;;  %10526 = vst [vmem:[#allocation33_spill] sm:$0xff] %v9009_v7  ;;  %v9019_v40 = vadd.f32 %v8966_v46, %v2580_v36  ;;  %v2586_v60 = vrot.slane %v8217_v29, 2  ;;  %v9087_v4 = vadd.f32 %v8966_v46, %v2591_v28 }
 0x686   : > { %10527 = vst [vmem:[#allocation34_spill] sm:$0xff] %v9012_v54  ;;  %v9107_v28 = vadd.f32 %v8969_v27, %v2595_v43  ;;  %v2603_v43 = vrot.slane %v8296_v26, 4 }
 0x687   : > { %10528 = vst [vmem:[#allocation35_spill] sm:$0xff] %v9016_v55  ;;  %v9056_v51 = vadd.f32 %v8969_v27, %v2586_v60  ;;  %v9072_v60 = vadd.f32 %v8966_v46, %v8228_v61 }
 0x688   : > { %10529 = vst [vmem:[#allocation36_spill] sm:$0xff] %v9019_v40 }
 0x689   : > { %v4954_v13 = vpop.permute.xlu1 %4953  ;;  %10537 = vst [vmem:[#allocation44_spill] sm:$0xff] %v9053_v39 }
 0x68a   : > { %v4963_v6 = vsel %vm4928_vm7, %v4962_v57, %v4954_v13  ;;  %v2587_v57 = vrot.slane %v8217_v29, 4  ;;  %v9025_v13 = vadd.f32 %v8969_v27, %v8191_v49  ;;  %v2589_v49 = vrot.slane %v8228_v61, 2  ;;  %10538 = vst [vmem:[#allocation45_spill] sm:$0xff] %v9056_v51 }
 0x68b   : > { %v8950_v22 = vpop.f32.mrf.mxu0  ;;  %10541 = vst [vmem:[#allocation48_spill] sm:$0xff] %v9072_v60  ;;  %v9090_v61 = vadd.f32 %v8969_v27, %v2592_v17  ;;  %v2600_v60 = vrot.slane %v8286_v47, 4  ;;  %v9111_v17 = vadd.f32 %v8955_v0, %v8270_v21 }
 0x68c   : > { %10530 = vst [vmem:[#allocation37_spill] sm:$0xff] %v9025_v13  ;;  %v9059_v36 = vadd.f32 %v8955_v0, %v2587_v57  ;;  %v9075_v57 = vadd.f32 %v8969_v27, %v2589_v49 }
 0x68d   : > { %10545 = vst [vmem:[#allocation52_spill] sm:$0xff] %v9087_v4 }
 0x68e   : > { %10539 = vst [vmem:[#allocation46_spill] sm:$0xff] %v9059_v36  ;;  %v2598_v36 = vrot.slane %v8270_v21, 6 }
 0x68f   : > { %10542 = vst [vmem:[#allocation49_spill] sm:$0xff] %v9075_v57  ;;  %v9097_v57 = vadd.f32 %v8961_v34, %v8255_v59 }
 0x690   : > { %10546 = vst [vmem:[#allocation53_spill] sm:$0xff] %v9090_v61 }
 0x691   : > { %10548 = vst [vmem:[#allocation55_spill] sm:$0xff] %v9097_v57  ;;  %v9120_v57 = vadd.f32 %v8969_v27, %v2598_v36 }
 0x692   : > { %10550 = vst [vmem:[#allocation57_spill] sm:$0xff] %v9107_v28  ;;  %v2604_v28 = vrot.slane %v8296_v26, 6 }
 0x693   : > { %v8972_v35 = vpop.f32.mrf.mxu0 }
 0x694   : > { %10522 = vst [vmem:[#allocation29_spill] sm:$0xff] %v8972_v35  ;;  %v2597_v35 = vrot.slane %v8270_v21, 4 }
 0x696   : > { %v9117_v59 = vadd.f32 %v8966_v46, %v2597_v35  ;;  %v9131_v35 = vadd.f32 %v8955_v0, %v8286_v47 }
 0x698   : > { %10551 = vst [vmem:[#allocation58_spill] sm:$0xff] %v9131_v35 }
 0x6fb   : > { %v4983_v9 = vpop.f32.mrf.mxu2 }
 0x6fc   : > { %v8892_v31 = vadd.f32 %v4983_v9, %v4963_v6  ;;  %v9031_v9 = vadd.f32 %v8961_v34, %v2582_v2  ;;  %v9062_v2 = vpop.f32.mrf.mxu0 }
 0x6fe   : > { %5002 = vrot.lane.b32.xlu1 %v8892_v31, %s7057_s11  ;;  %5074 = vrot.lane.b32.xlu0 %v8892_v31, %s7072_s10  ;;  %10532 = vst [vmem:[#allocation39_spill] sm:$0xff] %v9031_v9  ;;  %v2605_v9 = vrot.slane %v8315_v33, 2 }
 0x6ff   : > { %5026 = vrot.lane.b32.xlu2 %v8892_v31, %s7061_s15 }
 0x703   : > { %v4985_v62 = vpop.f32.mrf.mxu2 }
 0x704   : > { %v8918_v58 = vadd.f32 %v4985_v62, %v4963_v6  ;;  %v9028_v6 = vadd.f32 %v8955_v0, %v2581_v44  ;;  %v2588_v62 = vrot.slane %v8217_v29, 6  ;;  %v2593_v44 = vrot.slane %v8241_v12, 6  ;;  %v9159_v7 = vpop.f32.mrf.mxu0 }
 0x705   : > { %v2596_v29 = vrot.slane %v8270_v21, 2  ;;  %v2514_v21 = vadd.f32 %v8334_v11, %v7902_v14  ;;  %v2606_v14 = vrot.slane %v8315_v33, 4  ;;  %v2607_v11 = vrot.slane %v8315_v33, 6 }
 0x706   : > { %5050 = vrot.lane.b32.xlu1 %v8892_v31, %s7073_s20  ;;  %5020 = vrot.lane.b32.xlu0 %v8892_v31, %s7063_s17  ;;  %10518 = vst [vmem:[#allocation2_spill] sm:$0xff] %v8918_v58  ;;  %v9065_v3 = vadd.f32 %v8961_v34, %v2588_v62  ;;  %v9080_v62 = vadd.f32 %v8955_v0, %v2590_v15  ;;  %v2599_v15 = vrot.slane %v8286_v47, 2 }
 0x707   : > { %5014 = vrot.lane.b32.xlu2 %v8892_v31, %s7058_s12  ;;  %10531 = vst [vmem:[#allocation38_spill] sm:$0xff] %v9028_v6  ;;  %v9093_v49 = vadd.f32 %v8955_v0, %v2593_v44  ;;  %v9114_v44 = vadd.f32 %v8961_v34, %v2596_v29  ;;  %v9178_v23 = vadd.f32 %v8961_v34, %v2606_v14 }
 0x708   : > { %10540 = vst [vmem:[#allocation47_spill] sm:$0xff] %v9065_v3  ;;  %v9084_v3 = vadd.f32 %v8961_v34, %v8241_v12  ;;  %v9104_v12 = vadd.f32 %v8966_v46, %v2594_v24  ;;  %v2602_v24 = vrot.slane %v8296_v26, 2  ;;  %v9134_v36 = vadd.f32 %v8961_v34, %v2599_v15 }
 0x709   : > { %10543 = vst [vmem:[#allocation50_spill] sm:$0xff] %v9080_v62  ;;  %v9194_v61 = vadd.f32 %v8966_v46, %v2514_v21 }
 0x70a   : > { %10544 = vst [vmem:[#allocation51_spill] sm:$0xff] %v9084_v3  ;;  %v9162_v1 = vadd.f32 %v8955_v0, %v2602_v24  ;;  %v9181_v24 = vadd.f32 %v8966_v46, %v2607_v11 }
 0x70b   : > { %10547 = vst [vmem:[#allocation54_spill] sm:$0xff] %v9093_v49  ;;  %v2601_v49 = vrot.slane %v8286_v47, 6  ;;  %v2515_v47 = vadd.f32 %v8341_v20, %v7920_v53  ;;  %v9165_v53 = vadd.f32 %v8961_v34, %v2603_v43  ;;  %v9168_v20 = vadd.f32 %v8966_v46, %v2604_v28 }
 0x70c   : > { %10549 = vst [vmem:[#allocation56_spill] sm:$0xff] %v9104_v12  ;;  %v9137_v12 = vadd.f32 %v8966_v46, %v2600_v60  ;;  %v9185_v28 = vadd.f32 %v8969_v27, %v8323_v45 }
 0x70d   : > { %10552 = vst [vmem:[#allocation59_spill] sm:$0xff] %v9134_v36  ;;  %v9153_v60 = vadd.f32 %v8969_v27, %v2601_v49  ;;  %v10555_v36 = vld [vmem:[#allocation23_spill] sm:$0xff]  ;;  %v2610_v49 = vrot.slane %v2514_v21, 2  ;;  %v2613_v43 = vrot.slane %v2515_v47, 2  ;;  %v2614_v18 = vrot.slane %v2515_v47, 6 }
 0x70e   : > { %4990 = vrot.lane.b32.xlu1 %v8892_v31, %s7059_s13  ;;  %5068 = vrot.lane.b32.xlu0 %v8892_v31, %s7074_s18  ;;  %10553 = vst [vmem:[#allocation60_spill] sm:$0xff] %v9137_v12  ;;  %v2609_v12 = vrot.slane %v8323_v45, 6  ;;  %v2516_v35 = vadd.f32 %v10555_v36, %v7931_v19  ;;  %v2611_v19 = vrot.slane %v2514_v21, 4  ;;  %v2612_v36 = vrot.slane %v2514_v21, 6 }
 0x70f   : > { %5062 = vrot.lane.b32.xlu2 %v8892_v31, %s7075_s19  ;;  %10554 = vst [vmem:[#allocation61_spill] sm:$0xff] %v9153_v60  ;;  %v9175_v60 = vadd.f32 %v8955_v0, %v2605_v9  ;;  %v9197_v14 = vadd.f32 %v8969_v27, %v2610_v49  ;;  %v9217_v62 = vadd.f32 %v8969_v27, %v2613_v43 }
 0x710   : > { %10557 = vst [vmem:[#allocation62_spill] sm:$0xff] %v9178_v23  ;;  %v9191_v9 = vadd.f32 %v8961_v34, %v2609_v12  ;;  %v2616_v11 = vrot.slane %v2516_v35, 4  ;;  %v10561_v23 = vld [vmem:[#allocation22_spill] sm:$0xff]  ;;  %v9208_v12 = vadd.f32 %v8966_v46, %v2515_v47 }
 0x711   : > { %10556 = vst [vmem:[#allocation23_spill] sm:$0xff] %v9175_v60  ;;  %v2615_v60 = vrot.slane %v2516_v35, 2 }
 0x712   : > { %10558 = vst [vmem:[#allocation63_spill] sm:$0xff] %v9181_v24  ;;  %v10560_v24 = vld [vmem:[#allocation6_spill] sm:$0xff]  ;;  %v9235_v43 = vadd.f32 %v8969_v27, %v2616_v11 }
 0x713   : > { %10559 = vst [vmem:[#allocation64_spill] sm:$0xff] %v9185_v28  ;;  %v2518_v4 = vadd.f32 %v10561_v23, %v10560_v24  ;;  %v10565_v28 = vld [vmem:[#allocation4_spill] sm:$0xff]  ;;  %v9220_v23 = vadd.f32 %v8955_v0, %v2614_v18  ;;  %v9227_v47 = vadd.f32 %v8966_v46, %v2615_v60  ;;  %v2482_v60 = vpop.f32.mrf.mxu0 }
 0x714   : > { %10564 = vst [vmem:[#allocation65_spill] sm:$0xff] %v9208_v12  ;;  %v2520_v21 = vadd.f32 %v8916_v8, %v10565_v28  ;;  %v10568_v24 = vld [vmem:[#allocation20_spill] sm:$0xff]  ;;  %v10569_v28 = vld [vmem:[#allocation5_spill] sm:$0xff] }
 0x715   : > { %10567 = vst [vmem:[#allocation66_spill] sm:$0xff] %v9217_v62  ;;  %v2619_v8 = vrot.slane %v10568_v24, 4  ;;  %v9232_v12 = vadd.f32 %v8932_v63, %v10569_v28  ;;  %v2620_v18 = vrot.slane %v2518_v4, 2  ;;  %v2621_v62 = vrot.slane %v2518_v4, 4  ;;  %v10576_v28 = vld [vmem:[#allocation7_spill] sm:$0xff] }
 0x716   : > { %5038 = vrot.lane.b32.xlu1 %v8892_v31, %s7076_s21  ;;  %5008 = vrot.lane.b32.xlu0 %v8892_v31, %s7062_s16  ;;  %v2626_v51 = vrot.slane %v2520_v21, 2  ;;  %v2627_v39 = vrot.slane %v2520_v21, 4  ;;  %v2628_v37 = vrot.slane %v2520_v21, 6  ;;  %v9246_v63 = vadd.f32 %v8961_v34, %v10568_v24 }
 0x717   : > { %4996 = vrot.lane.b32.xlu2 %v8892_v31, %s7060_s14  ;;  %10570 = vst [vmem:[#allocation20_spill] sm:$0xff] %v9232_v12  ;;  %v9253_v40 = vadd.f32 %v8943_v30, %v10576_v28  ;;  %v9256_v21 = vadd.f32 %v8969_v27, %v2619_v8  ;;  %v10583_v30 = vld [vmem:[#allocation10_spill] sm:$0xff] }
 0x718   : > { %10574 = vst [vmem:[#allocation67_spill] sm:$0xff] %v9246_v63  ;;  %v2527_v8 = vadd.f32 %v9062_v2, %v10583_v30  ;;  %v9275_v28 = vadd.f32 %v8955_v0, %v2626_v51  ;;  %v10591_v51 = vld [vmem:[#allocation8_spill] sm:$0xff] }
 0x719   : > { %10577 = vst [vmem:[#allocation7_spill] sm:$0xff] %v9253_v40 }
 0x71a   : > { %10578 = vst [vmem:[#allocation69_spill] sm:$0xff] %v9256_v21 }
 0x71b   : > { %10584 = vst [vmem:[#allocation10_spill] sm:$0xff] %v9275_v28  ;;  %v10596_v28 = vld [vmem:[#allocation12_spill] sm:$0xff]  ;;  %v2485_v21 = vpop.f32.mrf.mxu0 }
 0x71e   : > { %5032 = vrot.lane.b32.xlu1 %v8892_v31, %s7077_s22  ;;  %5056 = vrot.lane.b32.xlu0 %v8892_v31, %s7078_s23 }
 0x71f   : > { %5044 = vrot.lane.b32.xlu2 %v8892_v31, %s7079_s24 }
 0x726   : > { %5004 = vrot.lane.b32.xlu1 %v8918_v58, %s7057_s11  ;;  %5076 = vrot.lane.b32.xlu0 %v8918_v58, %s7072_s10 }
 0x727   : > { %5028 = vrot.lane.b32.xlu2 %v8918_v58, %s7061_s15 }
 0x72e   : > { %5052 = vrot.lane.b32.xlu1 %v8918_v58, %s7073_s20  ;;  %5022 = vrot.lane.b32.xlu0 %v8918_v58, %s7063_s17 }
 0x72f   : > { %5016 = vrot.lane.b32.xlu2 %v8918_v58, %s7058_s12 }
 0x736   : > { %4992 = vrot.lane.b32.xlu1 %v8918_v58, %s7059_s13  ;;  %5070 = vrot.lane.b32.xlu0 %v8918_v58, %s7074_s18  ;;  %s6831_s13 = sshll.u32 %s10809_s27, 7 }
 0x737   : > { %5064 = vrot.lane.b32.xlu2 %v8918_v58, %s7075_s19  ;;  %s9561_s15 = scalar_lea.vmem %s10352_s8, %s6831_s13 }
 0x73e   : > { %5040 = vrot.lane.b32.xlu1 %v8918_v58, %s7076_s21  ;;  %5010 = vrot.lane.b32.xlu0 %v8918_v58, %s7062_s16 }
 0x73f   : > { %4998 = vrot.lane.b32.xlu2 %v8918_v58, %s7060_s14 }
 0x746   : > { %5034 = vrot.lane.b32.xlu1 %v8918_v58, %s7077_s22  ;;  %5058 = vrot.lane.b32.xlu0 %v8918_v58, %s7078_s23 }
 0x747   : > { %5046 = vrot.lane.b32.xlu2 %v8918_v58, %s7079_s24  ;;  %v2608_v58 = vrot.slane %v8323_v45, 4  ;;  %v9202_v45 = vadd.f32 %v8955_v0, %v2611_v19  ;;  %v2617_v19 = vrot.slane %v2516_v35, 6 }
 0x749   : > { %10562 = vst [vmem:[#allocation6_spill] sm:$0xff] %v9202_v45  ;;  %v2622_v45 = vrot.slane %v2518_v4, 6  ;;  %v9242_v13 = vadd.f32 %v8955_v0, %v2617_v19  ;;  %v2632_v19 = vrot.slane %v9232_v12, 4 }
 0x759   : > { %v8957_v52 = vpop.permute.xlu2 %5026 }
 0x761   : > { %v9003_v5 = vpop.permute.xlu2 %5014 }
 0x769   : > { %v9101_v10 = vpop.permute.xlu2 %5062 }
 0x76a   : > { %v5230_v29 = vrot.slane %v9101_v10, 4 }
 0x770   : > { %v9140_v6 = vpop.permute.xlu1 %5002  ;;  %v9142_v26 = vpop.permute.xlu0 %5074 }
 0x771   : > { %v9150_v15 = vsel %vm3888_vm8, %v9142_v26, %v5230_v29  ;;  %v9172_v29 = vadd.f32 %v8969_v27, %v8315_v33  ;;  %v9188_v33 = vadd.f32 %v8955_v0, %v2608_v58  ;;  %v9205_v58 = vadd.f32 %v8961_v34, %v2612_v36 }
 0x772   : > { %v2618_v36 = vrot.slane %v10568_v24, 2  ;;  %v9264_v24 = vadd.f32 %v8961_v34, %v2620_v18 }
 0x773   : > { %10563 = vst [vmem:[#allocation22_spill] sm:$0xff] %v9205_v58  ;;  %v9224_v58 = vadd.f32 %v8961_v34, %v2516_v35  ;;  %v10571_v35 = vld [vmem:[#allocation9_spill] sm:$0xff] }
 0x774   : > { %v9239_v56 = vadd.f32 %v8925_v41, %v10571_v35  ;;  %10573 = vst [vmem:[#allocation9_spill] sm:$0xff] %v9242_v13  ;;  %v9249_v11 = vadd.f32 %v8966_v46, %v2618_v36  ;;  %v9259_v41 = vadd.f32 %v8955_v0, %v2518_v4  ;;  %v2633_v35 = vrot.slane %v9232_v12, 6 }
 0x775   : > { %10580 = vst [vmem:[#allocation71_spill] sm:$0xff] %v9264_v24  ;;  %v9267_v36 = vadd.f32 %v8966_v46, %v2621_v62  ;;  %v9278_v4 = vadd.f32 %v8961_v34, %v2627_v39  ;;  %v9281_v12 = vadd.f32 %v8966_v46, %v2628_v37  ;;  %v9296_v39 = vadd.f32 %v8950_v22, %v10591_v51 }
 0x776   : > { %10572 = vst [vmem:[#allocation5_spill] sm:$0xff] %v9239_v56  ;;  %v9285_v18 = vadd.f32 %v8969_v27, %v9239_v56  ;;  %v9299_v37 = vadd.f32 %v8955_v0, %v2632_v19  ;;  %v9302_v56 = vadd.f32 %v8961_v34, %v2633_v35  ;;  %v2646_v51 = vrot.slane %v2527_v8, 6 }
 0x777   : > { %10575 = vst [vmem:[#allocation68_spill] sm:$0xff] %v9249_v11  ;;  %v9270_v11 = vadd.f32 %v8969_v27, %v2622_v45  ;;  %v2634_v45 = vrot.slane %v9253_v40, 2  ;;  %v2528_v19 = vadd.f32 %v9159_v7, %v10596_v28 }
 0x778   : > { %v9212_v3 = vpop.permute.xlu1 %5050  ;;  %v9214_v49 = vpop.permute.xlu0 %5020  ;;  %10579 = vst [vmem:[#allocation70_spill] sm:$0xff] %v9259_v41  ;;  %v5082_v41 = vrot.slane %v8892_v31, 4 }
 0x779   : > { %10566 = vst [vmem:[#allocation4_spill] sm:$0xff] %v9212_v3  ;;  %v9318_v24 = vadd.f32 %v8969_v27, %v2634_v45 }
 0x77a   : > { %10581 = vst [vmem:[#allocation72_spill] sm:$0xff] %v9267_v36 }
 0x77b   : > { %10582 = vst [vmem:[#allocation73_spill] sm:$0xff] %v9270_v11  ;;  %v10589_v11 = vld [vmem:[#allocation11_spill] sm:$0xff] }
 0x77c   : > { %10585 = vst [vmem:[#allocation74_spill] sm:$0xff] %v9278_v4  ;;  %v9292_v2 = vadd.f32 %v8948_v32, %v10589_v11  ;;  %v9308_v4 = vadd.f32 %v8966_v46, %v9253_v40  ;;  %v2644_v32 = vrot.slane %v2527_v8, 2  ;;  %v2645_v11 = vrot.slane %v2527_v8, 4 }
 0x77d   : > { %10586 = vst [vmem:[#allocation75_spill] sm:$0xff] %v9281_v12  ;;  %v5118_v12 = vrot.slane %v9003_v5, 4  ;;  %v2647_v40 = vrot.slane %v2528_v19, 2 }
 0x77e   : > { %10587 = vst [vmem:[#allocation76_spill] sm:$0xff] %v9285_v18  ;;  %v5116_v18 = vrot.slane %v8957_v52, 4  ;;  %v9331_v28 = vadd.f32 %v8961_v34, %v2644_v32 }
 0x77f   : > { %10590 = vst [vmem:[#allocation11_spill] sm:$0xff] %v9292_v2  ;;  %v5119_v7 = vsel %vm3888_vm8, %v8957_v52, %v5118_v12 }
 0x780   : > { %v4991_v62 = vpop.permute.xlu1 %4990  ;;  %v9287_v36 = vpop.permute.xlu0 %5068  ;;  %10592 = vst [vmem:[#allocation8_spill] sm:$0xff] %v9296_v39  ;;  %v5117_v35 = vsel %vm3888_vm8, %v5116_v18, %v9003_v5  ;;  %v9334_v18 = vadd.f32 %v8966_v46, %v2645_v11  ;;  %v5127_v2 = vperm.slane %v5119_v7, %v8453_v38  ;;  %v10605_v7 = vld [vmem:[#allocation13_spill] sm:$0xff] }
 0x781   : > { %10588 = vst [vmem:[#allocation77_spill] sm:$0xff] %v9287_v36  ;;  %v5094_v30 = vrot.slane %v4991_v62, 4  ;;  %v9337_v45 = vperm.slane %v5117_v35, %v8453_v38 }
 0x782   : > { %10593 = vst [vmem:[#allocation78_spill] sm:$0xff] %v9299_v37  ;;  %v4997_v37 = vpop.permute.xlu2 %4996 }
 0x783   : > { %10594 = vst [vmem:[#allocation79_spill] sm:$0xff] %v9302_v56  ;;  %v5095_v22 = vsel %vm3888_vm8, %v9140_v6, %v5094_v30  ;;  %v5092_v56 = vrot.slane %v9140_v6, 4  ;;  %v9324_v30 = vadd.f32 %v8955_v0, %v2527_v8  ;;  %v5083_v8 = vsel %vm3888_vm8, %v4997_v37, %v5082_v41 }
 0x784   : > { %10595 = vst [vmem:[#allocation80_spill] sm:$0xff] %v9308_v4  ;;  %v5103_v6 = vperm.slane %v5095_v22, %v8453_v38  ;;  %v9341_v4 = vadd.f32 %v8969_v27, %v2646_v51  ;;  %v5080_v52 = vrot.slane %v4997_v37, 4  ;;  %v10602_v22 = vld [vmem:[#allocation16_spill] sm:$0xff]  ;;  %v5091_v35 = vperm.slane %v5083_v8, %v8453_v38 }
 0x785   : > { %10597 = vst [vmem:[#allocation12_spill] sm:$0xff] %v9318_v24  ;;  %v5093_v5 = vsel %vm3888_vm8, %v5092_v56, %v4991_v62  ;;  %v5104_v56 = vrot.slane %v9214_v49, 4  ;;  %v2648_v62 = vrot.slane %v2528_v19, 4  ;;  %v2529_v32 = vadd.f32 %v2482_v60, %v10602_v22 }
 0x786   : > { %10598 = vst [vmem:[#allocation81_spill] sm:$0xff] %v9324_v30  ;;  %v9347_v11 = vperm.slane %v5093_v5, %v8453_v38  ;;  %v5140_v39 = vrot.slane %v5103_v6, 4  ;;  %v2649_v24 = vrot.slane %v2528_v19, 6  ;;  %v9352_v37 = vadd.f32 %v8955_v0, %v2528_v19 }
 0x787   : > { %10599 = vst [vmem:[#allocation82_spill] sm:$0xff] %v9331_v28  ;;  %v9359_v60 = vadd.f32 %v8961_v34, %v2647_v40  ;;  %v9362_v5 = vadd.f32 %v2485_v21, %v10605_v7  ;;  %v5081_v8 = vsel %vm3888_vm8, %v5080_v52, %v8892_v31  ;;  %v5142_v40 = vrot.slane %v5091_v35, 4  ;;  %v2487_v28 = vpop.f32.mrf.mxu0 }
 0x788   : > { %10600 = vst [vmem:[#allocation83_spill] sm:$0xff] %v9334_v18  ;;  %v5009_v12 = vpop.permute.xlu0 %5008  ;;  %v5128_v19 = vrot.slane %v9347_v11, 4  ;;  %v2651_v7 = vrot.slane %v2529_v32, 4  ;;  %v9377_v31 = vperm.slane %v5081_v8, %v8453_v38 }
 0x789   : > { %10601 = vst [vmem:[#allocation84_spill] sm:$0xff] %v9341_v4  ;;  %v5105_v41 = vsel %vm3888_vm8, %v5104_v56, %v5009_v12  ;;  %v5106_v51 = vrot.slane %v5009_v12, 4  ;;  %v5152_v4 = vrot.slane %v9337_v45, 4  ;;  %v5164_v12 = vrot.slane %v5127_v2, 4 }
 0x78a   : > { %10603 = vst [vmem:[#allocation16_spill] sm:$0xff] %v9352_v37  ;;  %v9356_v18 = vperm.slane %v5105_v41, %v8453_v38  ;;  %v2650_v37 = vrot.slane %v2529_v32, 2 }
 0x78b   : > { %10604 = vst [vmem:[#allocation85_spill] sm:$0xff] %v9359_v60  ;;  %v5107_v56 = vsel %vm3888_vm8, %v9214_v49, %v5106_v51  ;;  %v5141_v60 = vsel %vm3888_vm8, %v5140_v39, %v5091_v35  ;;  %v9381_v51 = vadd.f32 %v8966_v46, %v2648_v62  ;;  %v2653_v39 = vrot.slane %v9362_v5, 2 }
 0x78c   : > { %v5115_v22 = vperm.slane %v5107_v56, %v8453_v38  ;;  %v5153_v41 = vsel %vm3888_vm8, %v5152_v4, %v9356_v18  ;;  %v2652_v56 = vrot.slane %v2529_v32, 6  ;;  %v5143_v4 = vsel %vm3888_vm8, %v5103_v6, %v5142_v40 }
 0x78d   : > { %v9374_v21 = vperm.slane %v5153_v41, %v8465_v25  ;;  %10606 = vst [vmem:[#allocation13_spill] sm:$0xff] %v9381_v51  ;;  %v5129_v35 = vsel %vm3888_vm8, %v5128_v19, %v9377_v31  ;;  %v5147_v8 = vperm.slane %v5141_v60, %v8465_v25  ;;  %v5228_v62 = vrot.slane %v9142_v26, 4 }
 0x78e   : > { %v5165_v49 = vsel %vm3888_vm8, %v5164_v12, %v5115_v22  ;;  %v5166_v52 = vrot.slane %v5115_v22, 4  ;;  %v9391_v12 = vadd.f32 %v8969_v27, %v2649_v24  ;;  %v9397_v22 = vadd.f32 %v8955_v0, %v2650_v37 }
 0x78f   : > { %v5171_v30 = vperm.slane %v5165_v49, %v8465_v25  ;;  %v5176_v6 = vrot.slane %v9374_v21, 4  ;;  %v9400_v40 = vadd.f32 %v8961_v34, %v2651_v7  ;;  %v5151_v19 = vperm.slane %v5143_v4, %v8465_v25  ;;  %v2490_v63 = vpop.f32.mrf.mxu0 }
 0x790   : > { %v5167_v41 = vsel %vm3888_vm8, %v5127_v2, %v5166_v52  ;;  %10607 = vst [vmem:[#allocation86_spill] sm:$0xff] %v9391_v12  ;;  %v9404_v2 = vadd.f32 %v8966_v46, %v2652_v56  ;;  %v2654_v24 = vrot.slane %v9362_v5, 4  ;;  %v9408_v26 = vperm.slane %v5129_v35, %v8465_v25  ;;  %v10613_v56 = vld [vmem:[#allocation19_spill] sm:$0xff] }
 0x791   : > { %v5175_v32 = vperm.slane %v5167_v41, %v8465_v25  ;;  %10608 = vst [vmem:[#allocation87_spill] sm:$0xff] %v9397_v22  ;;  %v5184_v60 = vrot.slane %v5171_v30, 4  ;;  %v2655_v52 = vrot.slane %v9362_v5, 6  ;;  %v9413_v37 = vadd.f32 %v8969_v27, %v9362_v5  ;;  %v9418_v41 = vpop.permute.xlu1 %5038 }
 0x792   : > { %10609 = vst [vmem:[#allocation88_spill] sm:$0xff] %v9400_v40  ;;  %v9416_v7 = vadd.f32 %v8955_v0, %v2653_v39  ;;  %v5186_v4 = vrot.slane %v5147_v8, 4  ;;  %v9421_v12 = vadd.f32 %v2487_v28, %v10613_v56  ;;  %v9425_v35 = vsel %vm3888_vm8, %v5228_v62, %v9101_v10 }
 0x793   : > { %10610 = vst [vmem:[#allocation89_spill] sm:$0xff] %v9404_v2  ;;  %v5188_v49 = vrot.slane %v5175_v32, 4  ;;  %v5130_v51 = vrot.slane %v9377_v31, 4  ;;  %v5177_v2 = vsel %vm3888_vm8, %v5176_v6, %v9408_v26  ;;  %v5204_v5 = vrot.slane %v9212_v3, 4 }
 0x794   : > { %10611 = vst [vmem:[#allocation90_spill] sm:$0xff] %v9413_v37  ;;  %v5190_v37 = vrot.slane %v5151_v19, 4  ;;  %v5185_v39 = vsel %vm3888_vm8, %v5184_v60, %v5147_v8  ;;  %v5178_v40 = vrot.slane %v9408_v26, 4  ;;  %v5206_v28 = vrot.slane %v9418_v41, 4 }
 0x795   : > { %10612 = vst [vmem:[#allocation91_spill] sm:$0xff] %v9416_v7  ;;  %v5187_v7 = vsel %vm3888_vm8, %v5171_v30, %v5186_v4  ;;  %v5154_v56 = vrot.slane %v9356_v18, 4  ;;  %v5189_v10 = vsel %vm3888_vm8, %v5188_v49, %v5151_v19  ;;  %v5560_v62 = vrot.slane %v5177_v2, 2 }
 0x796   : > { %10614 = vst [vmem:[#allocation19_spill] sm:$0xff] %v9421_v12  ;;  %v5191_v31 = vsel %vm3888_vm8, %v5175_v32, %v5190_v37  ;;  %v5561_v22 = vrot.slane %v5177_v2, 4  ;;  %v5562_v6 = vrot.slane %v5177_v2, 6  ;;  %v5584_v13 = vrot.slane %v5185_v39, 2 }
 0x797   : > { %10615 = vst [vmem:[#allocation92_spill] sm:$0xff] %v9425_v35  ;;  %v5585_v0 = vrot.slane %v5185_v39, 4  ;;  %v5586_v55 = vrot.slane %v5185_v39, 6  ;;  %v5590_v8 = vrot.slane %v5187_v7, 2  ;;  %v5591_v60 = vrot.slane %v5187_v7, 4 }
 0x798   : > { %v5592_v30 = vrot.slane %v5187_v7, 6  ;;  %v5596_v4 = vrot.slane %v5189_v10, 2  ;;  %v5597_v26 = vrot.slane %v5189_v10, 4  ;;  %v5598_v54 = vrot.slane %v5189_v10, 6 }
 0x799   : > { %v5602_v36 = vrot.slane %v5191_v31, 2  ;;  %v5603_v27 = vrot.slane %v5191_v31, 4  ;;  %v5604_v18 = vrot.slane %v5191_v31, 6  ;;  %v5752_v19 = vadd.f32 %v5177_v2, %v8979_v42 }
 0x79a   : > { %v5753_v32 = vadd.f32 %v5560_v62, %v8982_v48  ;;  %v5754_v49 = vadd.f32 %v5561_v22, %v8987_v50  ;;  %v5755_v37 = vadd.f32 %v5562_v6, %v8990_v16  ;;  %v9443_v25 = vadd.f32 %v5185_v39, %v9111_v17  ;;  %v10634_v39 = vld [vmem:[#allocation17_spill] sm:$0xff]  ;;  %v5033_v62 = vpop.permute.xlu1 %5032 }
 0x79b   : > { %v9446_v3 = vadd.f32 %v5584_v13, %v9114_v44  ;;  %v9449_v35 = vadd.f32 %v5585_v0, %v9117_v59  ;;  %v9452_v12 = vadd.f32 %v5586_v55, %v9120_v57  ;;  %v9455_v42 = vadd.f32 %v5187_v7, %v9162_v1 }
 0x79c   : > { %v9458_v48 = vadd.f32 %v5590_v8, %v9165_v53  ;;  %v9461_v50 = vadd.f32 %v5591_v60, %v9168_v20  ;;  %v9464_v16 = vadd.f32 %v5592_v30, %v9172_v29  ;;  %v9467_v13 = vadd.f32 %v5189_v10, %v9188_v33  ;;  %v10626_v33 = vld [vmem:[#allocation15_spill] sm:$0xff]  ;;  %v5045_v10 = vpop.permute.xlu2 %5044  ;;  %v5057_v30 = vpop.permute.xlu0 %5056 }
 0x79d   : > { %v9470_v0 = vadd.f32 %v5596_v4, %v9191_v9  ;;  %v9473_v55 = vadd.f32 %v5597_v26, %v9194_v61  ;;  %v9476_v1 = vadd.f32 %v5598_v54, %v9197_v14  ;;  %v9479_v57 = vadd.f32 %v5191_v31, %v9220_v23  ;;  %v2492_v23 = vpop.f32.mrf.mxu0  ;;  %v10635_v26 = vld [vmem:[#allocation77_spill] sm:$0xff] }
 0x79e   : > { %10616 = vst [vmem:[#allocation93_spill] sm:$0xff] %v9464_v16  ;;  %v9482_v17 = vadd.f32 %v5602_v36, %v9224_v58  ;;  %v9485_v44 = vadd.f32 %v5603_v27, %v9227_v47  ;;  %v9488_v59 = vadd.f32 %v5604_v18, %v9235_v43  ;;  %v5155_v53 = vsel %vm3888_vm8, %v9337_v45, %v5154_v56  ;;  %v10659_v16 = vld [vmem:[#allocation23_spill] sm:$0xff] }
 0x79f   : > { %10617 = vst [vmem:[#allocation94_spill] sm:$0xff] %v9467_v13  ;;  %v5880_v61 = vmax.f32 %v5752_v19, 0.0  ;;  %v5881_v20 = vmax.f32 %v5753_v32, 0.0  ;;  %v5882_v29 = vmax.f32 %v5754_v49, 0.0  ;;  %v9493_v54 = vadd.f32 %v8961_v34, %v2654_v24  ;;  %v10631_v24 = vld [vmem:[#allocation3_spill] sm:$0xff]  ;;  %v10636_v32 = vld [vmem:[#allocation34_spill] sm:$0xff] }
 0x7a0   : > { %10618 = vst [vmem:[#allocation95_spill] sm:$0xff] %v9470_v0  ;;  %v9496_v9 = vadd.f32 %v2490_v63, %v10626_v33  ;;  %v5179_v14 = vsel %vm3888_vm8, %v9374_v21, %v5178_v40  ;;  %v5883_v27 = vmax.f32 %v5755_v37, 0.0  ;;  %v9501_v58 = vadd.f32 %v8966_v46, %v2655_v52  ;;  %v10628_v63 = vld [vmem:[#allocation19_spill] sm:$0xff]  ;;  %v10629_v21 = vld [vmem:[#allocation92_spill] sm:$0xff] }
 0x7a1   : > { %10619 = vst [vmem:[#allocation96_spill] sm:$0xff] %v9473_v55  ;;  %v9505_v47 = vperm.slane %v9150_v15, %v8453_v38  ;;  %v5131_v43 = vsel %vm3888_vm8, %v9347_v11, %v5130_v51  ;;  %v5205_v36 = vsel %vm3888_vm8, %v5204_v5, %v9418_v41  ;;  %v2656_v45 = vrot.slane %v10628_v63, 4  ;;  %v10630_v40 = vld [vmem:[#allocation4_spill] sm:$0xff] }
 0x7a2   : > { %10620 = vst [vmem:[#allocation97_spill] sm:$0xff] %v9476_v1  ;;  %v9514_v22 = vperm.slane %v10629_v21, %v8453_v38  ;;  %v5207_v2 = vsel %vm3888_vm8, %v10630_v40, %v5206_v28  ;;  %v5163_v52 = vperm.slane %v5155_v53, %v10631_v24  ;;  %v10632_v11 = vld [vmem:[#allocation28_spill] sm:$0xff]  ;;  %v5566_v7 = vrot.slane %v5179_v14, 2  ;;  %v10637_v53 = vld [vmem:[#allocation35_spill] sm:$0xff]  ;;  %v10639_v40 = vld [vmem:[#allocation37_spill] sm:$0xff] }
 0x7a3   : > { %10621 = vst [vmem:[#allocation98_spill] sm:$0xff] %v9479_v57  ;;  %v9522_v51 = vadd.f32 %v10632_v11, %v10628_v63  ;;  %v5567_v41 = vrot.slane %v5179_v14, 4  ;;  %v9526_v56 = vadd.f32 %v2492_v23, %v10634_v39  ;;  %v5139_v28 = vperm.slane %v5131_v43, %v10631_v24  ;;  %v10656_v1 = vld [vmem:[#allocation59_spill] sm:$0xff]  ;;  %v10657_v0 = vld [vmem:[#allocation60_spill] sm:$0xff] }
 0x7a4   : > { %10622 = vst [vmem:[#allocation99_spill] sm:$0xff] %v9482_v17  ;;  %v9530_v31 = vperm.slane %v5205_v36, %v8453_v38  ;;  %v5276_v6 = vrot.slane %v9505_v47, 4  ;;  %v5215_v8 = vperm.slane %v5207_v2, %v8453_v38  ;;  %v5568_v60 = vrot.slane %v5179_v14, 6  ;;  %v10655_v17 = vld [vmem:[#allocation58_spill] sm:$0xff] }
 0x7a5   : > { %10623 = vst [vmem:[#allocation100_spill] sm:$0xff] %v9485_v44  ;;  %v5264_v4 = vrot.slane %v9514_v22, 4  ;;  %v5216_v18 = vrot.slane %v10635_v26, 4  ;;  %v5180_v19 = vrot.slane %v5163_v52, 4  ;;  %v5760_v49 = vadd.f32 %v5179_v14, %v10636_v32 }
 0x7a6   : > { %10624 = vst [vmem:[#allocation101_spill] sm:$0xff] %v9488_v59  ;;  %v5192_v37 = vrot.slane %v5045_v10, 4  ;;  %v5194_v33 = vrot.slane %v5033_v62, 4  ;;  %v5240_v23 = vrot.slane %v9530_v31, 4  ;;  %v5218_v36 = vrot.slane %v5057_v30, 4 }
 0x7a7   : > { %10625 = vst [vmem:[#allocation102_spill] sm:$0xff] %v9493_v54  ;;  %v5217_v43 = vsel %vm3888_vm8, %v5216_v18, %v5057_v30  ;;  %v5252_v21 = vrot.slane %v5215_v8, 4  ;;  %v5763_v2 = vadd.f32 %v5568_v60, %v10639_v40  ;;  %v5181_v14 = vsel %vm3888_vm8, %v5180_v19, %v5139_v28  ;;  %v10653_v54 = vld [vmem:[#allocation32_spill] sm:$0xff] }
 0x7a8   : > { %10627 = vst [vmem:[#allocation15_spill] sm:$0xff] %v9501_v58  ;;  %v5195_v39 = vsel %vm3888_vm8, %v5045_v10, %v5194_v33  ;;  %v9544_v5 = vperm.slane %v5217_v43, %v8453_v38  ;;  %v5219_v10 = vsel %vm3888_vm8, %v10635_v26, %v5218_v36 }
 0x7a9   : > { %6136 = vst [vmem:[#allocation1] ss:$4 sm:$0xff] %v5880_v61  ;;  %v5761_v61 = vadd.f32 %v5566_v7, %v10637_v53  ;;  %v5203_v32 = vperm.slane %v5195_v39, %v8453_v38  ;;  %v5891_v19 = vmax.f32 %v5763_v2, 0.0  ;;  %v5227_v26 = vperm.slane %v5219_v10, %v8453_v38  ;;  %v10640_v2 = vld [vmem:[#allocation42_spill] sm:$0xff]  ;;  %v10642_v10 = vld [vmem:[#allocation44_spill] sm:$0xff] }
 0x7aa   : > { %6138 = vst [vmem:[#allocation1 + $0x1] ss:$4 sm:$0xff] %v5881_v20  ;;  %v10638_v20 = vld [vmem:[#allocation36_spill] sm:$0xff]  ;;  %v5768_v39 = vadd.f32 %v5181_v14, %v10640_v2  ;;  %v10644_v2 = vld [vmem:[#allocation50_spill] sm:$0xff] }
 0x7ab   : > { %10633 = vst [vmem:[#allocation19_spill] sm:$0xff] %v9522_v51  ;;  %v5889_v53 = vmax.f32 %v5761_v61, 0.0  ;;  %v5253_v33 = vsel %vm3888_vm8, %v5252_v21, %v5203_v32  ;;  %v5254_v43 = vrot.slane %v5203_v32, 4  ;;  %v5278_v32 = vrot.slane %v5227_v26, 4 }
 0x7ac   : > { %6140 = vst [vmem:[#allocation1 + $0x2] ss:$4 sm:$0xff] %v5882_v29  ;;  %v5762_v29 = vadd.f32 %v5567_v41, %v10638_v20  ;;  %v5888_v41 = vmax.f32 %v5760_v49, 0.0  ;;  %v5193_v20 = vsel %vm3888_vm8, %v5192_v37, %v5033_v62  ;;  %v5259_v62 = vperm.slane %v5253_v33, %v10631_v24 }
 0x7ad   : > { %6142 = vst [vmem:[#allocation1 + $0x3] ss:$4 sm:$0xff] %v5883_v27  ;;  %v5182_v27 = vrot.slane %v5139_v28, 4  ;;  %v5572_v28 = vrot.slane %v5181_v14, 2  ;;  %v5573_v49 = vrot.slane %v5181_v14, 4  ;;  %v5574_v37 = vrot.slane %v5181_v14, 6 }
 0x7ae   : > { %v5890_v18 = vmax.f32 %v5762_v29, 0.0  ;;  %v9566_v61 = vperm.slane %v5193_v20, %v8453_v38  ;;  %v5298_v36 = vrot.slane %v5259_v62, 4  ;;  %v5279_v14 = vsel %vm3888_vm8, %v9505_v47, %v5278_v32 }
 0x7af   : > { %v9549_v7 = vsel %vm3888_vm8, %v5163_v52, %v5182_v27  ;;  %v5265_v52 = vsel %vm3888_vm8, %v5264_v4, %v9544_v5  ;;  %v5255_v4 = vsel %vm3888_vm8, %v5215_v8, %v5254_v43  ;;  %v5770_v33 = vadd.f32 %v5573_v49, %v10642_v10  ;;  %v10643_v43 = vld [vmem:[#allocation45_spill] sm:$0xff] }
 0x7b0   : > { %v5578_v29 = vrot.slane %v9549_v7, 2  ;;  %v5263_v27 = vperm.slane %v5255_v4, %v10631_v24  ;;  %v9572_v21 = vperm.slane %v5265_v52, %v10631_v24  ;;  %v5579_v40 = vrot.slane %v9549_v7, 4 }
 0x7b1   : > { %v5580_v8 = vrot.slane %v9549_v7, 6  ;;  %v5771_v52 = vadd.f32 %v5574_v37, %v10643_v43  ;;  %v9597_v49 = vadd.f32 %v9549_v7, %v10644_v2  ;;  %v10645_v37 = vld [vmem:[#allocation51_spill] sm:$0xff]  ;;  %v5896_v47 = vmax.f32 %v5768_v39, 0.0  ;;  %v10647_v7 = vld [vmem:[#allocation26_spill] sm:$0xff] }
 0x7b2   : > { %v5898_v2 = vmax.f32 %v5770_v33, 0.0  ;;  %v9629_v33 = vpop.permute.xlu1 %5004 }
 0x7b3   : > { %10650 = vst [vmem:[#allocation4_spill] sm:$0xff] %v9629_v33  ;;  %v10658_v33 = vld [vmem:[#allocation61_spill] sm:$0xff] }
 0x7b4   : > { %v6151_v30 = vld.sshfl [vmem:[#allocation1] sm:$0xff pattern:$0x73625140] }
 0x7b5   : > { %6153 = vst [vmem:[#allocation1] ss:$4 sm:$0xff] %v5888_v41  ;;  %v6335_v60 = vpack.c.bf16 %v6151_v30, %v6151_v30  ;;  %v5277_v41 = vsel %vm3888_vm8, %v5276_v6, %v5227_v26  ;;  %v5302_v30 = vrot.slane %v5263_v27, 4  ;;  %v5287_v6 = vperm.slane %v5279_v14, %v10631_v24 }
 0x7b6   : > { %6154 = vst [vmem:[#allocation1 + $0x1] ss:$4 sm:$0xff] %v5889_v53  ;;  %v10641_v53 = vld [vmem:[#allocation43_spill] sm:$0xff]  ;;  %v5283_v20 = vperm.slane %v5277_v41, %v10631_v24  ;;  %v5288_v26 = vrot.slane %v9572_v21, 4  ;;  %v9600_v41 = vadd.f32 %v5578_v29, %v10645_v37  ;;  %v10649_v37 = vld [vmem:[#allocation53_spill] sm:$0xff] }
 0x7b7   : > { %6155 = vst [vmem:[#allocation1 + $0x2] ss:$4 sm:$0xff] %v5890_v18  ;;  %v5769_v18 = vadd.f32 %v5572_v28, %v10641_v53  ;;  %v5300_v43 = vrot.slane %v5287_v6, 4 }
 0x7b8   : > { %6156 = vst [vmem:[#allocation1 + $0x3] ss:$4 sm:$0xff] %v5891_v19  ;;  %v5241_v19 = vsel %vm3888_vm8, %v5240_v23, %v9566_v61  ;;  %v5296_v28 = vrot.slane %v5283_v20, 4  ;;  %v9593_v4 = vsel %vm3888_vm8, %v5283_v20, %v5298_v36  ;;  %v10646_v23 = vld [vmem:[#allocation52_spill] sm:$0xff]  ;;  %v9610_v36 = vsel %vm3888_vm8, %v5287_v6, %v5302_v30  ;;  %v9622_v6 = vpop.permute.xlu0 %5076 }
 0x7b9   : > { %6368 = vst.msk [vmem:[%s9561_s15] sm:$0xf] %vm6367_vm9, %v6335_v60  ;;  %v9588_v60 = vpop.permute.xlu2 %5028  ;;  %v9603_v53 = vadd.f32 %v5579_v40, %v10646_v23  ;;  %v9606_v32 = vperm.slane %v5241_v19, %v10631_v24  ;;  %v9615_v20 = vadd.f32 %v10647_v7, %v2656_v45  ;;  %v5897_v14 = vmax.f32 %v5769_v18, 0.0  ;;  %v2495_v45 = vpop.f32.mrf.mxu0 }
 0x7ba   : > { %v5297_v10 = vsel %vm3888_vm8, %v5296_v28, %v5259_v62  ;;  %v5301_v30 = vsel %vm3888_vm8, %v5300_v43, %v5263_v27  ;;  %v9626_v23 = vadd.f32 %v5580_v8, %v10649_v37  ;;  %v5899_v40 = vmax.f32 %v5771_v52, 0.0  ;;  %v10651_v37 = vld [vmem:[#allocation30_spill] sm:$0xff] }
 0x7bb   : > { %10648 = vst [vmem:[#allocation92_spill] sm:$0xff] %v9615_v20  ;;  %v5289_v62 = vsel %vm3888_vm8, %v5288_v26, %v9606_v32  ;;  %v5904_v18 = vmax.f32 %v9597_v49, 0.0  ;;  %v5906_v26 = vmax.f32 %v9603_v53, 0.0  ;;  %v5587_v49 = vrot.slane %v5297_v10, 2  ;;  %v10654_v20 = vld [vmem:[#allocation33_spill] sm:$0xff] }
 0x7bc   : > { %v5564_v28 = vrot.slane %v5289_v62, 4  ;;  %v5565_v8 = vrot.slane %v5289_v62, 6  ;;  %v9636_v52 = vadd.f32 %v5289_v62, %v10651_v37  ;;  %v5589_v29 = vrot.slane %v5297_v10, 6  ;;  %v10652_v37 = vld [vmem:[#allocation31_spill] sm:$0xff] }
 0x7bd   : > { %v5594_v53 = vrot.slane %v9593_v4, 4  ;;  %v5599_v27 = vrot.slane %v5301_v30, 2  ;;  %v5600_v43 = vrot.slane %v5301_v30, 4  ;;  %v5601_v15 = vrot.slane %v5301_v30, 6 }
 0x7be   : > { %v5605_v51 = vrot.slane %v9610_v36, 2  ;;  %v5758_v59 = vadd.f32 %v5564_v28, %v10653_v54  ;;  %v9651_v44 = vadd.f32 %v5565_v8, %v10654_v20  ;;  %v9654_v57 = vadd.f32 %v5297_v10, %v10655_v17  ;;  %v10661_v20 = vld [vmem:[#allocation62_spill] sm:$0xff]  ;;  %v10662_v17 = vld [vmem:[#allocation63_spill] sm:$0xff] }
 0x7bf   : > { %v6161_v39 = vld.sshfl [vmem:[#allocation1] sm:$0xff pattern:$0x73625140]  ;;  %v9657_v55 = vadd.f32 %v5587_v49, %v10656_v1  ;;  %v9663_v38 = vadd.f32 %v5589_v29, %v10658_v33  ;;  %v10663_v1 = vld [vmem:[#allocation64_spill] sm:$0xff]  ;;  %v10665_v33 = vld [vmem:[#allocation22_spill] sm:$0xff] }
 0x7c0   : > { %6163 = vst [vmem:[#allocation1] ss:$4 sm:$0xff] %v5896_v47  ;;  %v6337_v19 = vpack.c.bf16 %v6161_v39, %v6161_v39  ;;  %v5905_v47 = vmax.f32 %v9600_v41, 0.0  ;;  %v5563_v39 = vrot.slane %v5289_v62, 2  ;;  %v5593_v41 = vrot.slane %v9593_v4, 2  ;;  %v9669_v54 = vpop.permute.xlu0 %5022 }
 0x7c1   : > { %6164 = vst [vmem:[#allocation1 + $0x1] ss:$4 sm:$0xff] %v5897_v14  ;;  %v5588_v14 = vrot.slane %v5297_v10, 4  ;;  %v5606_v62 = vrot.slane %v9610_v36, 4  ;;  %v9675_v10 = vadd.f32 %v5594_v53, %v10662_v17  ;;  %v10673_v17 = vld [vmem:[#allocation67_spill] sm:$0xff] }
 0x7c2   : > { %6165 = vst [vmem:[#allocation1 + $0x2] ss:$4 sm:$0xff] %v5898_v2  ;;  %v5595_v2 = vrot.slane %v9593_v4, 6  ;;  %v5757_v58 = vadd.f32 %v5563_v39, %v10652_v37  ;;  %v9667_v39 = vadd.f32 %v9593_v4, %v10659_v16  ;;  %v9672_v28 = vadd.f32 %v5593_v41, %v10661_v20  ;;  %v10667_v16 = vld [vmem:[#allocation65_spill] sm:$0xff]  ;;  %v10669_v37 = vld [vmem:[#allocation66_spill] sm:$0xff]  ;;  %v2497_v20 = vpop.f32.mrf.mxu0 }
 0x7c3   : > { %6166 = vst [vmem:[#allocation1 + $0x3] ss:$4 sm:$0xff] %v5899_v40  ;;  %v9643_v40 = vpop.permute.xlu2 %5016  ;;  %v9660_v13 = vadd.f32 %v5588_v14, %v10657_v0  ;;  %v10664_v0 = vld [vmem:[#allocation6_spill] sm:$0xff]  ;;  %v9684_v14 = vadd.f32 %v5599_v27, %v10665_v33  ;;  %v9687_v4 = vadd.f32 %v5600_v43, %v10667_v16  ;;  %v10671_v41 = vld [vmem:[#allocation9_spill] sm:$0xff]  ;;  %v9705_v43 = vpop.permute.xlu1 %5052 }
 0x7c4   : > { %6370 = vst.msk [vmem:[%s9561_s15 + $0x8] sm:$0xf] %vm6367_vm9, %v6337_v19  ;;  %v5607_v19 = vrot.slane %v9610_v36, 6  ;;  %v9678_v8 = vadd.f32 %v5595_v2, %v10663_v1  ;;  %v9681_v49 = vadd.f32 %v5301_v30, %v10664_v0  ;;  %v9694_v53 = vadd.f32 %v9610_v36, %v10671_v41  ;;  %v10675_v1 = vld [vmem:[#allocation68_spill] sm:$0xff]  ;;  %v10677_v27 = vld [vmem:[#allocation69_spill] sm:$0xff] }
 0x7c5   : > { %10660 = vst [vmem:[#allocation3_spill] sm:$0xff] %v9667_v39  ;;  %v9690_v39 = vadd.f32 %v5601_v15, %v10669_v37  ;;  %v9697_v30 = vadd.f32 %v5605_v51, %v10673_v17  ;;  %v9700_v0 = vadd.f32 %v5606_v62, %v10675_v1  ;;  %v2662_v15 = vrot.slane %v9526_v56, 6  ;;  %v10679_v16 = vld [vmem:[#allocation21_spill] sm:$0xff] }
 0x7c6   : > { %10666 = vst [vmem:[#allocation17_spill] sm:$0xff] %v9684_v14  ;;  %v9703_v33 = vadd.f32 %v5607_v19, %v10677_v27  ;;  %v9709_v36 = vadd.f32 %v2495_v45, %v10679_v16  ;;  %v5884_v51 = vmax.f32 %v9636_v52, 0.0  ;;  %v9720_v19 = vadd.f32 %v8966_v46, %v9496_v9 }
 0x7c7   : > { %10668 = vst [vmem:[#allocation77_spill] sm:$0xff] %v9687_v4  ;;  %v10681_v37 = vrot.slane %v9496_v9, 2  ;;  %v5885_v45 = vmax.f32 %v5757_v58, 0.0  ;;  %v5242_v17 = vrot.slane %v9566_v61, 4  ;;  %v5886_v1 = vmax.f32 %v5758_v59, 0.0 }
 0x7c8   : > { %10670 = vst [vmem:[#allocation34_spill] sm:$0xff] %v9690_v39  ;;  %v10685_v27 = vrot.slane %v9496_v9, 6  ;;  %v10687_v58 = vrot.slane %v9544_v5, 4  ;;  %v5887_v61 = vmax.f32 %v9651_v44, 0.0  ;;  %v9754_v59 = vadd.f32 %v8966_v46, %v9526_v56  ;;  %v10694_v44 = vld [vmem:[#allocation38_spill] sm:$0xff] }
 0x7c9   : > { %10672 = vst [vmem:[#allocation35_spill] sm:$0xff] %v9694_v53  ;;  %v9725_v41 = vadd.f32 %v10632_v11, %v10681_v37  ;;  %v9762_v5 = vadd.f32 %v10647_v7, %v2662_v15  ;;  %v5340_v37 = vrot.slane %v9588_v60, 4  ;;  %v5243_v15 = vsel %vm3888_vm8, %v9530_v31, %v5242_v17  ;;  %v10698_v53 = vld [vmem:[#allocation93_spill] sm:$0xff] }
 0x7ca   : > { %v6171_v29 = vld.sshfl [vmem:[#allocation1] sm:$0xff pattern:$0x73625140]  ;;  %10674 = vst [vmem:[#allocation36_spill] sm:$0xff] %v9697_v30  ;;  %v9739_v16 = vadd.f32 %v8961_v34, %v10685_v27  ;;  %v5913_v17 = vmax.f32 %v9446_v3, 0.0  ;;  %v5915_v3 = vmax.f32 %v9452_v12, 0.0 }
 0x7cb   : > { %6173 = vst [vmem:[#allocation1] ss:$4 sm:$0xff] %v5904_v18  ;;  %v6339_v2 = vpack.c.bf16 %v6171_v29, %v6171_v29  ;;  %v5907_v18 = vmax.f32 %v9626_v23, 0.0  ;;  %v10680_v29 = vrot.slane %v10628_v63, 6  ;;  %v10682_v23 = vrot.slane %v9496_v9, 4  ;;  %v10684_v63 = vld [vmem:[#allocation18_spill] sm:$0xff] }
 0x7cc   : > { %10676 = vst [vmem:[#allocation37_spill] sm:$0xff] %v9700_v0  ;;  %v9733_v52 = vadd.f32 %v2497_v20, %v10684_v63  ;;  %v10690_v9 = vrot.slane %v9526_v56, 2  ;;  %v9773_v56 = vadd.f32 %v8961_v34, %v9709_v36  ;;  %v5341_v27 = vsel %vm3888_vm8, %v5340_v37, %v9643_v40 }
 0x7cd   : > { %10678 = vst [vmem:[#allocation42_spill] sm:$0xff] %v9703_v33  ;;  %v9716_v62 = vadd.f32 %v8961_v34, %v10680_v29  ;;  %v10688_v29 = vrot.slane %v9606_v32, 4  ;;  %v9765_v32 = vpop.permute.xlu2 %5064  ;;  %v5251_v63 = vperm.slane %v5243_v15, %v10631_v24  ;;  %v9791_v33 = vpop.permute.xlu1 %4992  ;;  %v5921_v15 = vmax.f32 %v9458_v48, 0.0 }
 0x7ce   : > { %6174 = vst [vmem:[#allocation1 + $0x1] ss:$4 sm:$0xff] %v5905_v47  ;;  %v9730_v47 = vadd.f32 %v10647_v7, %v10682_v23  ;;  %v5342_v7 = vrot.slane %v9643_v40, 4  ;;  %v5454_v31 = vrot.slane %v9765_v32, 4  ;;  %v5923_v12 = vmax.f32 %v10698_v53, 0.0 }
 0x7cf   : > { %6175 = vst [vmem:[#allocation1 + $0x2] ss:$4 sm:$0xff] %v5906_v26  ;;  %v5267_v26 = vsel %vm3888_vm8, %v9514_v22, %v10687_v58  ;;  %v5291_v20 = vsel %vm3888_vm8, %v9572_v21, %v10688_v29  ;;  %v2663_v22 = vrot.slane %v9709_v36, 2  ;;  %v9767_v21 = vpop.permute.xlu0 %5070  ;;  %v10693_v29 = vld [vmem:[#allocation2_spill] sm:$0xff]  ;;  %v5294_v48 = vrot.slane %v5251_v63, 4 }
 0x7d0   : > { %10683 = vst [vmem:[#allocation43_spill] sm:$0xff] %v9730_v47  ;;  %v5569_v23 = vrot.slane %v5291_v20, 2  ;;  %v5570_v58 = vrot.slane %v5291_v20, 4  ;;  %v5764_v37 = vadd.f32 %v5291_v20, %v10694_v44  ;;  %v9796_v40 = vsel %vm3888_vm8, %v9622_v6, %v5454_v31 }
 0x7d1   : > { %6176 = vst [vmem:[#allocation1 + $0x3] ss:$4 sm:$0xff] %v5907_v18  ;;  %v5571_v18 = vrot.slane %v5291_v20, 6  ;;  %v10696_v20 = vld [vmem:[#allocation40_spill] sm:$0xff]  ;;  %v5318_v31 = vrot.slane %v9791_v33, 4 }
 0x7d2   : > { %10686 = vst [vmem:[#allocation44_spill] sm:$0xff] %v9739_v16  ;;  %v5766_v44 = vadd.f32 %v5570_v58, %v10696_v20  ;;  %v9812_v58 = vadd.f32 %v8966_v46, %v2663_v22  ;;  %v10702_v22 = vld [vmem:[#allocation95_spill] sm:$0xff]  ;;  %v10704_v16 = vld [vmem:[#allocation46_spill] sm:$0xff] }
 0x7d3   : > { %6372 = vst.msk [vmem:[%s9561_s15 + $0x10] sm:$0xf] %vm6367_vm9, %v6339_v2  ;;  %v9759_v2 = vadd.f32 %v10632_v11, %v10690_v9  ;;  %v5306_v9 = vrot.slane %v10693_v29, 4 }
 0x7d4   : > { %10689 = vst [vmem:[#allocation45_spill] sm:$0xff] %v9754_v59 }
 0x7d5   : > { %10691 = vst [vmem:[#allocation50_spill] sm:$0xff] %v9759_v2 }
 0x7d6   : > { %6144 = vst [vmem:[#allocation1 + $0x20] ss:$4 sm:$0xff] %v5884_v51  ;;  %v5275_v51 = vperm.slane %v5267_v26, %v10631_v24 }
 0x7d7   : > { %10692 = vst [vmem:[#allocation51_spill] sm:$0xff] %v9765_v32  ;;  %v5011_v59 = vpop.permute.xlu0 %5010  ;;  %v9841_v32 = vpop.permute.xlu1 %5040 }
 0x7d8   : > { %6146 = vst [vmem:[#allocation1 + $0x21] ss:$4 sm:$0xff] %v5885_v45  ;;  %v5912_v45 = vmax.f32 %v9443_v25, 0.0  ;;  %v6181_v26 = vld.sshfl [vmem:[#allocation1] sm:$0xff pattern:$0x73625140] }
 0x7d9   : > { %6148 = vst [vmem:[#allocation1 + $0x22] ss:$4 sm:$0xff] %v5886_v1  ;;  %v5914_v1 = vmax.f32 %v9449_v35, 0.0  ;;  %v5292_v0 = vrot.slane %v5275_v51, 4  ;;  %v10695_v25 = vld [vmem:[#allocation39_spill] sm:$0xff]  ;;  %v5920_v35 = vmax.f32 %v9455_v42, 0.0 }
 0x7da   : > { %6150 = vst [vmem:[#allocation1 + $0x23] ss:$4 sm:$0xff] %v5887_v61  ;;  %v6341_v61 = vpack.c.bf16 %v6181_v26, %v6181_v26  ;;  %v5765_v30 = vadd.f32 %v5569_v23, %v10695_v25  ;;  %v5343_v23 = vsel %vm3888_vm8, %v9588_v60, %v5342_v7  ;;  %v10697_v26 = vld [vmem:[#allocation41_spill] sm:$0xff]  ;;  %v10699_v42 = vld [vmem:[#allocation24_spill] sm:$0xff]  ;;  %v9817_v7 = vpop.permute.xlu2 %4998 }
 0x7db   : > { %6183 = vst [vmem:[#allocation1] ss:$4 sm:$0xff] %v5912_v45  ;;  %v5922_v45 = vmax.f32 %v9461_v50, 0.0  ;;  %v5767_v25 = vadd.f32 %v5571_v18, %v10697_v26  ;;  %v9809_v2 = vperm.slane %v5341_v27, %v10699_v42  ;;  %v5293_v50 = vsel %vm3888_vm8, %v5292_v0, %v5251_v63  ;;  %v10703_v63 = vld [vmem:[#allocation96_spill] sm:$0xff] }
 0x7dc   : > { %6184 = vst [vmem:[#allocation1 + $0x1] ss:$4 sm:$0xff] %v5913_v17  ;;  %v5892_v17 = vmax.f32 %v5764_v37, 0.0  ;;  %v5893_v60 = vmax.f32 %v5765_v30, 0.0  ;;  %v5351_v20 = vperm.slane %v5343_v23, %v10699_v42  ;;  %v5894_v37 = vmax.f32 %v5766_v44, 0.0 }
 0x7dd   : > { %6185 = vst [vmem:[#allocation1 + $0x2] ss:$4 sm:$0xff] %v5914_v1  ;;  %v10700_v1 = vld [vmem:[#allocation4_spill] sm:$0xff]  ;;  %v5895_v47 = vmax.f32 %v5767_v25, 0.0  ;;  %v5330_v0 = vrot.slane %v5011_v59, 4  ;;  %v5376_v39 = vrot.slane %v9809_v2, 4  ;;  %v5307_v23 = vsel %vm3888_vm8, %v9817_v7, %v5306_v9 }
 0x7de   : > { %6186 = vst [vmem:[#allocation1 + $0x3] ss:$4 sm:$0xff] %v5915_v3  ;;  %v5319_v53 = vsel %vm3888_vm8, %v10700_v1, %v5318_v31  ;;  %v10701_v3 = vld [vmem:[#allocation94_spill] sm:$0xff]  ;;  %v5575_v31 = vrot.slane %v5293_v50, 2  ;;  %v5295_v44 = vsel %vm3888_vm8, %v5275_v51, %v5294_v48  ;;  %v5328_v25 = vrot.slane %v9669_v54, 4 }
 0x7df   : > { %6374 = vst.msk [vmem:[%s9561_s15 + $0x18] sm:$0xf] %vm6367_vm9, %v6341_v61  ;;  %v5327_v30 = vperm.slane %v5319_v53, %v10699_v42  ;;  %v5577_v53 = vrot.slane %v5293_v50, 6  ;;  %v5772_v61 = vadd.f32 %v5293_v50, %v10704_v16  ;;  %v5315_v9 = vperm.slane %v5307_v23, %v10699_v42  ;;  %v10708_v23 = vld [vmem:[#allocation49_spill] sm:$0xff] }
 0x7e0   : > { %v5329_v51 = vsel %vm3888_vm8, %v5328_v25, %v5011_v59  ;;  %v5581_v14 = vrot.slane %v5295_v44, 2  ;;  %10706 = vst [vmem:[#allocation52_spill] sm:$0xff] %v9841_v32  ;;  %v5583_v16 = vrot.slane %v5295_v44, 6 }
 0x7e1   : > { %v6152_v18 = vld.sshfl [vmem:[#allocation1 + $0x20] sm:$0xff pattern:$0x73625140]  ;;  %v5364_v4 = vrot.slane %v5327_v30, 4  ;;  %v9849_v25 = vperm.slane %v5329_v51, %v10699_v42 }
 0x7e2   : > { %6157 = vst [vmem:[#allocation1 + $0x20] ss:$4 sm:$0xff] %v5892_v17  ;;  %v6336_v26 = vpack.c.bf16 %v6152_v18, %v6152_v18  ;;  %v5576_v17 = vrot.slane %v5293_v50, 4  ;;  %v5388_v18 = vrot.slane %v5351_v20, 4  ;;  %v10707_v50 = vld [vmem:[#allocation48_spill] sm:$0xff] }
 0x7e3   : > { %6158 = vst [vmem:[#allocation1 + $0x21] ss:$4 sm:$0xff] %v5893_v60  ;;  %v5331_v60 = vsel %vm3888_vm8, %v9669_v54, %v5330_v0  ;;  %v5582_v54 = vrot.slane %v5295_v44, 4  ;;  %v10705_v0 = vld [vmem:[#allocation47_spill] sm:$0xff] }
 0x7e4   : > { %6159 = vst [vmem:[#allocation1 + $0x22] ss:$4 sm:$0xff] %v5894_v37  ;;  %v5316_v37 = vrot.slane %v10700_v1, 4  ;;  %v5773_v46 = vadd.f32 %v5575_v31, %v10705_v0  ;;  %v5774_v1 = vadd.f32 %v5576_v17, %v10707_v50  ;;  %v5365_v0 = vsel %vm3888_vm8, %v5364_v4, %v5315_v9 }
 0x7e5   : > { %6160 = vst [vmem:[#allocation1 + $0x23] ss:$4 sm:$0xff] %v5895_v47  ;;  %v6191_v27 = vld.sshfl [vmem:[#allocation1] sm:$0xff pattern:$0x73625140]  ;;  %v5339_v47 = vperm.slane %v5331_v60, %v10699_v42  ;;  %v5304_v60 = vrot.slane %v9817_v7, 4 }
 0x7e6   : > { %6369 = vst.msk [vmem:[%s9561_s15 + $0x4] sm:$0xf] %vm6367_vm9, %v6336_v26  ;;  %v6343_v48 = vpack.c.bf16 %v6191_v27, %v6191_v27  ;;  %v5317_v26 = vsel %vm3888_vm8, %v5316_v37, %v9791_v33  ;;  %v5900_v27 = vmax.f32 %v5772_v61, 0.0  ;;  %v10709_v33 = vld [vmem:[#allocation54_spill] sm:$0xff]  ;;  %v5902_v51 = vmax.f32 %v5774_v1, 0.0 }
 0x7e7   : > { %6193 = vst [vmem:[#allocation1] ss:$4 sm:$0xff] %v5920_v35  ;;  %v5389_v59 = vsel %vm3888_vm8, %v5388_v18, %v5339_v47  ;;  %v5775_v35 = vadd.f32 %v5577_v53, %v10708_v23  ;;  %v5390_v31 = vrot.slane %v5339_v47, 4  ;;  %v5780_v18 = vadd.f32 %v5295_v44, %v10709_v33  ;;  %v10713_v23 = vld [vmem:[#allocation98_spill] sm:$0xff]  ;;  %v10716_v33 = vld [vmem:[#allocation100_spill] sm:$0xff] }
 0x7e8   : > { %6194 = vst [vmem:[#allocation1 + $0x1] ss:$4 sm:$0xff] %v5921_v15  ;;  %v5366_v15 = vrot.slane %v5315_v9, 4  ;;  %v5395_v17 = vperm.slane %v5389_v59, %v10631_v24  ;;  %v9858_v61 = vperm.slane %v5317_v26, %v10699_v42  ;;  %v10710_v9 = vld [vmem:[#allocation55_spill] sm:$0xff]  ;;  %v5377_v44 = vsel %vm3888_vm8, %v5376_v39, %v9849_v25 }
 0x7e9   : > { %6195 = vst [vmem:[#allocation1 + $0x2] ss:$4 sm:$0xff] %v5922_v45  ;;  %v5901_v45 = vmax.f32 %v5773_v46, 0.0  ;;  %v5391_v53 = vsel %vm3888_vm8, %v5351_v20, %v5390_v31  ;;  %v5781_v47 = vadd.f32 %v5581_v14, %v10710_v9  ;;  %v5903_v50 = vmax.f32 %v5775_v35, 0.0  ;;  %v10712_v20 = vld [vmem:[#allocation56_spill] sm:$0xff]  ;;  %v10714_v14 = vld [vmem:[#allocation57_spill] sm:$0xff]  ;;  %v9885_v9 = vpop.permute.xlu1 %5034 }
 0x7ea   : > { %6196 = vst [vmem:[#allocation1 + $0x3] ss:$4 sm:$0xff] %v5923_v12  ;;  %v5367_v7 = vsel %vm3888_vm8, %v5327_v30, %v5366_v15  ;;  %v5399_v4 = vperm.slane %v5391_v53, %v10631_v24  ;;  %v5371_v46 = vperm.slane %v5365_v0, %v10631_v24  ;;  %v5782_v1 = vadd.f32 %v5582_v54, %v10712_v20  ;;  %v10715_v0 = vld [vmem:[#allocation99_spill] sm:$0xff] }
 0x7eb   : > { %6376 = vst.msk [vmem:[%s9561_s15 + $0x20] sm:$0xf] %vm6367_vm9, %v6343_v48  ;;  %v10711_v48 = vld [vmem:[#allocation97_spill] sm:$0xff]  ;;  %v5305_v30 = vsel %vm3888_vm8, %v5304_v60, %v10693_v29  ;;  %v5408_v59 = vrot.slane %v5395_v17, 4  ;;  %v5783_v35 = vadd.f32 %v5583_v16, %v10714_v14  ;;  %v5352_v31 = vrot.slane %v9858_v61, 4 }
 0x7ec   : > { %v6162_v37 = vld.sshfl [vmem:[#allocation1 + $0x20] sm:$0xff pattern:$0x73625140]  ;;  %v5931_v26 = vmax.f32 %v10711_v48, 0.0  ;;  %v5375_v15 = vperm.slane %v5367_v7, %v10631_v24  ;;  %v9880_v54 = vperm.slane %v5377_v44, %v10631_v24  ;;  %v5412_v29 = vrot.slane %v5399_v4, 4  ;;  %10718 = vst [vmem:[#allocation53_spill] sm:$0xff] %v9885_v9 }
 0x7ed   : > { %6167 = vst [vmem:[#allocation1 + $0x20] ss:$4 sm:$0xff] %v5900_v27  ;;  %v6338_v12 = vpack.c.bf16 %v6162_v37, %v6162_v37  ;;  %v5908_v37 = vmax.f32 %v5780_v18, 0.0  ;;  %v5909_v53 = vmax.f32 %v5781_v47, 0.0  ;;  %v9883_v16 = vperm.slane %v5305_v30, %v10699_v42  ;;  %v10724_v27 = vld [vmem:[#allocation81_spill] sm:$0xff] }
 0x7ee   : > { %6168 = vst [vmem:[#allocation1 + $0x21] ss:$4 sm:$0xff] %v5901_v45  ;;  %v10719_v7 = vmax.f32 %v10701_v3, 0.0  ;;  %v5910_v48 = vmax.f32 %v5782_v1, 0.0  ;;  %v5409_v44 = vsel %vm3888_vm8, %v5408_v59, %v5371_v46  ;;  %v10720_v20 = vmax.f32 %v10702_v22, 0.0 }
 0x7ef   : > { %6169 = vst [vmem:[#allocation1 + $0x22] ss:$4 sm:$0xff] %v5902_v51  ;;  %v5410_v51 = vrot.slane %v5371_v46, 4  ;;  %v5911_v18 = vmax.f32 %v5783_v35, 0.0  ;;  %v5353_v47 = vsel %vm3888_vm8, %v5352_v31, %v9883_v16  ;;  %v5414_v30 = vrot.slane %v5375_v15, 4 }
 0x7f0   : > { %6170 = vst [vmem:[#allocation1 + $0x23] ss:$4 sm:$0xff] %v5903_v50  ;;  %v10721_v3 = vmax.f32 %v10703_v63, 0.0  ;;  %v5378_v1 = vrot.slane %v9849_v25, 4  ;;  %v5413_v46 = vsel %vm3888_vm8, %v5412_v29, %v5375_v15  ;;  %v5418_v22 = vrot.slane %v9885_v9, 4  ;;  %v10726_v9 = vld [vmem:[#allocation83_spill] sm:$0xff] }
 0x7f1   : > { %6371 = vst.msk [vmem:[%s9561_s15 + $0xc] sm:$0xf] %vm6367_vm9, %v6338_v12  ;;  %v6201_v60 = vld.sshfl [vmem:[#allocation1] sm:$0xff pattern:$0x73625140]  ;;  %v5430_v12 = vrot.slane %v9841_v32, 4  ;;  %v5411_v14 = vsel %vm3888_vm8, %v5395_v17, %v5410_v51  ;;  %v5415_v59 = vsel %vm3888_vm8, %v5399_v4, %v5414_v30  ;;  %v9909_v25 = vperm.slane %v5353_v47, %v10631_v24 }
 0x7f2   : > { %10717 = vst [vmem:[#allocation26_spill] sm:$0xff] %v9880_v54  ;;  %v6345_v50 = vpack.c.bf16 %v6201_v60, %v6201_v60  ;;  %v5400_v60 = vrot.slane %v9880_v54, 4  ;;  %v5632_v35 = vrot.slane %v5409_v44, 2  ;;  %v5634_v31 = vrot.slane %v5409_v44, 6 }
 0x7f3   : > { %6203 = vst [vmem:[#allocation1] ss:$4 sm:$0xff] %v10719_v7  ;;  %v5633_v7 = vrot.slane %v5409_v44, 4  ;;  %v5431_v15 = vsel %vm3888_vm8, %v9705_v43, %v5430_v12  ;;  %v5638_v29 = vrot.slane %v5411_v14, 2  ;;  %v5639_v4 = vrot.slane %v5411_v14, 4 }
 0x7f4   : > { %6204 = vst [vmem:[#allocation1 + $0x1] ss:$4 sm:$0xff] %v10720_v20  ;;  %v10722_v20 = vrot.slane %v9709_v36, 4  ;;  %v5640_v51 = vrot.slane %v5411_v14, 6  ;;  %v5644_v30 = vrot.slane %v5413_v46, 2  ;;  %v5650_v45 = vrot.slane %v5415_v59, 2 }
 0x7f5   : > { %6205 = vst [vmem:[#allocation1 + $0x2] ss:$4 sm:$0xff] %v10721_v3  ;;  %v9915_v3 = vsel %vm3888_vm8, %v5400_v60, %v9909_v25  ;;  %v5651_v47 = vrot.slane %v5415_v59, 4  ;;  %v5652_v39 = vrot.slane %v5415_v59, 6  ;;  %v9918_v12 = vadd.f32 %v5409_v44, %v10724_v27  ;;  %v10728_v60 = vld [vmem:[#allocation87_spill] sm:$0xff]  ;;  %v10730_v27 = vld [vmem:[#allocation89_spill] sm:$0xff] }
 0x7f6   : > { %6206 = vst [vmem:[#allocation1 + $0x3] ss:$4 sm:$0xff] %v5931_v26  ;;  %v2897_v17 = vadd.f32 %v10632_v11, %v10722_v20  ;;  %v5646_v20 = vrot.slane %v5413_v46, 6  ;;  %v9924_v11 = vadd.f32 %v5633_v7, %v10726_v9  ;;  %v9930_v54 = vadd.f32 %v5411_v14, %v10728_v60 }
 0x7f7   : > { %6378 = vst.msk [vmem:[%s9561_s15 + $0x28] sm:$0xf] %vm6367_vm9, %v6345_v50  ;;  %v6172_v63 = vld.sshfl [vmem:[#allocation1 + $0x20] sm:$0xff pattern:$0x73625140]  ;;  %v5645_v50 = vrot.slane %v5413_v46, 4  ;;  %v9938_v44 = vadd.f32 %v5639_v4, %v10730_v27  ;;  %v9947_v7 = vadd.f32 %v5644_v30, %v9716_v62  ;;  %v9964_v30 = vpop.permute.xlu2 %5046 }
 0x7f8   : > { %10723 = vst [vmem:[#allocation30_spill] sm:$0xff] %v9909_v25  ;;  %v6340_v26 = vpack.c.bf16 %v6172_v63, %v6172_v63  ;;  %v10729_v25 = vld [vmem:[#allocation88_spill] sm:$0xff]  ;;  %v10733_v4 = vld [vmem:[#allocation101_spill] sm:$0xff] }
 0x7f9   : > { %6177 = vst [vmem:[#allocation1 + $0x20] ss:$4 sm:$0xff] %v5908_v37  ;;  %v10725_v37 = vld [vmem:[#allocation82_spill] sm:$0xff]  ;;  %v9950_v14 = vadd.f32 %v5645_v50, %v9720_v19  ;;  %v9967_v19 = vadd.f32 %v5651_v47, %v9812_v58  ;;  %v9969_v50 = vadd.f32 %v5652_v39, %v2897_v17  ;;  %v5919_v58 = vmax.f32 %v9663_v38, 0.0  ;;  %v9992_v38 = vld [vmem:[%s10346_s2] ss:$0 sm:$0xff] }
 0x7fa   : > { %6178 = vst [vmem:[#allocation1 + $0x21] ss:$4 sm:$0xff] %v5909_v53  ;;  %v9921_v63 = vadd.f32 %v5632_v35, %v10725_v37  ;;  %v10727_v53 = vld [vmem:[#allocation84_spill] sm:$0xff]  ;;  %v10731_v35 = vld [vmem:[#allocation90_spill] sm:$0xff]  ;;  %v5439_v39 = vperm.slane %v5431_v15, %v10699_v42  ;;  %v5609_v47 = vrot.slane %v9915_v3, 4 }
 0x7fb   : > { %6179 = vst [vmem:[#allocation1 + $0x22] ss:$4 sm:$0xff] %v5910_v48  ;;  %v9927_v32 = vadd.f32 %v5634_v31, %v10727_v53  ;;  %v9933_v48 = vadd.f32 %v5638_v29, %v10729_v25  ;;  %v9941_v37 = vadd.f32 %v5640_v51, %v10731_v35  ;;  %v9953_v25 = vadd.f32 %v5646_v20, %v9725_v41  ;;  %v10740_v35 = vld [vmem:[#allocation70_spill] sm:$0xff] }
 0x7fc   : > { %6180 = vst [vmem:[#allocation1 + $0x23] ss:$4 sm:$0xff] %v5911_v18  ;;  %v10732_v18 = vld [vmem:[#allocation92_spill] sm:$0xff]  ;;  %v9956_v29 = vadd.f32 %v5415_v59, %v9762_v5  ;;  %v5939_v51 = vmax.f32 %v10733_v4, 0.0  ;;  %v10736_v41 = vmax.f32 %v10715_v0, 0.0  ;;  %v5916_v5 = vmax.f32 %v9654_v57, 0.0 }
 0x7fd   : > { %6373 = vst.msk [vmem:[%s9561_s15 + $0x14] sm:$0xf] %vm6367_vm9, %v6340_v26  ;;  %v9944_v9 = vadd.f32 %v5413_v46, %v10732_v18  ;;  %v6211_v31 = vld.sshfl [vmem:[#allocation1] sm:$0xff pattern:$0x73625140]  ;;  %v9959_v26 = vadd.f32 %v5650_v45, %v9773_v56  ;;  %v10734_v46 = vmax.f32 %v10713_v23, 0.0  ;;  %v5419_v23 = vsel %vm3888_vm8, %v9964_v30, %v5418_v22 }
 0x7fe   : > { %v6347_v62 = vpack.c.bf16 %v6211_v31, %v6211_v31  ;;  %10735 = vst [vmem:[#allocation31_spill] sm:$0xff] %v9969_v50  ;;  %v5917_v56 = vmax.f32 %v9657_v55, 0.0  ;;  %v5918_v45 = vmax.f32 %v9660_v13, 0.0  ;;  %v10737_v59 = vmax.f32 %v10716_v33, 0.0  ;;  %v10738_v55 = vld [vmem:[#allocation3_spill] sm:$0xff]  ;;  %v10774_v50 = vld [vmem:[#allocation102_spill] sm:$0xff] }
 0x7ff   : > { %6213 = vst [vmem:[#allocation1] ss:$4 sm:$0xff] %v10734_v46  ;;  %v5379_v0 = vsel %vm3888_vm8, %v9809_v2, %v5378_v1  ;;  %v5608_v57 = vrot.slane %v9915_v3, 2  ;;  %v5924_v17 = vmax.f32 %v10738_v55, 0.0  ;;  %v5925_v13 = vmax.f32 %v9672_v28, 0.0  ;;  %v10741_v46 = vld [vmem:[#allocation71_spill] sm:$0xff] }
 0x800   : > { %6214 = vst [vmem:[#allocation1 + $0x1] ss:$4 sm:$0xff] %v10736_v41  ;;  %v5926_v20 = vmax.f32 %v9675_v10, 0.0  ;;  %v10739_v33 = vrot.slane %v9709_v36, 6  ;;  %v10001_v1 = vadd.f32 %v8961_v34, %v9733_v52  ;;  %v5427_v53 = vperm.slane %v5419_v23, %v10699_v42  ;;  %v10756_v10 = vld [vmem:[#allocation76_spill] sm:$0xff] }
 0x801   : > { %6215 = vst [vmem:[#allocation1 + $0x2] ss:$4 sm:$0xff] %v10737_v59  ;;  %v10008_v27 = vperm.slane %v5379_v0, %v10631_v24  ;;  %v5610_v36 = vrot.slane %v9915_v3, 6  ;;  %v5816_v18 = vadd.f32 %v9915_v3, %v10740_v35  ;;  %v5452_v31 = vrot.slane %v9622_v6, 4  ;;  %v5059_v3 = vpop.permute.xlu0 %5058 }
 0x802   : > { %6216 = vst [vmem:[#allocation1 + $0x3] ss:$4 sm:$0xff] %v5939_v51  ;;  %v9997_v2 = vadd.f32 %v9992_v38, %v10739_v33  ;;  %v5354_v4 = vrot.slane %v9883_v16, 4  ;;  %v5476_v51 = vrot.slane %v5439_v39, 4  ;;  %v5428_v23 = vrot.slane %v9705_v43, 4  ;;  %v10744_v43 = vld [vmem:[#allocation73_spill] sm:$0xff] }
 0x803   : > { %6380 = vst.msk [vmem:[%s9561_s15 + $0x30] sm:$0xf] %vm6367_vm9, %v6347_v62  ;;  %v6182_v15 = vld.sshfl [vmem:[#allocation1 + $0x20] sm:$0xff pattern:$0x73625140]  ;;  %v5817_v62 = vadd.f32 %v5608_v57, %v10741_v46  ;;  %v5440_v16 = vrot.slane %v9767_v21, 4 }
 0x804   : > { %6187 = vst [vmem:[#allocation1 + $0x20] ss:$4 sm:$0xff] %v5916_v5  ;;  %v6342_v60 = vpack.c.bf16 %v6182_v15, %v6182_v15  ;;  %v5463_v5 = vperm.slane %v9796_v40, %v10699_v42  ;;  %v5355_v6 = vsel %vm3888_vm8, %v9858_v61, %v5354_v4  ;;  %v5477_v57 = vsel %vm3888_vm8, %v5476_v51, %v5427_v53  ;;  %v10745_v46 = vld [vmem:[#allocation51_spill] sm:$0xff] }
 0x805   : > { %6188 = vst [vmem:[#allocation1 + $0x21] ss:$4 sm:$0xff] %v5917_v56  ;;  %v10742_v56 = vld [vmem:[#allocation72_spill] sm:$0xff]  ;;  %v5404_v40 = vrot.slane %v10008_v27, 4  ;;  %v5819_v15 = vadd.f32 %v5610_v36, %v10744_v43  ;;  %v5944_v35 = vmax.f32 %v5816_v18, 0.0  ;;  %v5453_v61 = vsel %vm3888_vm8, %v5452_v31, %v10745_v46 }
 0x806   : > { %6189 = vst [vmem:[#allocation1 + $0x22] ss:$4 sm:$0xff] %v5918_v45  ;;  %v5818_v0 = vadd.f32 %v5609_v47, %v10742_v56  ;;  %v10743_v45 = vld [vmem:[#allocation30_spill] sm:$0xff]  ;;  %v5945_v4 = vmax.f32 %v5817_v62, 0.0  ;;  %v5478_v41 = vrot.slane %v5427_v53, 4  ;;  %v5442_v59 = vrot.slane %v5059_v3, 4 }
 0x807   : > { %6190 = vst [vmem:[#allocation1 + $0x23] ss:$4 sm:$0xff] %v5919_v58  ;;  %v5402_v33 = vrot.slane %v10743_v45, 4  ;;  %v10034_v51 = vperm.slane %v5355_v6, %v10631_v24  ;;  %v5483_v45 = vperm.slane %v5477_v57, %v10631_v24  ;;  %v5500_v36 = vrot.slane %v5463_v5, 4  ;;  %v10747_v18 = vld [vmem:[#allocation52_spill] sm:$0xff] }
 0x808   : > { %6375 = vst.msk [vmem:[%s9561_s15 + $0x1c] sm:$0xf] %vm6367_vm9, %v6342_v60  ;;  %v10746_v60 = vld [vmem:[#allocation26_spill] sm:$0xff]  ;;  %v5429_v43 = vsel %vm3888_vm8, %v5428_v23, %v10747_v18  ;;  %v5946_v22 = vmax.f32 %v5818_v0, 0.0  ;;  %v5479_v31 = vsel %vm3888_vm8, %v5439_v39, %v5478_v41  ;;  %v5947_v62 = vmax.f32 %v5819_v15, 0.0  ;;  %v10749_v41 = vld [vmem:[#allocation27_spill] sm:$0xff] }
 0x809   : > { %v6221_v58 = vld.sshfl [vmem:[#allocation1] sm:$0xff pattern:$0x73625140]  ;;  %v5403_v56 = vsel %vm3888_vm8, %v10746_v60, %v5402_v33  ;;  %v10046_v53 = vsel %vm3888_vm8, %v5404_v40, %v10034_v51  ;;  %v5487_v6 = vperm.slane %v5479_v31, %v10631_v24  ;;  %v5443_v57 = vsel %vm3888_vm8, %v9767_v21, %v5442_v59  ;;  %v10751_v46 = vld [vmem:[#allocation28_spill] sm:$0xff] }
 0x80a   : > { %v6349_v47 = vpack.c.bf16 %v6221_v58, %v6221_v58  ;;  %6223 = vst [vmem:[#allocation1] ss:$4 sm:$0xff] %v5944_v35  ;;  %v5614_v33 = vrot.slane %v5403_v56, 2  ;;  %v5615_v35 = vrot.slane %v5403_v56, 4  ;;  %v5616_v58 = vrot.slane %v5403_v56, 6 }
 0x80b   : > { %6224 = vst [vmem:[#allocation1 + $0x1] ss:$4 sm:$0xff] %v5945_v4  ;;  %v5451_v23 = vperm.slane %v5443_v57, %v10699_v42  ;;  %v10748_v39 = vrot.slane %v9733_v52, 2  ;;  %v10750_v40 = vrot.slane %v9733_v52, 4  ;;  %v5522_v21 = vrot.slane %v5483_v45, 4 }
 0x80c   : > { %6382 = vst.msk [vmem:[%s9561_s15 + $0x38] sm:$0xf] %vm6367_vm9, %v6349_v47  ;;  %v10063_v47 = vperm.slane %v5453_v61, %v10699_v42  ;;  %v5620_v59 = vrot.slane %v10046_v53, 2  ;;  %v10072_v52 = vperm.slane %v5429_v43, %v10699_v42  ;;  %v10752_v61 = vld [vmem:[#allocation10_spill] sm:$0xff]  ;;  %v5621_v55 = vrot.slane %v10046_v53, 4  ;;  %v10755_v43 = vld [vmem:[#allocation75_spill] sm:$0xff] }
 0x80d   : > { %6225 = vst [vmem:[#allocation1 + $0x2] ss:$4 sm:$0xff] %v5946_v22  ;;  %v10055_v0 = vadd.f32 %v10749_v41, %v10748_v39  ;;  %v10060_v15 = vadd.f32 %v10751_v46, %v10750_v40  ;;  %v5501_v60 = vsel %vm3888_vm8, %v5500_v36, %v5451_v23  ;;  %v5502_v18 = vrot.slane %v5451_v23, 4 }
 0x80e   : > { %v6192_v4 = vld.sshfl [vmem:[#allocation1 + $0x20] sm:$0xff pattern:$0x73625140]  ;;  %6226 = vst [vmem:[#allocation1 + $0x3] ss:$4 sm:$0xff] %v5947_v62  ;;  %v5824_v31 = vadd.f32 %v5403_v56, %v10752_v61  ;;  %v5526_v62 = vrot.slane %v5487_v6, 4  ;;  %v5507_v57 = vperm.slane %v5501_v60, %v10631_v24  ;;  %v5441_v23 = vsel %vm3888_vm8, %v5440_v16, %v5059_v3 }
 0x80f   : > { %6197 = vst [vmem:[#allocation1 + $0x20] ss:$4 sm:$0xff] %v5924_v17  ;;  %v6344_v22 = vpack.c.bf16 %v6192_v4, %v6192_v4  ;;  %v10753_v17 = vld [vmem:[#allocation74_spill] sm:$0xff]  ;;  %v5503_v28 = vsel %vm3888_vm8, %v5463_v5, %v5502_v18  ;;  %v5826_v39 = vadd.f32 %v5615_v35, %v10755_v43  ;;  %v10758_v5 = vld [vmem:[#allocation79_spill] sm:$0xff]  ;;  %v10760_v35 = vrot.slane %v9964_v30, 4  ;;  %v10762_v30 = vld [vmem:[#allocation17_spill] sm:$0xff] }
 0x810   : > { %6198 = vst [vmem:[#allocation1 + $0x21] ss:$4 sm:$0xff] %v5925_v13  ;;  %v5825_v36 = vadd.f32 %v5614_v33, %v10753_v17  ;;  %v10754_v13 = vmax.f32 %v9678_v8, 0.0  ;;  %v5511_v56 = vperm.slane %v5503_v28, %v10631_v24  ;;  %v5520_v40 = vrot.slane %v5507_v57, 4  ;;  %v10757_v33 = vld [vmem:[#allocation78_spill] sm:$0xff]  ;;  %v10759_v8 = vld [vmem:[#allocation53_spill] sm:$0xff] }
 0x811   : > { %6199 = vst [vmem:[#allocation1 + $0x22] ss:$4 sm:$0xff] %v5926_v20  ;;  %v10087_v4 = vsel %vm3888_vm8, %v5507_v57, %v5522_v21  ;;  %v5827_v20 = vadd.f32 %v5616_v58, %v10756_v10  ;;  %v10094_v3 = vadd.f32 %v10046_v53, %v10757_v33  ;;  %v10097_v16 = vadd.f32 %v5620_v59, %v10758_v5  ;;  %v10761_v57 = vld [vmem:[#allocation80_spill] sm:$0xff]  ;;  %v10763_v10 = vld [vmem:[#allocation77_spill] sm:$0xff] }
 0x812   : > { %6200 = vst [vmem:[#allocation1 + $0x23] ss:$4 sm:$0xff] %v10754_v13  ;;  %v5417_v60 = vsel %vm3888_vm8, %v10760_v35, %v10759_v8  ;;  %v5952_v18 = vmax.f32 %v5824_v31, 0.0  ;;  %v5521_v21 = vsel %vm3888_vm8, %v5520_v40, %v5483_v45  ;;  %v5524_v61 = vrot.slane %v5511_v56, 4  ;;  %v10765_v35 = vld [vmem:[#allocation12_spill] sm:$0xff] }
 0x813   : > { %6377 = vst.msk [vmem:[%s9561_s15 + $0x24] sm:$0xf] %vm6367_vm9, %v6344_v22  ;;  %v10105_v22 = vsel %vm3888_vm8, %v5511_v56, %v5526_v62  ;;  %v5622_v58 = vrot.slane %v10046_v53, 6  ;;  %v10109_v17 = vadd.f32 %v5621_v55, %v10761_v57  ;;  %v5953_v28 = vmax.f32 %v5825_v36, 0.0  ;;  %v10764_v62 = vld [vmem:[#allocation34_spill] sm:$0xff] }
 0x814   : > { %v10112_v13 = vperm.slane %v5441_v23, %v10699_v42  ;;  %v5933_v43 = vmax.f32 %v10762_v30, 0.0  ;;  %v5934_v31 = vmax.f32 %v10763_v10, 0.0  ;;  %v5954_v33 = vmax.f32 %v5826_v39, 0.0 }
 0x815   : > { %v6231_v59 = vld.sshfl [vmem:[#allocation1] sm:$0xff pattern:$0x73625140]  ;;  %v5525_v45 = vsel %vm3888_vm8, %v5524_v61, %v5487_v6  ;;  %v5935_v56 = vmax.f32 %v10764_v62, 0.0  ;;  %v5488_v53 = vrot.slane %v10063_v47, 4  ;;  %v5406_v55 = vrot.slane %v10034_v51, 4 }
 0x816   : > { %6233 = vst [vmem:[#allocation1] ss:$4 sm:$0xff] %v5952_v18  ;;  %v5955_v40 = vmax.f32 %v5827_v20, 0.0  ;;  %v5464_v36 = vrot.slane %v10072_v52, 4  ;;  %v5960_v23 = vmax.f32 %v10094_v3, 0.0  ;;  %v5961_v5 = vmax.f32 %v10097_v16, 0.0 }
 0x817   : > { %6234 = vst [vmem:[#allocation1 + $0x1] ss:$4 sm:$0xff] %v5953_v28  ;;  %v10124_v39 = vperm.slane %v5417_v60, %v10699_v42  ;;  %v10128_v6 = vsel %vm3888_vm8, %v10008_v27, %v5406_v55  ;;  %v5835_v18 = vadd.f32 %v5622_v58, %v10765_v35  ;;  %v5962_v51 = vmax.f32 %v10109_v17, 0.0  ;;  %v10767_v62 = vld [vmem:[#allocation16_spill] sm:$0xff]  ;;  %v10768_v55 = vld [vmem:[#allocation85_spill] sm:$0xff]  ;;  %v10770_v35 = vld [vmem:[#allocation86_spill] sm:$0xff] }
 0x818   : > { %6235 = vst [vmem:[#allocation1 + $0x2] ss:$4 sm:$0xff] %v5954_v33  ;;  %v5489_v20 = vsel %vm3888_vm8, %v5488_v53, %v10112_v13  ;;  %v10766_v3 = vmax.f32 %v9681_v49, 0.0  ;;  %v5635_v61 = vrot.slane %v5521_v21, 2  ;;  %v5636_v42 = vrot.slane %v5521_v21, 4 }
 0x819   : > { %v6202_v8 = vld.sshfl [vmem:[#allocation1 + $0x20] sm:$0xff pattern:$0x73625140]  ;;  %6236 = vst [vmem:[#allocation1 + $0x3] ss:$4 sm:$0xff] %v5955_v40  ;;  %v5637_v60 = vrot.slane %v5521_v21, 6  ;;  %v6351_v57 = vpack.c.bf16 %v6231_v59, %v6231_v59  ;;  %v10140_v28 = vperm.slane %v5489_v20, %v10631_v24  ;;  %v10146_v53 = vadd.f32 %v5521_v21, %v10767_v62 }
 0x81a   : > { %6207 = vst [vmem:[#allocation1 + $0x20] ss:$4 sm:$0xff] %v10766_v3  ;;  %v6346_v16 = vpack.c.bf16 %v6202_v8, %v6202_v8  ;;  %v5641_v27 = vrot.slane %v10087_v4, 2  ;;  %v5642_v58 = vrot.slane %v10087_v4, 4  ;;  %v5643_v17 = vrot.slane %v10087_v4, 6  ;;  %v10769_v40 = vld [vmem:[#allocation13_spill] sm:$0xff] }
 0x81b   : > { %6208 = vst [vmem:[#allocation1 + $0x21] ss:$4 sm:$0xff] %v5933_v43  ;;  %v5647_v49 = vrot.slane %v5525_v45, 2  ;;  %v5648_v30 = vrot.slane %v5525_v45, 4  ;;  %v5649_v10 = vrot.slane %v5525_v45, 6  ;;  %v5653_v33 = vrot.slane %v10105_v22, 2 }
 0x81c   : > { %6209 = vst [vmem:[#allocation1 + $0x22] ss:$4 sm:$0xff] %v5934_v31  ;;  %v5654_v43 = vrot.slane %v10105_v22, 4  ;;  %v5655_v59 = vrot.slane %v10105_v22, 6  ;;  %v10151_v31 = vadd.f32 %v5635_v61, %v10768_v55  ;;  %v10154_v8 = vadd.f32 %v5636_v42, %v10769_v40  ;;  %v10775_v62 = vld [vmem:[#allocation15_spill] sm:$0xff] }
 0x81d   : > { %6210 = vst [vmem:[#allocation1 + $0x23] ss:$4 sm:$0xff] %v5935_v56  ;;  %v10157_v20 = vadd.f32 %v5637_v60, %v10770_v35  ;;  %v10772_v56 = vld [vmem:[#allocation91_spill] sm:$0xff]  ;;  %v10166_v21 = vadd.f32 %v5641_v27, %v10774_v50  ;;  %v10778_v35 = vld [vmem:[#allocation44_spill] sm:$0xff]  ;;  %v10188_v50 = vadd.f32 %v10105_v22, %v9997_v2  ;;  %v5465_v27 = vsel %vm3888_vm8, %v5464_v36, %v10124_v39 }
 0x81e   : > { %6379 = vst.msk [vmem:[%s9561_s15 + $0x2c] sm:$0xf] %vm6367_vm9, %v6346_v16  ;;  %v10161_v3 = vadd.f32 %v10087_v4, %v10772_v56  ;;  %v10169_v16 = vadd.f32 %v5642_v58, %v10775_v62  ;;  %v10776_v61 = vld [vmem:[#allocation19_spill] sm:$0xff]  ;;  %v10779_v4 = vld [vmem:[#allocation45_spill] sm:$0xff]  ;;  %v10196_v58 = vadd.f32 %v5654_v43, %v10055_v0  ;;  %v10786_v62 = vld [vmem:[#allocation36_spill] sm:$0xff]  ;;  %v5626_v36 = vrot.slane %v10128_v6, 2 }
 0x81f   : > { %10771 = vst [vmem:[#allocation32_spill] sm:$0xff] %v10157_v20  ;;  %v10172_v55 = vadd.f32 %v5643_v17, %v10776_v61  ;;  %v10777_v42 = vld [vmem:[#allocation43_spill] sm:$0xff]  ;;  %v10178_v20 = vadd.f32 %v5647_v49, %v10778_v35  ;;  %v10181_v56 = vadd.f32 %v5648_v30, %v10779_v4  ;;  %v10199_v17 = vadd.f32 %v5655_v59, %v10060_v15  ;;  %v10790_v35 = vld [vmem:[#allocation37_spill] sm:$0xff] }
 0x820   : > { %10773 = vst [vmem:[#allocation33_spill] sm:$0xff] %v10161_v3  ;;  %v10175_v40 = vadd.f32 %v5525_v45, %v10777_v42  ;;  %v6241_v60 = vld.sshfl [vmem:[#allocation1] sm:$0xff pattern:$0x73625140]  ;;  %v10193_v45 = vadd.f32 %v5653_v33, %v10001_v1  ;;  %v5963_v49 = vmax.f32 %v5835_v18, 0.0  ;;  %v5512_v30 = vrot.slane %v10140_v28, 4 }
 0x821   : > { %6384 = vst.msk [vmem:[%s9561_s15 + $0x40] sm:$0xf] %vm6367_vm9, %v6351_v57  ;;  %v10780_v57 = vld [vmem:[#allocation50_spill] sm:$0xff]  ;;  %v10785_v22 = vld [vmem:[#allocation35_spill] sm:$0xff]  ;;  %v5941_v61 = vmax.f32 %v10786_v62, 0.0  ;;  %v5471_v43 = vperm.slane %v5465_v27, %v10631_v24  ;;  %v5942_v4 = vmax.f32 %v10790_v35, 0.0 }
 0x822   : > { %v10184_v3 = vadd.f32 %v5649_v10, %v10780_v57  ;;  %6243 = vst [vmem:[#allocation1] ss:$4 sm:$0xff] %v5960_v23  ;;  %v10784_v10 = vld [vmem:[#allocation8_spill] sm:$0xff]  ;;  %v5940_v23 = vmax.f32 %v10785_v22, 0.0  ;;  %v10787_v1 = vld [vmem:[#allocation11_spill] sm:$0xff]  ;;  %v5628_v57 = vrot.slane %v10128_v6, 6 }
 0x823   : > { %10781 = vst [vmem:[#allocation58_spill] sm:$0xff] %v10193_v45  ;;  %v2640_v2 = vrot.slane %v10784_v10, 4  ;;  %v10788_v33 = vrot.slane %v10787_v1, 6  ;;  %v2863_v15 = vadd.f32 %v8961_v34, %v10784_v10  ;;  %v10789_v59 = vrot.slane %v10784_v10, 2  ;;  %v10791_v22 = vld [vmem:[#allocation42_spill] sm:$0xff] }
 0x824   : > { %10782 = vst [vmem:[#allocation59_spill] sm:$0xff] %v10196_v58  ;;  %v6212_v18 = vld.sshfl [vmem:[#allocation1 + $0x20] sm:$0xff pattern:$0x73625140]  ;;  %v5943_v62 = vmax.f32 %v10791_v22, 0.0  ;;  %v5513_v27 = vsel %vm3888_vm8, %v5512_v30, %v5471_v43 }
 0x825   : > { %10783 = vst [vmem:[#allocation60_spill] sm:$0xff] %v10199_v17  ;;  %v2862_v0 = vadd.f32 %v9992_v38, %v10788_v33  ;;  %v2864_v42 = vadd.f32 %v10749_v41, %v10789_v59  ;;  %v10792_v17 = vld [vmem:[#allocation25_spill] sm:$0xff]  ;;  %v2865_v59 = vadd.f32 %v10751_v46, %v2640_v2  ;;  %v5841_v35 = vadd.f32 %v5626_v36, %v2863_v15 }
 0x826   : > { %6244 = vst [vmem:[#allocation1 + $0x1] ss:$4 sm:$0xff] %v5961_v5  ;;  %v5627_v5 = vrot.slane %v10128_v6, 4  ;;  %v2623_v58 = vrot.slane %v10792_v17, 2 }
 0x827   : > { %6245 = vst [vmem:[#allocation1 + $0x2] ss:$4 sm:$0xff] %v5962_v51  ;;  %v6348_v51 = vpack.c.bf16 %v6212_v18, %v6212_v18  ;;  %v5840_v33 = vadd.f32 %v10128_v6, %v2862_v0  ;;  %v2625_v18 = vrot.slane %v10792_v17, 6  ;;  %v5843_v6 = vadd.f32 %v5628_v57, %v2865_v59 }
 0x828   : > { %6246 = vst [vmem:[#allocation1 + $0x3] ss:$4 sm:$0xff] %v5963_v49  ;;  %v6353_v49 = vpack.c.bf16 %v6241_v60, %v6241_v60  ;;  %v5842_v45 = vadd.f32 %v5627_v5, %v2864_v42  ;;  %v5611_v60 = vrot.slane %v5513_v27, 2  ;;  %v5612_v0 = vrot.slane %v5513_v27, 4 }
 0x829   : > { %6217 = vst [vmem:[#allocation1 + $0x20] ss:$4 sm:$0xff] %v5940_v23  ;;  %v2624_v23 = vrot.slane %v10792_v17, 4  ;;  %v5968_v30 = vmax.f32 %v5840_v33, 0.0  ;;  %v2843_v2 = vadd.f32 %v8961_v34, %v2623_v58  ;;  %v5969_v36 = vmax.f32 %v5841_v35, 0.0 }
 0x82a   : > { %6218 = vst [vmem:[#allocation1 + $0x21] ss:$4 sm:$0xff] %v5941_v61  ;;  %v2842_v61 = vadd.f32 %v9992_v38, %v10792_v17  ;;  %v2845_v5 = vadd.f32 %v10751_v46, %v2625_v18  ;;  %v5970_v17 = vmax.f32 %v5842_v45, 0.0  ;;  %v5514_v57 = vrot.slane %v5471_v43, 4  ;;  %v10793_v18 = vld [vmem:[#allocation5_spill] sm:$0xff] }
 0x82b   : > { %6219 = vst [vmem:[#allocation1 + $0x22] ss:$4 sm:$0xff] %v5942_v4  ;;  %v5613_v4 = vrot.slane %v5513_v27, 6  ;;  %v5490_v33 = vrot.slane %v10112_v13, 4  ;;  %v2629_v45 = vrot.slane %v10793_v18, 2 }
 0x82c   : > { %6220 = vst [vmem:[#allocation1 + $0x23] ss:$4 sm:$0xff] %v5943_v62  ;;  %v5820_v22 = vadd.f32 %v5513_v27, %v2842_v61  ;;  %v2844_v62 = vadd.f32 %v10749_v41, %v2624_v23  ;;  %v5515_v43 = vsel %vm3888_vm8, %v10140_v28, %v5514_v57 }
 0x82d   : > { %6381 = vst.msk [vmem:[%s9561_s15 + $0x34] sm:$0xf] %vm6367_vm9, %v6348_v51  ;;  %v5971_v51 = vmax.f32 %v5843_v6, 0.0  ;;  %v5823_v27 = vadd.f32 %v5613_v4, %v2845_v5  ;;  %v5491_v61 = vsel %vm3888_vm8, %v10063_v47, %v5490_v33  ;;  %v2630_v6 = vrot.slane %v10793_v18, 4 }
 0x82e   : > { %6386 = vst.msk [vmem:[%s9561_s15 + $0x48] sm:$0xf] %vm6367_vm9, %v6353_v49  ;;  %v5821_v49 = vadd.f32 %v5611_v60, %v2843_v2  ;;  %v5822_v58 = vadd.f32 %v5612_v0, %v2844_v62  ;;  %v5948_v35 = vmax.f32 %v5820_v22, 0.0  ;;  %v2631_v60 = vrot.slane %v10793_v18, 6 }
 0x82f   : > { %v6251_v15 = vld.sshfl [vmem:[#allocation1] sm:$0xff pattern:$0x73625140]  ;;  %v5466_v0 = vrot.slane %v10124_v39, 4  ;;  %v5951_v2 = vmax.f32 %v5823_v27, 0.0  ;;  %v5617_v47 = vrot.slane %v5515_v43, 2  ;;  %v2850_v28 = vadd.f32 %v9992_v38, %v2629_v45 }
 0x830   : > { %6253 = vst [vmem:[#allocation1] ss:$4 sm:$0xff] %v5968_v30  ;;  %v6355_v42 = vpack.c.bf16 %v6251_v15, %v6251_v15  ;;  %v5949_v13 = vmax.f32 %v5821_v49, 0.0  ;;  %v5950_v30 = vmax.f32 %v5822_v58, 0.0  ;;  %v5976_v15 = vmax.f32 %v9918_v12, 0.0  ;;  %v10794_v12 = vld [vmem:[#allocation20_spill] sm:$0xff] }
 0x831   : > { %6254 = vst [vmem:[#allocation1 + $0x1] ss:$4 sm:$0xff] %v5969_v36  ;;  %v10248_v36 = vperm.slane %v5491_v61, %v10631_v24  ;;  %v5618_v4 = vrot.slane %v5515_v43, 4  ;;  %v2851_v22 = vadd.f32 %v8961_v34, %v2630_v6  ;;  %v2852_v62 = vadd.f32 %v10749_v41, %v2631_v60 }
 0x832   : > { %6255 = vst [vmem:[#allocation1 + $0x2] ss:$4 sm:$0xff] %v5970_v17  ;;  %v5977_v5 = vmax.f32 %v9921_v63, 0.0  ;;  %v5619_v17 = vrot.slane %v5515_v43, 6  ;;  %v5467_v57 = vsel %vm3888_vm8, %v10072_v52, %v5466_v0  ;;  %v5828_v33 = vadd.f32 %v5515_v43, %v2850_v28  ;;  %v10795_v52 = vld [vmem:[#allocation7_spill] sm:$0xff] }
 0x833   : > { %v6222_v59 = vld.sshfl [vmem:[#allocation1 + $0x20] sm:$0xff pattern:$0x73625140]  ;;  %6256 = vst [vmem:[#allocation1 + $0x3] ss:$4 sm:$0xff] %v5971_v51  ;;  %v2853_v49 = vadd.f32 %v10751_v46, %v10794_v12  ;;  %v5979_v58 = vmax.f32 %v9927_v32, 0.0  ;;  %v5829_v63 = vadd.f32 %v5617_v47, %v2851_v22  ;;  %v5830_v27 = vadd.f32 %v5618_v4, %v2852_v62 }
 0x834   : > { %v6350_v23 = vpack.c.bf16 %v6222_v59, %v6222_v59  ;;  %6388 = vst.msk [vmem:[%s9561_s15 + $0x50] sm:$0xf] %vm6367_vm9, %v6355_v42  ;;  %v5978_v42 = vmax.f32 %v9924_v11, 0.0  ;;  %v5516_v59 = vrot.slane %v10248_v36, 4  ;;  %v5475_v11 = vperm.slane %v5467_v57, %v10631_v24  ;;  %v10797_v12 = vld [vmem:[#allocation29_spill] sm:$0xff] }
 0x835   : > { %6227 = vst [vmem:[#allocation1 + $0x20] ss:$4 sm:$0xff] %v5948_v35  ;;  %v5831_v35 = vadd.f32 %v5619_v17, %v2853_v49  ;;  %v2635_v18 = vrot.slane %v10795_v52, 4  ;;  %v5957_v61 = vmax.f32 %v5829_v63, 0.0  ;;  %v2636_v32 = vrot.slane %v10795_v52, 6 }
 0x836   : > { %6383 = vst.msk [vmem:[%s9561_s15 + $0x3c] sm:$0xf] %vm6367_vm9, %v6350_v23  ;;  %v5956_v23 = vmax.f32 %v5828_v33, 0.0  ;;  %v5517_v45 = vsel %vm3888_vm8, %v5516_v59, %v5475_v11  ;;  %v2637_v24 = vrot.slane %v10787_v1, 2  ;;  %v5985_v47 = vmax.f32 %v9933_v48, 0.0  ;;  %v10796_v33 = vld [vmem:[#allocation14_spill] sm:$0xff] }
 0x837   : > { %6228 = vst [vmem:[#allocation1 + $0x21] ss:$4 sm:$0xff] %v5949_v13  ;;  %v5958_v13 = vmax.f32 %v5830_v27, 0.0  ;;  %v5959_v60 = vmax.f32 %v5831_v35, 0.0  ;;  %v2858_v0 = vadd.f32 %v9992_v38, %v2635_v18  ;;  %v5624_v28 = vrot.slane %v5517_v45, 4 }
 0x838   : > { %6229 = vst [vmem:[#allocation1 + $0x22] ss:$4 sm:$0xff] %v5950_v30  ;;  %v5623_v30 = vrot.slane %v5517_v45, 2  ;;  %v5625_v22 = vrot.slane %v5517_v45, 6  ;;  %v2860_v62 = vadd.f32 %v10749_v41, %v10787_v1  ;;  %v5987_v48 = vmax.f32 %v9941_v37, 0.0 }
 0x839   : > { %6230 = vst [vmem:[#allocation1 + $0x23] ss:$4 sm:$0xff] %v5951_v2  ;;  %v5984_v2 = vmax.f32 %v9930_v54, 0.0  ;;  %v5836_v17 = vadd.f32 %v5517_v45, %v2858_v0  ;;  %v2861_v54 = vadd.f32 %v10751_v46, %v2637_v24  ;;  %v2526_v49 = vadd.f32 %v10797_v12, %v10796_v33 }
 0x83a   : > { %v6261_v39 = vld.sshfl [vmem:[#allocation1] sm:$0xff pattern:$0x73625140]  ;;  %v5838_v57 = vadd.f32 %v5624_v28, %v2860_v62  ;;  %v2641_v1 = vrot.slane %v10784_v10, 6  ;;  %v5993_v10 = vmax.f32 %v9947_v7, 0.0  ;;  %v5995_v7 = vmax.f32 %v9953_v25, 0.0 }
 0x83b   : > { %6263 = vst [vmem:[#allocation1] ss:$4 sm:$0xff] %v5976_v15  ;;  %v6357_v51 = vpack.c.bf16 %v6261_v39, %v6261_v39  ;;  %v2859_v15 = vadd.f32 %v8961_v34, %v2636_v32  ;;  %v2642_v35 = vrot.slane %v2526_v49, 2  ;;  %v2643_v52 = vrot.slane %v2526_v49, 4 }
 0x83c   : > { %6264 = vst [vmem:[#allocation1 + $0x1] ss:$4 sm:$0xff] %v5977_v5  ;;  %v5986_v5 = vmax.f32 %v9938_v44, 0.0  ;;  %v5964_v44 = vmax.f32 %v5836_v17, 0.0  ;;  %v5966_v27 = vmax.f32 %v5838_v57, 0.0  ;;  %v2866_v45 = vadd.f32 %v9992_v38, %v2641_v1 }
 0x83d   : > { %6265 = vst [vmem:[#allocation1 + $0x2] ss:$4 sm:$0xff] %v5978_v42  ;;  %v5518_v42 = vrot.slane %v5475_v11, 4  ;;  %v6000_v25 = vmax.f32 %v9956_v29, 0.0  ;;  %v5980_v29 = vmax.f32 %v10146_v53, 0.0  ;;  %v10800_v53 = vld [vmem:[#allocation33_spill] sm:$0xff] }
 0x83e   : > { %6266 = vst [vmem:[#allocation1 + $0x3] ss:$4 sm:$0xff] %v5979_v58  ;;  %v5839_v58 = vadd.f32 %v5625_v22, %v2861_v54  ;;  %v6002_v22 = vmax.f32 %v9967_v19, 0.0  ;;  %v5982_v54 = vmax.f32 %v10154_v8, 0.0  ;;  %v5988_v33 = vmax.f32 %v10800_v53, 0.0 }
 0x83f   : > { %6390 = vst.msk [vmem:[%s9561_s15 + $0x58] sm:$0xf] %vm6367_vm9, %v6357_v51  ;;  %v5837_v51 = vadd.f32 %v5623_v30, %v2859_v15  ;;  %v5519_v59 = vsel %vm3888_vm8, %v10248_v36, %v5518_v42  ;;  %v2867_v36 = vadd.f32 %v8961_v34, %v2526_v49  ;;  %v5990_v8 = vmax.f32 %v10169_v16, 0.0 }
 0x840   : > { %v6232_v43 = vld.sshfl [vmem:[#allocation1 + $0x20] sm:$0xff pattern:$0x73625140]  ;;  %v5629_v18 = vrot.slane %v5519_v59, 2  ;;  %v5844_v38 = vadd.f32 %v5519_v59, %v2866_v45  ;;  %v5997_v1 = vmax.f32 %v10178_v20, 0.0  ;;  %v5999_v16 = vmax.f32 %v10184_v3, 0.0 }
 0x841   : > { %6237 = vst [vmem:[#allocation1 + $0x20] ss:$4 sm:$0xff] %v5956_v23  ;;  %v6352_v6 = vpack.c.bf16 %v6232_v43, %v6232_v43  ;;  %v5965_v63 = vmax.f32 %v5837_v51, 0.0  ;;  %v5967_v23 = vmax.f32 %v5839_v58, 0.0  ;;  %v5630_v43 = vrot.slane %v5519_v59, 4  ;;  %v10802_v20 = vld [vmem:[#allocation59_spill] sm:$0xff] }
 0x842   : > { %6238 = vst [vmem:[#allocation1 + $0x21] ss:$4 sm:$0xff] %v5957_v61  ;;  %v5992_v61 = vmax.f32 %v9944_v9, 0.0  ;;  %v2869_v9 = vadd.f32 %v10751_v46, %v2643_v52  ;;  %v5845_v30 = vadd.f32 %v5629_v18, %v2867_v36  ;;  %v6001_v46 = vmax.f32 %v9959_v26, 0.0 }
 0x843   : > { %6239 = vst [vmem:[#allocation1 + $0x22] ss:$4 sm:$0xff] %v5958_v13  ;;  %v5631_v13 = vrot.slane %v5519_v59, 6  ;;  %v5981_v26 = vmax.f32 %v10151_v31, 0.0  ;;  %v5989_v31 = vmax.f32 %v10166_v21, 0.0  ;;  %v5991_v58 = vmax.f32 %v10172_v55, 0.0 }
 0x844   : > { %6240 = vst [vmem:[#allocation1 + $0x23] ss:$4 sm:$0xff] %v5959_v60  ;;  %v5994_v60 = vmax.f32 %v9950_v14, 0.0  ;;  %v5998_v21 = vmax.f32 %v10181_v56, 0.0  ;;  %v6004_v55 = vmax.f32 %v10188_v50, 0.0 }
 0x845   : > { %v6271_v4 = vld.sshfl [vmem:[#allocation1] sm:$0xff pattern:$0x73625140]  ;;  %6385 = vst.msk [vmem:[%s9561_s15 + $0x44] sm:$0xf] %vm6367_vm9, %v6352_v6  ;;  %v2868_v6 = vadd.f32 %v10749_v41, %v2642_v35  ;;  %v5847_v0 = vadd.f32 %v5631_v13, %v2869_v9  ;;  %v5973_v41 = vmax.f32 %v5845_v30, 0.0 }
 0x846   : > { %6273 = vst [vmem:[#allocation1] ss:$4 sm:$0xff] %v5984_v2  ;;  %v6359_v39 = vpack.c.bf16 %v6271_v4, %v6271_v4  ;;  %v5972_v2 = vmax.f32 %v5844_v38, 0.0  ;;  %v10803_v35 = vld [vmem:[#allocation60_spill] sm:$0xff] }
 0x847   : > { %6274 = vst [vmem:[#allocation1 + $0x1] ss:$4 sm:$0xff] %v5985_v47  ;;  %v5846_v34 = vadd.f32 %v5630_v43, %v2868_v6  ;;  %v5975_v15 = vmax.f32 %v5847_v0, 0.0 }
 0x848   : > { %6275 = vst [vmem:[#allocation1 + $0x2] ss:$4 sm:$0xff] %v5986_v5  ;;  %v10798_v5 = vld [vmem:[#allocation31_spill] sm:$0xff] }
 0x849   : > { %6276 = vst [vmem:[#allocation1 + $0x3] ss:$4 sm:$0xff] %v5987_v48  ;;  %v5974_v14 = vmax.f32 %v5846_v34, 0.0  ;;  %v10799_v48 = vld [vmem:[#allocation32_spill] sm:$0xff] }
 0x84a   : > { %6392 = vst.msk [vmem:[%s9561_s15 + $0x60] sm:$0xf] %vm6367_vm9, %v6359_v39  ;;  %v6003_v39 = vmax.f32 %v10798_v5, 0.0  ;;  %v5983_v42 = vmax.f32 %v10799_v48, 0.0 }
 0x84b   : > { %v6242_v37 = vld.sshfl [vmem:[#allocation1 + $0x20] sm:$0xff pattern:$0x73625140] }
 0x84c   : > { %6247 = vst [vmem:[#allocation1 + $0x20] ss:$4 sm:$0xff] %v5964_v44  ;;  %v6354_v11 = vpack.c.bf16 %v6242_v37, %v6242_v37  ;;  %v5996_v44 = vmax.f32 %v10175_v40, 0.0  ;;  %v10801_v37 = vld [vmem:[#allocation58_spill] sm:$0xff] }
 0x84d   : > { %6248 = vst [vmem:[#allocation1 + $0x21] ss:$4 sm:$0xff] %v5965_v63  ;;  %v6005_v40 = vmax.f32 %v10801_v37, 0.0 }
 0x84e   : > { %6249 = vst [vmem:[#allocation1 + $0x22] ss:$4 sm:$0xff] %v5966_v27 }
 0x84f   : > { %6250 = vst [vmem:[#allocation1 + $0x23] ss:$4 sm:$0xff] %v5967_v23  ;;  %v6007_v23 = vmax.f32 %v10803_v35, 0.0 }
 0x850   : > { %v6281_v32 = vld.sshfl [vmem:[#allocation1] sm:$0xff pattern:$0x73625140]  ;;  %6387 = vst.msk [vmem:[%s9561_s15 + $0x4c] sm:$0xf] %vm6367_vm9, %v6354_v11  ;;  %v6006_v11 = vmax.f32 %v10802_v20, 0.0 }
 0x851   : > { %6283 = vst [vmem:[#allocation1] ss:$4 sm:$0xff] %v5992_v61  ;;  %v6361_v24 = vpack.c.bf16 %v6281_v32, %v6281_v32 }
 0x852   : > { %6284 = vst [vmem:[#allocation1 + $0x1] ss:$4 sm:$0xff] %v5993_v10 }
 0x853   : > { %6285 = vst [vmem:[#allocation1 + $0x2] ss:$4 sm:$0xff] %v5994_v60 }
 0x854   : > { %6286 = vst [vmem:[#allocation1 + $0x3] ss:$4 sm:$0xff] %v5995_v7 }
 0x855   : > { %6394 = vst.msk [vmem:[%s9561_s15 + $0x68] sm:$0xf] %vm6367_vm9, %v6361_v24 }
 0x856   : > { %v6252_v47 = vld.sshfl [vmem:[#allocation1 + $0x20] sm:$0xff pattern:$0x73625140] }
 0x857   : > { %6257 = vst [vmem:[#allocation1 + $0x20] ss:$4 sm:$0xff] %v5972_v2  ;;  %v6356_v28 = vpack.c.bf16 %v6252_v47, %v6252_v47 }
 0x858   : > { %6258 = vst [vmem:[#allocation1 + $0x21] ss:$4 sm:$0xff] %v5973_v41 }
 0x859   : > { %6259 = vst [vmem:[#allocation1 + $0x22] ss:$4 sm:$0xff] %v5974_v14 }
 0x85a   : > { %6260 = vst [vmem:[#allocation1 + $0x23] ss:$4 sm:$0xff] %v5975_v15 }
 0x85b   : > { %v6291_v4 = vld.sshfl [vmem:[#allocation1] sm:$0xff pattern:$0x73625140]  ;;  %6389 = vst.msk [vmem:[%s9561_s15 + $0x54] sm:$0xf] %vm6367_vm9, %v6356_v28 }
 0x85c   : > { %6293 = vst [vmem:[#allocation1] ss:$4 sm:$0xff] %v6000_v25  ;;  %v6363_v62 = vpack.c.bf16 %v6291_v4, %v6291_v4 }
 0x85d   : > { %6294 = vst [vmem:[#allocation1 + $0x1] ss:$4 sm:$0xff] %v6001_v46 }
 0x85e   : > { %6295 = vst [vmem:[#allocation1 + $0x2] ss:$4 sm:$0xff] %v6002_v22 }
 0x85f   : > { %6296 = vst [vmem:[#allocation1 + $0x3] ss:$4 sm:$0xff] %v6003_v39 }
 0x860   : > { %6396 = vst.msk [vmem:[%s9561_s15 + $0x70] sm:$0xf] %vm6367_vm9, %v6363_v62 }
 0x861   : > { %v6262_v17 = vld.sshfl [vmem:[#allocation1 + $0x20] sm:$0xff pattern:$0x73625140] }
 0x862   : > { %6267 = vst [vmem:[#allocation1 + $0x20] ss:$4 sm:$0xff] %v5980_v29  ;;  %v6358_v19 = vpack.c.bf16 %v6262_v17, %v6262_v17 }
 0x863   : > { %6268 = vst [vmem:[#allocation1 + $0x21] ss:$4 sm:$0xff] %v5981_v26 }
 0x864   : > { %6269 = vst [vmem:[#allocation1 + $0x22] ss:$4 sm:$0xff] %v5982_v54 }
 0x865   : > { %6270 = vst [vmem:[#allocation1 + $0x23] ss:$4 sm:$0xff] %v5983_v42 }
 0x866   : > { %v6301_v51 = vld.sshfl [vmem:[#allocation1] sm:$0xff pattern:$0x73625140]  ;;  %6391 = vst.msk [vmem:[%s9561_s15 + $0x5c] sm:$0xf] %vm6367_vm9, %v6358_v19 }
 0x867   : > { %v6365_v57 = vpack.c.bf16 %v6301_v51, %v6301_v51 }
 0x869   : > { %6398 = vst.msk [vmem:[%s9561_s15 + $0x78] sm:$0xf] %vm6367_vm9, %v6365_v57 }
 0x86c   : > { %v6272_v12 = vld.sshfl [vmem:[#allocation1 + $0x20] sm:$0xff pattern:$0x73625140] }
 0x86d   : > { %6277 = vst [vmem:[#allocation1 + $0x20] ss:$4 sm:$0xff] %v5988_v33  ;;  %v6360_v49 = vpack.c.bf16 %v6272_v12, %v6272_v12 }
 0x86e   : > { %6278 = vst [vmem:[#allocation1 + $0x21] ss:$4 sm:$0xff] %v5989_v31 }
 0x86f   : > { %6279 = vst [vmem:[#allocation1 + $0x22] ss:$4 sm:$0xff] %v5990_v8 }
 0x870   : > { %6280 = vst [vmem:[#allocation1 + $0x23] ss:$4 sm:$0xff] %v5991_v58 }
 0x871   : > { %6393 = vst.msk [vmem:[%s9561_s15 + $0x64] sm:$0xf] %vm6367_vm9, %v6360_v49 }
 0x877   : > { %v6282_v59 = vld.sshfl [vmem:[#allocation1 + $0x20] sm:$0xff pattern:$0x73625140] }
 0x878   : > { %6287 = vst [vmem:[#allocation1 + $0x20] ss:$4 sm:$0xff] %v5996_v44  ;;  %v6362_v63 = vpack.c.bf16 %v6282_v59, %v6282_v59 }
 0x879   : > { %6288 = vst [vmem:[#allocation1 + $0x21] ss:$4 sm:$0xff] %v5997_v1 }
 0x87a   : > { %6289 = vst [vmem:[#allocation1 + $0x22] ss:$4 sm:$0xff] %v5998_v21 }
 0x87b   : > { %6290 = vst [vmem:[#allocation1 + $0x23] ss:$4 sm:$0xff] %v5999_v16 }
 0x87c   : > { %6395 = vst.msk [vmem:[%s9561_s15 + $0x6c] sm:$0xf] %vm6367_vm9, %v6362_v63 }
 0x882   : > { %v6292_v27 = vld.sshfl [vmem:[#allocation1 + $0x20] sm:$0xff pattern:$0x73625140] }
 0x883   : > { %6297 = vst [vmem:[#allocation1 + $0x20] ss:$4 sm:$0xff] %v6004_v55  ;;  %v6364_v56 = vpack.c.bf16 %v6292_v27, %v6292_v27 }
 0x884   : > { %6298 = vst [vmem:[#allocation1 + $0x21] ss:$4 sm:$0xff] %v6005_v40 }
 0x885   : > { %6299 = vst [vmem:[#allocation1 + $0x22] ss:$4 sm:$0xff] %v6006_v11 }
 0x886   : > { %6300 = vst [vmem:[#allocation1 + $0x23] ss:$4 sm:$0xff] %v6007_v23 }
 0x887   : > { %6397 = vst.msk [vmem:[%s9561_s15 + $0x74] sm:$0xf] %vm6367_vm9, %v6364_v56 }
 0x88d   : > { %v6302_v3 = vld.sshfl [vmem:[#allocation1 + $0x20] sm:$0xff pattern:$0x73625140] }
 0x88e   : > { %v6366_v52 = vpack.c.bf16 %v6302_v3, %v6302_v3 }
 0x890   : > { %6399 = vst.msk [vmem:[%s9561_s15 + $0x7c] sm:$0xf] %vm6367_vm9, %v6366_v52 }
 0x891 PF: > { %s18_s29 = sadd.s32 1, %s7045_s29   ;;  %s10804_s27 = smov %s7041_s28 }
 0x892   : > { %p15_p5 = scmp.ge.s32.totalorder %s18_s29, 4   ;;  %s10805_s28 = smov %s10807_s30 }
 0x894   :  { %17 = sbr.rel (!%p15_p5) target bundleno = 2 (0x2), region = 118 }

</bundles_post_ra>
